<compile_context>
chip_gen: v7x
topology: tpu7x:2x2x1
jax: 0.10.0
libtpu: 0.0.40
codegen_flags: <defaults>
</compile_context>

<pallas_src>
import functools
import math

import jax
import jax.numpy as jnp
from jax.experimental import pallas as pl
from jax.experimental.pallas import tpu as pltpu

D_MODEL = 32
NHEAD = 4
DHEAD = D_MODEL // NHEAD
DFF = 2048
EPS = 1e-5          # torch.nn.LayerNorm default
NEG = -1e9          # additive mask value; exp() underflows to exactly 0 in f32


# ----------------------------------------------------------------------------
# In-kernel building blocks (all operate on 2-D VMEM-resident values/refs)
# ----------------------------------------------------------------------------
def _layernorm(x, g_ref, b_ref):
    mean = jnp.mean(x, axis=-1, keepdims=True)
    xc = x - mean
    var = jnp.mean(xc * xc, axis=-1, keepdims=True)
    return xc * jax.lax.rsqrt(var + EPS) * g_ref[...] + b_ref[...]


def _linear(x, w_ref, b_ref):
    """x @ W + b with bf16 MXU operands and f32 accumulation."""
    return jnp.dot(x.astype(jnp.bfloat16), w_ref[...],
                   preferred_element_type=jnp.float32) + b_ref[...]


def _mha_packed(q, k, v, bias_p, head_mask, sum_mat, head_expand, wo_ref, bo_ref):
    """All-head attention via block-diagonal lane packing (one MXU op per stage).

    q:          (Mq, D) f32 — the 1/sqrt(dh) scale is already folded into W_q.
    k, v:       (Mk, D) f32.
    bias_p:     (Mq, NHEAD*Mk) f32 additive bias (0 valid / NEG masked), pre-tiled per head.
    head_mask:  (NHEAD*Mk, D) 0/1 f32 — row block h keeps only head h's feature slice.
    sum_mat:    (NHEAD*Mk, NHEAD) 0/1 bf16 — per-head-block lane sums.
    head_expand:(D, NHEAD) 0/1 f32 — broadcasts a per-head scalar to that head's lanes.
    """
    qb = q.astype(jnp.bfloat16)
    # block-diagonal K/V: packed row h*Mk+j holds K[j]/V[j] restricted to head h's dims
    k_rep = jnp.concatenate([k] * NHEAD, axis=0)                  # (NHEAD*Mk, D)
    v_rep = jnp.concatenate([v] * NHEAD, axis=0)
    kb = (k_rep * head_mask).astype(jnp.bfloat16)
    vb = (v_rep * head_mask).astype(jnp.bfloat16)

    # all-head scores in one matmul: (Mq, NHEAD*Mk), head h in lane block h
    s = jax.lax.dot_general(qb, kb, (((1,), (1,)), ((), ())),
                            preferred_element_type=jnp.float32) + bias_p
    # One shared per-row shift.  It is constant within every head's lane block,
    # so each per-head softmax is unchanged; valid scores here are O(1), so no
    # cross-head underflow risk.
    s = s - jnp.max(s, axis=-1, keepdims=True)
    e = jnp.exp(s).astype(jnp.bfloat16)

    o_num = jnp.dot(e, vb, preferred_element_type=jnp.float32)    # (Mq, D), heads in place
    denom = jnp.dot(e, sum_mat, preferred_element_type=jnp.float32)  # (Mq, NHEAD)
    inv = pl.reciprocal(denom, approx=True)                       # EUP slot
    inv_d = jax.lax.dot_general(inv, head_expand, (((1,), (1,)), ((), ())),
                                preferred_element_type=jnp.float32)  # (Mq, D)
    o = (o_num * inv_d).astype(jnp.bfloat16)
    return jnp.dot(o, wo_ref[...], preferred_element_type=jnp.float32) + bo_ref[...]


def _ffn(x, w1_ref, b1_ref, w2_ref, b2_ref):
    """relu(x @ w1 + b1) @ w2 + b2, un-chunked (single matmul pair, bf16 operands)."""
    h = jnp.dot(x.astype(jnp.bfloat16), w1_ref[...],
                preferred_element_type=jnp.float32) + b1_ref[...]
    h = jnp.maximum(h, 0.0).astype(jnp.bfloat16)
    return jnp.dot(h, w2_ref[...], preferred_element_type=jnp.float32) + b2_ref[...]


# ----------------------------------------------------------------------------
# The fused whole-forward kernel
# ----------------------------------------------------------------------------
N_AUX = 11
N_HBM = 4


def _fused_kernel(*refs, treedef, n_params):
    (src_ref, tgt_ref, bias_src_ref, bias_tgt_ref, bias_xsrc_ref,
     hmask_src_ref, hmask_tgt_ref, smat_src_ref, smat_tgt_ref, hexp_ref,
     avg_mat_ref) = refs[:N_AUX]
    dec_ffn_hbm = refs[N_AUX:N_AUX + N_HBM]                       # d0w1, d0w2, d1w1, d1w2
    param_refs = refs[N_AUX + N_HBM:N_AUX + N_HBM + n_params]
    act_out_ref = refs[N_AUX + N_HBM + n_params]
    end_out_ref = refs[N_AUX + N_HBM + n_params + 1]
    (d0w1_v, d0w2_v, d1w1_v, d1w2_v, sem) = refs[N_AUX + N_HBM + n_params + 2:]

    p = jax.tree_util.tree_unflatten(treedef, list(param_refs))

    # Kick off the decoder-FFN weight DMAs immediately; they overlap with the
    # encoder compute and are only waited on right before each decoder FFN.
    dec_ffn_vmem = [(d0w1_v, d0w2_v), (d1w1_v, d1w2_v)]
    dec_ffn_copies = [
        (pltpu.make_async_copy(dec_ffn_hbm[0], d0w1_v, sem.at[0]),
         pltpu.make_async_copy(dec_ffn_hbm[1], d0w2_v, sem.at[1])),
        (pltpu.make_async_copy(dec_ffn_hbm[2], d1w1_v, sem.at[2]),
         pltpu.make_async_copy(dec_ffn_hbm[3], d1w2_v, sem.at[3])),
    ]
    for pair in dec_ffn_copies:
        for cp in pair:
            cp.start()

    D = src_ref.shape[-1]
    x = src_ref[...]                  # (B*S, D)  row-stacked encoder input
    y = tgt_ref[...]                  # (B*T, D)  row-stacked decoder input

    bias_src = bias_src_ref[...]      # (B*S, NHEAD*B*S)
    bias_tgt = bias_tgt_ref[...]      # (B*T, NHEAD*B*T)
    bias_xsrc = bias_xsrc_ref[...]    # (B*T, NHEAD*B*S)
    hmask_src = hmask_src_ref[...]
    hmask_tgt = hmask_tgt_ref[...]
    smat_src = smat_src_ref[...]
    smat_tgt = smat_tgt_ref[...]
    hexp = hexp_ref[...]

    # ------------------ encoder (1 layer, post-norm, relu FFN) ------------------
    ep = p["enc"]
    qkv = _linear(x, ep["sa_wqkv"], ep["sa_bqkv"])                      # fused QKV
    a = _mha_packed(qkv[:, :D], qkv[:, D:2 * D], qkv[:, 2 * D:],
                    bias_src, hmask_src, smat_src, hexp, ep["sa_wo"], ep["sa_bo"])
    x = _layernorm(x + a, ep["n1_g"], ep["n1_b"])
    h = _ffn(x, ep["w1"], ep["b1"], ep["w2"], ep["b2"])
    x = _layernorm(x + h, ep["n2_g"], ep["n2_b"])
    mem = _layernorm(x, p["enc_norm_g"], p["enc_norm_b"])               # encoder final norm

    # ------------------ decoder (2 layers) ------------------
    for li, dl in enumerate(p["dec"]):
        qkv = _linear(y, dl["sa_wqkv"], dl["sa_bqkv"])
        a = _mha_packed(qkv[:, :D], qkv[:, D:2 * D], qkv[:, 2 * D:],
                        bias_tgt, hmask_tgt, smat_tgt, hexp,
                        dl["sa_wo"], dl["sa_bo"])                        # no causal mask (matches spec)
        y = _layernorm(y + a, dl["n1_g"], dl["n1_b"])

        q = _linear(y, dl["ca_wq"], dl["ca_bq"])
        kv = _linear(mem, dl["ca_wkv"], dl["ca_bkv"])
        a = _mha_packed(q, kv[:, :D], kv[:, D:],
                        bias_xsrc, hmask_src, smat_src, hexp,
                        dl["ca_wo"], dl["ca_bo"])
        y = _layernorm(y + a, dl["n2_g"], dl["n2_b"])

        w1_v, w2_v = dec_ffn_vmem[li]
        for cp in dec_ffn_copies[li]:
            cp.wait()                                                    # DMA hidden behind prior compute
        h = _ffn(y, w1_v, dl["b1"], w2_v, dl["b2"])
        y = _layernorm(y + h, dl["n3_g"], dl["n3_b"])
    emb = _layernorm(y, p["dec_norm_g"], p["dec_norm_b"])               # (B*T, D) f32

    # ------------------ heads (tiny, kept f32) ------------------
    act_w = p["act_w"][...]           # (1, D) PyTorch layout
    act_b = p["act_b"][...]           # (1, 1)
    act_out_ref[...] = jax.lax.dot_general(
        act_w, emb, (((1,), (1,)), ((), ())),
        preferred_element_type=jnp.float32) + act_b                     # (1, B*T)

    avg = jnp.dot(avg_mat_ref[...], emb, preferred_element_type=jnp.float32)  # (B, D)
    end_w = p["end_w"][...]
    end_b = p["end_b"][...]
    end_out_ref[...] = jax.lax.dot_general(
        end_w, avg, (((1,), (1,)), ((), ())),
        preferred_element_type=jnp.float32) + end_b                     # (1, B)


# ----------------------------------------------------------------------------
# Host-side constants (tiny, shape-dependent)
# ----------------------------------------------------------------------------
def _block_diag_bias(mq, mk, tq, tk):
    rb = jnp.arange(mq, dtype=jnp.int32) // tq
    cb = jnp.arange(mk, dtype=jnp.int32) // tk
    return jnp.where(rb[:, None] == cb[None, :], 0.0, NEG).astype(jnp.float32)


def _head_mask(mk):
    r = jnp.arange(NHEAD * mk, dtype=jnp.int32) // mk
    c = jnp.arange(D_MODEL, dtype=jnp.int32) // DHEAD
    return (r[:, None] == c[None, :]).astype(jnp.float32)          # (NHEAD*Mk, D)


def _sum_mat(mk):
    r = jnp.arange(NHEAD * mk, dtype=jnp.int32) // mk
    c = jnp.arange(NHEAD, dtype=jnp.int32)
    return (r[:, None] == c[None, :]).astype(jnp.bfloat16)         # (NHEAD*Mk, NHEAD)


def _head_expand():
    r = jnp.arange(D_MODEL, dtype=jnp.int32) // DHEAD
    c = jnp.arange(NHEAD, dtype=jnp.int32)
    return (r[:, None] == c[None, :]).astype(jnp.float32)          # (D, NHEAD)


# ----------------------------------------------------------------------------
# Host-side wrapper
# ----------------------------------------------------------------------------
def transformer_step_actor_forward(obs, kparams):
    """kparams must be the output of prepare_kernel_params (bf16 / scale-folded)."""
    src, tgt, padded_mask = preprocess(obs)
    B, S, D = src.shape
    T = tgt.shape[1]

    src2 = src.reshape(B * S, D)
    tgt2 = tgt.reshape(B * T, D)

    # additive biases: batch isolation (batches are row-stacked in the kernel)
    # plus key-padding (True in padded_mask == ignore that key), tiled per head
    pad_bias = jnp.where(padded_mask, NEG, 0.0).astype(jnp.float32).reshape(1, B * S)
    bias_src = jnp.tile(_block_diag_bias(B * S, B * S, S, S) + pad_bias, (1, NHEAD))
    bias_tgt = jnp.tile(_block_diag_bias(B * T, B * T, T, T), (1, NHEAD))
    bias_xsrc = jnp.tile(_block_diag_bias(B * T, B * S, T, S) + pad_bias, (1, NHEAD))

    # attention packing constants + per-batch token-averaging matrix
    hmask_src, hmask_tgt = _head_mask(B * S), _head_mask(B * T)
    smat_src, smat_tgt = _sum_mat(B * S), _sum_mat(B * T)
    hexp = _head_expand()
    avg_mat = jnp.where(
        jnp.arange(B, dtype=jnp.int32)[:, None]
        == (jnp.arange(B * T, dtype=jnp.int32)[None, :] // T),
        1.0 / T, 0.0).astype(jnp.float32)

    # split the decoder FFN weights out: they stay in HBM and are prefetched
    # inside the kernel while the encoder computes.
    kp = dict(kparams)
    dec_ffn_w, new_dec = [], []
    for dl in kparams["dec"]:
        dl = dict(dl)
        dec_ffn_w.append(dl.pop("w1"))
        dec_ffn_w.append(dl.pop("w2"))
        new_dec.append(dl)
    kp["dec"] = new_dec

    flat, treedef = jax.tree_util.tree_flatten(kp)
    kernel = functools.partial(_fused_kernel, treedef=treedef, n_params=len(flat))
    vmem = pltpu.MemorySpace.VMEM
    in_specs = ([pl.BlockSpec(memory_space=vmem)] * N_AUX
                + [pl.BlockSpec(memory_space=pl.ANY)] * N_HBM
                + [pl.BlockSpec(memory_space=vmem)] * len(flat))

    act_row, end_row = pl.pallas_call(
        kernel,
        out_shape=(jax.ShapeDtypeStruct((1, B * T), jnp.float32),
                   jax.ShapeDtypeStruct((1, B), jnp.float32)),
        in_specs=in_specs,
        out_specs=(pl.BlockSpec(memory_space=vmem),
                   pl.BlockSpec(memory_space=vmem)),
        scratch_shapes=[
            pltpu.VMEM((D_MODEL, DFF), jnp.bfloat16),   # dec layer 0 w1
            pltpu.VMEM((DFF, D_MODEL), jnp.bfloat16),   # dec layer 0 w2
            pltpu.VMEM((D_MODEL, DFF), jnp.bfloat16),   # dec layer 1 w1
            pltpu.VMEM((DFF, D_MODEL), jnp.bfloat16),   # dec layer 1 w2
            pltpu.SemaphoreType.DMA((4,)),
        ],
    )(src2, tgt2, bias_src, bias_tgt, bias_xsrc,
      hmask_src, hmask_tgt, smat_src, smat_tgt, hexp, avg_mat,
      *dec_ffn_w, *flat)

    # lane-dense kernel outputs -> (B, T+1) logits (pure XLA glue)
    logits = jnp.concatenate([act_row.reshape(B, T), end_row.reshape(B, 1)], axis=1)
    return logits, None


# ----------------------------------------------------------------------------
# preprocess: deterministic synthetic stand-in (the real one is injected into
# the PyTorch module's constructor and is not part of the spec).
# ----------------------------------------------------------------------------
def preprocess(obs):
    """obs (B, S, D) -> src (B, S, D), tgt (B, 4, D) = last-4 valid tokens,
    padded_mask (B, S) bool, True = padding (PyTorch key_padding_mask)."""
    # TODO(synk): the reference preprocess callable is external to the module;
    # this deterministic stand-in only fixes shapes/mask semantics.
    B, S, D = obs.shape
    src = obs
    lengths = jnp.maximum(S - 4 * (jnp.arange(B, dtype=jnp.int32) % 2), 4)
    positions = jnp.arange(S, dtype=jnp.int32)[None, :]
    padded_mask = positions >= lengths[:, None]
    offs = jnp.array([0, -1, -2, -3], jnp.int32)[None, :]
    idx = jnp.clip((lengths - 1)[:, None] + offs, 0, S - 1)          # (B, 4)
    tgt = jnp.take_along_axis(
        src, jnp.broadcast_to(idx[:, :, None], (B, 4, D)), axis=1)
    return src, tgt, padded_mask


# ----------------------------------------------------------------------------
# Pure-JAX f32 reference (no Pallas) mirroring PyTorch nn.Transformer eval mode
# ----------------------------------------------------------------------------
def _reference_forward(obs, params):
    src, tgt, padded_mask = preprocess(obs)
    B, S, D = src.shape
    key_bias = jnp.where(padded_mask, NEG, 0.0)[:, None, None, :]    # (B,1,1,S)

    def layernorm(x, g, b):
        m = jnp.mean(x, -1, keepdims=True)
        v = jnp.mean((x - m) ** 2, -1, keepdims=True)
        return (x - m) * jax.lax.rsqrt(v + EPS) * g + b

    def attention(q, k, v, bias):
        Bq, Tq, D_ = q.shape
        Tk = k.shape[1]
        dh = D_ // NHEAD
        qh = q.reshape(Bq, Tq, NHEAD, dh).transpose(0, 2, 1, 3)
        kh = k.reshape(Bq, Tk, NHEAD, dh).transpose(0, 2, 1, 3)
        vh = v.reshape(Bq, Tk, NHEAD, dh).transpose(0, 2, 1, 3)
        s = jnp.einsum("bhqd,bhkd->bhqk", qh, kh) / math.sqrt(dh) + bias
        p = jax.nn.softmax(s, axis=-1)
        o = jnp.einsum("bhqk,bhkd->bhqd", p, vh)
        return o.transpose(0, 2, 1, 3).reshape(Bq, Tq, D_)

    def self_attn(x, pp, bias):
        qkv = x @ pp["sa_wqkv"] + pp["sa_bqkv"]
        q, k, v = qkv[..., :D], qkv[..., D:2 * D], qkv[..., 2 * D:]
        return attention(q, k, v, bias) @ pp["sa_wo"] + pp["sa_bo"]

    def cross_attn(x, mem, pp, bias):
        q = x @ pp["ca_wq"] + pp["ca_bq"]
        kv = mem @ pp["ca_wkv"] + pp["ca_bkv"]
        k, v = kv[..., :D], kv[..., D:]
        return attention(q, k, v, bias) @ pp["ca_wo"] + pp["ca_bo"]

    def ffn(x, pp):
        return jnp.maximum(x @ pp["w1"] + pp["b1"], 0.0) @ pp["w2"] + pp["b2"]

    ep = params["enc"]
    x = src
    x = layernorm(x + self_attn(x, ep, key_bias), ep["n1_g"], ep["n1_b"])
    x = layernorm(x + ffn(x, ep), ep["n2_g"], ep["n2_b"])
    mem = layernorm(x, params["enc_norm_g"], params["enc_norm_b"])

    y = tgt
    for dl in params["dec"]:
        y = layernorm(y + self_attn(y, dl, 0.0), dl["n1_g"], dl["n1_b"])
        y = layernorm(y + cross_attn(y, mem, dl, key_bias), dl["n2_g"], dl["n2_b"])
        y = layernorm(y + ffn(y, dl), dl["n3_g"], dl["n3_b"])
    emb = layernorm(y, params["dec_norm_g"], params["dec_norm_b"])    # (B,T,D)

    act_logits = (emb @ params["act_w"].T)[..., 0] + params["act_b"][0, 0]    # (B,T)
    avg = emb.mean(axis=1)                                                    # (B,D)
    end_logit = avg @ params["end_w"].T + params["end_b"]                     # (B,1)
    return jnp.concatenate([act_logits, end_logit], axis=1), None


# ----------------------------------------------------------------------------
# Deterministic parameter init (PyTorch shapes, stored pre-transposed for x @ W)
# ----------------------------------------------------------------------------
def init_params(key, d_model=D_MODEL, dff=DFF):
    keys = iter(jax.random.split(key, 64))

    def w(shape, scale=0.05):
        return jax.random.normal(next(keys), shape, jnp.float32) * scale

    def zeros(*shape):
        return jnp.zeros(shape, jnp.float32)

    def ones(*shape):
        return jnp.ones(shape, jnp.float32)

    def self_attn():
        return dict(
            sa_wqkv=w((3 * d_model, d_model)).T,      # (D, 3D)
            sa_bqkv=zeros(1, 3 * d_model),
            sa_wo=w((d_model, d_model)).T,            # (D, D)
            sa_bo=zeros(1, d_model),
        )

    def cross_attn():
        w_in = w((3 * d_model, d_model))              # PyTorch in_proj_weight
        return dict(
            ca_wq=w_in[:d_model].T, ca_bq=zeros(1, d_model),
            ca_wkv=w_in[d_model:].T, ca_bkv=zeros(1, 2 * d_model),
            ca_wo=w((d_model, d_model)).T, ca_bo=zeros(1, d_model),
        )

    def ffn_ln(n_norms):
        d = dict(
            w1=w((dff, d_model)).T, b1=zeros(1, dff),
            w2=w((d_model, dff)).T, b2=zeros(1, d_model),
        )
        for i in range(1, n_norms + 1):
            d[f"n{i}_g"] = ones(1, d_model)
            d[f"n{i}_b"] = zeros(1, d_model)
        return d

    enc = dict(**self_attn(), **ffn_ln(2))
    dec = [dict(**self_attn(), **cross_attn(), **ffn_ln(3)) for _ in range(2)]

    return dict(
        enc=enc,
        enc_norm_g=ones(1, d_model), enc_norm_b=zeros(1, d_model),
        dec=dec,
        dec_norm_g=ones(1, d_model), dec_norm_b=zeros(1, d_model),
        # nn.Linear(d_model, 1) with weight /= 1000 (PyTorch (1, D) layout kept)
        act_w=w((1, d_model)) / 1000.0, act_b=zeros(1, 1),
        end_w=w((1, d_model)) / 1000.0, end_b=zeros(1, 1),
    )


def prepare_kernel_params(params):
    """One-time transform of the f32 params into kernel layout:
    1/sqrt(dh) folded into the Q projections; MXU weights cast to bf16.
    LayerNorm params, biases and the act/end heads stay f32."""
    scale = 1.0 / math.sqrt(DHEAD)
    bf = jnp.bfloat16

    def self_attn_prep(d):
        d = dict(d)
        wqkv, bqkv = d["sa_wqkv"], d["sa_bqkv"]
        d["sa_wqkv"] = jnp.concatenate(
            [wqkv[:, :D_MODEL] * scale, wqkv[:, D_MODEL:]], axis=1).astype(bf)
        d["sa_bqkv"] = jnp.concatenate(
            [bqkv[:, :D_MODEL] * scale, bqkv[:, D_MODEL:]], axis=1)
        d["sa_wo"] = d["sa_wo"].astype(bf)
        return d

    def cross_attn_prep(d):
        d["ca_wq"] = (d["ca_wq"] * scale).astype(bf)
        d["ca_bq"] = d["ca_bq"] * scale
        d["ca_wkv"] = d["ca_wkv"].astype(bf)
        d["ca_wo"] = d["ca_wo"].astype(bf)
        return d

    def ffn_prep(d):
        d["w1"] = d["w1"].astype(bf)
        d["w2"] = d["w2"].astype(bf)
        return d

    out = dict(params)
    out["enc"] = ffn_prep(self_attn_prep(params["enc"]))
    out["dec"] = [ffn_prep(cross_attn_prep(self_attn_prep(dl))) for dl in params["dec"]]
    return out


# ----------------------------------------------------------------------------
if __name__ == "__main__":
    key = jax.random.PRNGKey(0)
    k_obs, k_params = jax.random.split(key)

    B, S, D = 2, 16, D_MODEL
    obs = jax.random.normal(k_obs, (B, S, D), jnp.float32)
    params = init_params(k_params)
    kparams = prepare_kernel_params(params)      # one-time: scale fold + bf16 cast

    fwd = jax.jit(transformer_step_actor_forward)
    logits, extra = fwd(obs, kparams)
    jax.block_until_ready(logits)

    assert logits.shape == (B, 5), logits.shape          # 4 act logits + 1 end logit
    assert extra is None
    assert bool(jnp.all(jnp.isfinite(logits)))

    with jax.default_matmul_precision("highest"):
        ref_logits, _ = _reference_forward(obs, params)
    # tolerance loosened vs the all-f32 version to account for bf16 MXU
    # operands + approx reciprocal (estimated logit error ~1e-5, logits ~1e-3)
    err = float(jnp.max(jnp.abs(logits - ref_logits)))
    assert jnp.allclose(logits, ref_logits, atol=2e-4, rtol=2e-2), err

    print("KERNEL_OK")
</pallas_src>

<mosaic_0001>
module attributes {stable_mosaic.version = 11 : i64} {
  func.func @_fused_kernel(%arg0: memref<32x32xf32, #tpu.memory_space<vmem>>, %arg1: memref<8x32xf32, #tpu.memory_space<vmem>>, %arg2: memref<32x128xf32, #tpu.memory_space<vmem>>, %arg3: memref<8x32xf32, #tpu.memory_space<vmem>>, %arg4: memref<8x128xf32, #tpu.memory_space<vmem>>, %arg5: memref<128x32xf32, #tpu.memory_space<vmem>>, %arg6: memref<32x32xf32, #tpu.memory_space<vmem>>, %arg7: memref<128x4xbf16, #tpu.memory_space<vmem>>, %arg8: memref<32x4xbf16, #tpu.memory_space<vmem>>, %arg9: memref<32x4xf32, #tpu.memory_space<vmem>>, %arg10: memref<2x8xf32, #tpu.memory_space<vmem>>, %arg11: memref<32x2048xbf16, #tpu.memory_space<any>>, %arg12: memref<2048x32xbf16, #tpu.memory_space<any>>, %arg13: memref<32x2048xbf16, #tpu.memory_space<any>>, %arg14: memref<2048x32xbf16, #tpu.memory_space<any>>, %arg15: memref<1x1xf32, #tpu.memory_space<vmem>>, %arg16: memref<1x32xf32, #tpu.memory_space<vmem>>, %arg17: memref<1x2048xf32, #tpu.memory_space<vmem>>, %arg18: memref<1x32xf32, #tpu.memory_space<vmem>>, %arg19: memref<1x64xf32, #tpu.memory_space<vmem>>, %arg20: memref<1x32xf32, #tpu.memory_space<vmem>>, %arg21: memref<1x32xf32, #tpu.memory_space<vmem>>, %arg22: memref<32x64xbf16, #tpu.memory_space<vmem>>, %arg23: memref<32x32xbf16, #tpu.memory_space<vmem>>, %arg24: memref<32x32xbf16, #tpu.memory_space<vmem>>, %arg25: memref<1x32xf32, #tpu.memory_space<vmem>>, %arg26: memref<1x32xf32, #tpu.memory_space<vmem>>, %arg27: memref<1x32xf32, #tpu.memory_space<vmem>>, %arg28: memref<1x32xf32, #tpu.memory_space<vmem>>, %arg29: memref<1x32xf32, #tpu.memory_space<vmem>>, %arg30: memref<1x32xf32, #tpu.memory_space<vmem>>, %arg31: memref<1x32xf32, #tpu.memory_space<vmem>>, %arg32: memref<1x96xf32, #tpu.memory_space<vmem>>, %arg33: memref<32x32xbf16, #tpu.memory_space<vmem>>, %arg34: memref<32x96xbf16, #tpu.memory_space<vmem>>, %arg35: memref<1x2048xf32, #tpu.memory_space<vmem>>, %arg36: memref<1x32xf32, #tpu.memory_space<vmem>>, %arg37: memref<1x64xf32, #tpu.memory_space<vmem>>, %arg38: memref<1x32xf32, #tpu.memory_space<vmem>>, %arg39: memref<1x32xf32, #tpu.memory_space<vmem>>, %arg40: memref<32x64xbf16, #tpu.memory_space<vmem>>, %arg41: memref<32x32xbf16, #tpu.memory_space<vmem>>, %arg42: memref<32x32xbf16, #tpu.memory_space<vmem>>, %arg43: memref<1x32xf32, #tpu.memory_space<vmem>>, %arg44: memref<1x32xf32, #tpu.memory_space<vmem>>, %arg45: memref<1x32xf32, #tpu.memory_space<vmem>>, %arg46: memref<1x32xf32, #tpu.memory_space<vmem>>, %arg47: memref<1x32xf32, #tpu.memory_space<vmem>>, %arg48: memref<1x32xf32, #tpu.memory_space<vmem>>, %arg49: memref<1x32xf32, #tpu.memory_space<vmem>>, %arg50: memref<1x96xf32, #tpu.memory_space<vmem>>, %arg51: memref<32x32xbf16, #tpu.memory_space<vmem>>, %arg52: memref<32x96xbf16, #tpu.memory_space<vmem>>, %arg53: memref<1x32xf32, #tpu.memory_space<vmem>>, %arg54: memref<1x32xf32, #tpu.memory_space<vmem>>, %arg55: memref<1x2048xf32, #tpu.memory_space<vmem>>, %arg56: memref<1x32xf32, #tpu.memory_space<vmem>>, %arg57: memref<1x32xf32, #tpu.memory_space<vmem>>, %arg58: memref<1x32xf32, #tpu.memory_space<vmem>>, %arg59: memref<1x32xf32, #tpu.memory_space<vmem>>, %arg60: memref<1x32xf32, #tpu.memory_space<vmem>>, %arg61: memref<1x32xf32, #tpu.memory_space<vmem>>, %arg62: memref<1x96xf32, #tpu.memory_space<vmem>>, %arg63: memref<32x32xbf16, #tpu.memory_space<vmem>>, %arg64: memref<32x96xbf16, #tpu.memory_space<vmem>>, %arg65: memref<32x2048xbf16, #tpu.memory_space<vmem>>, %arg66: memref<2048x32xbf16, #tpu.memory_space<vmem>>, %arg67: memref<1x32xf32, #tpu.memory_space<vmem>>, %arg68: memref<1x32xf32, #tpu.memory_space<vmem>>, %arg69: memref<1x1xf32, #tpu.memory_space<vmem>>, %arg70: memref<1x32xf32, #tpu.memory_space<vmem>>, %arg71: memref<1x8xf32, #tpu.memory_space<vmem>>, %arg72: memref<1x2xf32, #tpu.memory_space<vmem>>, %arg73: memref<32x2048xbf16, #tpu.memory_space<vmem>>, %arg74: memref<2048x32xbf16, #tpu.memory_space<vmem>>, %arg75: memref<32x2048xbf16, #tpu.memory_space<vmem>>, %arg76: memref<2048x32xbf16, #tpu.memory_space<vmem>>, %arg77: memref<4x!tpu.dma_semaphore, #tpu.memory_space<semaphore_mem>>) attributes {dimension_semantics = [], scalar_prefetch = 0 : i64, scratch_operands = 5 : i64, tpu.core_type = #tpu.core_type<tc>} {
    %c0_i32 = arith.constant 0 : i32
    %0 = tpu.memref_slice %arg77[%c0_i32] : memref<4x!tpu.dma_semaphore, #tpu.memory_space<semaphore_mem>> -> memref<1x!tpu.dma_semaphore, #tpu.memory_space<semaphore_mem>>
    %1 = tpu.memref_squeeze %0 : memref<1x!tpu.dma_semaphore, #tpu.memory_space<semaphore_mem>> -> memref<!tpu.dma_semaphore, #tpu.memory_space<semaphore_mem>>
    tpu.enqueue_dma source(%arg11 : memref<32x2048xbf16, #tpu.memory_space<any>>) target(%arg73 : memref<32x2048xbf16, #tpu.memory_space<vmem>>) target_semaphore(%1 : memref<!tpu.dma_semaphore, #tpu.memory_space<semaphore_mem>>)
    %c1_i32 = arith.constant 1 : i32
    %2 = tpu.memref_slice %arg77[%c1_i32] : memref<4x!tpu.dma_semaphore, #tpu.memory_space<semaphore_mem>> -> memref<1x!tpu.dma_semaphore, #tpu.memory_space<semaphore_mem>>
    %3 = tpu.memref_squeeze %2 : memref<1x!tpu.dma_semaphore, #tpu.memory_space<semaphore_mem>> -> memref<!tpu.dma_semaphore, #tpu.memory_space<semaphore_mem>>
    tpu.enqueue_dma source(%arg12 : memref<2048x32xbf16, #tpu.memory_space<any>>) target(%arg74 : memref<2048x32xbf16, #tpu.memory_space<vmem>>) target_semaphore(%3 : memref<!tpu.dma_semaphore, #tpu.memory_space<semaphore_mem>>)
    %c2_i32 = arith.constant 2 : i32
    %4 = tpu.memref_slice %arg77[%c2_i32] : memref<4x!tpu.dma_semaphore, #tpu.memory_space<semaphore_mem>> -> memref<1x!tpu.dma_semaphore, #tpu.memory_space<semaphore_mem>>
    %5 = tpu.memref_squeeze %4 : memref<1x!tpu.dma_semaphore, #tpu.memory_space<semaphore_mem>> -> memref<!tpu.dma_semaphore, #tpu.memory_space<semaphore_mem>>
    tpu.enqueue_dma source(%arg13 : memref<32x2048xbf16, #tpu.memory_space<any>>) target(%arg75 : memref<32x2048xbf16, #tpu.memory_space<vmem>>) target_semaphore(%5 : memref<!tpu.dma_semaphore, #tpu.memory_space<semaphore_mem>>)
    %c3_i32 = arith.constant 3 : i32
    %6 = tpu.memref_slice %arg77[%c3_i32] : memref<4x!tpu.dma_semaphore, #tpu.memory_space<semaphore_mem>> -> memref<1x!tpu.dma_semaphore, #tpu.memory_space<semaphore_mem>>
    %7 = tpu.memref_squeeze %6 : memref<1x!tpu.dma_semaphore, #tpu.memory_space<semaphore_mem>> -> memref<!tpu.dma_semaphore, #tpu.memory_space<semaphore_mem>>
    tpu.enqueue_dma source(%arg14 : memref<2048x32xbf16, #tpu.memory_space<any>>) target(%arg76 : memref<2048x32xbf16, #tpu.memory_space<vmem>>) target_semaphore(%7 : memref<!tpu.dma_semaphore, #tpu.memory_space<semaphore_mem>>)
    %c0 = arith.constant 0 : index
    %c0_0 = arith.constant 0 : index
    %8 = vector.load %arg0[%c0, %c0_0] : memref<32x32xf32, #tpu.memory_space<vmem>>, vector<32x32xf32>
    %c0_1 = arith.constant 0 : index
    %c0_2 = arith.constant 0 : index
    %9 = vector.load %arg1[%c0_1, %c0_2] : memref<8x32xf32, #tpu.memory_space<vmem>>, vector<8x32xf32>
    %c0_3 = arith.constant 0 : index
    %c0_4 = arith.constant 0 : index
    %10 = vector.load %arg2[%c0_3, %c0_4] : memref<32x128xf32, #tpu.memory_space<vmem>>, vector<32x128xf32>
    %c0_5 = arith.constant 0 : index
    %c0_6 = arith.constant 0 : index
    %11 = vector.load %arg3[%c0_5, %c0_6] : memref<8x32xf32, #tpu.memory_space<vmem>>, vector<8x32xf32>
    %c0_7 = arith.constant 0 : index
    %c0_8 = arith.constant 0 : index
    %12 = vector.load %arg4[%c0_7, %c0_8] : memref<8x128xf32, #tpu.memory_space<vmem>>, vector<8x128xf32>
    %c0_9 = arith.constant 0 : index
    %c0_10 = arith.constant 0 : index
    %13 = vector.load %arg5[%c0_9, %c0_10] : memref<128x32xf32, #tpu.memory_space<vmem>>, vector<128x32xf32>
    %c0_11 = arith.constant 0 : index
    %c0_12 = arith.constant 0 : index
    %14 = vector.load %arg6[%c0_11, %c0_12] : memref<32x32xf32, #tpu.memory_space<vmem>>, vector<32x32xf32>
    %c0_13 = arith.constant 0 : index
    %c0_14 = arith.constant 0 : index
    %15 = vector.load %arg7[%c0_13, %c0_14] : memref<128x4xbf16, #tpu.memory_space<vmem>>, vector<128x4xbf16>
    %c0_15 = arith.constant 0 : index
    %c0_16 = arith.constant 0 : index
    %16 = vector.load %arg8[%c0_15, %c0_16] : memref<32x4xbf16, #tpu.memory_space<vmem>>, vector<32x4xbf16>
    %c0_17 = arith.constant 0 : index
    %c0_18 = arith.constant 0 : index
    %17 = vector.load %arg9[%c0_17, %c0_18] : memref<32x4xf32, #tpu.memory_space<vmem>>, vector<32x4xf32>
    %18 = arith.truncf %8 : vector<32x32xf32> to vector<32x32xbf16>
    %c0_19 = arith.constant 0 : index
    %c0_20 = arith.constant 0 : index
    %19 = vector.load %arg64[%c0_19, %c0_20] : memref<32x96xbf16, #tpu.memory_space<vmem>>, vector<32x96xbf16>
    %cst = arith.constant dense<0.000000e+00> : vector<32x96xf32>
    %20 = tpu.matmul %18, %19, %cst {dimension_numbers = #tpu.dot_dimension_numbers<[1], [0], [0], [1], [0, 0, 1, 1], [], []>} : vector<32x32xbf16>, vector<32x96xbf16>, vector<32x96xf32> -> vector<32x96xf32>
    %c0_21 = arith.constant 0 : index
    %c0_22 = arith.constant 0 : index
    %21 = vector.load %arg62[%c0_21, %c0_22] : memref<1x96xf32, #tpu.memory_space<vmem>>, vector<1x96xf32>
    %22 = vector.broadcast %21 : vector<1x96xf32> to vector<32x96xf32>
    %23 = arith.addf %20, %22 : vector<32x96xf32>
    %24 = vector.extract_strided_slice %23 {offsets = [0, 0], sizes = [32, 32], strides = [1, 1]} : vector<32x96xf32> to vector<32x32xf32>
    %25 = vector.extract_strided_slice %23 {offsets = [0, 32], sizes = [32, 32], strides = [1, 1]} : vector<32x96xf32> to vector<32x32xf32>
    %26 = vector.extract_strided_slice %23 {offsets = [0, 64], sizes = [32, 32], strides = [1, 1]} : vector<32x96xf32> to vector<32x32xf32>
    %27 = arith.truncf %24 : vector<32x32xf32> to vector<32x32xbf16>
    %28 = tpu.concatenate %25, %25, %25, %25 in 0 : vector<32x32xf32>, vector<32x32xf32>, vector<32x32xf32>, vector<32x32xf32> -> vector<128x32xf32>
    %29 = tpu.concatenate %26, %26, %26, %26 in 0 : vector<32x32xf32>, vector<32x32xf32>, vector<32x32xf32>, vector<32x32xf32> -> vector<128x32xf32>
    %30 = arith.mulf %28, %13 : vector<128x32xf32>
    %31 = arith.truncf %30 : vector<128x32xf32> to vector<128x32xbf16>
    %32 = arith.mulf %29, %13 : vector<128x32xf32>
    %33 = arith.truncf %32 : vector<128x32xf32> to vector<128x32xbf16>
    %cst_23 = arith.constant dense<0.000000e+00> : vector<32x128xf32>
    %34 = tpu.matmul %27, %31, %cst_23 {dimension_numbers = #tpu.dot_dimension_numbers<[1], [1], [0], [0], [0, 0, 1, 0], [], []>} : vector<32x32xbf16>, vector<128x32xbf16>, vector<32x128xf32> -> vector<32x128xf32>
    %35 = arith.addf %34, %10 : vector<32x128xf32>
    %cst_24 = arith.constant dense<0xFF800000> : vector<32xf32>
    %36 = vector.multi_reduction <maximumf>, %35, %cst_24 [1] : vector<32x128xf32> to vector<32xf32>
    %37 = vector.shape_cast %36 : vector<32xf32> to vector<32x1xf32>
    %38 = vector.broadcast %37 : vector<32x1xf32> to vector<32x128xf32>
    %39 = arith.subf %35, %38 : vector<32x128xf32>
    %40 = math.exp %39 : vector<32x128xf32>
    %41 = arith.truncf %40 : vector<32x128xf32> to vector<32x128xbf16>
    %cst_25 = arith.constant dense<0.000000e+00> : vector<32x32xf32>
    %42 = tpu.matmul %41, %33, %cst_25 {dimension_numbers = #tpu.dot_dimension_numbers<[1], [0], [0], [1], [0, 0, 1, 1], [], []>} : vector<32x128xbf16>, vector<128x32xbf16>, vector<32x32xf32> -> vector<32x32xf32>
    %cst_26 = arith.constant dense<0.000000e+00> : vector<32x4xf32>
    %43 = tpu.matmul %41, %15, %cst_26 {dimension_numbers = #tpu.dot_dimension_numbers<[1], [0], [0], [1], [0, 0, 1, 1], [], []>} : vector<32x128xbf16>, vector<128x4xbf16>, vector<32x4xf32> -> vector<32x4xf32>
    %44 = tpu.reciprocal %43 {approx = true} : vector<32x4xf32> -> vector<32x4xf32>
    %cst_27 = arith.constant dense<0.000000e+00> : vector<32x32xf32>
    %45 = tpu.matmul %44, %17, %cst_27 {dimension_numbers = #tpu.dot_dimension_numbers<[1], [1], [0], [0], [0, 0, 1, 0], [], []>} : vector<32x4xf32>, vector<32x4xf32>, vector<32x32xf32> -> vector<32x32xf32>
    %46 = arith.mulf %42, %45 : vector<32x32xf32>
    %47 = arith.truncf %46 : vector<32x32xf32> to vector<32x32xbf16>
    %c0_28 = arith.constant 0 : index
    %c0_29 = arith.constant 0 : index
    %48 = vector.load %arg63[%c0_28, %c0_29] : memref<32x32xbf16, #tpu.memory_space<vmem>>, vector<32x32xbf16>
    %cst_30 = arith.constant dense<0.000000e+00> : vector<32x32xf32>
    %49 = tpu.matmul %47, %48, %cst_30 {dimension_numbers = #tpu.dot_dimension_numbers<[1], [0], [0], [1], [0, 0, 1, 1], [], []>} : vector<32x32xbf16>, vector<32x32xbf16>, vector<32x32xf32> -> vector<32x32xf32>
    %c0_31 = arith.constant 0 : index
    %c0_32 = arith.constant 0 : index
    %50 = vector.load %arg61[%c0_31, %c0_32] : memref<1x32xf32, #tpu.memory_space<vmem>>, vector<1x32xf32>
    %51 = vector.broadcast %50 : vector<1x32xf32> to vector<32x32xf32>
    %52 = arith.addf %49, %51 : vector<32x32xf32>
    %53 = arith.addf %8, %52 : vector<32x32xf32>
    %cst_33 = arith.constant dense<0.000000e+00> : vector<32xf32>
    %54 = vector.multi_reduction <add>, %53, %cst_33 [1] : vector<32x32xf32> to vector<32xf32>
    %55 = vector.shape_cast %54 : vector<32xf32> to vector<32x1xf32>
    %cst_34 = arith.constant 3.200000e+01 : f32
    %56 = vector.broadcast %cst_34 : f32 to vector<32x1xf32>
    %57 = arith.divf %55, %56 : vector<32x1xf32>
    %58 = vector.broadcast %57 : vector<32x1xf32> to vector<32x32xf32>
    %59 = arith.subf %53, %58 : vector<32x32xf32>
    %60 = arith.mulf %59, %59 : vector<32x32xf32>
    %cst_35 = arith.constant dense<0.000000e+00> : vector<32xf32>
    %61 = vector.multi_reduction <add>, %60, %cst_35 [1] : vector<32x32xf32> to vector<32xf32>
    %62 = vector.shape_cast %61 : vector<32xf32> to vector<32x1xf32>
    %cst_36 = arith.constant 3.200000e+01 : f32
    %63 = vector.broadcast %cst_36 : f32 to vector<32x1xf32>
    %64 = arith.divf %62, %63 : vector<32x1xf32>
    %cst_37 = arith.constant 9.99999974E-6 : f32
    %65 = vector.broadcast %cst_37 : f32 to vector<32x1xf32>
    %66 = arith.addf %64, %65 : vector<32x1xf32>
    %67 = math.rsqrt %66 : vector<32x1xf32>
    %68 = vector.broadcast %67 : vector<32x1xf32> to vector<32x32xf32>
    %69 = arith.mulf %59, %68 : vector<32x32xf32>
    %c0_38 = arith.constant 0 : index
    %c0_39 = arith.constant 0 : index
    %70 = vector.load %arg58[%c0_38, %c0_39] : memref<1x32xf32, #tpu.memory_space<vmem>>, vector<1x32xf32>
    %71 = vector.broadcast %70 : vector<1x32xf32> to vector<32x32xf32>
    %72 = arith.mulf %69, %71 : vector<32x32xf32>
    %c0_40 = arith.constant 0 : index
    %c0_41 = arith.constant 0 : index
    %73 = vector.load %arg57[%c0_40, %c0_41] : memref<1x32xf32, #tpu.memory_space<vmem>>, vector<1x32xf32>
    %74 = vector.broadcast %73 : vector<1x32xf32> to vector<32x32xf32>
    %75 = arith.addf %72, %74 : vector<32x32xf32>
    %76 = arith.truncf %75 : vector<32x32xf32> to vector<32x32xbf16>
    %c0_42 = arith.constant 0 : index
    %c0_43 = arith.constant 0 : index
    %77 = vector.load %arg65[%c0_42, %c0_43] : memref<32x2048xbf16, #tpu.memory_space<vmem>>, vector<32x2048xbf16>
    %cst_44 = arith.constant dense<0.000000e+00> : vector<32x2048xf32>
    %78 = tpu.matmul %76, %77, %cst_44 {dimension_numbers = #tpu.dot_dimension_numbers<[1], [0], [0], [1], [0, 0, 1, 1], [], []>} : vector<32x32xbf16>, vector<32x2048xbf16>, vector<32x2048xf32> -> vector<32x2048xf32>
    %c0_45 = arith.constant 0 : index
    %c0_46 = arith.constant 0 : index
    %79 = vector.load %arg55[%c0_45, %c0_46] : memref<1x2048xf32, #tpu.memory_space<vmem>>, vector<1x2048xf32>
    %80 = vector.broadcast %79 : vector<1x2048xf32> to vector<32x2048xf32>
    %81 = arith.addf %78, %80 : vector<32x2048xf32>
    %cst_47 = arith.constant 0.000000e+00 : f32
    %82 = vector.broadcast %cst_47 : f32 to vector<32x2048xf32>
    %83 = arith.maximumf %81, %82 : vector<32x2048xf32>
    %84 = arith.truncf %83 : vector<32x2048xf32> to vector<32x2048xbf16>
    %c0_48 = arith.constant 0 : index
    %c0_49 = arith.constant 0 : index
    %85 = vector.load %arg66[%c0_48, %c0_49] : memref<2048x32xbf16, #tpu.memory_space<vmem>>, vector<2048x32xbf16>
    %cst_50 = arith.constant dense<0.000000e+00> : vector<32x32xf32>
    %86 = tpu.matmul %84, %85, %cst_50 {dimension_numbers = #tpu.dot_dimension_numbers<[1], [0], [0], [1], [0, 0, 1, 1], [], []>} : vector<32x2048xbf16>, vector<2048x32xbf16>, vector<32x32xf32> -> vector<32x32xf32>
    %c0_51 = arith.constant 0 : index
    %c0_52 = arith.constant 0 : index
    %87 = vector.load %arg56[%c0_51, %c0_52] : memref<1x32xf32, #tpu.memory_space<vmem>>, vector<1x32xf32>
    %88 = vector.broadcast %87 : vector<1x32xf32> to vector<32x32xf32>
    %89 = arith.addf %86, %88 : vector<32x32xf32>
    %90 = arith.addf %75, %89 : vector<32x32xf32>
    %cst_53 = arith.constant dense<0.000000e+00> : vector<32xf32>
    %91 = vector.multi_reduction <add>, %90, %cst_53 [1] : vector<32x32xf32> to vector<32xf32>
    %92 = vector.shape_cast %91 : vector<32xf32> to vector<32x1xf32>
    %cst_54 = arith.constant 3.200000e+01 : f32
    %93 = vector.broadcast %cst_54 : f32 to vector<32x1xf32>
    %94 = arith.divf %92, %93 : vector<32x1xf32>
    %95 = vector.broadcast %94 : vector<32x1xf32> to vector<32x32xf32>
    %96 = arith.subf %90, %95 : vector<32x32xf32>
    %97 = arith.mulf %96, %96 : vector<32x32xf32>
    %cst_55 = arith.constant dense<0.000000e+00> : vector<32xf32>
    %98 = vector.multi_reduction <add>, %97, %cst_55 [1] : vector<32x32xf32> to vector<32xf32>
    %99 = vector.shape_cast %98 : vector<32xf32> to vector<32x1xf32>
    %cst_56 = arith.constant 3.200000e+01 : f32
    %100 = vector.broadcast %cst_56 : f32 to vector<32x1xf32>
    %101 = arith.divf %99, %100 : vector<32x1xf32>
    %cst_57 = arith.constant 9.99999974E-6 : f32
    %102 = vector.broadcast %cst_57 : f32 to vector<32x1xf32>
    %103 = arith.addf %101, %102 : vector<32x1xf32>
    %104 = math.rsqrt %103 : vector<32x1xf32>
    %105 = vector.broadcast %104 : vector<32x1xf32> to vector<32x32xf32>
    %106 = arith.mulf %96, %105 : vector<32x32xf32>
    %c0_58 = arith.constant 0 : index
    %c0_59 = arith.constant 0 : index
    %107 = vector.load %arg60[%c0_58, %c0_59] : memref<1x32xf32, #tpu.memory_space<vmem>>, vector<1x32xf32>
    %108 = vector.broadcast %107 : vector<1x32xf32> to vector<32x32xf32>
    %109 = arith.mulf %106, %108 : vector<32x32xf32>
    %c0_60 = arith.constant 0 : index
    %c0_61 = arith.constant 0 : index
    %110 = vector.load %arg59[%c0_60, %c0_61] : memref<1x32xf32, #tpu.memory_space<vmem>>, vector<1x32xf32>
    %111 = vector.broadcast %110 : vector<1x32xf32> to vector<32x32xf32>
    %112 = arith.addf %109, %111 : vector<32x32xf32>
    %cst_62 = arith.constant dense<0.000000e+00> : vector<32xf32>
    %113 = vector.multi_reduction <add>, %112, %cst_62 [1] : vector<32x32xf32> to vector<32xf32>
    %114 = vector.shape_cast %113 : vector<32xf32> to vector<32x1xf32>
    %cst_63 = arith.constant 3.200000e+01 : f32
    %115 = vector.broadcast %cst_63 : f32 to vector<32x1xf32>
    %116 = arith.divf %114, %115 : vector<32x1xf32>
    %117 = vector.broadcast %116 : vector<32x1xf32> to vector<32x32xf32>
    %118 = arith.subf %112, %117 : vector<32x32xf32>
    %119 = arith.mulf %118, %118 : vector<32x32xf32>
    %cst_64 = arith.constant dense<0.000000e+00> : vector<32xf32>
    %120 = vector.multi_reduction <add>, %119, %cst_64 [1] : vector<32x32xf32> to vector<32xf32>
    %121 = vector.shape_cast %120 : vector<32xf32> to vector<32x1xf32>
    %cst_65 = arith.constant 3.200000e+01 : f32
    %122 = vector.broadcast %cst_65 : f32 to vector<32x1xf32>
    %123 = arith.divf %121, %122 : vector<32x1xf32>
    %cst_66 = arith.constant 9.99999974E-6 : f32
    %124 = vector.broadcast %cst_66 : f32 to vector<32x1xf32>
    %125 = arith.addf %123, %124 : vector<32x1xf32>
    %126 = math.rsqrt %125 : vector<32x1xf32>
    %127 = vector.broadcast %126 : vector<32x1xf32> to vector<32x32xf32>
    %128 = arith.mulf %118, %127 : vector<32x32xf32>
    %c0_67 = arith.constant 0 : index
    %c0_68 = arith.constant 0 : index
    %129 = vector.load %arg68[%c0_67, %c0_68] : memref<1x32xf32, #tpu.memory_space<vmem>>, vector<1x32xf32>
    %130 = vector.broadcast %129 : vector<1x32xf32> to vector<32x32xf32>
    %131 = arith.mulf %128, %130 : vector<32x32xf32>
    %c0_69 = arith.constant 0 : index
    %c0_70 = arith.constant 0 : index
    %132 = vector.load %arg67[%c0_69, %c0_70] : memref<1x32xf32, #tpu.memory_space<vmem>>, vector<1x32xf32>
    %133 = vector.broadcast %132 : vector<1x32xf32> to vector<32x32xf32>
    %134 = arith.addf %131, %133 : vector<32x32xf32>
    %135 = arith.truncf %9 : vector<8x32xf32> to vector<8x32xbf16>
    %c0_71 = arith.constant 0 : index
    %c0_72 = arith.constant 0 : index
    %136 = vector.load %arg34[%c0_71, %c0_72] : memref<32x96xbf16, #tpu.memory_space<vmem>>, vector<32x96xbf16>
    %cst_73 = arith.constant dense<0.000000e+00> : vector<8x96xf32>
    %137 = tpu.matmul %135, %136, %cst_73 {dimension_numbers = #tpu.dot_dimension_numbers<[1], [0], [0], [1], [0, 0, 1, 1], [], []>} : vector<8x32xbf16>, vector<32x96xbf16>, vector<8x96xf32> -> vector<8x96xf32>
    %c0_74 = arith.constant 0 : index
    %c0_75 = arith.constant 0 : index
    %138 = vector.load %arg32[%c0_74, %c0_75] : memref<1x96xf32, #tpu.memory_space<vmem>>, vector<1x96xf32>
    %139 = vector.broadcast %138 : vector<1x96xf32> to vector<8x96xf32>
    %140 = arith.addf %137, %139 : vector<8x96xf32>
    %141 = vector.extract_strided_slice %140 {offsets = [0, 0], sizes = [8, 32], strides = [1, 1]} : vector<8x96xf32> to vector<8x32xf32>
    %142 = vector.extract_strided_slice %140 {offsets = [0, 32], sizes = [8, 32], strides = [1, 1]} : vector<8x96xf32> to vector<8x32xf32>
    %143 = vector.extract_strided_slice %140 {offsets = [0, 64], sizes = [8, 32], strides = [1, 1]} : vector<8x96xf32> to vector<8x32xf32>
    %144 = arith.truncf %141 : vector<8x32xf32> to vector<8x32xbf16>
    %145 = tpu.concatenate %142, %142, %142, %142 in 0 : vector<8x32xf32>, vector<8x32xf32>, vector<8x32xf32>, vector<8x32xf32> -> vector<32x32xf32>
    %146 = tpu.concatenate %143, %143, %143, %143 in 0 : vector<8x32xf32>, vector<8x32xf32>, vector<8x32xf32>, vector<8x32xf32> -> vector<32x32xf32>
    %147 = arith.mulf %145, %14 : vector<32x32xf32>
    %148 = arith.truncf %147 : vector<32x32xf32> to vector<32x32xbf16>
    %149 = arith.mulf %146, %14 : vector<32x32xf32>
    %150 = arith.truncf %149 : vector<32x32xf32> to vector<32x32xbf16>
    %cst_76 = arith.constant dense<0.000000e+00> : vector<8x32xf32>
    %151 = tpu.matmul %144, %148, %cst_76 {dimension_numbers = #tpu.dot_dimension_numbers<[1], [1], [0], [0], [0, 0, 1, 0], [], []>} : vector<8x32xbf16>, vector<32x32xbf16>, vector<8x32xf32> -> vector<8x32xf32>
    %152 = arith.addf %151, %11 : vector<8x32xf32>
    %cst_77 = arith.constant dense<0xFF800000> : vector<8xf32>
    %153 = vector.multi_reduction <maximumf>, %152, %cst_77 [1] : vector<8x32xf32> to vector<8xf32>
    %154 = vector.shape_cast %153 : vector<8xf32> to vector<8x1xf32>
    %155 = vector.broadcast %154 : vector<8x1xf32> to vector<8x32xf32>
    %156 = arith.subf %152, %155 : vector<8x32xf32>
    %157 = math.exp %156 : vector<8x32xf32>
    %158 = arith.truncf %157 : vector<8x32xf32> to vector<8x32xbf16>
    %cst_78 = arith.constant dense<0.000000e+00> : vector<8x32xf32>
    %159 = tpu.matmul %158, %150, %cst_78 {dimension_numbers = #tpu.dot_dimension_numbers<[1], [0], [0], [1], [0, 0, 1, 1], [], []>} : vector<8x32xbf16>, vector<32x32xbf16>, vector<8x32xf32> -> vector<8x32xf32>
    %cst_79 = arith.constant dense<0.000000e+00> : vector<8x4xf32>
    %160 = tpu.matmul %158, %16, %cst_79 {dimension_numbers = #tpu.dot_dimension_numbers<[1], [0], [0], [1], [0, 0, 1, 1], [], []>} : vector<8x32xbf16>, vector<32x4xbf16>, vector<8x4xf32> -> vector<8x4xf32>
    %161 = tpu.reciprocal %160 {approx = true} : vector<8x4xf32> -> vector<8x4xf32>
    %cst_80 = arith.constant dense<0.000000e+00> : vector<8x32xf32>
    %162 = tpu.matmul %161, %17, %cst_80 {dimension_numbers = #tpu.dot_dimension_numbers<[1], [1], [0], [0], [0, 0, 1, 0], [], []>} : vector<8x4xf32>, vector<32x4xf32>, vector<8x32xf32> -> vector<8x32xf32>
    %163 = arith.mulf %159, %162 : vector<8x32xf32>
    %164 = arith.truncf %163 : vector<8x32xf32> to vector<8x32xbf16>
    %c0_81 = arith.constant 0 : index
    %c0_82 = arith.constant 0 : index
    %165 = vector.load %arg33[%c0_81, %c0_82] : memref<32x32xbf16, #tpu.memory_space<vmem>>, vector<32x32xbf16>
    %cst_83 = arith.constant dense<0.000000e+00> : vector<8x32xf32>
    %166 = tpu.matmul %164, %165, %cst_83 {dimension_numbers = #tpu.dot_dimension_numbers<[1], [0], [0], [1], [0, 0, 1, 1], [], []>} : vector<8x32xbf16>, vector<32x32xbf16>, vector<8x32xf32> -> vector<8x32xf32>
    %c0_84 = arith.constant 0 : index
    %c0_85 = arith.constant 0 : index
    %167 = vector.load %arg31[%c0_84, %c0_85] : memref<1x32xf32, #tpu.memory_space<vmem>>, vector<1x32xf32>
    %168 = vector.broadcast %167 : vector<1x32xf32> to vector<8x32xf32>
    %169 = arith.addf %166, %168 : vector<8x32xf32>
    %170 = arith.addf %9, %169 : vector<8x32xf32>
    %cst_86 = arith.constant dense<0.000000e+00> : vector<8xf32>
    %171 = vector.multi_reduction <add>, %170, %cst_86 [1] : vector<8x32xf32> to vector<8xf32>
    %172 = vector.shape_cast %171 : vector<8xf32> to vector<8x1xf32>
    %cst_87 = arith.constant 3.200000e+01 : f32
    %173 = vector.broadcast %cst_87 : f32 to vector<8x1xf32>
    %174 = arith.divf %172, %173 : vector<8x1xf32>
    %175 = vector.broadcast %174 : vector<8x1xf32> to vector<8x32xf32>
    %176 = arith.subf %170, %175 : vector<8x32xf32>
    %177 = arith.mulf %176, %176 : vector<8x32xf32>
    %cst_88 = arith.constant dense<0.000000e+00> : vector<8xf32>
    %178 = vector.multi_reduction <add>, %177, %cst_88 [1] : vector<8x32xf32> to vector<8xf32>
    %179 = vector.shape_cast %178 : vector<8xf32> to vector<8x1xf32>
    %cst_89 = arith.constant 3.200000e+01 : f32
    %180 = vector.broadcast %cst_89 : f32 to vector<8x1xf32>
    %181 = arith.divf %179, %180 : vector<8x1xf32>
    %cst_90 = arith.constant 9.99999974E-6 : f32
    %182 = vector.broadcast %cst_90 : f32 to vector<8x1xf32>
    %183 = arith.addf %181, %182 : vector<8x1xf32>
    %184 = math.rsqrt %183 : vector<8x1xf32>
    %185 = vector.broadcast %184 : vector<8x1xf32> to vector<8x32xf32>
    %186 = arith.mulf %176, %185 : vector<8x32xf32>
    %c0_91 = arith.constant 0 : index
    %c0_92 = arith.constant 0 : index
    %187 = vector.load %arg26[%c0_91, %c0_92] : memref<1x32xf32, #tpu.memory_space<vmem>>, vector<1x32xf32>
    %188 = vector.broadcast %187 : vector<1x32xf32> to vector<8x32xf32>
    %189 = arith.mulf %186, %188 : vector<8x32xf32>
    %c0_93 = arith.constant 0 : index
    %c0_94 = arith.constant 0 : index
    %190 = vector.load %arg25[%c0_93, %c0_94] : memref<1x32xf32, #tpu.memory_space<vmem>>, vector<1x32xf32>
    %191 = vector.broadcast %190 : vector<1x32xf32> to vector<8x32xf32>
    %192 = arith.addf %189, %191 : vector<8x32xf32>
    %193 = arith.truncf %192 : vector<8x32xf32> to vector<8x32xbf16>
    %c0_95 = arith.constant 0 : index
    %c0_96 = arith.constant 0 : index
    %194 = vector.load %arg24[%c0_95, %c0_96] : memref<32x32xbf16, #tpu.memory_space<vmem>>, vector<32x32xbf16>
    %cst_97 = arith.constant dense<0.000000e+00> : vector<8x32xf32>
    %195 = tpu.matmul %193, %194, %cst_97 {dimension_numbers = #tpu.dot_dimension_numbers<[1], [0], [0], [1], [0, 0, 1, 1], [], []>} : vector<8x32xbf16>, vector<32x32xbf16>, vector<8x32xf32> -> vector<8x32xf32>
    %c0_98 = arith.constant 0 : index
    %c0_99 = arith.constant 0 : index
    %196 = vector.load %arg21[%c0_98, %c0_99] : memref<1x32xf32, #tpu.memory_space<vmem>>, vector<1x32xf32>
    %197 = vector.broadcast %196 : vector<1x32xf32> to vector<8x32xf32>
    %198 = arith.addf %195, %197 : vector<8x32xf32>
    %199 = arith.truncf %134 : vector<32x32xf32> to vector<32x32xbf16>
    %c0_100 = arith.constant 0 : index
    %c0_101 = arith.constant 0 : index
    %200 = vector.load %arg22[%c0_100, %c0_101] : memref<32x64xbf16, #tpu.memory_space<vmem>>, vector<32x64xbf16>
    %cst_102 = arith.constant dense<0.000000e+00> : vector<32x64xf32>
    %201 = tpu.matmul %199, %200, %cst_102 {dimension_numbers = #tpu.dot_dimension_numbers<[1], [0], [0], [1], [0, 0, 1, 1], [], []>} : vector<32x32xbf16>, vector<32x64xbf16>, vector<32x64xf32> -> vector<32x64xf32>
    %c0_103 = arith.constant 0 : index
    %c0_104 = arith.constant 0 : index
    %202 = vector.load %arg19[%c0_103, %c0_104] : memref<1x64xf32, #tpu.memory_space<vmem>>, vector<1x64xf32>
    %203 = vector.broadcast %202 : vector<1x64xf32> to vector<32x64xf32>
    %204 = arith.addf %201, %203 : vector<32x64xf32>
    %205 = vector.extract_strided_slice %204 {offsets = [0, 0], sizes = [32, 32], strides = [1, 1]} : vector<32x64xf32> to vector<32x32xf32>
    %206 = vector.extract_strided_slice %204 {offsets = [0, 32], sizes = [32, 32], strides = [1, 1]} : vector<32x64xf32> to vector<32x32xf32>
    %207 = arith.truncf %198 : vector<8x32xf32> to vector<8x32xbf16>
    %208 = tpu.concatenate %205, %205, %205, %205 in 0 : vector<32x32xf32>, vector<32x32xf32>, vector<32x32xf32>, vector<32x32xf32> -> vector<128x32xf32>
    %209 = tpu.concatenate %206, %206, %206, %206 in 0 : vector<32x32xf32>, vector<32x32xf32>, vector<32x32xf32>, vector<32x32xf32> -> vector<128x32xf32>
    %210 = arith.mulf %208, %13 : vector<128x32xf32>
    %211 = arith.truncf %210 : vector<128x32xf32> to vector<128x32xbf16>
    %212 = arith.mulf %209, %13 : vector<128x32xf32>
    %213 = arith.truncf %212 : vector<128x32xf32> to vector<128x32xbf16>
    %cst_105 = arith.constant dense<0.000000e+00> : vector<8x128xf32>
    %214 = tpu.matmul %207, %211, %cst_105 {dimension_numbers = #tpu.dot_dimension_numbers<[1], [1], [0], [0], [0, 0, 1, 0], [], []>} : vector<8x32xbf16>, vector<128x32xbf16>, vector<8x128xf32> -> vector<8x128xf32>
    %215 = arith.addf %214, %12 : vector<8x128xf32>
    %cst_106 = arith.constant dense<0xFF800000> : vector<8xf32>
    %216 = vector.multi_reduction <maximumf>, %215, %cst_106 [1] : vector<8x128xf32> to vector<8xf32>
    %217 = vector.shape_cast %216 : vector<8xf32> to vector<8x1xf32>
    %218 = vector.broadcast %217 : vector<8x1xf32> to vector<8x128xf32>
    %219 = arith.subf %215, %218 : vector<8x128xf32>
    %220 = math.exp %219 : vector<8x128xf32>
    %221 = arith.truncf %220 : vector<8x128xf32> to vector<8x128xbf16>
    %cst_107 = arith.constant dense<0.000000e+00> : vector<8x32xf32>
    %222 = tpu.matmul %221, %213, %cst_107 {dimension_numbers = #tpu.dot_dimension_numbers<[1], [0], [0], [1], [0, 0, 1, 1], [], []>} : vector<8x128xbf16>, vector<128x32xbf16>, vector<8x32xf32> -> vector<8x32xf32>
    %cst_108 = arith.constant dense<0.000000e+00> : vector<8x4xf32>
    %223 = tpu.matmul %221, %15, %cst_108 {dimension_numbers = #tpu.dot_dimension_numbers<[1], [0], [0], [1], [0, 0, 1, 1], [], []>} : vector<8x128xbf16>, vector<128x4xbf16>, vector<8x4xf32> -> vector<8x4xf32>
    %224 = tpu.reciprocal %223 {approx = true} : vector<8x4xf32> -> vector<8x4xf32>
    %cst_109 = arith.constant dense<0.000000e+00> : vector<8x32xf32>
    %225 = tpu.matmul %224, %17, %cst_109 {dimension_numbers = #tpu.dot_dimension_numbers<[1], [1], [0], [0], [0, 0, 1, 0], [], []>} : vector<8x4xf32>, vector<32x4xf32>, vector<8x32xf32> -> vector<8x32xf32>
    %226 = arith.mulf %222, %225 : vector<8x32xf32>
    %227 = arith.truncf %226 : vector<8x32xf32> to vector<8x32xbf16>
    %c0_110 = arith.constant 0 : index
    %c0_111 = arith.constant 0 : index
    %228 = vector.load %arg23[%c0_110, %c0_111] : memref<32x32xbf16, #tpu.memory_space<vmem>>, vector<32x32xbf16>
    %cst_112 = arith.constant dense<0.000000e+00> : vector<8x32xf32>
    %229 = tpu.matmul %227, %228, %cst_112 {dimension_numbers = #tpu.dot_dimension_numbers<[1], [0], [0], [1], [0, 0, 1, 1], [], []>} : vector<8x32xbf16>, vector<32x32xbf16>, vector<8x32xf32> -> vector<8x32xf32>
    %c0_113 = arith.constant 0 : index
    %c0_114 = arith.constant 0 : index
    %230 = vector.load %arg20[%c0_113, %c0_114] : memref<1x32xf32, #tpu.memory_space<vmem>>, vector<1x32xf32>
    %231 = vector.broadcast %230 : vector<1x32xf32> to vector<8x32xf32>
    %232 = arith.addf %229, %231 : vector<8x32xf32>
    %233 = arith.addf %192, %232 : vector<8x32xf32>
    %cst_115 = arith.constant dense<0.000000e+00> : vector<8xf32>
    %234 = vector.multi_reduction <add>, %233, %cst_115 [1] : vector<8x32xf32> to vector<8xf32>
    %235 = vector.shape_cast %234 : vector<8xf32> to vector<8x1xf32>
    %cst_116 = arith.constant 3.200000e+01 : f32
    %236 = vector.broadcast %cst_116 : f32 to vector<8x1xf32>
    %237 = arith.divf %235, %236 : vector<8x1xf32>
    %238 = vector.broadcast %237 : vector<8x1xf32> to vector<8x32xf32>
    %239 = arith.subf %233, %238 : vector<8x32xf32>
    %240 = arith.mulf %239, %239 : vector<8x32xf32>
    %cst_117 = arith.constant dense<0.000000e+00> : vector<8xf32>
    %241 = vector.multi_reduction <add>, %240, %cst_117 [1] : vector<8x32xf32> to vector<8xf32>
    %242 = vector.shape_cast %241 : vector<8xf32> to vector<8x1xf32>
    %cst_118 = arith.constant 3.200000e+01 : f32
    %243 = vector.broadcast %cst_118 : f32 to vector<8x1xf32>
    %244 = arith.divf %242, %243 : vector<8x1xf32>
    %cst_119 = arith.constant 9.99999974E-6 : f32
    %245 = vector.broadcast %cst_119 : f32 to vector<8x1xf32>
    %246 = arith.addf %244, %245 : vector<8x1xf32>
    %247 = math.rsqrt %246 : vector<8x1xf32>
    %248 = vector.broadcast %247 : vector<8x1xf32> to vector<8x32xf32>
    %249 = arith.mulf %239, %248 : vector<8x32xf32>
    %c0_120 = arith.constant 0 : index
    %c0_121 = arith.constant 0 : index
    %250 = vector.load %arg28[%c0_120, %c0_121] : memref<1x32xf32, #tpu.memory_space<vmem>>, vector<1x32xf32>
    %251 = vector.broadcast %250 : vector<1x32xf32> to vector<8x32xf32>
    %252 = arith.mulf %249, %251 : vector<8x32xf32>
    %c0_122 = arith.constant 0 : index
    %c0_123 = arith.constant 0 : index
    %253 = vector.load %arg27[%c0_122, %c0_123] : memref<1x32xf32, #tpu.memory_space<vmem>>, vector<1x32xf32>
    %254 = vector.broadcast %253 : vector<1x32xf32> to vector<8x32xf32>
    %255 = arith.addf %252, %254 : vector<8x32xf32>
    %c0_i32_124 = arith.constant 0 : i32
    %256 = tpu.memref_slice %arg77[%c0_i32_124] : memref<4x!tpu.dma_semaphore, #tpu.memory_space<semaphore_mem>> -> memref<1x!tpu.dma_semaphore, #tpu.memory_space<semaphore_mem>>
    %257 = tpu.memref_squeeze %256 : memref<1x!tpu.dma_semaphore, #tpu.memory_space<semaphore_mem>> -> memref<!tpu.dma_semaphore, #tpu.memory_space<semaphore_mem>>
    tpu.wait_dma2 semaphore(%257 : memref<!tpu.dma_semaphore, #tpu.memory_space<semaphore_mem>>) src(%arg11 : memref<32x2048xbf16, #tpu.memory_space<any>>) dst(%arg73 : memref<32x2048xbf16, #tpu.memory_space<vmem>>)
    %c1_i32_125 = arith.constant 1 : i32
    %258 = tpu.memref_slice %arg77[%c1_i32_125] : memref<4x!tpu.dma_semaphore, #tpu.memory_space<semaphore_mem>> -> memref<1x!tpu.dma_semaphore, #tpu.memory_space<semaphore_mem>>
    %259 = tpu.memref_squeeze %258 : memref<1x!tpu.dma_semaphore, #tpu.memory_space<semaphore_mem>> -> memref<!tpu.dma_semaphore, #tpu.memory_space<semaphore_mem>>
    tpu.wait_dma2 semaphore(%259 : memref<!tpu.dma_semaphore, #tpu.memory_space<semaphore_mem>>) src(%arg12 : memref<2048x32xbf16, #tpu.memory_space<any>>) dst(%arg74 : memref<2048x32xbf16, #tpu.memory_space<vmem>>)
    %260 = arith.truncf %255 : vector<8x32xf32> to vector<8x32xbf16>
    %c0_126 = arith.constant 0 : index
    %c0_127 = arith.constant 0 : index
    %261 = vector.load %arg73[%c0_126, %c0_127] : memref<32x2048xbf16, #tpu.memory_space<vmem>>, vector<32x2048xbf16>
    %cst_128 = arith.constant dense<0.000000e+00> : vector<8x2048xf32>
    %262 = tpu.matmul %260, %261, %cst_128 {dimension_numbers = #tpu.dot_dimension_numbers<[1], [0], [0], [1], [0, 0, 1, 1], [], []>} : vector<8x32xbf16>, vector<32x2048xbf16>, vector<8x2048xf32> -> vector<8x2048xf32>
    %c0_129 = arith.constant 0 : index
    %c0_130 = arith.constant 0 : index
    %263 = vector.load %arg17[%c0_129, %c0_130] : memref<1x2048xf32, #tpu.memory_space<vmem>>, vector<1x2048xf32>
    %264 = vector.broadcast %263 : vector<1x2048xf32> to vector<8x2048xf32>
    %265 = arith.addf %262, %264 : vector<8x2048xf32>
    %cst_131 = arith.constant 0.000000e+00 : f32
    %266 = vector.broadcast %cst_131 : f32 to vector<8x2048xf32>
    %267 = arith.maximumf %265, %266 : vector<8x2048xf32>
    %268 = arith.truncf %267 : vector<8x2048xf32> to vector<8x2048xbf16>
    %c0_132 = arith.constant 0 : index
    %c0_133 = arith.constant 0 : index
    %269 = vector.load %arg74[%c0_132, %c0_133] : memref<2048x32xbf16, #tpu.memory_space<vmem>>, vector<2048x32xbf16>
    %cst_134 = arith.constant dense<0.000000e+00> : vector<8x32xf32>
    %270 = tpu.matmul %268, %269, %cst_134 {dimension_numbers = #tpu.dot_dimension_numbers<[1], [0], [0], [1], [0, 0, 1, 1], [], []>} : vector<8x2048xbf16>, vector<2048x32xbf16>, vector<8x32xf32> -> vector<8x32xf32>
    %c0_135 = arith.constant 0 : index
    %c0_136 = arith.constant 0 : index
    %271 = vector.load %arg18[%c0_135, %c0_136] : memref<1x32xf32, #tpu.memory_space<vmem>>, vector<1x32xf32>
    %272 = vector.broadcast %271 : vector<1x32xf32> to vector<8x32xf32>
    %273 = arith.addf %270, %272 : vector<8x32xf32>
    %274 = arith.addf %255, %273 : vector<8x32xf32>
    %cst_137 = arith.constant dense<0.000000e+00> : vector<8xf32>
    %275 = vector.multi_reduction <add>, %274, %cst_137 [1] : vector<8x32xf32> to vector<8xf32>
    %276 = vector.shape_cast %275 : vector<8xf32> to vector<8x1xf32>
    %cst_138 = arith.constant 3.200000e+01 : f32
    %277 = vector.broadcast %cst_138 : f32 to vector<8x1xf32>
    %278 = arith.divf %276, %277 : vector<8x1xf32>
    %279 = vector.broadcast %278 : vector<8x1xf32> to vector<8x32xf32>
    %280 = arith.subf %274, %279 : vector<8x32xf32>
    %281 = arith.mulf %280, %280 : vector<8x32xf32>
    %cst_139 = arith.constant dense<0.000000e+00> : vector<8xf32>
    %282 = vector.multi_reduction <add>, %281, %cst_139 [1] : vector<8x32xf32> to vector<8xf32>
    %283 = vector.shape_cast %282 : vector<8xf32> to vector<8x1xf32>
    %cst_140 = arith.constant 3.200000e+01 : f32
    %284 = vector.broadcast %cst_140 : f32 to vector<8x1xf32>
    %285 = arith.divf %283, %284 : vector<8x1xf32>
    %cst_141 = arith.constant 9.99999974E-6 : f32
    %286 = vector.broadcast %cst_141 : f32 to vector<8x1xf32>
    %287 = arith.addf %285, %286 : vector<8x1xf32>
    %288 = math.rsqrt %287 : vector<8x1xf32>
    %289 = vector.broadcast %288 : vector<8x1xf32> to vector<8x32xf32>
    %290 = arith.mulf %280, %289 : vector<8x32xf32>
    %c0_142 = arith.constant 0 : index
    %c0_143 = arith.constant 0 : index
    %291 = vector.load %arg30[%c0_142, %c0_143] : memref<1x32xf32, #tpu.memory_space<vmem>>, vector<1x32xf32>
    %292 = vector.broadcast %291 : vector<1x32xf32> to vector<8x32xf32>
    %293 = arith.mulf %290, %292 : vector<8x32xf32>
    %c0_144 = arith.constant 0 : index
    %c0_145 = arith.constant 0 : index
    %294 = vector.load %arg29[%c0_144, %c0_145] : memref<1x32xf32, #tpu.memory_space<vmem>>, vector<1x32xf32>
    %295 = vector.broadcast %294 : vector<1x32xf32> to vector<8x32xf32>
    %296 = arith.addf %293, %295 : vector<8x32xf32>
    %297 = arith.truncf %296 : vector<8x32xf32> to vector<8x32xbf16>
    %c0_146 = arith.constant 0 : index
    %c0_147 = arith.constant 0 : index
    %298 = vector.load %arg52[%c0_146, %c0_147] : memref<32x96xbf16, #tpu.memory_space<vmem>>, vector<32x96xbf16>
    %cst_148 = arith.constant dense<0.000000e+00> : vector<8x96xf32>
    %299 = tpu.matmul %297, %298, %cst_148 {dimension_numbers = #tpu.dot_dimension_numbers<[1], [0], [0], [1], [0, 0, 1, 1], [], []>} : vector<8x32xbf16>, vector<32x96xbf16>, vector<8x96xf32> -> vector<8x96xf32>
    %c0_149 = arith.constant 0 : index
    %c0_150 = arith.constant 0 : index
    %300 = vector.load %arg50[%c0_149, %c0_150] : memref<1x96xf32, #tpu.memory_space<vmem>>, vector<1x96xf32>
    %301 = vector.broadcast %300 : vector<1x96xf32> to vector<8x96xf32>
    %302 = arith.addf %299, %301 : vector<8x96xf32>
    %303 = vector.extract_strided_slice %302 {offsets = [0, 0], sizes = [8, 32], strides = [1, 1]} : vector<8x96xf32> to vector<8x32xf32>
    %304 = vector.extract_strided_slice %302 {offsets = [0, 32], sizes = [8, 32], strides = [1, 1]} : vector<8x96xf32> to vector<8x32xf32>
    %305 = vector.extract_strided_slice %302 {offsets = [0, 64], sizes = [8, 32], strides = [1, 1]} : vector<8x96xf32> to vector<8x32xf32>
    %306 = arith.truncf %303 : vector<8x32xf32> to vector<8x32xbf16>
    %307 = tpu.concatenate %304, %304, %304, %304 in 0 : vector<8x32xf32>, vector<8x32xf32>, vector<8x32xf32>, vector<8x32xf32> -> vector<32x32xf32>
    %308 = tpu.concatenate %305, %305, %305, %305 in 0 : vector<8x32xf32>, vector<8x32xf32>, vector<8x32xf32>, vector<8x32xf32> -> vector<32x32xf32>
    %309 = arith.mulf %307, %14 : vector<32x32xf32>
    %310 = arith.truncf %309 : vector<32x32xf32> to vector<32x32xbf16>
    %311 = arith.mulf %308, %14 : vector<32x32xf32>
    %312 = arith.truncf %311 : vector<32x32xf32> to vector<32x32xbf16>
    %cst_151 = arith.constant dense<0.000000e+00> : vector<8x32xf32>
    %313 = tpu.matmul %306, %310, %cst_151 {dimension_numbers = #tpu.dot_dimension_numbers<[1], [1], [0], [0], [0, 0, 1, 0], [], []>} : vector<8x32xbf16>, vector<32x32xbf16>, vector<8x32xf32> -> vector<8x32xf32>
    %314 = arith.addf %313, %11 : vector<8x32xf32>
    %cst_152 = arith.constant dense<0xFF800000> : vector<8xf32>
    %315 = vector.multi_reduction <maximumf>, %314, %cst_152 [1] : vector<8x32xf32> to vector<8xf32>
    %316 = vector.shape_cast %315 : vector<8xf32> to vector<8x1xf32>
    %317 = vector.broadcast %316 : vector<8x1xf32> to vector<8x32xf32>
    %318 = arith.subf %314, %317 : vector<8x32xf32>
    %319 = math.exp %318 : vector<8x32xf32>
    %320 = arith.truncf %319 : vector<8x32xf32> to vector<8x32xbf16>
    %cst_153 = arith.constant dense<0.000000e+00> : vector<8x32xf32>
    %321 = tpu.matmul %320, %312, %cst_153 {dimension_numbers = #tpu.dot_dimension_numbers<[1], [0], [0], [1], [0, 0, 1, 1], [], []>} : vector<8x32xbf16>, vector<32x32xbf16>, vector<8x32xf32> -> vector<8x32xf32>
    %cst_154 = arith.constant dense<0.000000e+00> : vector<8x4xf32>
    %322 = tpu.matmul %320, %16, %cst_154 {dimension_numbers = #tpu.dot_dimension_numbers<[1], [0], [0], [1], [0, 0, 1, 1], [], []>} : vector<8x32xbf16>, vector<32x4xbf16>, vector<8x4xf32> -> vector<8x4xf32>
    %323 = tpu.reciprocal %322 {approx = true} : vector<8x4xf32> -> vector<8x4xf32>
    %cst_155 = arith.constant dense<0.000000e+00> : vector<8x32xf32>
    %324 = tpu.matmul %323, %17, %cst_155 {dimension_numbers = #tpu.dot_dimension_numbers<[1], [1], [0], [0], [0, 0, 1, 0], [], []>} : vector<8x4xf32>, vector<32x4xf32>, vector<8x32xf32> -> vector<8x32xf32>
    %325 = arith.mulf %321, %324 : vector<8x32xf32>
    %326 = arith.truncf %325 : vector<8x32xf32> to vector<8x32xbf16>
    %c0_156 = arith.constant 0 : index
    %c0_157 = arith.constant 0 : index
    %327 = vector.load %arg51[%c0_156, %c0_157] : memref<32x32xbf16, #tpu.memory_space<vmem>>, vector<32x32xbf16>
    %cst_158 = arith.constant dense<0.000000e+00> : vector<8x32xf32>
    %328 = tpu.matmul %326, %327, %cst_158 {dimension_numbers = #tpu.dot_dimension_numbers<[1], [0], [0], [1], [0, 0, 1, 1], [], []>} : vector<8x32xbf16>, vector<32x32xbf16>, vector<8x32xf32> -> vector<8x32xf32>
    %c0_159 = arith.constant 0 : index
    %c0_160 = arith.constant 0 : index
    %329 = vector.load %arg49[%c0_159, %c0_160] : memref<1x32xf32, #tpu.memory_space<vmem>>, vector<1x32xf32>
    %330 = vector.broadcast %329 : vector<1x32xf32> to vector<8x32xf32>
    %331 = arith.addf %328, %330 : vector<8x32xf32>
    %332 = arith.addf %296, %331 : vector<8x32xf32>
    %cst_161 = arith.constant dense<0.000000e+00> : vector<8xf32>
    %333 = vector.multi_reduction <add>, %332, %cst_161 [1] : vector<8x32xf32> to vector<8xf32>
    %334 = vector.shape_cast %333 : vector<8xf32> to vector<8x1xf32>
    %cst_162 = arith.constant 3.200000e+01 : f32
    %335 = vector.broadcast %cst_162 : f32 to vector<8x1xf32>
    %336 = arith.divf %334, %335 : vector<8x1xf32>
    %337 = vector.broadcast %336 : vector<8x1xf32> to vector<8x32xf32>
    %338 = arith.subf %332, %337 : vector<8x32xf32>
    %339 = arith.mulf %338, %338 : vector<8x32xf32>
    %cst_163 = arith.constant dense<0.000000e+00> : vector<8xf32>
    %340 = vector.multi_reduction <add>, %339, %cst_163 [1] : vector<8x32xf32> to vector<8xf32>
    %341 = vector.shape_cast %340 : vector<8xf32> to vector<8x1xf32>
    %cst_164 = arith.constant 3.200000e+01 : f32
    %342 = vector.broadcast %cst_164 : f32 to vector<8x1xf32>
    %343 = arith.divf %341, %342 : vector<8x1xf32>
    %cst_165 = arith.constant 9.99999974E-6 : f32
    %344 = vector.broadcast %cst_165 : f32 to vector<8x1xf32>
    %345 = arith.addf %343, %344 : vector<8x1xf32>
    %346 = math.rsqrt %345 : vector<8x1xf32>
    %347 = vector.broadcast %346 : vector<8x1xf32> to vector<8x32xf32>
    %348 = arith.mulf %338, %347 : vector<8x32xf32>
    %c0_166 = arith.constant 0 : index
    %c0_167 = arith.constant 0 : index
    %349 = vector.load %arg44[%c0_166, %c0_167] : memref<1x32xf32, #tpu.memory_space<vmem>>, vector<1x32xf32>
    %350 = vector.broadcast %349 : vector<1x32xf32> to vector<8x32xf32>
    %351 = arith.mulf %348, %350 : vector<8x32xf32>
    %c0_168 = arith.constant 0 : index
    %c0_169 = arith.constant 0 : index
    %352 = vector.load %arg43[%c0_168, %c0_169] : memref<1x32xf32, #tpu.memory_space<vmem>>, vector<1x32xf32>
    %353 = vector.broadcast %352 : vector<1x32xf32> to vector<8x32xf32>
    %354 = arith.addf %351, %353 : vector<8x32xf32>
    %355 = arith.truncf %354 : vector<8x32xf32> to vector<8x32xbf16>
    %c0_170 = arith.constant 0 : index
    %c0_171 = arith.constant 0 : index
    %356 = vector.load %arg42[%c0_170, %c0_171] : memref<32x32xbf16, #tpu.memory_space<vmem>>, vector<32x32xbf16>
    %cst_172 = arith.constant dense<0.000000e+00> : vector<8x32xf32>
    %357 = tpu.matmul %355, %356, %cst_172 {dimension_numbers = #tpu.dot_dimension_numbers<[1], [0], [0], [1], [0, 0, 1, 1], [], []>} : vector<8x32xbf16>, vector<32x32xbf16>, vector<8x32xf32> -> vector<8x32xf32>
    %c0_173 = arith.constant 0 : index
    %c0_174 = arith.constant 0 : index
    %358 = vector.load %arg39[%c0_173, %c0_174] : memref<1x32xf32, #tpu.memory_space<vmem>>, vector<1x32xf32>
    %359 = vector.broadcast %358 : vector<1x32xf32> to vector<8x32xf32>
    %360 = arith.addf %357, %359 : vector<8x32xf32>
    %361 = arith.truncf %134 : vector<32x32xf32> to vector<32x32xbf16>
    %c0_175 = arith.constant 0 : index
    %c0_176 = arith.constant 0 : index
    %362 = vector.load %arg40[%c0_175, %c0_176] : memref<32x64xbf16, #tpu.memory_space<vmem>>, vector<32x64xbf16>
    %cst_177 = arith.constant dense<0.000000e+00> : vector<32x64xf32>
    %363 = tpu.matmul %361, %362, %cst_177 {dimension_numbers = #tpu.dot_dimension_numbers<[1], [0], [0], [1], [0, 0, 1, 1], [], []>} : vector<32x32xbf16>, vector<32x64xbf16>, vector<32x64xf32> -> vector<32x64xf32>
    %c0_178 = arith.constant 0 : index
    %c0_179 = arith.constant 0 : index
    %364 = vector.load %arg37[%c0_178, %c0_179] : memref<1x64xf32, #tpu.memory_space<vmem>>, vector<1x64xf32>
    %365 = vector.broadcast %364 : vector<1x64xf32> to vector<32x64xf32>
    %366 = arith.addf %363, %365 : vector<32x64xf32>
    %367 = vector.extract_strided_slice %366 {offsets = [0, 0], sizes = [32, 32], strides = [1, 1]} : vector<32x64xf32> to vector<32x32xf32>
    %368 = vector.extract_strided_slice %366 {offsets = [0, 32], sizes = [32, 32], strides = [1, 1]} : vector<32x64xf32> to vector<32x32xf32>
    %369 = arith.truncf %360 : vector<8x32xf32> to vector<8x32xbf16>
    %370 = tpu.concatenate %367, %367, %367, %367 in 0 : vector<32x32xf32>, vector<32x32xf32>, vector<32x32xf32>, vector<32x32xf32> -> vector<128x32xf32>
    %371 = tpu.concatenate %368, %368, %368, %368 in 0 : vector<32x32xf32>, vector<32x32xf32>, vector<32x32xf32>, vector<32x32xf32> -> vector<128x32xf32>
    %372 = arith.mulf %370, %13 : vector<128x32xf32>
    %373 = arith.truncf %372 : vector<128x32xf32> to vector<128x32xbf16>
    %374 = arith.mulf %371, %13 : vector<128x32xf32>
    %375 = arith.truncf %374 : vector<128x32xf32> to vector<128x32xbf16>
    %cst_180 = arith.constant dense<0.000000e+00> : vector<8x128xf32>
    %376 = tpu.matmul %369, %373, %cst_180 {dimension_numbers = #tpu.dot_dimension_numbers<[1], [1], [0], [0], [0, 0, 1, 0], [], []>} : vector<8x32xbf16>, vector<128x32xbf16>, vector<8x128xf32> -> vector<8x128xf32>
    %377 = arith.addf %376, %12 : vector<8x128xf32>
    %cst_181 = arith.constant dense<0xFF800000> : vector<8xf32>
    %378 = vector.multi_reduction <maximumf>, %377, %cst_181 [1] : vector<8x128xf32> to vector<8xf32>
    %379 = vector.shape_cast %378 : vector<8xf32> to vector<8x1xf32>
    %380 = vector.broadcast %379 : vector<8x1xf32> to vector<8x128xf32>
    %381 = arith.subf %377, %380 : vector<8x128xf32>
    %382 = math.exp %381 : vector<8x128xf32>
    %383 = arith.truncf %382 : vector<8x128xf32> to vector<8x128xbf16>
    %cst_182 = arith.constant dense<0.000000e+00> : vector<8x32xf32>
    %384 = tpu.matmul %383, %375, %cst_182 {dimension_numbers = #tpu.dot_dimension_numbers<[1], [0], [0], [1], [0, 0, 1, 1], [], []>} : vector<8x128xbf16>, vector<128x32xbf16>, vector<8x32xf32> -> vector<8x32xf32>
    %cst_183 = arith.constant dense<0.000000e+00> : vector<8x4xf32>
    %385 = tpu.matmul %383, %15, %cst_183 {dimension_numbers = #tpu.dot_dimension_numbers<[1], [0], [0], [1], [0, 0, 1, 1], [], []>} : vector<8x128xbf16>, vector<128x4xbf16>, vector<8x4xf32> -> vector<8x4xf32>
    %386 = tpu.reciprocal %385 {approx = true} : vector<8x4xf32> -> vector<8x4xf32>
    %cst_184 = arith.constant dense<0.000000e+00> : vector<8x32xf32>
    %387 = tpu.matmul %386, %17, %cst_184 {dimension_numbers = #tpu.dot_dimension_numbers<[1], [1], [0], [0], [0, 0, 1, 0], [], []>} : vector<8x4xf32>, vector<32x4xf32>, vector<8x32xf32> -> vector<8x32xf32>
    %388 = arith.mulf %384, %387 : vector<8x32xf32>
    %389 = arith.truncf %388 : vector<8x32xf32> to vector<8x32xbf16>
    %c0_185 = arith.constant 0 : index
    %c0_186 = arith.constant 0 : index
    %390 = vector.load %arg41[%c0_185, %c0_186] : memref<32x32xbf16, #tpu.memory_space<vmem>>, vector<32x32xbf16>
    %cst_187 = arith.constant dense<0.000000e+00> : vector<8x32xf32>
    %391 = tpu.matmul %389, %390, %cst_187 {dimension_numbers = #tpu.dot_dimension_numbers<[1], [0], [0], [1], [0, 0, 1, 1], [], []>} : vector<8x32xbf16>, vector<32x32xbf16>, vector<8x32xf32> -> vector<8x32xf32>
    %c0_188 = arith.constant 0 : index
    %c0_189 = arith.constant 0 : index
    %392 = vector.load %arg38[%c0_188, %c0_189] : memref<1x32xf32, #tpu.memory_space<vmem>>, vector<1x32xf32>
    %393 = vector.broadcast %392 : vector<1x32xf32> to vector<8x32xf32>
    %394 = arith.addf %391, %393 : vector<8x32xf32>
    %395 = arith.addf %354, %394 : vector<8x32xf32>
    %cst_190 = arith.constant dense<0.000000e+00> : vector<8xf32>
    %396 = vector.multi_reduction <add>, %395, %cst_190 [1] : vector<8x32xf32> to vector<8xf32>
    %397 = vector.shape_cast %396 : vector<8xf32> to vector<8x1xf32>
    %cst_191 = arith.constant 3.200000e+01 : f32
    %398 = vector.broadcast %cst_191 : f32 to vector<8x1xf32>
    %399 = arith.divf %397, %398 : vector<8x1xf32>
    %400 = vector.broadcast %399 : vector<8x1xf32> to vector<8x32xf32>
    %401 = arith.subf %395, %400 : vector<8x32xf32>
    %402 = arith.mulf %401, %401 : vector<8x32xf32>
    %cst_192 = arith.constant dense<0.000000e+00> : vector<8xf32>
    %403 = vector.multi_reduction <add>, %402, %cst_192 [1] : vector<8x32xf32> to vector<8xf32>
    %404 = vector.shape_cast %403 : vector<8xf32> to vector<8x1xf32>
    %cst_193 = arith.constant 3.200000e+01 : f32
    %405 = vector.broadcast %cst_193 : f32 to vector<8x1xf32>
    %406 = arith.divf %404, %405 : vector<8x1xf32>
    %cst_194 = arith.constant 9.99999974E-6 : f32
    %407 = vector.broadcast %cst_194 : f32 to vector<8x1xf32>
    %408 = arith.addf %406, %407 : vector<8x1xf32>
    %409 = math.rsqrt %408 : vector<8x1xf32>
    %410 = vector.broadcast %409 : vector<8x1xf32> to vector<8x32xf32>
    %411 = arith.mulf %401, %410 : vector<8x32xf32>
    %c0_195 = arith.constant 0 : index
    %c0_196 = arith.constant 0 : index
    %412 = vector.load %arg46[%c0_195, %c0_196] : memref<1x32xf32, #tpu.memory_space<vmem>>, vector<1x32xf32>
    %413 = vector.broadcast %412 : vector<1x32xf32> to vector<8x32xf32>
    %414 = arith.mulf %411, %413 : vector<8x32xf32>
    %c0_197 = arith.constant 0 : index
    %c0_198 = arith.constant 0 : index
    %415 = vector.load %arg45[%c0_197, %c0_198] : memref<1x32xf32, #tpu.memory_space<vmem>>, vector<1x32xf32>
    %416 = vector.broadcast %415 : vector<1x32xf32> to vector<8x32xf32>
    %417 = arith.addf %414, %416 : vector<8x32xf32>
    %c2_i32_199 = arith.constant 2 : i32
    %418 = tpu.memref_slice %arg77[%c2_i32_199] : memref<4x!tpu.dma_semaphore, #tpu.memory_space<semaphore_mem>> -> memref<1x!tpu.dma_semaphore, #tpu.memory_space<semaphore_mem>>
    %419 = tpu.memref_squeeze %418 : memref<1x!tpu.dma_semaphore, #tpu.memory_space<semaphore_mem>> -> memref<!tpu.dma_semaphore, #tpu.memory_space<semaphore_mem>>
    tpu.wait_dma2 semaphore(%419 : memref<!tpu.dma_semaphore, #tpu.memory_space<semaphore_mem>>) src(%arg13 : memref<32x2048xbf16, #tpu.memory_space<any>>) dst(%arg75 : memref<32x2048xbf16, #tpu.memory_space<vmem>>)
    %c3_i32_200 = arith.constant 3 : i32
    %420 = tpu.memref_slice %arg77[%c3_i32_200] : memref<4x!tpu.dma_semaphore, #tpu.memory_space<semaphore_mem>> -> memref<1x!tpu.dma_semaphore, #tpu.memory_space<semaphore_mem>>
    %421 = tpu.memref_squeeze %420 : memref<1x!tpu.dma_semaphore, #tpu.memory_space<semaphore_mem>> -> memref<!tpu.dma_semaphore, #tpu.memory_space<semaphore_mem>>
    tpu.wait_dma2 semaphore(%421 : memref<!tpu.dma_semaphore, #tpu.memory_space<semaphore_mem>>) src(%arg14 : memref<2048x32xbf16, #tpu.memory_space<any>>) dst(%arg76 : memref<2048x32xbf16, #tpu.memory_space<vmem>>)
    %422 = arith.truncf %417 : vector<8x32xf32> to vector<8x32xbf16>
    %c0_201 = arith.constant 0 : index
    %c0_202 = arith.constant 0 : index
    %423 = vector.load %arg75[%c0_201, %c0_202] : memref<32x2048xbf16, #tpu.memory_space<vmem>>, vector<32x2048xbf16>
    %cst_203 = arith.constant dense<0.000000e+00> : vector<8x2048xf32>
    %424 = tpu.matmul %422, %423, %cst_203 {dimension_numbers = #tpu.dot_dimension_numbers<[1], [0], [0], [1], [0, 0, 1, 1], [], []>} : vector<8x32xbf16>, vector<32x2048xbf16>, vector<8x2048xf32> -> vector<8x2048xf32>
    %c0_204 = arith.constant 0 : index
    %c0_205 = arith.constant 0 : index
    %425 = vector.load %arg35[%c0_204, %c0_205] : memref<1x2048xf32, #tpu.memory_space<vmem>>, vector<1x2048xf32>
    %426 = vector.broadcast %425 : vector<1x2048xf32> to vector<8x2048xf32>
    %427 = arith.addf %424, %426 : vector<8x2048xf32>
    %cst_206 = arith.constant 0.000000e+00 : f32
    %428 = vector.broadcast %cst_206 : f32 to vector<8x2048xf32>
    %429 = arith.maximumf %427, %428 : vector<8x2048xf32>
    %430 = arith.truncf %429 : vector<8x2048xf32> to vector<8x2048xbf16>
    %c0_207 = arith.constant 0 : index
    %c0_208 = arith.constant 0 : index
    %431 = vector.load %arg76[%c0_207, %c0_208] : memref<2048x32xbf16, #tpu.memory_space<vmem>>, vector<2048x32xbf16>
    %cst_209 = arith.constant dense<0.000000e+00> : vector<8x32xf32>
    %432 = tpu.matmul %430, %431, %cst_209 {dimension_numbers = #tpu.dot_dimension_numbers<[1], [0], [0], [1], [0, 0, 1, 1], [], []>} : vector<8x2048xbf16>, vector<2048x32xbf16>, vector<8x32xf32> -> vector<8x32xf32>
    %c0_210 = arith.constant 0 : index
    %c0_211 = arith.constant 0 : index
    %433 = vector.load %arg36[%c0_210, %c0_211] : memref<1x32xf32, #tpu.memory_space<vmem>>, vector<1x32xf32>
    %434 = vector.broadcast %433 : vector<1x32xf32> to vector<8x32xf32>
    %435 = arith.addf %432, %434 : vector<8x32xf32>
    %436 = arith.addf %417, %435 : vector<8x32xf32>
    %cst_212 = arith.constant dense<0.000000e+00> : vector<8xf32>
    %437 = vector.multi_reduction <add>, %436, %cst_212 [1] : vector<8x32xf32> to vector<8xf32>
    %438 = vector.shape_cast %437 : vector<8xf32> to vector<8x1xf32>
    %cst_213 = arith.constant 3.200000e+01 : f32
    %439 = vector.broadcast %cst_213 : f32 to vector<8x1xf32>
    %440 = arith.divf %438, %439 : vector<8x1xf32>
    %441 = vector.broadcast %440 : vector<8x1xf32> to vector<8x32xf32>
    %442 = arith.subf %436, %441 : vector<8x32xf32>
    %443 = arith.mulf %442, %442 : vector<8x32xf32>
    %cst_214 = arith.constant dense<0.000000e+00> : vector<8xf32>
    %444 = vector.multi_reduction <add>, %443, %cst_214 [1] : vector<8x32xf32> to vector<8xf32>
    %445 = vector.shape_cast %444 : vector<8xf32> to vector<8x1xf32>
    %cst_215 = arith.constant 3.200000e+01 : f32
    %446 = vector.broadcast %cst_215 : f32 to vector<8x1xf32>
    %447 = arith.divf %445, %446 : vector<8x1xf32>
    %cst_216 = arith.constant 9.99999974E-6 : f32
    %448 = vector.broadcast %cst_216 : f32 to vector<8x1xf32>
    %449 = arith.addf %447, %448 : vector<8x1xf32>
    %450 = math.rsqrt %449 : vector<8x1xf32>
    %451 = vector.broadcast %450 : vector<8x1xf32> to vector<8x32xf32>
    %452 = arith.mulf %442, %451 : vector<8x32xf32>
    %c0_217 = arith.constant 0 : index
    %c0_218 = arith.constant 0 : index
    %453 = vector.load %arg48[%c0_217, %c0_218] : memref<1x32xf32, #tpu.memory_space<vmem>>, vector<1x32xf32>
    %454 = vector.broadcast %453 : vector<1x32xf32> to vector<8x32xf32>
    %455 = arith.mulf %452, %454 : vector<8x32xf32>
    %c0_219 = arith.constant 0 : index
    %c0_220 = arith.constant 0 : index
    %456 = vector.load %arg47[%c0_219, %c0_220] : memref<1x32xf32, #tpu.memory_space<vmem>>, vector<1x32xf32>
    %457 = vector.broadcast %456 : vector<1x32xf32> to vector<8x32xf32>
    %458 = arith.addf %455, %457 : vector<8x32xf32>
    %cst_221 = arith.constant dense<0.000000e+00> : vector<8xf32>
    %459 = vector.multi_reduction <add>, %458, %cst_221 [1] : vector<8x32xf32> to vector<8xf32>
    %460 = vector.shape_cast %459 : vector<8xf32> to vector<8x1xf32>
    %cst_222 = arith.constant 3.200000e+01 : f32
    %461 = vector.broadcast %cst_222 : f32 to vector<8x1xf32>
    %462 = arith.divf %460, %461 : vector<8x1xf32>
    %463 = vector.broadcast %462 : vector<8x1xf32> to vector<8x32xf32>
    %464 = arith.subf %458, %463 : vector<8x32xf32>
    %465 = arith.mulf %464, %464 : vector<8x32xf32>
    %cst_223 = arith.constant dense<0.000000e+00> : vector<8xf32>
    %466 = vector.multi_reduction <add>, %465, %cst_223 [1] : vector<8x32xf32> to vector<8xf32>
    %467 = vector.shape_cast %466 : vector<8xf32> to vector<8x1xf32>
    %cst_224 = arith.constant 3.200000e+01 : f32
    %468 = vector.broadcast %cst_224 : f32 to vector<8x1xf32>
    %469 = arith.divf %467, %468 : vector<8x1xf32>
    %cst_225 = arith.constant 9.99999974E-6 : f32
    %470 = vector.broadcast %cst_225 : f32 to vector<8x1xf32>
    %471 = arith.addf %469, %470 : vector<8x1xf32>
    %472 = math.rsqrt %471 : vector<8x1xf32>
    %473 = vector.broadcast %472 : vector<8x1xf32> to vector<8x32xf32>
    %474 = arith.mulf %464, %473 : vector<8x32xf32>
    %c0_226 = arith.constant 0 : index
    %c0_227 = arith.constant 0 : index
    %475 = vector.load %arg54[%c0_226, %c0_227] : memref<1x32xf32, #tpu.memory_space<vmem>>, vector<1x32xf32>
    %476 = vector.broadcast %475 : vector<1x32xf32> to vector<8x32xf32>
    %477 = arith.mulf %474, %476 : vector<8x32xf32>
    %c0_228 = arith.constant 0 : index
    %c0_229 = arith.constant 0 : index
    %478 = vector.load %arg53[%c0_228, %c0_229] : memref<1x32xf32, #tpu.memory_space<vmem>>, vector<1x32xf32>
    %479 = vector.broadcast %478 : vector<1x32xf32> to vector<8x32xf32>
    %480 = arith.addf %477, %479 : vector<8x32xf32>
    %c0_230 = arith.constant 0 : index
    %c0_231 = arith.constant 0 : index
    %481 = vector.load %arg16[%c0_230, %c0_231] : memref<1x32xf32, #tpu.memory_space<vmem>>, vector<1x32xf32>
    %c0_232 = arith.constant 0 : index
    %c0_233 = arith.constant 0 : index
    %482 = vector.load %arg15[%c0_232, %c0_233] : memref<1x1xf32, #tpu.memory_space<vmem>>, vector<1x1xf32>
    %cst_234 = arith.constant dense<0.000000e+00> : vector<1x8xf32>
    %483 = tpu.matmul %481, %480, %cst_234 {dimension_numbers = #tpu.dot_dimension_numbers<[1], [1], [0], [0], [0, 0, 1, 0], [], []>} : vector<1x32xf32>, vector<8x32xf32>, vector<1x8xf32> -> vector<1x8xf32>
    %484 = vector.broadcast %482 : vector<1x1xf32> to vector<1x8xf32>
    %485 = arith.addf %483, %484 : vector<1x8xf32>
    %c0_235 = arith.constant 0 : index
    %c0_236 = arith.constant 0 : index
    %486 = vector.load %arg71[%c0_235, %c0_236] : memref<1x8xf32, #tpu.memory_space<vmem>>, vector<1x8xf32>
    tpu.vector_store %arg71[%c0_235, %c0_236], %485 {strides = array<i32>} : memref<1x8xf32, #tpu.memory_space<vmem>>, vector<1x8xf32>,
    %c0_237 = arith.constant 0 : index
    %c0_238 = arith.constant 0 : index
    %487 = vector.load %arg10[%c0_237, %c0_238] : memref<2x8xf32, #tpu.memory_space<vmem>>, vector<2x8xf32>
    %cst_239 = arith.constant dense<0.000000e+00> : vector<2x32xf32>
    %488 = tpu.matmul %487, %480, %cst_239 {dimension_numbers = #tpu.dot_dimension_numbers<[1], [0], [0], [1], [0, 0, 1, 1], [], []>} : vector<2x8xf32>, vector<8x32xf32>, vector<2x32xf32> -> vector<2x32xf32>
    %c0_240 = arith.constant 0 : index
    %c0_241 = arith.constant 0 : index
    %489 = vector.load %arg70[%c0_240, %c0_241] : memref<1x32xf32, #tpu.memory_space<vmem>>, vector<1x32xf32>
    %c0_242 = arith.constant 0 : index
    %c0_243 = arith.constant 0 : index
    %490 = vector.load %arg69[%c0_242, %c0_243] : memref<1x1xf32, #tpu.memory_space<vmem>>, vector<1x1xf32>
    %cst_244 = arith.constant dense<0.000000e+00> : vector<1x2xf32>
    %491 = tpu.matmul %489, %488, %cst_244 {dimension_numbers = #tpu.dot_dimension_numbers<[1], [1], [0], [0], [0, 0, 1, 0], [], []>} : vector<1x32xf32>, vector<2x32xf32>, vector<1x2xf32> -> vector<1x2xf32>
    %492 = vector.broadcast %490 : vector<1x1xf32> to vector<1x2xf32>
    %493 = arith.addf %491, %492 : vector<1x2xf32>
    %c0_245 = arith.constant 0 : index
    %c0_246 = arith.constant 0 : index
    %494 = vector.load %arg72[%c0_245, %c0_246] : memref<1x2xf32, #tpu.memory_space<vmem>>, vector<1x2xf32>
    tpu.vector_store %arg72[%c0_245, %c0_246], %493 {strides = array<i32>} : memref<1x2xf32, #tpu.memory_space<vmem>>, vector<1x2xf32>,
    return
  }
}

</mosaic_0001>

<bundles_post_ra>
// kernel: tile.29
= control target key start
LH: loop header
LB: loop body
LE: loop exit
PB: predicated region body
PF: predicated region fallthrough
CT: control target
= control target key end

     0   :  { %vm42_vm0 = vcmask 1047556   ;;  %vm44_vm1 = vcmask 261120   ;;  %s93_s22 = smov 32   ;;  %s94_s25 = smov 64   ;;  %vm54_vm2 = vcmask 1048320   ;;  %vm64_vm3 = vcmask 785920   ;;  %s146_s0 = inlined_call_operand.vmem [shape: f32[8,4,32], index: 0, kind: input, shape index: {}]   ;;  %s147_s1 = inlined_call_operand.vmem [shape: f32[8,128], index: 1, kind: output, shape index: {}]  }
   0x1   :  { %v82_v0 = vld [vmem:[%s146_s0 + $0x1c] sm:$0xf]  ;;  %v83_v1 = vld [vmem:[%s146_s0 + $0x18] sm:$0xf]  ;;  %v84_v2 = vld [vmem:[%s146_s0 + $0x14] sm:$0xf] }
   0x2   :  { %8 = vst [vmem:[#allocation0 + $0x38] sm:$0xf] %v82_v0  ;;  %13 = vst [vmem:[#allocation0 + $0x30] sm:$0xf] %v83_v1  ;;  %v85_v3 = vld [vmem:[%s146_s0 + $0x10] sm:$0xf] }
   0x3   :  { %18 = vst [vmem:[#allocation0 + $0x28] sm:$0xf] %v84_v2  ;;  %v86_v4 = vld [vmem:[%s146_s0 + $0xc] sm:$0xf]  ;;  %v87_v5 = vld [vmem:[%s146_s0 + $0x8] sm:$0xf] }
   0x4   :  { %23 = vst [vmem:[#allocation0 + $0x20] sm:$0xf] %v85_v3  ;;  %28 = vst [vmem:[#allocation0 + $0x18] sm:$0xf] %v86_v4  ;;  %v88_v6 = vld [vmem:[%s146_s0 + $0x4] sm:$0xf] }
   0x5   :  { %33 = vst [vmem:[#allocation0 + $0x10] sm:$0xf] %v87_v5  ;;  %v38_v7 = vld [vmem:[%s146_s0] sm:$0xf]  ;;  %37 = vst [vmem:[#allocation0 + $0x8] sm:$0xf] %v88_v6 }
   0x6   :  { %39 = vst [vmem:[#allocation0] sm:$0xf] %v38_v7  ;;  %s92_s0 = smov 96   ;;  %vm74_vm4 = vcmask 523520  }
   0xb   :  { %v49_v8 = vld [vmem:[#allocation0 + $0x3] ss:$8 sm:$0xf0]   ;;  %v59_v9 = vld [vmem:[#allocation0 + $0x2] ss:$8 sm:$0xf0]  }
   0xc   :  { %v69_v14 = vld [vmem:[#allocation0 + $0x1] ss:$8 sm:$0xf0]   ;;  %v41_v17 = vld [vmem:[#allocation0] ss:$8 sm:$0xf0]  }
   0xd   :  { %v47_v10 = vld [vmem:[#allocation0 + $0x3] ss:$8 sm:$0xf]   ;;  %v57_v11 = vld [vmem:[#allocation0 + $0x2] ss:$8 sm:$0xf]  }
   0xe   :  { %v51_v12 = vsel %vm42_vm0, %v49_v8, %v47_v10  ;;  %v67_v13 = vld [vmem:[#allocation0 + $0x1] ss:$8 sm:$0xf]   ;;  %v40_v16 = vld [vmem:[#allocation0] ss:$8 sm:$0xf]   ;;  %v61_v18 = vsel %vm42_vm0, %v59_v9, %v57_v11 }
   0xf   :  { %52 = vrot.lane.b32.xlu0 %v51_v12, %s92_s0  ;;  %v71_v15 = vsel %vm42_vm0, %v69_v14, %v67_v13  ;;  %v43_v19 = vsel %vm42_vm0, %v41_v17, %v40_v16 }
  0x10   :  { %72 = vrot.lane.b32.xlu1 %v71_v15, %s93_s22  ;;  %45 = vst.msk [vmem:[%s147_s1] sm:$0xff] %vm44_vm1, %v43_v19  }
  0x13   :  { %62 = vrot.lane.b32.xlu0 %v61_v18, %s94_s25 }
  0x81   :  { %v53_v20 = vpop.permute.xlu0 %52  }
  0x82   :  { %55 = vst.msk [vmem:[%s147_s1] sm:$0xff] %vm54_vm2, %v53_v20   ;;  %v73_v21 = vpop.permute.xlu1 %72  }
  0x85   :  { %v63_v22 = vpop.permute.xlu0 %62  }
  0x86   :  { %65 = vst.msk [vmem:[%s147_s1] sm:$0xff] %vm64_vm3, %v63_v22  }
  0x87   :  { %75 = vst.msk [vmem:[%s147_s1] sm:$0xff] %vm74_vm4, %v73_v21  }

// kernel: tile.19
= control target key start
LH: loop header
LB: loop body
LE: loop exit
PB: predicated region body
PF: predicated region fallthrough
CT: control target
= control target key end

     0   :  { %vm162_vm0 = vcmask 1047556   ;;  %s398_s10 = smov 96   ;;  %vm164_vm1 = vcmask 261120   ;;  %s400_s21 = smov 32   ;;  %vm201_vm2 = vcmask 1048320   ;;  %vm244_vm3 = vcmask 785920   ;;  %s579_s0 = inlined_call_operand.vmem [shape: f32[32,4,32], index: 0, kind: input, shape index: {}]   ;;  %s580_s1 = inlined_call_operand.vmem [shape: f32[32,128], index: 1, kind: output, shape index: {}]  }
   0x1   :  { %v376_v0 = vld [vmem:[%s579_s0 + $0x1c] sm:$0xf]  ;;  %v377_v1 = vld [vmem:[%s579_s0 + $0x18] sm:$0xf]  ;;  %v378_v2 = vld [vmem:[%s579_s0 + $0x14] sm:$0xf] }
   0x2   :  { %128 = vst [vmem:[#allocation0 + $0x38] sm:$0xf] %v376_v0  ;;  %133 = vst [vmem:[#allocation0 + $0x30] sm:$0xf] %v377_v1  ;;  %v379_v3 = vld [vmem:[%s579_s0 + $0x10] sm:$0xf] }
   0x3   :  { %138 = vst [vmem:[#allocation0 + $0x28] sm:$0xf] %v378_v2  ;;  %v380_v4 = vld [vmem:[%s579_s0 + $0xc] sm:$0xf]  ;;  %v381_v5 = vld [vmem:[%s579_s0 + $0x8] sm:$0xf] }
   0x4   :  { %143 = vst [vmem:[#allocation0 + $0x20] sm:$0xf] %v379_v3  ;;  %148 = vst [vmem:[#allocation0 + $0x18] sm:$0xf] %v380_v4  ;;  %v382_v6 = vld [vmem:[%s579_s0 + $0x4] sm:$0xf] }
   0x5   :  { %153 = vst [vmem:[#allocation0 + $0x10] sm:$0xf] %v381_v5  ;;  %v158_v7 = vld [vmem:[%s579_s0] sm:$0xf]  ;;  %157 = vst [vmem:[#allocation0 + $0x8] sm:$0xf] %v382_v6 }
   0x6   :  { %159 = vst [vmem:[#allocation0] sm:$0xf] %v158_v7  ;;  %v360_v8 = vld [vmem:[%s579_s0 + $0x5c] sm:$0xf]  ;;  %v361_v9 = vld [vmem:[%s579_s0 + $0x58] sm:$0xf] }
   0x7   :  { %v362_v10 = vld [vmem:[%s579_s0 + $0x54] sm:$0xf]  ;;  %48 = vst [vmem:[#allocation0 + $0xb8] sm:$0xf] %v360_v8  ;;  %53 = vst [vmem:[#allocation0 + $0xb0] sm:$0xf] %v361_v9 }
   0x8   :  { %58 = vst [vmem:[#allocation0 + $0xa8] sm:$0xf] %v362_v10  ;;  %v363_v11 = vld [vmem:[%s579_s0 + $0x50] sm:$0xf]  ;;  %v364_v12 = vld [vmem:[%s579_s0 + $0x4c] sm:$0xf] }
   0x9   :  { %v365_v13 = vld [vmem:[%s579_s0 + $0x48] sm:$0xf]  ;;  %63 = vst [vmem:[#allocation0 + $0xa0] sm:$0xf] %v363_v11  ;;  %68 = vst [vmem:[#allocation0 + $0x98] sm:$0xf] %v364_v12 }
   0xa   :  { %73 = vst [vmem:[#allocation0 + $0x90] sm:$0xf] %v365_v13  ;;  %v366_v14 = vld [vmem:[%s579_s0 + $0x44] sm:$0xf]  ;;  %v367_v15 = vld [vmem:[%s579_s0 + $0x40] sm:$0xf] }
   0xb   :  { %v368_v16 = vld [vmem:[%s579_s0 + $0x3c] sm:$0xf]  ;;  %78 = vst [vmem:[#allocation0 + $0x88] sm:$0xf] %v366_v14  ;;  %83 = vst [vmem:[#allocation0 + $0x80] sm:$0xf] %v367_v15 }
   0xc   :  { %88 = vst [vmem:[#allocation0 + $0x78] sm:$0xf] %v368_v16  ;;  %v369_v17 = vld [vmem:[%s579_s0 + $0x38] sm:$0xf]  ;;  %v370_v18 = vld [vmem:[%s579_s0 + $0x34] sm:$0xf] }
   0xd   :  { %v371_v19 = vld [vmem:[%s579_s0 + $0x30] sm:$0xf]  ;;  %93 = vst [vmem:[#allocation0 + $0x70] sm:$0xf] %v369_v17  ;;  %98 = vst [vmem:[#allocation0 + $0x68] sm:$0xf] %v370_v18 }
   0xe   :  { %103 = vst [vmem:[#allocation0 + $0x60] sm:$0xf] %v371_v19  ;;  %v372_v20 = vld [vmem:[%s579_s0 + $0x2c] sm:$0xf]  ;;  %v373_v21 = vld [vmem:[%s579_s0 + $0x28] sm:$0xf] }
   0xf   :  { %v374_v22 = vld [vmem:[%s579_s0 + $0x24] sm:$0xf]  ;;  %108 = vst [vmem:[#allocation0 + $0x58] sm:$0xf] %v372_v20  ;;  %113 = vst [vmem:[#allocation0 + $0x50] sm:$0xf] %v373_v21 }
  0x10   :  { %118 = vst [vmem:[#allocation0 + $0x48] sm:$0xf] %v374_v22  ;;  %v375_v23 = vld [vmem:[%s579_s0 + $0x20] sm:$0xf]  ;;  %v352_v24 = vld [vmem:[%s579_s0 + $0x7c] sm:$0xf] }
  0x11   :  { %v353_v25 = vld [vmem:[%s579_s0 + $0x78] sm:$0xf]  ;;  %123 = vst [vmem:[#allocation0 + $0x40] sm:$0xf] %v375_v23  ;;  %8 = vst [vmem:[#allocation0 + $0xf8] sm:$0xf] %v352_v24 }
  0x12   :  { %v196_v26 = vld [vmem:[#allocation0 + $0x3] ss:$8 sm:$0xf0]   ;;  %13 = vst [vmem:[#allocation0 + $0xf0] sm:$0xf] %v353_v25  ;;  %vm287_vm4 = vcmask 523520  }
  0x13   :  { %v354_v27 = vld [vmem:[%s579_s0 + $0x74] sm:$0xf]  ;;  %v194_v28 = vld [vmem:[#allocation0 + $0x3] ss:$8 sm:$0xf]  }
  0x14   :  { %18 = vst [vmem:[#allocation0 + $0xe8] sm:$0xf] %v354_v27  ;;  %v355_v29 = vld [vmem:[%s579_s0 + $0x70] sm:$0xf]  ;;  %v198_v30 = vsel %vm162_vm0, %v196_v26, %v194_v28  ;;  %v356_v31 = vld [vmem:[%s579_s0 + $0x6c] sm:$0xf] }
  0x15   :  { %23 = vst [vmem:[#allocation0 + $0xe0] sm:$0xf] %v355_v29  ;;  %v357_v32 = vld [vmem:[%s579_s0 + $0x68] sm:$0xf]  ;;  %v358_v33 = vld [vmem:[%s579_s0 + $0x64] sm:$0xf]  ;;  %199 = vrot.lane.b32.xlu0 %v198_v30, %s398_s10 }
  0x16   :  { %v217_v34 = vld [vmem:[#allocation0 + $0x83] ss:$8 sm:$0xf0]   ;;  %28 = vst [vmem:[#allocation0 + $0xd8] sm:$0xf] %v356_v31 }
  0x17   :  { %33 = vst [vmem:[#allocation0 + $0xd0] sm:$0xf] %v357_v32  ;;  %38 = vst [vmem:[#allocation0 + $0xc8] sm:$0xf] %v358_v33  ;;  %v359_v35 = vld [vmem:[%s579_s0 + $0x60] sm:$0xf] }
  0x18   :  { %v215_v36 = vld [vmem:[#allocation0 + $0x83] ss:$8 sm:$0xf]   ;;  %43 = vst [vmem:[#allocation0 + $0xc0] sm:$0xf] %v359_v35  ;;  %s399_s0 = smov 64  }
  0x19   :  { %v219_v37 = vsel %vm162_vm0, %v217_v34, %v215_v36  ;;  %v206_v38 = vld [vmem:[#allocation0 + $0x43] ss:$8 sm:$0xf0]   ;;  %v237_v39 = vld [vmem:[#allocation0 + $0x2] ss:$8 sm:$0xf]  }
  0x1a   :  { %220 = vrot.lane.b32.xlu1 %v219_v37, %s398_s10  ;;  %v204_v40 = vld [vmem:[#allocation0 + $0x43] ss:$8 sm:$0xf]   ;;  %v239_v41 = vld [vmem:[#allocation0 + $0x2] ss:$8 sm:$0xf0]  }
  0x1b   :  { %v208_v42 = vsel %vm162_vm0, %v206_v38, %v204_v40  ;;  %v249_v44 = vld [vmem:[#allocation0 + $0x42] ss:$8 sm:$0xf0]   ;;  %v241_v45 = vsel %vm162_vm0, %v239_v41, %v237_v39  ;;  %v280_v52 = vld [vmem:[#allocation0 + $0x1] ss:$8 sm:$0xf]  }
  0x1c   :  { %209 = vrot.lane.b32.xlu0 %v208_v42, %s398_s10  ;;  %v228_v43 = vld [vmem:[#allocation0 + $0xc3] ss:$8 sm:$0xf0]   ;;  %v247_v46 = vld [vmem:[#allocation0 + $0x42] ss:$8 sm:$0xf]  }
  0x1d   :  { %v258_v47 = vld [vmem:[#allocation0 + $0x82] ss:$8 sm:$0xf]   ;;  %v251_v53 = vsel %vm162_vm0, %v249_v44, %v247_v46  ;;  %v282_v55 = vld [vmem:[#allocation0 + $0x1] ss:$8 sm:$0xf0]  }
  0x1e   :  { %v260_v49 = vld [vmem:[#allocation0 + $0x82] ss:$8 sm:$0xf0]   ;;  %v160_v56 = vld [vmem:[#allocation0] ss:$8 sm:$0xf]   ;;  %v284_v4 = vsel %vm162_vm0, %v282_v55, %v280_v52 }
  0x1f   :  { %v226_v48 = vld [vmem:[#allocation0 + $0xc3] ss:$8 sm:$0xf]   ;;  %v271_v51 = vld [vmem:[#allocation0 + $0xc2] ss:$8 sm:$0xf0]   ;;  %v262_v54 = vsel %vm162_vm0, %v260_v49, %v258_v47 }
  0x20   :  { %v230_v50 = vsel %vm162_vm0, %v228_v43, %v226_v48  ;;  %242 = vrot.lane.b32.xlu0 %v241_v45, %s399_s0  ;;  %v269_v57 = vld [vmem:[#allocation0 + $0xc2] ss:$8 sm:$0xf]   ;;  %v161_v58 = vld [vmem:[#allocation0] ss:$8 sm:$0xf0]  }
  0x21   :  { %231 = vrot.lane.b32.xlu1 %v230_v50, %s398_s10  ;;  %v163_v59 = vsel %vm162_vm0, %v161_v58, %v160_v56  ;;  %v176_v60 = vld [vmem:[#allocation0 + $0x80] ss:$8 sm:$0xf]   ;;  %v290_v62 = vld [vmem:[#allocation0 + $0x41] ss:$8 sm:$0xf]   ;;  %v273_v3 = vsel %vm162_vm0, %v271_v51, %v269_v57 }
  0x22   :  { %v178_v61 = vld [vmem:[#allocation0 + $0x80] ss:$8 sm:$0xf0]   ;;  %v292_v63 = vld [vmem:[#allocation0 + $0x41] ss:$8 sm:$0xf0]  }
  0x23   :  { %165 = vst.msk [vmem:[%s580_s1] sm:$0xff] %vm164_vm1, %v163_v59   ;;  %v180_v0 = vsel %vm162_vm0, %v178_v61, %v176_v60  ;;  %v167_v1 = vld [vmem:[#allocation0 + $0x40] ss:$8 sm:$0xf]   ;;  %v294_v11 = vsel %vm162_vm0, %v292_v63, %v290_v62 }
  0x24   :  { %263 = vrot.lane.b32.xlu0 %v262_v54, %s399_s0  ;;  %v169_v2 = vld [vmem:[#allocation0 + $0x40] ss:$8 sm:$0xf0]   ;;  %384 = vst.msk [vmem:[%s580_s1 + $0x10] sm:$0xff] %vm164_vm1, %v180_v0  }
  0x25   :  { %252 = vrot.lane.b32.xlu1 %v251_v53, %s399_s0  ;;  %v171_v5 = vsel %vm162_vm0, %v169_v2, %v167_v1  ;;  %v185_v6 = vld [vmem:[#allocation0 + $0xc0] ss:$8 sm:$0xf]   ;;  %v301_v8 = vld [vmem:[#allocation0 + $0x81] ss:$8 sm:$0xf]  }
  0x26   :  { %v187_v7 = vld [vmem:[#allocation0 + $0xc0] ss:$8 sm:$0xf0]   ;;  %v303_v9 = vld [vmem:[#allocation0 + $0x81] ss:$8 sm:$0xf0]  }
  0x27   :  { %383 = vst.msk [vmem:[%s580_s1 + $0x8] sm:$0xff] %vm164_vm1, %v171_v5   ;;  %v189_v10 = vsel %vm162_vm0, %v187_v7, %v185_v6  ;;  %v305_v12 = vsel %vm162_vm0, %v303_v9, %v301_v8  ;;  %v312_v13 = vld [vmem:[#allocation0 + $0xc1] ss:$8 sm:$0xf]  }
  0x28   :  { %385 = vst.msk [vmem:[%s580_s1 + $0x18] sm:$0xff] %vm164_vm1, %v189_v10   ;;  %285 = vrot.lane.b32.xlu0 %v284_v4, %s400_s21  ;;  %v314_v14 = vld [vmem:[#allocation0 + $0xc1] ss:$8 sm:$0xf0]  }
  0x29   :  { %274 = vrot.lane.b32.xlu1 %v273_v3, %s399_s0  ;;  %v316_v15 = vsel %vm162_vm0, %v314_v14, %v312_v13 }
  0x2c   :  { %306 = vrot.lane.b32.xlu0 %v305_v12, %s400_s21 }
  0x2d   :  { %295 = vrot.lane.b32.xlu1 %v294_v11, %s400_s21 }
  0x31   :  { %317 = vrot.lane.b32.xlu1 %v316_v15, %s400_s21 }
  0x87   :  { %v200_v16 = vpop.permute.xlu0 %199  }
  0x88   :  { %202 = vst.msk [vmem:[%s580_s1] sm:$0xff] %vm201_vm2, %v200_v16  }
  0x8c   :  { %v221_v17 = vpop.permute.xlu1 %220  }
  0x8d   :  { %387 = vst.msk [vmem:[%s580_s1 + $0x10] sm:$0xff] %vm201_vm2, %v221_v17  }
  0x8e   :  { %v210_v18 = vpop.permute.xlu0 %209  }
  0x8f   :  { %386 = vst.msk [vmem:[%s580_s1 + $0x8] sm:$0xff] %vm201_vm2, %v210_v18  }
  0x92   :  { %v243_v20 = vpop.permute.xlu0 %242  }
  0x93   :  { %v232_v19 = vpop.permute.xlu1 %231   ;;  %245 = vst.msk [vmem:[%s580_s1] sm:$0xff] %vm244_vm3, %v243_v20  }
  0x94   :  { %388 = vst.msk [vmem:[%s580_s1 + $0x18] sm:$0xff] %vm201_vm2, %v232_v19  }
  0x96   :  { %v264_v22 = vpop.permute.xlu0 %263  }
  0x97   :  { %v253_v21 = vpop.permute.xlu1 %252   ;;  %390 = vst.msk [vmem:[%s580_s1 + $0x10] sm:$0xff] %vm244_vm3, %v264_v22  }
  0x98   :  { %389 = vst.msk [vmem:[%s580_s1 + $0x8] sm:$0xff] %vm244_vm3, %v253_v21  }
  0x9a   :  { %v286_v24 = vpop.permute.xlu0 %285  }
  0x9b   :  { %v275_v23 = vpop.permute.xlu1 %274   ;;  %288 = vst.msk [vmem:[%s580_s1] sm:$0xff] %vm287_vm4, %v286_v24  }
  0x9c   :  { %391 = vst.msk [vmem:[%s580_s1 + $0x18] sm:$0xff] %vm244_vm3, %v275_v23  }
  0x9e   :  { %v307_v26 = vpop.permute.xlu0 %306  }
  0x9f   :  { %v296_v25 = vpop.permute.xlu1 %295   ;;  %393 = vst.msk [vmem:[%s580_s1 + $0x10] sm:$0xff] %vm287_vm4, %v307_v26  }
  0xa0   :  { %392 = vst.msk [vmem:[%s580_s1 + $0x8] sm:$0xff] %vm287_vm4, %v296_v25  }
  0xa3   :  { %v318_v27 = vpop.permute.xlu1 %317  }
  0xa4   :  { %394 = vst.msk [vmem:[%s580_s1 + $0x18] sm:$0xff] %vm287_vm4, %v318_v27  }

// kernel: tile.24
= control target key start
LH: loop header
LB: loop body
LE: loop exit
PB: predicated region body
PF: predicated region fallthrough
CT: control target
= control target key end

     0   :  { %vm42_vm0 = vcmask 1047556   ;;  %vm44_vm1 = vcmask 64512   ;;  %s93_s22 = smov 8   ;;  %s94_s25 = smov 16   ;;  %vm54_vm2 = vcmask 261312   ;;  %vm64_vm3 = vcmask 195712   ;;  %s146_s0 = inlined_call_operand.vmem [shape: f32[8,4,8], index: 0, kind: input, shape index: {}]   ;;  %s147_s1 = inlined_call_operand.vmem [shape: f32[8,32], index: 1, kind: output, shape index: {}]  }
   0x1   :  { %v82_v0 = vld [vmem:[%s146_s0 + $0x1c] sm:$0xf]  ;;  %v83_v1 = vld [vmem:[%s146_s0 + $0x18] sm:$0xf]  ;;  %v84_v2 = vld [vmem:[%s146_s0 + $0x14] sm:$0xf] }
   0x2   :  { %8 = vst [vmem:[#allocation0 + $0x38] sm:$0xf] %v82_v0  ;;  %13 = vst [vmem:[#allocation0 + $0x30] sm:$0xf] %v83_v1  ;;  %v85_v3 = vld [vmem:[%s146_s0 + $0x10] sm:$0xf] }
   0x3   :  { %18 = vst [vmem:[#allocation0 + $0x28] sm:$0xf] %v84_v2  ;;  %v86_v4 = vld [vmem:[%s146_s0 + $0xc] sm:$0xf]  ;;  %v87_v5 = vld [vmem:[%s146_s0 + $0x8] sm:$0xf] }
   0x4   :  { %23 = vst [vmem:[#allocation0 + $0x20] sm:$0xf] %v85_v3  ;;  %28 = vst [vmem:[#allocation0 + $0x18] sm:$0xf] %v86_v4  ;;  %v88_v6 = vld [vmem:[%s146_s0 + $0x4] sm:$0xf] }
   0x5   :  { %33 = vst [vmem:[#allocation0 + $0x10] sm:$0xf] %v87_v5  ;;  %v38_v7 = vld [vmem:[%s146_s0] sm:$0xf]  ;;  %37 = vst [vmem:[#allocation0 + $0x8] sm:$0xf] %v88_v6 }
   0x6   :  { %39 = vst [vmem:[#allocation0] sm:$0xf] %v38_v7  ;;  %s92_s0 = smov 24   ;;  %vm74_vm4 = vcmask 130112  }
   0xb   :  { %v49_v8 = vld [vmem:[#allocation0 + $0x3] ss:$8 sm:$0xf0]   ;;  %v59_v9 = vld [vmem:[#allocation0 + $0x2] ss:$8 sm:$0xf0]  }
   0xc   :  { %v69_v14 = vld [vmem:[#allocation0 + $0x1] ss:$8 sm:$0xf0]   ;;  %v41_v17 = vld [vmem:[#allocation0] ss:$8 sm:$0xf0]  }
   0xd   :  { %v47_v10 = vld [vmem:[#allocation0 + $0x3] ss:$8 sm:$0xf]   ;;  %v57_v11 = vld [vmem:[#allocation0 + $0x2] ss:$8 sm:$0xf]  }
   0xe   :  { %v51_v12 = vsel %vm42_vm0, %v49_v8, %v47_v10  ;;  %v67_v13 = vld [vmem:[#allocation0 + $0x1] ss:$8 sm:$0xf]   ;;  %v40_v16 = vld [vmem:[#allocation0] ss:$8 sm:$0xf]   ;;  %v61_v18 = vsel %vm42_vm0, %v59_v9, %v57_v11 }
   0xf   :  { %52 = vrot.lane.b32.xlu0 %v51_v12, %s92_s0  ;;  %v71_v15 = vsel %vm42_vm0, %v69_v14, %v67_v13  ;;  %v43_v19 = vsel %vm42_vm0, %v41_v17, %v40_v16 }
  0x10   :  { %72 = vrot.lane.b32.xlu1 %v71_v15, %s93_s22  ;;  %45 = vst.msk [vmem:[%s147_s1] sm:$0xff] %vm44_vm1, %v43_v19  }
  0x13   :  { %62 = vrot.lane.b32.xlu0 %v61_v18, %s94_s25 }
  0x81   :  { %v53_v20 = vpop.permute.xlu0 %52  }
  0x82   :  { %55 = vst.msk [vmem:[%s147_s1] sm:$0xff] %vm54_vm2, %v53_v20   ;;  %v73_v21 = vpop.permute.xlu1 %72  }
  0x85   :  { %v63_v22 = vpop.permute.xlu0 %62  }
  0x86   :  { %65 = vst.msk [vmem:[%s147_s1] sm:$0xff] %vm64_vm3, %v63_v22  }
  0x87   :  { %75 = vst.msk [vmem:[%s147_s1] sm:$0xff] %vm74_vm4, %v73_v21  }

// kernel: transformer_step_actor_forward.1
= control target key start
LH: loop header
LB: loop body
LE: loop exit
PB: predicated region body
PF: predicated region fallthrough
CT: control target
= control target key end

     0   :  { %s11565_s6 = smov 1   ;;  %s11566_s10 = smov 2   ;;  %s14787_s0 = inlined_call_operand.smem [shape: u32[73], index: -1, kind: input, shape index: {}] }
   0x1   :  { %s11669_s5 = sld [smem:[%s14787_s0]]   ;;  %s11567_s14 = smov 3  }
   0x2   :  { %s11674_s9 = sld [smem:[%s14787_s0 + %s11565_s6]]   ;;  %s11568_s18 = smov 4  }
   0x3   :  { %s11679_s13 = sld [smem:[%s14787_s0 + %s11566_s10]]   ;;  %s11569_s22 = smov 5  }
   0x4   :  { %s11684_s17 = sld [smem:[%s14787_s0 + %s11567_s14]]   ;;  %s11570_s26 = smov 6  }
   0x5   :  { %s11689_s21 = sld [smem:[%s14787_s0 + %s11568_s18]]   ;;  %s11571_s30 = smov 7  }
   0x6   :  { %s11694_s25 = sld [smem:[%s14787_s0 + %s11569_s22]]   ;;  %s11572_s4 = smov 8  }
   0x7   :  { %14866 = sst [smem:[#allocation52_spill]] %s11669_s5  ;;  %s11573_s10 = smov 9  }
   0x8   :  { %14867 = sst [smem:[#allocation53_spill]] %s11674_s9  ;;  %s11574_s15 = smov 10  }
   0x9   :  { %14868 = sst [smem:[#allocation54_spill]] %s11679_s13  ;;  %s11575_s20 = smov 11  }
   0xa   :  { %14869 = sst [smem:[#allocation55_spill]] %s11684_s17  ;;  %s11577_s1 = smov 13  }
   0xb   :  { %14870 = sst [smem:[#allocation56_spill]] %s11689_s21  ;;  %s11578_s7 = smov 14  }
   0xc   :  { %14871 = sst [smem:[#allocation57_spill]] %s11694_s25  ;;  %s11580_s22 = smov 16  }
   0xd   :  { %s11699_s29 = sld [smem:[%s14787_s0 + %s11570_s26]]   ;;  %s11576_s26 = smov 12  }
   0xe   :  { %s11704_s3 = sld [smem:[%s14787_s0 + %s11571_s30]]   ;;  %s11581_s28 = smov 17  }
   0xf   :  { %s11709_s8 = sld [smem:[%s14787_s0 + %s11572_s4]]   ;;  %s11583_s16 = smov 19  }
  0x10   :  { %s11714_s14 = sld [smem:[%s14787_s0 + %s11573_s10]]   ;;  %s11582_s10 = smov 18  }
  0x11   :  { %s11719_s19 = sld [smem:[%s14787_s0 + %s11574_s15]]   ;;  %s11579_s15 = smov 15  }
  0x12   :  { %s11724_s24 = sld [smem:[%s14787_s0 + %s11575_s20]]   ;;  %s11588_s23 = smov 24  }
  0x13   :  { %14872 = sst [smem:[#allocation58_spill]] %s11699_s29 }
  0x14   :  { %14873 = sst [smem:[#allocation59_spill]] %s11704_s3 }
  0x15   :  { %14874 = sst [smem:[#allocation60_spill]] %s11709_s8 }
  0x16   :  { %14875 = sst [smem:[#allocation61_spill]] %s11714_s14 }
  0x17   :  { %14876 = sst [smem:[#allocation62_spill]] %s11719_s19 }
  0x18   :  { %14877 = sst [smem:[#allocation63_spill]] %s11724_s24 }
  0x19   :  { %s11729_s30 = sld [smem:[%s14787_s0 + %s11576_s26]]  }
  0x1a   :  { %s11734_s6 = sld [smem:[%s14787_s0 + %s11577_s1]]  }
  0x1b   :  { %s11739_s12 = sld [smem:[%s14787_s0 + %s11578_s7]]  }
  0x1c   :  { %s9220_s20 = sld [smem:[%s14787_s0 + %s11579_s15]]  }
  0x1d   :  { %s11747_s27 = sld [smem:[%s14787_s0 + %s11580_s22]]   ;;  %s11584_s22 = smov 20  }
  0x1e   :  { %s11752_s4 = sld [smem:[%s14787_s0 + %s11581_s28]]   ;;  %s11585_s28 = smov 21  }
  0x1f   :  { %14878 = sst [smem:[#allocation64_spill]] %s11729_s30 }
  0x20   :  { %14879 = sst [smem:[#allocation65_spill]] %s11734_s6 }
  0x21   :  { %14880 = sst [smem:[#allocation66_spill]] %s11739_s12 }
  0x22   :  { %s11757_s19 = sld [smem:[%s14787_s0 + %s11582_s10]]   ;;  %v151_v0 = vstv %s9220_s20  ;;  %s11586_s10 = smov 22  }
  0x23   :  { %14881 = sst [smem:[#allocation67_spill]] %s11747_s27  ;;  %152 = vst [vmem:[#allocation7] sm:$0x1] %v151_v0  ;;  %s11589_s20 = smov 25  }
  0x24   :  { %14882 = sst [smem:[#allocation68_spill]] %s11752_s4 }
  0x25   :  { %s11762_s21 = sld [smem:[%s14787_s0 + %s11583_s16]]   ;;  %s11587_s16 = smov 23  }
  0x26   :  { %s11767_s27 = sld [smem:[%s14787_s0 + %s11584_s22]]  }
  0x27   :  { %s11772_s4 = sld [smem:[%s14787_s0 + %s11585_s28]]  }
  0x28   :  { %14883 = sst [smem:[#allocation69_spill]] %s11757_s19  ;;  %s11591_s19 = smov 27  }
  0x29   :  { %s11777_s15 = sld [smem:[%s14787_s0 + %s11586_s10]]   ;;  %s11590_s10 = smov 26  }
  0x2a   :  { %s11782_s22 = sld [smem:[%s14787_s0 + %s11587_s16]]   ;;  %s11635_s16 = smov 71  }
  0x2b   :  { %14884 = sst [smem:[#allocation70_spill]] %s11762_s21 }
  0x2c   :  { %14885 = sst [smem:[#allocation71_spill]] %s11767_s27  ;;  %s11592_s27 = smov 28  }
  0x2d   :  { %14886 = sst [smem:[#allocation72_spill]] %s11772_s4  ;;  %s11594_s4 = smov 30  }
  0x2e   :  { %s11787_s28 = sld [smem:[%s14787_s0 + %s11588_s23]]   ;;  %s11636_s23 = smov 72  }
  0x2f   :  { %14887 = sst [smem:[#allocation73_spill]] %s11777_s15 }
  0x30   :  { %14888 = sst [smem:[#allocation74_spill]] %s11782_s22 }
  0x31   :  { %s11792_s7 = sld [smem:[%s14787_s0 + %s11589_s20]]   ;;  %s11593_s20 = smov 29  }
  0x32   :  { %s11797_s21 = sld [smem:[%s14787_s0 + %s11590_s10]]   ;;  %s11634_s10 = smov 70  }
  0x33   :  { %s11802_s22 = sld [smem:[%s14787_s0 + %s11591_s19]]   ;;  %s11595_s19 = smov 31  }
  0x34   :  { %14889 = sst [smem:[#allocation75_spill]] %s11787_s28 }
  0x35   :  { %s11807_s28 = sld [smem:[%s14787_s0 + %s11592_s27]]   ;;  %s11596_s27 = smov 32  }
  0x37   :  { %14890 = sst [smem:[#allocation76_spill]] %s11792_s7 }
  0x38   :  { %14891 = sst [smem:[#allocation77_spill]] %s11797_s21 }
  0x39   :  { %14892 = sst [smem:[#allocation78_spill]] %s11802_s22 }
  0x3a   :  { %s11812_s7 = sld [smem:[%s14787_s0 + %s11593_s20]]   ;;  %s11597_s20 = smov 33  }
  0x3b   :  { %14893 = sst [smem:[#allocation79_spill]] %s11807_s28 }
  0x3c   :  { %s11817_s21 = sld [smem:[%s14787_s0 + %s11594_s4]]   ;;  %s11598_s4 = smov 34  }
  0x3d   :  { %s11822_s22 = sld [smem:[%s14787_s0 + %s11595_s19]]   ;;  %s11599_s19 = smov 35  }
  0x3e   :  { %s11827_s28 = sld [smem:[%s14787_s0 + %s11596_s27]]   ;;  %s11600_s27 = smov 36  }
  0x3f   :  { %s11842_s15 = sld [smem:[%s14787_s0 + %s11599_s19]]   ;;  %s11603_s19 = smov 39  }
  0x40   :  { %14894 = sst [smem:[#allocation80_spill]] %s11812_s7 }
  0x41   :  { %s11832_s7 = sld [smem:[%s14787_s0 + %s11597_s20]]   ;;  %s11601_s20 = smov 37  }
  0x42   :  { %14895 = sst [smem:[#allocation81_spill]] %s11817_s21 }
  0x43   :  { %14896 = sst [smem:[#allocation82_spill]] %s11822_s22 }
  0x44   :  { %14897 = sst [smem:[#allocation83_spill]] %s11827_s28 }
  0x45   :  { %s11837_s21 = sld [smem:[%s14787_s0 + %s11598_s4]]   ;;  %s11602_s4 = smov 38  }
  0x46   :  { %14900 = sst [smem:[#allocation86_spill]] %s11842_s15 }
  0x47   :  { %14898 = sst [smem:[#allocation84_spill]] %s11832_s7 }
  0x48   :  { %s11847_s22 = sld [smem:[%s14787_s0 + %s11600_s27]]   ;;  %s11604_s27 = smov 40  }
  0x49   :  { %s11852_s7 = sld [smem:[%s14787_s0 + %s11601_s20]]   ;;  %s11605_s20 = smov 41  }
  0x4a   :  { %s11857_s8 = sld [smem:[%s14787_s0 + %s11602_s4]]   ;;  %s11606_s4 = smov 42  }
  0x4b   :  { %14899 = sst [smem:[#allocation85_spill]] %s11837_s21 }
  0x4c   :  { %s11862_s15 = sld [smem:[%s14787_s0 + %s11603_s19]]   ;;  %s11607_s19 = smov 43  }
  0x4e   :  { %14901 = sst [smem:[#allocation87_spill]] %s11847_s22 }
  0x4f   :  { %14902 = sst [smem:[#allocation88_spill]] %s11852_s7 }
  0x50   :  { %14903 = sst [smem:[#allocation89_spill]] %s11857_s8 }
  0x51   :  { %s11867_s22 = sld [smem:[%s14787_s0 + %s11604_s27]]   ;;  %s11608_s27 = smov 44  }
  0x52   :  { %14904 = sst [smem:[#allocation90_spill]] %s11862_s15 }
  0x53   :  { %s11872_s7 = sld [smem:[%s14787_s0 + %s11605_s20]]   ;;  %s11609_s20 = smov 45  }
  0x54   :  { %s11877_s8 = sld [smem:[%s14787_s0 + %s11606_s4]]   ;;  %s11610_s4 = smov 46  }
  0x55   :  { %s11882_s15 = sld [smem:[%s14787_s0 + %s11607_s19]]   ;;  %s11611_s19 = smov 47  }
  0x57   :  { %14905 = sst [smem:[#allocation91_spill]] %s11867_s22 }
  0x58   :  { %s11887_s22 = sld [smem:[%s14787_s0 + %s11608_s27]]   ;;  %s11612_s27 = smov 48  }
  0x59   :  { %14906 = sst [smem:[#allocation92_spill]] %s11872_s7 }
  0x5a   :  { %14907 = sst [smem:[#allocation93_spill]] %s11877_s8 }
  0x5b   :  { %14908 = sst [smem:[#allocation94_spill]] %s11882_s15 }
  0x5c   :  { %s11892_s7 = sld [smem:[%s14787_s0 + %s11609_s20]]   ;;  %s11613_s20 = smov 49  }
  0x5d   :  { %s11897_s8 = sld [smem:[%s14787_s0 + %s11610_s4]]   ;;  %s11614_s4 = smov 50  }
  0x5e   :  { %14909 = sst [smem:[#allocation95_spill]] %s11887_s22 }
  0x5f   :  { %s11902_s15 = sld [smem:[%s14787_s0 + %s11611_s19]]   ;;  %s11615_s19 = smov 51  }
  0x60   :  { %s11907_s22 = sld [smem:[%s14787_s0 + %s11612_s27]]   ;;  %s11616_s27 = smov 52  }
  0x61   :  { %s11917_s17 = sld [smem:[%s14787_s0 + %s11614_s4]]   ;;  %s11618_s4 = smov 54  }
  0x62   :  { %14910 = sst [smem:[#allocation96_spill]] %s11892_s7 }
  0x63   :  { %s11912_s7 = sld [smem:[%s14787_s0 + %s11613_s20]]   ;;  %s11617_s20 = smov 53  }
  0x64   :  { %s11922_s28 = sld [smem:[%s14787_s0 + %s11615_s19]]   ;;  %s11619_s19 = smov 55  }
  0x65   :  { %s11927_s9 = sld [smem:[%s14787_s0 + %s11616_s27]]   ;;  %s11620_s27 = smov 56  }
  0x66   :  { %s11932_s21 = sld [smem:[%s14787_s0 + %s11617_s20]]   ;;  %s11621_s20 = smov 57  }
  0x67   :  { %s11937_s29 = sld [smem:[%s14787_s0 + %s11618_s4]]   ;;  %s11622_s4 = smov 58  }
  0x68   :  { %s11952_s14 = sld [smem:[%s14787_s0 + %s11621_s20]]   ;;  %s11625_s20 = smov 61  }
  0x69   :  { %s11957_s3 = sld [smem:[%s14787_s0 + %s11622_s4]]   ;;  %s11626_s4 = smov 62  }
  0x6a   :  { %14911 = sst [smem:[#allocation97_spill]] %s11922_s28 }
  0x6b   :  { %14912 = sst [smem:[#allocation98_spill]] %s11927_s9 }
  0x6c   :  { %s11942_s28 = sld [smem:[%s14787_s0 + %s11619_s19]]   ;;  %s11623_s19 = smov 59  }
  0x6d   :  { %s11947_s9 = sld [smem:[%s14787_s0 + %s11620_s27]]   ;;  %s11624_s27 = smov 60  }
  0x6e   :  { %s11967_s13 = sld [smem:[%s14787_s0 + %s11624_s27]]   ;;  %s11628_s27 = smov 64  }
  0x6f   :  { %s11972_s25 = sld [smem:[%s14787_s0 + %s11625_s20]]   ;;  %s11629_s20 = smov 65  }
  0x70   :  { %s11977_s5 = sld [smem:[%s14787_s0 + %s11626_s4]]   ;;  %s11630_s4 = smov 66  }
  0x71   :  { %s11987_s6 = sld [smem:[%s14787_s0 + %s11628_s27]]   ;;  %s11632_s27 = smov 68  }
  0x72   :  { %14913 = sst [smem:[#allocation99_spill]] %s11942_s28 }
  0x73   :  { %s11962_s28 = sld [smem:[%s14787_s0 + %s11623_s19]]   ;;  %s11627_s19 = smov 63  }
  0x74   :  { %s11982_s12 = sld [smem:[%s14787_s0 + %s11627_s19]]   ;;  %s11631_s19 = smov 67  }
  0x75   :  { %14914 = sst [smem:[#allocation100_spill]] %s11972_s25 }
  0x76   :  { %s11992_s30 = sld [smem:[%s14787_s0 + %s11629_s20]]   ;;  %s11633_s20 = smov 69  }
  0x77   :  { %14916 = sst [smem:[#allocation102_spill]] %s11987_s6 }
  0x78   :  { %s11997_s24 = sld [smem:[%s14787_s0 + %s11630_s4]]  }
  0x79   :  { %s12007_s6 = sld [smem:[%s14787_s0 + %s11632_s27]]  }
  0x7a   :  { %14915 = sst [smem:[#allocation101_spill]] %s11982_s12 }
  0x7b   :  { %s12002_s12 = sld [smem:[%s14787_s0 + %s11631_s19]]  }
  0x7c   :  { %14917 = sst [smem:[#allocation103_spill]] %s11992_s30 }
  0x7d   :  { %s9274_s30 = sld [smem:[%s14787_s0 + %s11633_s20]]  }
  0x7e   :  { %14918 = sst [smem:[#allocation104_spill]] %s11997_s24 }
  0x7f   :  { %s12015_s24 = sld [smem:[%s14787_s0 + %s11634_s10]]  }
  0x80   :  { %s12025_s25 = sld [smem:[%s14787_s0 + %s11636_s23]]  }
  0x81   :  { %14919 = sst [smem:[#allocation105_spill]] %s12002_s12 }
  0x82   :  { %s12020_s12 = sld [smem:[%s14787_s0 + %s11635_s16]]  }
  0x83   :  { %v153_v1 = vstv %s9274_s30 }
  0x84   :  { %154 = vst [vmem:[#allocation8] sm:$0x1] %v153_v1 }
  0x85   :  { %155 = vsyncpa [#allocation10], 0 }
  0x86   :  { %156 = vsyncpa [#allocation12], 0 }
  0x87   :  { %157 = vsyncpa [#allocation15], 0 }
  0x88   :  { %158 = vsyncpa [#allocation18], 0 }
  0x89   :  { %159 = vsyncpa [#allocation21], 0 }
  0x8a   :  { %160 = vsyncpa [#allocation24], 0 }
  0x8b   :  { %161 = vsyncpa [#allocation27], 0 }
  0x8c   :  { %162 = vsyncpa [#allocation30], 0 }
  0x8d   :  { %163 = vsyncpa [#allocation33], 0  ;;  %s11637_s20 = smov [#allocation11]   ;;  %s11638_s2 = smov [#allocation14]  }
  0x8e   :  { %s264_s1 = sshll.u32 %s11637_s20, 4  ;;  %s284_s10 = sshll.u32 %s11638_s2, 4  ;;  %s265_s1 = int_to_ptr.vmem [resolvable:$true] %s264_s1  ;;  %s285_s10 = int_to_ptr.vmem [resolvable:$true] %s284_s10 }
  0x8f   :  { %s11165_s0 = scalar_lea.hbm %s11902_s15, 16 }
  0x90   :  { %p11166_p0 = scmp.ne.s32.totalorder %s11902_s15, %s11165_s0  ;;  %p11169_p1 = scmp.lt.u32.totalorder %s11165_s0, %s11902_s15 }
  0x92   :  { %p11171_p2 = pnand %p11169_p1, %p11166_p0 }
  0x94   :  { %11174 = shalt.err (!%p11171_p2)
}
  0x95   :  { %s11175_s30 = scalar_lea.vmem %s265_s1, 16  ;;  %s11179_s4 = scalar_lea.vmem %s265_s1, 32 }
  0x96   :  { %p11176_p3 = scmp.ne.s32.totalorder %s265_s1, %s11175_s30  ;;  %p11180_p4 = scmp.lt.s32.totalorder %s265_s1, %s265_s1 }
  0x97   :  { %p11181_p5 = scmp.lt.s32.totalorder %s11179_s4, %s11175_s30 }
  0x99   :  { %p11182_p6 = por %p11181_p5, %p11180_p4 }
  0x9b   :  { %p11183_p7 = pnand %p11182_p6, %p11176_p3 }
  0x9d   :  { %11186 = shalt.err (!%p11183_p7)
}
  0x9e   :  { %267 = dma.hbm_to_vmem [thread:$0]  %s11902_s15, 16, %s265_s1, [#allocation12]  }
  0x9f   :  { %s11187_s11 = scalar_lea.hbm %s11912_s7, 16 }
  0xa0   :  { %p11188_p8 = scmp.ne.s32.totalorder %s11912_s7, %s11187_s11  ;;  %p11191_p9 = scmp.lt.u32.totalorder %s11187_s11, %s11912_s7 }
  0xa2   :  { %p11193_p10 = pnand %p11191_p9, %p11188_p8 }
  0xa4   :  { %11196 = shalt.err (!%p11193_p10)
}
  0xa5   :  { %s11197_s16 = scalar_lea.vmem %s285_s10, 16  ;;  %s11201_s19 = scalar_lea.vmem %s285_s10, 32 }
  0xa6   :  { %p11198_p11 = scmp.ne.s32.totalorder %s285_s10, %s11197_s16  ;;  %p11202_p12 = scmp.lt.s32.totalorder %s285_s10, %s285_s10 }
  0xa7   :  { %p11203_p13 = scmp.lt.s32.totalorder %s11201_s19, %s11197_s16 }
  0xa9   :  { %p11204_p0 = por %p11203_p13, %p11202_p12 }
  0xab   :  { %p11205_p1 = pnand %p11204_p0, %p11198_p11 }
  0xad   :  { %11208 = shalt.err (!%p11205_p1)
}
  0xae   :  { %287 = dma.hbm_to_vmem [thread:$0]  %s11912_s7, 16, %s285_s10, [#allocation15]  }
  0xaf   :  { %s11639_s18 = smov [#allocation17]   ;;  %s11640_s23 = smov [#allocation20]  }
  0xb0   :  { %s308_s15 = sshll.u32 %s11639_s18, 4  ;;  %s330_s27 = sshll.u32 %s11640_s23, 4  ;;  %s309_s15 = int_to_ptr.vmem [resolvable:$true] %s308_s15  ;;  %s331_s27 = int_to_ptr.vmem [resolvable:$true] %s330_s27 }
  0xb1   :  { %s11209_s26 = scalar_lea.hbm %s11932_s21, 16 }
  0xb2   :  { %p11210_p2 = scmp.ne.s32.totalorder %s11932_s21, %s11209_s26  ;;  %p11213_p3 = scmp.lt.u32.totalorder %s11209_s26, %s11932_s21 }
  0xb4   :  { %p11215_p4 = pnand %p11213_p3, %p11210_p2 }
  0xb6   :  { %11218 = shalt.err (!%p11215_p4)
}
  0xb7   :  { %s11219_s20 = scalar_lea.vmem %s309_s15, 16  ;;  %s11223_s1 = scalar_lea.vmem %s309_s15, 32 }
  0xb8   :  { %p11220_p5 = scmp.ne.s32.totalorder %s309_s15, %s11219_s20  ;;  %p11224_p6 = scmp.lt.s32.totalorder %s309_s15, %s309_s15 }
  0xb9   :  { %p11225_p7 = scmp.lt.s32.totalorder %s11223_s1, %s11219_s20 }
  0xbb   :  { %p11226_p8 = por %p11225_p7, %p11224_p6 }
  0xbd   :  { %p11227_p9 = pnand %p11226_p8, %p11220_p5 }
  0xbf   :  { %11230 = shalt.err (!%p11227_p9)
}
  0xc0   :  { %311 = dma.hbm_to_vmem [thread:$0]  %s11932_s21, 16, %s309_s15, [#allocation18]  }
  0xc1   :  { %s11231_s7 = scalar_lea.hbm %s11947_s9, 16 }
  0xc2   :  { %p11232_p10 = scmp.ne.s32.totalorder %s11947_s9, %s11231_s7  ;;  %p11235_p11 = scmp.lt.u32.totalorder %s11231_s7, %s11947_s9 }
  0xc4   :  { %p11237_p12 = pnand %p11235_p11, %p11232_p10 }
  0xc6   :  { %11240 = shalt.err (!%p11237_p12)
}
  0xc7   :  { %s11241_s2 = scalar_lea.vmem %s331_s27, 16  ;;  %s11245_s10 = scalar_lea.vmem %s331_s27, 32 }
  0xc8   :  { %p11242_p13 = scmp.ne.s32.totalorder %s331_s27, %s11241_s2  ;;  %p11246_p0 = scmp.lt.s32.totalorder %s331_s27, %s331_s27 }
  0xc9   :  { %p11247_p1 = scmp.lt.s32.totalorder %s11245_s10, %s11241_s2 }
  0xcb   :  { %p11248_p2 = por %p11247_p1, %p11246_p0 }
  0xcd   :  { %p11249_p3 = pnand %p11248_p2, %p11242_p13 }
  0xcf   :  { %11252 = shalt.err (!%p11249_p3)
}
  0xd0   :  { %333 = dma.hbm_to_vmem [thread:$0]  %s11947_s9, 16, %s331_s27, [#allocation21]  }
  0xd1   :  { %s11641_s0 = smov [#allocation23]   ;;  %s11642_s30 = smov [#allocation26]  }
  0xd2   :  { %s350_s21 = sshll.u32 %s11641_s0, 4  ;;  %s370_s4 = sshll.u32 %s11642_s30, 4  ;;  %s351_s21 = int_to_ptr.vmem [resolvable:$true] %s350_s21  ;;  %s371_s4 = int_to_ptr.vmem [resolvable:$true] %s370_s4 }
  0xd3   :  { %s11253_s11 = scalar_lea.hbm %s11957_s3, 16 }
  0xd4   :  { %p11254_p4 = scmp.ne.s32.totalorder %s11957_s3, %s11253_s11  ;;  %p11257_p5 = scmp.lt.u32.totalorder %s11253_s11, %s11957_s3 }
  0xd6   :  { %p11259_p6 = pnand %p11257_p5, %p11254_p4 }
  0xd8   :  { %11262 = shalt.err (!%p11259_p6)
}
  0xd9   :  { %s11263_s16 = scalar_lea.vmem %s351_s21, 16  ;;  %s11267_s19 = scalar_lea.vmem %s351_s21, 32 }
  0xda   :  { %p11264_p7 = scmp.ne.s32.totalorder %s351_s21, %s11263_s16  ;;  %p11268_p8 = scmp.lt.s32.totalorder %s351_s21, %s351_s21 }
  0xdb   :  { %p11269_p9 = scmp.lt.s32.totalorder %s11267_s19, %s11263_s16 }
  0xdd   :  { %p11270_p10 = por %p11269_p9, %p11268_p8 }
  0xdf   :  { %p11271_p11 = pnand %p11270_p10, %p11264_p7 }
  0xe1   :  { %11274 = shalt.err (!%p11271_p11)
}
  0xe2   :  { %353 = dma.hbm_to_vmem [thread:$0]  %s11957_s3, 16, %s351_s21, [#allocation24]  }
  0xe3   :  { %s11275_s9 = scalar_lea.hbm %s11967_s13, 16 }
  0xe4   :  { %p11276_p12 = scmp.ne.s32.totalorder %s11967_s13, %s11275_s9  ;;  %p11279_p13 = scmp.lt.u32.totalorder %s11275_s9, %s11967_s13 }
  0xe6   :  { %p11281_p0 = pnand %p11279_p13, %p11276_p12 }
  0xe8   :  { %11284 = shalt.err (!%p11281_p0)
}
  0xe9   :  { %s11285_s18 = scalar_lea.vmem %s371_s4, 16  ;;  %s11289_s15 = scalar_lea.vmem %s371_s4, 32 }
  0xea   :  { %p11286_p1 = scmp.ne.s32.totalorder %s371_s4, %s11285_s18  ;;  %p11290_p2 = scmp.lt.s32.totalorder %s371_s4, %s371_s4 }
  0xeb   :  { %p11291_p3 = scmp.lt.s32.totalorder %s11289_s15, %s11285_s18 }
  0xed   :  { %p11292_p4 = por %p11291_p3, %p11290_p2 }
  0xef   :  { %p11293_p5 = pnand %p11292_p4, %p11286_p1 }
  0xf1   :  { %11296 = shalt.err (!%p11293_p5)
}
  0xf2   :  { %373 = dma.hbm_to_vmem [thread:$0]  %s11967_s13, 16, %s371_s4, [#allocation27]  }
  0xf3   :  { %s11643_s23 = smov [#allocation29]   ;;  %s11644_s27 = smov [#allocation32]  }
  0xf4   :  { %s390_s3 = sshll.u32 %s11643_s23, 4  ;;  %s418_s26 = sshll.u32 %s11644_s27, 4  ;;  %s391_s3 = int_to_ptr.vmem [resolvable:$true] %s390_s3  ;;  %s419_s26 = int_to_ptr.vmem [resolvable:$true] %s418_s26 }
  0xf5   :  { %s11297_s20 = scalar_lea.hbm %s11977_s5, 16 }
  0xf6   :  { %p11298_p6 = scmp.ne.s32.totalorder %s11977_s5, %s11297_s20  ;;  %p11301_p7 = scmp.lt.u32.totalorder %s11297_s20, %s11977_s5 }
  0xf8   :  { %p11303_p8 = pnand %p11301_p7, %p11298_p6 }
  0xfa   :  { %11306 = shalt.err (!%p11303_p8)
}
  0xfb   :  { %s11307_s1 = scalar_lea.vmem %s391_s3, 16  ;;  %s11311_s7 = scalar_lea.vmem %s391_s3, 32 }
  0xfc   :  { %p11308_p9 = scmp.ne.s32.totalorder %s391_s3, %s11307_s1  ;;  %p11312_p10 = scmp.lt.s32.totalorder %s391_s3, %s391_s3 }
  0xfd   :  { %p11313_p11 = scmp.lt.s32.totalorder %s11311_s7, %s11307_s1 }
  0xff   :  { %p11314_p12 = por %p11313_p11, %p11312_p10 }
 0x101   :  { %p11315_p13 = pnand %p11314_p12, %p11308_p9 }
 0x103   :  { %11318 = shalt.err (!%p11315_p13)
}
 0x104   :  { %393 = dma.hbm_to_vmem [thread:$0]  %s11977_s5, 16, %s391_s3, [#allocation30]  }
 0x105   :  { %s11319_s13 = scalar_lea.hbm %s12007_s6, 16 }
 0x106   :  { %p11320_p0 = scmp.ne.s32.totalorder %s12007_s6, %s11319_s13  ;;  %p11323_p1 = scmp.lt.u32.totalorder %s11319_s13, %s12007_s6 }
 0x108   :  { %p11325_p2 = pnand %p11323_p1, %p11320_p0 }
 0x10a   :  { %11328 = shalt.err (!%p11325_p2)
}
 0x10b   :  { %s11329_s2 = scalar_lea.vmem %s419_s26, 16  ;;  %s11333_s10 = scalar_lea.vmem %s419_s26, 32 }
 0x10c   :  { %p11330_p3 = scmp.ne.s32.totalorder %s419_s26, %s11329_s2  ;;  %p11334_p4 = scmp.lt.s32.totalorder %s419_s26, %s419_s26 }
 0x10d   :  { %p11335_p5 = scmp.lt.s32.totalorder %s11333_s10, %s11329_s2 }
 0x10f   :  { %p11336_p6 = por %p11335_p5, %p11334_p4 }
 0x111   :  { %p11337_p7 = pnand %p11336_p6, %p11330_p3 }
 0x113   :  { %11340 = shalt.err (!%p11337_p7)
}
 0x114   :  { %421 = dma.hbm_to_vmem [thread:$0]  %s12007_s6, 16, %s419_s26, [#allocation33]  }
 0x115   :  { %s11645_s0 = smov [#allocation9]   ;;  %s11646_s21 = smov [#allocation13]  }
 0x116   :  { %s254_s5 = sshll.u32 %s11645_s0, 4  ;;  %s274_s30 = sshll.u32 %s11646_s21, 4  ;;  %s255_s5 = int_to_ptr.vmem [resolvable:$true] %s254_s5  ;;  %s275_s30 = int_to_ptr.vmem [resolvable:$true] %s274_s30 }
 0x117   :  { %s11341_s4 = scalar_lea.hbm %s11897_s8, 16 }
 0x118   :  { %p11342_p8 = scmp.ne.s32.totalorder %s11897_s8, %s11341_s4  ;;  %p11345_p9 = scmp.lt.u32.totalorder %s11341_s4, %s11897_s8 }
 0x11a   :  { %p11347_p10 = pnand %p11345_p9, %p11342_p8 }
 0x11c   :  { %11350 = shalt.err (!%p11347_p10)
}
 0x11d   :  { %s11351_s11 = scalar_lea.vmem %s255_s5, 16  ;;  %s11355_s16 = scalar_lea.vmem %s255_s5, 32 }
 0x11e   :  { %p11352_p11 = scmp.ne.s32.totalorder %s255_s5, %s11351_s11  ;;  %p11356_p12 = scmp.lt.s32.totalorder %s255_s5, %s255_s5 }
 0x11f   :  { %p11357_p13 = scmp.lt.s32.totalorder %s11355_s16, %s11351_s11 }
 0x121   :  { %p11358_p0 = por %p11357_p13, %p11356_p12 }
 0x123   :  { %p11359_p1 = pnand %p11358_p0, %p11352_p11 }
 0x125   :  { %11362 = shalt.err (!%p11359_p1)
}
 0x126   :  { %257 = dma.hbm_to_vmem [thread:$0]  %s11897_s8, 16, %s255_s5, [#allocation10]  }
 0x127   :  { %s11363_s6 = scalar_lea.hbm %s11907_s22, 16 }
 0x128   :  { %p11364_p2 = scmp.ne.s32.totalorder %s11907_s22, %s11363_s6  ;;  %p11367_p3 = scmp.lt.u32.totalorder %s11363_s6, %s11907_s22 }
 0x12a   :  { %p11369_p4 = pnand %p11367_p3, %p11364_p2 }
 0x12c   :  { %11372 = shalt.err (!%p11369_p4)
}
 0x12d   :  { %s11373_s19 = scalar_lea.vmem %s275_s30, 16  ;;  %s11377_s9 = scalar_lea.vmem %s275_s30, 32 }
 0x12e   :  { %p11374_p5 = scmp.ne.s32.totalorder %s275_s30, %s11373_s19  ;;  %p11378_p6 = scmp.lt.s32.totalorder %s275_s30, %s275_s30 }
 0x12f   :  { %p11379_p7 = scmp.lt.s32.totalorder %s11377_s9, %s11373_s19 }
 0x131   :  { %p11380_p8 = por %p11379_p7, %p11378_p6 }
 0x133   :  { %p11381_p9 = pnand %p11380_p8, %p11374_p5 }
 0x135   :  { %11384 = shalt.err (!%p11381_p9)
}
 0x136   :  { %277 = dma.hbm_to_vmem [thread:$0]  %s11907_s22, 16, %s275_s30, [#allocation12]  }
 0x137   :  { %s11647_s18 = smov [#allocation16]   ;;  %s11648_s15 = smov [#allocation19]  }
 0x138   :  { %s294_s8 = sshll.u32 %s11647_s18, 4  ;;  %s318_s23 = sshll.u32 %s11648_s15, 4  ;;  %s295_s8 = int_to_ptr.vmem [resolvable:$true] %s294_s8  ;;  %s319_s23 = int_to_ptr.vmem [resolvable:$true] %s318_s23 }
 0x139   :  { %s11385_s3 = scalar_lea.hbm %s11917_s17, 16 }
 0x13a   :  { %p11386_p10 = scmp.ne.s32.totalorder %s11917_s17, %s11385_s3  ;;  %p11389_p11 = scmp.lt.u32.totalorder %s11385_s3, %s11917_s17 }
 0x13c   :  { %p11391_p12 = pnand %p11389_p11, %p11386_p10 }
 0x13e   :  { %11394 = shalt.err (!%p11391_p12)
}
 0x13f   :  { %s11395_s27 = scalar_lea.vmem %s295_s8, 16  ;;  %s11399_s26 = scalar_lea.vmem %s295_s8, 32 }
 0x140   :  { %p11396_p13 = scmp.ne.s32.totalorder %s295_s8, %s11395_s27  ;;  %p11400_p0 = scmp.lt.s32.totalorder %s295_s8, %s295_s8 }
 0x141   :  { %p11401_p1 = scmp.lt.s32.totalorder %s11399_s26, %s11395_s27 }
 0x143   :  { %p11402_p2 = por %p11401_p1, %p11400_p0 }
 0x145   :  { %p11403_p3 = pnand %p11402_p2, %p11396_p13 }
 0x147   :  { %11406 = shalt.err (!%p11403_p3)
}
 0x148   :  { %297 = dma.hbm_to_vmem [thread:$0]  %s11917_s17, 16, %s295_s8, [#allocation15]  }
 0x149   :  { %s11407_s22 = scalar_lea.hbm %s11937_s29, 16 }
 0x14a   :  { %p11408_p4 = scmp.ne.s32.totalorder %s11937_s29, %s11407_s22  ;;  %p11411_p5 = scmp.lt.u32.totalorder %s11407_s22, %s11937_s29 }
 0x14c   :  { %p11413_p6 = pnand %p11411_p5, %p11408_p4 }
 0x14e   :  { %11416 = shalt.err (!%p11413_p6)
}
 0x14f   :  { %s11417_s20 = scalar_lea.vmem %s319_s23, 16  ;;  %s11421_s1 = scalar_lea.vmem %s319_s23, 32 }
 0x150   :  { %p11418_p7 = scmp.ne.s32.totalorder %s319_s23, %s11417_s20  ;;  %p11422_p8 = scmp.lt.s32.totalorder %s319_s23, %s319_s23 }
 0x151   :  { %p11423_p9 = scmp.lt.s32.totalorder %s11421_s1, %s11417_s20 }
 0x153   :  { %p11424_p10 = por %p11423_p9, %p11422_p8 }
 0x155   :  { %p11425_p11 = pnand %p11424_p10, %p11418_p7 }
 0x157   :  { %11428 = shalt.err (!%p11425_p11)
}
 0x158   :  { %321 = dma.hbm_to_vmem [thread:$0]  %s11937_s29, 16, %s319_s23, [#allocation18]  }
 0x159   :  { %s11649_s7 = smov [#allocation22]   ;;  %s11650_s13 = smov [#allocation25]  }
 0x15a   :  { %s340_s17 = sshll.u32 %s11649_s7, 4  ;;  %s360_s2 = sshll.u32 %s11650_s13, 4  ;;  %s341_s17 = int_to_ptr.vmem [resolvable:$true] %s340_s17  ;;  %s361_s2 = int_to_ptr.vmem [resolvable:$true] %s360_s2 }
 0x15b   :  { %s11429_s10 = scalar_lea.hbm %s11952_s14, 16 }
 0x15c   :  { %p11430_p12 = scmp.ne.s32.totalorder %s11952_s14, %s11429_s10  ;;  %p11433_p13 = scmp.lt.u32.totalorder %s11429_s10, %s11952_s14 }
 0x15e   :  { %p11435_p0 = pnand %p11433_p13, %p11430_p12 }
 0x160   :  { %11438 = shalt.err (!%p11435_p0)
}
 0x161   :  { %s11439_s0 = scalar_lea.vmem %s341_s17, 16  ;;  %s11443_s5 = scalar_lea.vmem %s341_s17, 32 }
 0x162   :  { %p11440_p1 = scmp.ne.s32.totalorder %s341_s17, %s11439_s0  ;;  %p11444_p2 = scmp.lt.s32.totalorder %s341_s17, %s341_s17 }
 0x163   :  { %p11445_p3 = scmp.lt.s32.totalorder %s11443_s5, %s11439_s0 }
 0x165   :  { %p11446_p4 = por %p11445_p3, %p11444_p2 }
 0x167   :  { %p11447_p5 = pnand %p11446_p4, %p11440_p1 }
 0x169   :  { %11450 = shalt.err (!%p11447_p5)
}
 0x16a   :  { %343 = dma.hbm_to_vmem [thread:$0]  %s11952_s14, 16, %s341_s17, [#allocation21]  }
 0x16b   :  { %s11451_s29 = scalar_lea.hbm %s11962_s28, 16 }
 0x16c   :  { %p11452_p6 = scmp.ne.s32.totalorder %s11962_s28, %s11451_s29  ;;  %p11455_p7 = scmp.lt.u32.totalorder %s11451_s29, %s11962_s28 }
 0x16e   :  { %p11457_p8 = pnand %p11455_p7, %p11452_p6 }
 0x170   :  { %11460 = shalt.err (!%p11457_p8)
}
 0x171   :  { %s11461_s21 = scalar_lea.vmem %s361_s2, 16  ;;  %s11465_s30 = scalar_lea.vmem %s361_s2, 32 }
 0x172   :  { %p11462_p9 = scmp.ne.s32.totalorder %s361_s2, %s11461_s21  ;;  %p11466_p10 = scmp.lt.s32.totalorder %s361_s2, %s361_s2 }
 0x173   :  { %p11467_p11 = scmp.lt.s32.totalorder %s11465_s30, %s11461_s21 }
 0x175   :  { %p11468_p12 = por %p11467_p11, %p11466_p10 }
 0x177   :  { %p11469_p13 = pnand %p11468_p12, %p11462_p9 }
 0x179   :  { %11472 = shalt.err (!%p11469_p13)
}
 0x17a   :  { %s14920_s4 = sld [smem:[#allocation100_spill]]  ;;  %s11651_s11 = smov [#allocation28]  }
 0x17b   :  { %363 = dma.hbm_to_vmem [thread:$0]  %s11962_s28, 16, %s361_s2, [#allocation24]  }
 0x17c   :  { %s380_s14 = sshll.u32 %s11651_s11, 4  ;;  %s11652_s16 = smov [#allocation31]   ;;  %s381_s14 = int_to_ptr.vmem [resolvable:$true] %s380_s14 }
 0x17d   :  { %s408_s6 = sshll.u32 %s11652_s16, 4  ;;  %s409_s6 = int_to_ptr.vmem [resolvable:$true] %s408_s6 }
 0x180   :  { %s11473_s19 = scalar_lea.hbm %s14920_s4, 16 }
 0x181   :  { %p11474_p0 = scmp.ne.s32.totalorder %s14920_s4, %s11473_s19  ;;  %p11477_p1 = scmp.lt.u32.totalorder %s11473_s19, %s14920_s4 }
 0x183   :  { %p11479_p2 = pnand %p11477_p1, %p11474_p0 }
 0x185   :  { %11482 = shalt.err (!%p11479_p2)
}
 0x186   :  { %s11483_s9 = scalar_lea.vmem %s381_s14, 16  ;;  %s11487_s18 = scalar_lea.vmem %s381_s14, 32 }
 0x187   :  { %p11484_p3 = scmp.ne.s32.totalorder %s381_s14, %s11483_s9  ;;  %p11488_p4 = scmp.lt.s32.totalorder %s381_s14, %s381_s14 }
 0x188   :  { %p11489_p5 = scmp.lt.s32.totalorder %s11487_s18, %s11483_s9 }
 0x18a   :  { %p11490_p6 = por %p11489_p5, %p11488_p4 }
 0x18c   :  { %p11491_p7 = pnand %p11490_p6, %p11484_p3 }
 0x18e   :  { %11494 = shalt.err (!%p11491_p7)
}
 0x18f   :  { %s14921_s28 = sld [smem:[#allocation105_spill]] }
 0x190   :  { %383 = dma.hbm_to_vmem [thread:$0]  %s14920_s4, 16, %s381_s14, [#allocation27]  }
 0x195   :  { %s11495_s8 = scalar_lea.hbm %s14921_s28, 16 }
 0x196   :  { %p11496_p8 = scmp.ne.s32.totalorder %s14921_s28, %s11495_s8  ;;  %p11499_p9 = scmp.lt.u32.totalorder %s11495_s8, %s14921_s28 }
 0x198   :  { %p11501_p10 = pnand %p11499_p9, %p11496_p8 }
 0x19a   :  { %11504 = shalt.err (!%p11501_p10)
}
 0x19b   :  { %s11505_s15 = scalar_lea.vmem %s409_s6, 16  ;;  %s11509_s23 = scalar_lea.vmem %s409_s6, 32 }
 0x19c   :  { %p11506_p11 = scmp.ne.s32.totalorder %s409_s6, %s11505_s15  ;;  %p11510_p12 = scmp.lt.s32.totalorder %s409_s6, %s409_s6 }
 0x19d   :  { %p11511_p13 = scmp.lt.s32.totalorder %s11509_s23, %s11505_s15 }
 0x19f   :  { %p11512_p0 = por %p11511_p13, %p11510_p12 }
 0x1a1   :  { %p11513_p1 = pnand %p11512_p0, %p11506_p11 }
 0x1a3   :  { %11516 = shalt.err (!%p11513_p1)
}
 0x1a4   :  { %411 = dma.hbm_to_vmem [thread:$0]  %s14921_s28, 16, %s409_s6, [#allocation30]  }
 0x1a5   :  { %s11653_s3 = smov [#allocation34]   ;;  %s11517_s26 = scalar_lea.hbm %s12015_s24, 16 }
 0x1a6   :  { %s430_s27 = sshll.u32 %s11653_s3, 4  ;;  %p11518_p2 = scmp.ne.s32.totalorder %s12015_s24, %s11517_s26  ;;  %s431_s27 = int_to_ptr.vmem [resolvable:$true] %s430_s27 }
 0x1a7   :  { %p11521_p3 = scmp.lt.u32.totalorder %s11517_s26, %s12015_s24 }
 0x1a9   :  { %p11523_p4 = pnand %p11521_p3, %p11518_p2 }
 0x1ab   :  { %11526 = shalt.err (!%p11523_p4)
}
 0x1ac   :  { %s11527_s22 = scalar_lea.vmem %s431_s27, 16  ;;  %s11531_s20 = scalar_lea.vmem %s431_s27, 32 }
 0x1ad   :  { %p11528_p5 = scmp.ne.s32.totalorder %s431_s27, %s11527_s22  ;;  %p11532_p6 = scmp.lt.s32.totalorder %s431_s27, %s431_s27 }
 0x1ae   :  { %p11533_p7 = scmp.lt.s32.totalorder %s11531_s20, %s11527_s22 }
 0x1b0   :  { %p11534_p8 = por %p11533_p7, %p11532_p6 }
 0x1b2   :  { %p11535_p9 = pnand %p11534_p8, %p11528_p5 }
 0x1b4   :  { %11538 = shalt.err (!%p11535_p9)
}
 0x1b5   :  { %433 = dma.hbm_to_vmem [thread:$0]  %s12015_s24, 16, %s431_s27, [#allocation33]  }
 0x1b6   :  { %11539 = dma.done.wait [#allocation10], 16  }
 0x1b7   :  { %11540 = vsyncadd [#allocation10], 4294967280 }
 0x1b8   :  { %11541 = dma.done.wait [#allocation12], 32  }
 0x1b9   :  { %11542 = vsyncadd [#allocation12], 4294967264 }
 0x1ba   :  { %11543 = dma.done.wait [#allocation15], 32  }
 0x1bb   :  { %11544 = vsyncadd [#allocation15], 4294967264 }
 0x1bc   :  { %11545 = dma.done.wait [#allocation18], 32  }
 0x1bd   :  { %11546 = vsyncadd [#allocation18], 4294967264 }
 0x1be   :  { %11547 = dma.done.wait [#allocation21], 32  }
 0x1bf   :  { %11548 = vsyncadd [#allocation21], 4294967264 }
 0x1c0   :  { %11549 = dma.done.wait [#allocation24], 32  }
 0x1c1   :  { %11550 = vsyncadd [#allocation24], 4294967264 }
 0x1c2   :  { %11551 = dma.done.wait [#allocation27], 32  }
 0x1c3   :  { %11552 = vsyncadd [#allocation27], 4294967264 }
 0x1c4   :  { %11553 = dma.done.wait [#allocation30], 32  }
 0x1c5   :  { %11554 = vsyncadd [#allocation30], 4294967264 }
 0x1c6   :  { %11555 = dma.done.wait [#allocation33], 32  }
 0x1c7   :  { %11556 = vsyncadd [#allocation33], 4294967264  ;;  %s14922_s1 = sld [smem:[#allocation63_spill]] }
 0x1cd   :  { %v503_v2 = vld [vmem:[%s14922_s1] sm:$0xf]  ;;  %v507_v4 = vld [vmem:[%s14922_s1 + $0x4] sm:$0xf]  ;;  %v511_v6 = vld [vmem:[%s14922_s1 + $0x8] sm:$0xf] }
 0x1ce   :  { %v505_v3 = vld [vmem:[%s14922_s1 + $0x40] sm:$0xf]  ;;  %504 = vst [vmem:[#allocation2] sm:$0xf] %v503_v2  ;;  %508 = vst [vmem:[#allocation2 + $0x8] sm:$0xf] %v507_v4 }
 0x1cf   :  { %506 = vst [vmem:[#allocation2 + $0x4] sm:$0xf] %v505_v3  ;;  %v509_v5 = vld [vmem:[%s14922_s1 + $0x44] sm:$0xf]  ;;  %v513_v7 = vld [vmem:[%s14922_s1 + $0x48] sm:$0xf] }
 0x1d0   :  { %510 = vst [vmem:[#allocation2 + $0xc] sm:$0xf] %v509_v5  ;;  %512 = vst [vmem:[#allocation2 + $0x10] sm:$0xf] %v511_v6  ;;  %v515_v8 = vld [vmem:[%s14922_s1 + $0xc] sm:$0xf] }
 0x1d1   :  { %514 = vst [vmem:[#allocation2 + $0x14] sm:$0xf] %v513_v7  ;;  %v517_v9 = vld [vmem:[%s14922_s1 + $0x4c] sm:$0xf]  ;;  %v519_v10 = vld [vmem:[%s14922_s1 + $0x10] sm:$0xf] }
 0x1d2   :  { %516 = vst [vmem:[#allocation2 + $0x18] sm:$0xf] %v515_v8  ;;  %518 = vst [vmem:[#allocation2 + $0x1c] sm:$0xf] %v517_v9  ;;  %v521_v11 = vld [vmem:[%s14922_s1 + $0x50] sm:$0xf] }
 0x1d3   :  { %520 = vst [vmem:[#allocation2 + $0x20] sm:$0xf] %v519_v10  ;;  %v523_v12 = vld [vmem:[%s14922_s1 + $0x14] sm:$0xf]  ;;  %522 = vst [vmem:[#allocation2 + $0x24] sm:$0xf] %v521_v11 }
 0x1d4   :  { %v525_v13 = vld [vmem:[%s14922_s1 + $0x54] sm:$0xf]  ;;  %524 = vst [vmem:[#allocation2 + $0x28] sm:$0xf] %v523_v12  ;;  %v527_v14 = vld [vmem:[%s14922_s1 + $0x18] sm:$0xf] }
 0x1d5   :  { %526 = vst [vmem:[#allocation2 + $0x2c] sm:$0xf] %v525_v13  ;;  %v529_v15 = vld [vmem:[%s14922_s1 + $0x58] sm:$0xf]  ;;  %v531_v16 = vld [vmem:[%s14922_s1 + $0x1c] sm:$0xf] }
 0x1d6   :  { %528 = vst [vmem:[#allocation2 + $0x30] sm:$0xf] %v527_v14  ;;  %530 = vst [vmem:[#allocation2 + $0x34] sm:$0xf] %v529_v15  ;;  %v533_v17 = vld [vmem:[%s14922_s1 + $0x5c] sm:$0xf] }
 0x1d7   :  { %532 = vst [vmem:[#allocation2 + $0x38] sm:$0xf] %v531_v16  ;;  %v535_v18 = vld [vmem:[%s14922_s1 + $0x20] sm:$0xf]  ;;  %534 = vst [vmem:[#allocation2 + $0x3c] sm:$0xf] %v533_v17 }
 0x1d8   :  { %v537_v19 = vld [vmem:[%s14922_s1 + $0x60] sm:$0xf]  ;;  %536 = vst [vmem:[#allocation2 + $0x40] sm:$0xf] %v535_v18  ;;  %v539_v20 = vld [vmem:[%s14922_s1 + $0x24] sm:$0xf] }
 0x1d9   :  { %538 = vst [vmem:[#allocation2 + $0x44] sm:$0xf] %v537_v19  ;;  %v541_v21 = vld [vmem:[%s14922_s1 + $0x64] sm:$0xf]  ;;  %v543_v22 = vld [vmem:[%s14922_s1 + $0x28] sm:$0xf] }
 0x1da   :  { %540 = vst [vmem:[#allocation2 + $0x48] sm:$0xf] %v539_v20  ;;  %542 = vst [vmem:[#allocation2 + $0x4c] sm:$0xf] %v541_v21  ;;  %v545_v23 = vld [vmem:[%s14922_s1 + $0x68] sm:$0xf] }
 0x1db   :  { %544 = vst [vmem:[#allocation2 + $0x50] sm:$0xf] %v543_v22  ;;  %v547_v24 = vld [vmem:[%s14922_s1 + $0x2c] sm:$0xf]  ;;  %546 = vst [vmem:[#allocation2 + $0x54] sm:$0xf] %v545_v23 }
 0x1dc   :  { %v549_v25 = vld [vmem:[%s14922_s1 + $0x6c] sm:$0xf]  ;;  %548 = vst [vmem:[#allocation2 + $0x58] sm:$0xf] %v547_v24  ;;  %v551_v26 = vld [vmem:[%s14922_s1 + $0x30] sm:$0xf] }
 0x1dd   :  { %550 = vst [vmem:[#allocation2 + $0x5c] sm:$0xf] %v549_v25  ;;  %v553_v27 = vld [vmem:[%s14922_s1 + $0x70] sm:$0xf]  ;;  %v555_v28 = vld [vmem:[%s14922_s1 + $0x34] sm:$0xf] }
 0x1de   :  { %552 = vst [vmem:[#allocation2 + $0x60] sm:$0xf] %v551_v26  ;;  %554 = vst [vmem:[#allocation2 + $0x64] sm:$0xf] %v553_v27  ;;  %v557_v29 = vld [vmem:[%s14922_s1 + $0x74] sm:$0xf] }
 0x1df   :  { %556 = vst [vmem:[#allocation2 + $0x68] sm:$0xf] %v555_v28  ;;  %v559_v30 = vld [vmem:[%s14922_s1 + $0x38] sm:$0xf]  ;;  %558 = vst [vmem:[#allocation2 + $0x6c] sm:$0xf] %v557_v29 }
 0x1e0   :  { %v561_v31 = vld [vmem:[%s14922_s1 + $0x78] sm:$0xf]  ;;  %560 = vst [vmem:[#allocation2 + $0x70] sm:$0xf] %v559_v30  ;;  %v563_v32 = vld [vmem:[%s14922_s1 + $0x3c] sm:$0xf] }
 0x1e1   :  { %562 = vst [vmem:[#allocation2 + $0x74] sm:$0xf] %v561_v31  ;;  %v565_v33 = vld [vmem:[%s14922_s1 + $0x7c] sm:$0xf]  ;;  %v567_v34 = vld [vmem:[%s14922_s1 + $0x80] sm:$0xf] }
 0x1e2   :  { %564 = vst [vmem:[#allocation2 + $0x78] sm:$0xf] %v563_v32  ;;  %566 = vst [vmem:[#allocation2 + $0x7c] sm:$0xf] %v565_v33  ;;  %v569_v35 = vld [vmem:[%s14922_s1 + $0xc0] sm:$0xf] }
 0x1e3   :  { %568 = vst [vmem:[#allocation2 + $0x80] sm:$0xf] %v567_v34  ;;  %v571_v36 = vld [vmem:[%s14922_s1 + $0x84] sm:$0xf]  ;;  %570 = vst [vmem:[#allocation2 + $0x84] sm:$0xf] %v569_v35 }
 0x1e4   :  { %v573_v37 = vld [vmem:[%s14922_s1 + $0xc4] sm:$0xf]  ;;  %572 = vst [vmem:[#allocation2 + $0x88] sm:$0xf] %v571_v36  ;;  %v575_v38 = vld [vmem:[%s14922_s1 + $0x88] sm:$0xf] }
 0x1e5   :  { %574 = vst [vmem:[#allocation2 + $0x8c] sm:$0xf] %v573_v37  ;;  %v577_v39 = vld [vmem:[%s14922_s1 + $0xc8] sm:$0xf]  ;;  %v579_v40 = vld [vmem:[%s14922_s1 + $0x8c] sm:$0xf] }
 0x1e6   :  { %576 = vst [vmem:[#allocation2 + $0x90] sm:$0xf] %v575_v38  ;;  %578 = vst [vmem:[#allocation2 + $0x94] sm:$0xf] %v577_v39  ;;  %v581_v41 = vld [vmem:[%s14922_s1 + $0xcc] sm:$0xf] }
 0x1e7   :  { %580 = vst [vmem:[#allocation2 + $0x98] sm:$0xf] %v579_v40  ;;  %v583_v42 = vld [vmem:[%s14922_s1 + $0x90] sm:$0xf]  ;;  %582 = vst [vmem:[#allocation2 + $0x9c] sm:$0xf] %v581_v41 }
 0x1e8   :  { %v585_v43 = vld [vmem:[%s14922_s1 + $0xd0] sm:$0xf]  ;;  %584 = vst [vmem:[#allocation2 + $0xa0] sm:$0xf] %v583_v42  ;;  %v587_v44 = vld [vmem:[%s14922_s1 + $0x94] sm:$0xf] }
 0x1e9   :  { %586 = vst [vmem:[#allocation2 + $0xa4] sm:$0xf] %v585_v43  ;;  %v589_v45 = vld [vmem:[%s14922_s1 + $0xd4] sm:$0xf]  ;;  %v591_v46 = vld [vmem:[%s14922_s1 + $0x98] sm:$0xf] }
 0x1ea   :  { %588 = vst [vmem:[#allocation2 + $0xa8] sm:$0xf] %v587_v44  ;;  %590 = vst [vmem:[#allocation2 + $0xac] sm:$0xf] %v589_v45  ;;  %v593_v47 = vld [vmem:[%s14922_s1 + $0xd8] sm:$0xf] }
 0x1eb   :  { %592 = vst [vmem:[#allocation2 + $0xb0] sm:$0xf] %v591_v46  ;;  %v595_v48 = vld [vmem:[%s14922_s1 + $0x9c] sm:$0xf]  ;;  %594 = vst [vmem:[#allocation2 + $0xb4] sm:$0xf] %v593_v47 }
 0x1ec   :  { %v597_v49 = vld [vmem:[%s14922_s1 + $0xdc] sm:$0xf]  ;;  %596 = vst [vmem:[#allocation2 + $0xb8] sm:$0xf] %v595_v48  ;;  %v599_v50 = vld [vmem:[%s14922_s1 + $0xa0] sm:$0xf] }
 0x1ed   :  { %598 = vst [vmem:[#allocation2 + $0xbc] sm:$0xf] %v597_v49  ;;  %v601_v51 = vld [vmem:[%s14922_s1 + $0xe0] sm:$0xf]  ;;  %v603_v52 = vld [vmem:[%s14922_s1 + $0xa4] sm:$0xf] }
 0x1ee   :  { %600 = vst [vmem:[#allocation2 + $0xc0] sm:$0xf] %v599_v50  ;;  %602 = vst [vmem:[#allocation2 + $0xc4] sm:$0xf] %v601_v51  ;;  %v605_v53 = vld [vmem:[%s14922_s1 + $0xe4] sm:$0xf] }
 0x1ef   :  { %604 = vst [vmem:[#allocation2 + $0xc8] sm:$0xf] %v603_v52  ;;  %v607_v54 = vld [vmem:[%s14922_s1 + $0xa8] sm:$0xf]  ;;  %606 = vst [vmem:[#allocation2 + $0xcc] sm:$0xf] %v605_v53 }
 0x1f0   :  { %v609_v55 = vld [vmem:[%s14922_s1 + $0xe8] sm:$0xf]  ;;  %608 = vst [vmem:[#allocation2 + $0xd0] sm:$0xf] %v607_v54  ;;  %v611_v56 = vld [vmem:[%s14922_s1 + $0xac] sm:$0xf] }
 0x1f1   :  { %610 = vst [vmem:[#allocation2 + $0xd4] sm:$0xf] %v609_v55  ;;  %v613_v57 = vld [vmem:[%s14922_s1 + $0xec] sm:$0xf]  ;;  %v615_v58 = vld [vmem:[%s14922_s1 + $0xb0] sm:$0xf] }
 0x1f2   :  { %612 = vst [vmem:[#allocation2 + $0xd8] sm:$0xf] %v611_v56  ;;  %614 = vst [vmem:[#allocation2 + $0xdc] sm:$0xf] %v613_v57  ;;  %v617_v59 = vld [vmem:[%s14922_s1 + $0xf0] sm:$0xf] }
 0x1f3   :  { %616 = vst [vmem:[#allocation2 + $0xe0] sm:$0xf] %v615_v58  ;;  %v619_v60 = vld [vmem:[%s14922_s1 + $0xb4] sm:$0xf]  ;;  %618 = vst [vmem:[#allocation2 + $0xe4] sm:$0xf] %v617_v59 }
 0x1f4   :  { %v621_v61 = vld [vmem:[%s14922_s1 + $0xf4] sm:$0xf]  ;;  %620 = vst [vmem:[#allocation2 + $0xe8] sm:$0xf] %v619_v60  ;;  %v623_v62 = vld [vmem:[%s14922_s1 + $0xb8] sm:$0xf] }
 0x1f5   :  { %622 = vst [vmem:[#allocation2 + $0xec] sm:$0xf] %v621_v61  ;;  %v625_v63 = vld [vmem:[%s14922_s1 + $0xf8] sm:$0xf]  ;;  %v627_v0 = vld [vmem:[%s14922_s1 + $0xbc] sm:$0xf] }
 0x1f6   :  { %624 = vst [vmem:[#allocation2 + $0xf0] sm:$0xf] %v623_v62  ;;  %626 = vst [vmem:[#allocation2 + $0xf4] sm:$0xf] %v625_v63  ;;  %v629_v1 = vld [vmem:[%s14922_s1 + $0xfc] sm:$0xf] }
 0x1f7   :  { %628 = vst [vmem:[#allocation2 + $0xf8] sm:$0xf] %v627_v0  ;;  %630 = vst [vmem:[#allocation2 + $0xfc] sm:$0xf] %v629_v1 }
 0x1f8   :  { %789 = vsyncadd [#allocation6], 4096  ;;  %s14923_s24 = sld [smem:[#allocation64_spill]] }
 0x1fe   :  { %v12160_v2 = vld [vmem:[%s14923_s24] sm:$0xff]  ;;  %v12163_v3 = vld [vmem:[%s14923_s24 + $0x8] sm:$0xff]  ;;  %v12166_v4 = vld [vmem:[%s14923_s24 + $0x10] sm:$0xff] }
 0x1ff   :  { %14924 = vst [vmem:[#allocation106_spill] sm:$0xff] %v12160_v2  ;;  %14925 = vst [vmem:[#allocation107_spill] sm:$0xff] %v12163_v3  ;;  %v12169_v5 = vld [vmem:[%s14923_s24 + $0x18] sm:$0xff]  ;;  %v12172_v6 = vld [vmem:[%s14923_s24 + $0x20] sm:$0xff] }
 0x200   :  { %14926 = vst [vmem:[#allocation108_spill] sm:$0xff] %v12166_v4  ;;  %14927 = vst [vmem:[#allocation109_spill] sm:$0xff] %v12169_v5  ;;  %v12175_v7 = vld [vmem:[%s14923_s24 + $0x28] sm:$0xff]  ;;  %v12178_v8 = vld [vmem:[%s14923_s24 + $0x30] sm:$0xff] }
 0x201   :  { %14928 = vst [vmem:[#allocation110_spill] sm:$0xff] %v12172_v6  ;;  %14929 = vst [vmem:[#allocation111_spill] sm:$0xff] %v12175_v7  ;;  %v12181_v9 = vld [vmem:[%s14923_s24 + $0x38] sm:$0xff]  ;;  %v12184_v10 = vld [vmem:[%s14923_s24 + $0x40] sm:$0xff] }
 0x202   :  { %14930 = vst [vmem:[#allocation112_spill] sm:$0xff] %v12178_v8  ;;  %14931 = vst [vmem:[#allocation113_spill] sm:$0xff] %v12181_v9  ;;  %v12187_v11 = vld [vmem:[%s14923_s24 + $0x48] sm:$0xff]  ;;  %v12190_v12 = vld [vmem:[%s14923_s24 + $0x50] sm:$0xff] }
 0x203   :  { %14932 = vst [vmem:[#allocation114_spill] sm:$0xff] %v12184_v10  ;;  %14933 = vst [vmem:[#allocation115_spill] sm:$0xff] %v12187_v11  ;;  %v12193_v13 = vld [vmem:[%s14923_s24 + $0x58] sm:$0xff]  ;;  %v12196_v14 = vld [vmem:[%s14923_s24 + $0x60] sm:$0xff] }
 0x204   :  { %14934 = vst [vmem:[#allocation116_spill] sm:$0xff] %v12190_v12  ;;  %14935 = vst [vmem:[#allocation117_spill] sm:$0xff] %v12193_v13  ;;  %v12199_v15 = vld [vmem:[%s14923_s24 + $0x68] sm:$0xff]  ;;  %v12202_v16 = vld [vmem:[%s14923_s24 + $0x70] sm:$0xff] }
 0x205   :  { %14936 = vst [vmem:[#allocation118_spill] sm:$0xff] %v12196_v14  ;;  %14937 = vst [vmem:[#allocation119_spill] sm:$0xff] %v12199_v15  ;;  %v12205_v17 = vld [vmem:[%s14923_s24 + $0x78] sm:$0xff]  ;;  %v12208_v18 = vld [vmem:[%s14923_s24 + $0x80] sm:$0xff] }
 0x206   :  { %14938 = vst [vmem:[#allocation120_spill] sm:$0xff] %v12202_v16  ;;  %14939 = vst [vmem:[#allocation121_spill] sm:$0xff] %v12205_v17  ;;  %v12211_v19 = vld [vmem:[%s14923_s24 + $0x88] sm:$0xff]  ;;  %v12214_v20 = vld [vmem:[%s14923_s24 + $0x90] sm:$0xff] }
 0x207   :  { %14940 = vst [vmem:[#allocation122_spill] sm:$0xff] %v12208_v18  ;;  %14941 = vst [vmem:[#allocation123_spill] sm:$0xff] %v12211_v19  ;;  %v12217_v21 = vld [vmem:[%s14923_s24 + $0x98] sm:$0xff]  ;;  %v12220_v22 = vld [vmem:[%s14923_s24 + $0xa0] sm:$0xff] }
 0x208   :  { %14942 = vst [vmem:[#allocation124_spill] sm:$0xff] %v12214_v20  ;;  %14943 = vst [vmem:[#allocation125_spill] sm:$0xff] %v12217_v21  ;;  %v12223_v23 = vld [vmem:[%s14923_s24 + $0xa8] sm:$0xff]  ;;  %v12226_v24 = vld [vmem:[%s14923_s24 + $0xb0] sm:$0xff] }
 0x209   :  { %14944 = vst [vmem:[#allocation126_spill] sm:$0xff] %v12220_v22  ;;  %14945 = vst [vmem:[#allocation127_spill] sm:$0xff] %v12223_v23  ;;  %v12229_v25 = vld [vmem:[%s14923_s24 + $0xb8] sm:$0xff]  ;;  %v12232_v26 = vld [vmem:[%s14923_s24 + $0xc0] sm:$0xff] }
 0x20a   :  { %14946 = vst [vmem:[#allocation128_spill] sm:$0xff] %v12226_v24  ;;  %14947 = vst [vmem:[#allocation129_spill] sm:$0xff] %v12229_v25  ;;  %v12235_v27 = vld [vmem:[%s14923_s24 + $0xc8] sm:$0xff]  ;;  %v12238_v28 = vld [vmem:[%s14923_s24 + $0xd0] sm:$0xff] }
 0x20b   :  { %14948 = vst [vmem:[#allocation130_spill] sm:$0xff] %v12232_v26  ;;  %14949 = vst [vmem:[#allocation131_spill] sm:$0xff] %v12235_v27  ;;  %v12241_v29 = vld [vmem:[%s14923_s24 + $0xd8] sm:$0xff]  ;;  %v12244_v30 = vld [vmem:[%s14923_s24 + $0xe0] sm:$0xff] }
 0x20c   :  { %14950 = vst [vmem:[#allocation132_spill] sm:$0xff] %v12238_v28  ;;  %14951 = vst [vmem:[#allocation133_spill] sm:$0xff] %v12241_v29  ;;  %v12247_v31 = vld [vmem:[%s14923_s24 + $0xe8] sm:$0xff]  ;;  %v12250_v32 = vld [vmem:[%s14923_s24 + $0xf0] sm:$0xff] }
 0x20d   :  { %14952 = vst [vmem:[#allocation134_spill] sm:$0xff] %v12244_v30  ;;  %14953 = vst [vmem:[#allocation135_spill] sm:$0xff] %v12247_v31  ;;  %v12253_v33 = vld [vmem:[%s14923_s24 + $0xf8] sm:$0xff]  ;;  %v12256_v34 = vld [vmem:[%s14923_s24 + $0x100] sm:$0xff] }
 0x20e   :  { %14954 = vst [vmem:[#allocation136_spill] sm:$0xff] %v12250_v32  ;;  %14955 = vst [vmem:[#allocation137_spill] sm:$0xff] %v12253_v33  ;;  %v12259_v35 = vld [vmem:[%s14923_s24 + $0x108] sm:$0xff]  ;;  %v12262_v36 = vld [vmem:[%s14923_s24 + $0x110] sm:$0xff] }
 0x20f   :  { %14956 = vst [vmem:[#allocation138_spill] sm:$0xff] %v12256_v34  ;;  %14957 = vst [vmem:[#allocation139_spill] sm:$0xff] %v12259_v35  ;;  %v12265_v37 = vld [vmem:[%s14923_s24 + $0x118] sm:$0xff]  ;;  %v12268_v38 = vld [vmem:[%s14923_s24 + $0x120] sm:$0xff] }
 0x210   :  { %14958 = vst [vmem:[#allocation140_spill] sm:$0xff] %v12262_v36  ;;  %14959 = vst [vmem:[#allocation141_spill] sm:$0xff] %v12265_v37  ;;  %v12271_v39 = vld [vmem:[%s14923_s24 + $0x128] sm:$0xff]  ;;  %v12274_v40 = vld [vmem:[%s14923_s24 + $0x130] sm:$0xff] }
 0x211   :  { %14960 = vst [vmem:[#allocation142_spill] sm:$0xff] %v12268_v38  ;;  %14961 = vst [vmem:[#allocation143_spill] sm:$0xff] %v12271_v39  ;;  %v12277_v41 = vld [vmem:[%s14923_s24 + $0x138] sm:$0xff]  ;;  %v12280_v42 = vld [vmem:[%s14923_s24 + $0x140] sm:$0xff] }
 0x212   :  { %14962 = vst [vmem:[#allocation144_spill] sm:$0xff] %v12274_v40  ;;  %14963 = vst [vmem:[#allocation145_spill] sm:$0xff] %v12277_v41  ;;  %v12283_v43 = vld [vmem:[%s14923_s24 + $0x148] sm:$0xff]  ;;  %v12286_v44 = vld [vmem:[%s14923_s24 + $0x150] sm:$0xff] }
 0x213   :  { %14964 = vst [vmem:[#allocation146_spill] sm:$0xff] %v12280_v42  ;;  %14965 = vst [vmem:[#allocation147_spill] sm:$0xff] %v12283_v43  ;;  %v12289_v45 = vld [vmem:[%s14923_s24 + $0x158] sm:$0xff]  ;;  %v12292_v46 = vld [vmem:[%s14923_s24 + $0x160] sm:$0xff] }
 0x214   :  { %14966 = vst [vmem:[#allocation148_spill] sm:$0xff] %v12286_v44  ;;  %14967 = vst [vmem:[#allocation149_spill] sm:$0xff] %v12289_v45  ;;  %v12295_v47 = vld [vmem:[%s14923_s24 + $0x168] sm:$0xff]  ;;  %v12298_v48 = vld [vmem:[%s14923_s24 + $0x170] sm:$0xff] }
 0x215   :  { %14968 = vst [vmem:[#allocation150_spill] sm:$0xff] %v12292_v46  ;;  %14969 = vst [vmem:[#allocation151_spill] sm:$0xff] %v12295_v47  ;;  %v12301_v49 = vld [vmem:[%s14923_s24 + $0x178] sm:$0xff]  ;;  %v12304_v50 = vld [vmem:[%s14923_s24 + $0x180] sm:$0xff] }
 0x216   :  { %14970 = vst [vmem:[#allocation152_spill] sm:$0xff] %v12298_v48  ;;  %14971 = vst [vmem:[#allocation153_spill] sm:$0xff] %v12301_v49  ;;  %v12307_v51 = vld [vmem:[%s14923_s24 + $0x188] sm:$0xff]  ;;  %v12310_v52 = vld [vmem:[%s14923_s24 + $0x190] sm:$0xff] }
 0x217   :  { %14972 = vst [vmem:[#allocation154_spill] sm:$0xff] %v12304_v50  ;;  %14973 = vst [vmem:[#allocation155_spill] sm:$0xff] %v12307_v51  ;;  %v12313_v53 = vld [vmem:[%s14923_s24 + $0x198] sm:$0xff]  ;;  %v12316_v54 = vld [vmem:[%s14923_s24 + $0x1a0] sm:$0xff] }
 0x218   :  { %14974 = vst [vmem:[#allocation156_spill] sm:$0xff] %v12310_v52  ;;  %14975 = vst [vmem:[#allocation157_spill] sm:$0xff] %v12313_v53  ;;  %v12319_v55 = vld [vmem:[%s14923_s24 + $0x1a8] sm:$0xff]  ;;  %v12322_v56 = vld [vmem:[%s14923_s24 + $0x1b0] sm:$0xff] }
 0x219   :  { %14976 = vst [vmem:[#allocation158_spill] sm:$0xff] %v12316_v54  ;;  %14977 = vst [vmem:[#allocation159_spill] sm:$0xff] %v12319_v55  ;;  %v12325_v57 = vld [vmem:[%s14923_s24 + $0x1b8] sm:$0xff]  ;;  %v12328_v58 = vld [vmem:[%s14923_s24 + $0x1c0] sm:$0xff] }
 0x21a   :  { %14978 = vst [vmem:[#allocation160_spill] sm:$0xff] %v12322_v56  ;;  %14979 = vst [vmem:[#allocation161_spill] sm:$0xff] %v12325_v57  ;;  %v12331_v59 = vld [vmem:[%s14923_s24 + $0x1c8] sm:$0xff]  ;;  %v12334_v60 = vld [vmem:[%s14923_s24 + $0x1d0] sm:$0xff] }
 0x21b   :  { %14980 = vst [vmem:[#allocation162_spill] sm:$0xff] %v12328_v58  ;;  %14981 = vst [vmem:[#allocation163_spill] sm:$0xff] %v12331_v59  ;;  %v12337_v61 = vld [vmem:[%s14923_s24 + $0x1d8] sm:$0xff]  ;;  %v12340_v62 = vld [vmem:[%s14923_s24 + $0x1e0] sm:$0xff] }
 0x21c   :  { %14982 = vst [vmem:[#allocation164_spill] sm:$0xff] %v12334_v60  ;;  %14983 = vst [vmem:[#allocation165_spill] sm:$0xff] %v12337_v61  ;;  %v12343_v63 = vld [vmem:[%s14923_s24 + $0x1e8] sm:$0xff]  ;;  %v12346_v0 = vld [vmem:[%s14923_s24 + $0x1f0] sm:$0xff] }
 0x21d   :  { %14984 = vst [vmem:[#allocation166_spill] sm:$0xff] %v12340_v62  ;;  %14985 = vst [vmem:[#allocation167_spill] sm:$0xff] %v12343_v63  ;;  %v12349_v1 = vld [vmem:[%s14923_s24 + $0x1f8] sm:$0xff]  ;;  %v12352_v57 = vld [vmem:[%s14923_s24 + $0x200] sm:$0xff] }
 0x21e   :  { %14986 = vst [vmem:[#allocation168_spill] sm:$0xff] %v12346_v0  ;;  %14987 = vst [vmem:[#allocation169_spill] sm:$0xff] %v12349_v1  ;;  %v12355_v41 = vld [vmem:[%s14923_s24 + $0x208] sm:$0xff]  ;;  %v12358_v49 = vld [vmem:[%s14923_s24 + $0x210] sm:$0xff] }
 0x21f   :  { %14988 = vst [vmem:[#allocation170_spill] sm:$0xff] %v12352_v57  ;;  %14989 = vst [vmem:[#allocation171_spill] sm:$0xff] %v12355_v41  ;;  %v12361_v56 = vld [vmem:[%s14923_s24 + $0x218] sm:$0xff]  ;;  %v12364_v40 = vld [vmem:[%s14923_s24 + $0x220] sm:$0xff] }
 0x220   :  { %14990 = vst [vmem:[#allocation172_spill] sm:$0xff] %v12358_v49  ;;  %14991 = vst [vmem:[#allocation173_spill] sm:$0xff] %v12361_v56  ;;  %v12367_v0 = vld [vmem:[%s14923_s24 + $0x228] sm:$0xff]  ;;  %v12370_v1 = vld [vmem:[%s14923_s24 + $0x230] sm:$0xff] }
 0x221   :  { %14992 = vst [vmem:[#allocation174_spill] sm:$0xff] %v12364_v40  ;;  %14993 = vst [vmem:[#allocation175_spill] sm:$0xff] %v12367_v0  ;;  %v12373_v57 = vld [vmem:[%s14923_s24 + $0x238] sm:$0xff]  ;;  %v12376_v41 = vld [vmem:[%s14923_s24 + $0x240] sm:$0xff] }
 0x222   :  { %14994 = vst [vmem:[#allocation176_spill] sm:$0xff] %v12370_v1  ;;  %14995 = vst [vmem:[#allocation177_spill] sm:$0xff] %v12373_v57  ;;  %v12379_v49 = vld [vmem:[%s14923_s24 + $0x248] sm:$0xff]  ;;  %v12382_v56 = vld [vmem:[%s14923_s24 + $0x250] sm:$0xff] }
 0x223   :  { %14996 = vst [vmem:[#allocation178_spill] sm:$0xff] %v12376_v41  ;;  %14997 = vst [vmem:[#allocation179_spill] sm:$0xff] %v12379_v49  ;;  %v12385_v40 = vld [vmem:[%s14923_s24 + $0x258] sm:$0xff]  ;;  %v12388_v0 = vld [vmem:[%s14923_s24 + $0x260] sm:$0xff] }
 0x224   :  { %14998 = vst [vmem:[#allocation180_spill] sm:$0xff] %v12382_v56  ;;  %14999 = vst [vmem:[#allocation181_spill] sm:$0xff] %v12385_v40  ;;  %v12391_v1 = vld [vmem:[%s14923_s24 + $0x268] sm:$0xff]  ;;  %v12394_v57 = vld [vmem:[%s14923_s24 + $0x270] sm:$0xff] }
 0x225   :  { %15000 = vst [vmem:[#allocation182_spill] sm:$0xff] %v12388_v0  ;;  %15001 = vst [vmem:[#allocation183_spill] sm:$0xff] %v12391_v1  ;;  %v12397_v41 = vld [vmem:[%s14923_s24 + $0x278] sm:$0xff]  ;;  %v12400_v49 = vld [vmem:[%s14923_s24 + $0x280] sm:$0xff] }
 0x226   :  { %15002 = vst [vmem:[#allocation184_spill] sm:$0xff] %v12394_v57  ;;  %15003 = vst [vmem:[#allocation185_spill] sm:$0xff] %v12397_v41  ;;  %v12403_v56 = vld [vmem:[%s14923_s24 + $0x288] sm:$0xff]  ;;  %v12406_v40 = vld [vmem:[%s14923_s24 + $0x290] sm:$0xff] }
 0x227   :  { %15004 = vst [vmem:[#allocation186_spill] sm:$0xff] %v12400_v49  ;;  %15005 = vst [vmem:[#allocation187_spill] sm:$0xff] %v12403_v56  ;;  %v12409_v0 = vld [vmem:[%s14923_s24 + $0x298] sm:$0xff]  ;;  %v12412_v1 = vld [vmem:[%s14923_s24 + $0x2a0] sm:$0xff] }
 0x228   :  { %15006 = vst [vmem:[#allocation188_spill] sm:$0xff] %v12406_v40  ;;  %15007 = vst [vmem:[#allocation189_spill] sm:$0xff] %v12409_v0  ;;  %v12415_v57 = vld [vmem:[%s14923_s24 + $0x2a8] sm:$0xff]  ;;  %v12418_v41 = vld [vmem:[%s14923_s24 + $0x2b0] sm:$0xff] }
 0x229   :  { %15008 = vst [vmem:[#allocation190_spill] sm:$0xff] %v12412_v1  ;;  %15009 = vst [vmem:[#allocation191_spill] sm:$0xff] %v12415_v57  ;;  %v12421_v49 = vld [vmem:[%s14923_s24 + $0x2b8] sm:$0xff]  ;;  %v12424_v56 = vld [vmem:[%s14923_s24 + $0x2c0] sm:$0xff] }
 0x22a   :  { %15010 = vst [vmem:[#allocation192_spill] sm:$0xff] %v12418_v41  ;;  %15011 = vst [vmem:[#allocation193_spill] sm:$0xff] %v12421_v49  ;;  %v12427_v40 = vld [vmem:[%s14923_s24 + $0x2c8] sm:$0xff]  ;;  %v12430_v0 = vld [vmem:[%s14923_s24 + $0x2d0] sm:$0xff] }
 0x22b   :  { %15012 = vst [vmem:[#allocation194_spill] sm:$0xff] %v12424_v56  ;;  %15013 = vst [vmem:[#allocation195_spill] sm:$0xff] %v12427_v40  ;;  %v12433_v1 = vld [vmem:[%s14923_s24 + $0x2d8] sm:$0xff]  ;;  %v12436_v57 = vld [vmem:[%s14923_s24 + $0x2e0] sm:$0xff] }
 0x22c   :  { %15014 = vst [vmem:[#allocation196_spill] sm:$0xff] %v12430_v0  ;;  %15015 = vst [vmem:[#allocation197_spill] sm:$0xff] %v12433_v1  ;;  %v12439_v41 = vld [vmem:[%s14923_s24 + $0x2e8] sm:$0xff]  ;;  %v12442_v49 = vld [vmem:[%s14923_s24 + $0x2f0] sm:$0xff] }
 0x22d   :  { %15016 = vst [vmem:[#allocation198_spill] sm:$0xff] %v12436_v57  ;;  %15017 = vst [vmem:[#allocation199_spill] sm:$0xff] %v12439_v41  ;;  %v12445_v56 = vld [vmem:[%s14923_s24 + $0x2f8] sm:$0xff]  ;;  %v12448_v40 = vld [vmem:[%s14923_s24 + $0x300] sm:$0xff] }
 0x22e   :  { %15018 = vst [vmem:[#allocation200_spill] sm:$0xff] %v12442_v49  ;;  %15019 = vst [vmem:[#allocation201_spill] sm:$0xff] %v12445_v56  ;;  %v12451_v0 = vld [vmem:[%s14923_s24 + $0x308] sm:$0xff]  ;;  %v12454_v1 = vld [vmem:[%s14923_s24 + $0x310] sm:$0xff] }
 0x22f   :  { %15020 = vst [vmem:[#allocation202_spill] sm:$0xff] %v12448_v40  ;;  %15021 = vst [vmem:[#allocation203_spill] sm:$0xff] %v12451_v0  ;;  %v12457_v57 = vld [vmem:[%s14923_s24 + $0x318] sm:$0xff]  ;;  %v12460_v41 = vld [vmem:[%s14923_s24 + $0x320] sm:$0xff] }
 0x230   :  { %15022 = vst [vmem:[#allocation204_spill] sm:$0xff] %v12454_v1  ;;  %15023 = vst [vmem:[#allocation205_spill] sm:$0xff] %v12457_v57  ;;  %v12463_v49 = vld [vmem:[%s14923_s24 + $0x328] sm:$0xff]  ;;  %v12466_v56 = vld [vmem:[%s14923_s24 + $0x330] sm:$0xff] }
 0x231   :  { %15024 = vst [vmem:[#allocation206_spill] sm:$0xff] %v12460_v41  ;;  %15025 = vst [vmem:[#allocation207_spill] sm:$0xff] %v12463_v49  ;;  %v12469_v40 = vld [vmem:[%s14923_s24 + $0x338] sm:$0xff]  ;;  %v12472_v0 = vld [vmem:[%s14923_s24 + $0x340] sm:$0xff] }
 0x232   :  { %15026 = vst [vmem:[#allocation208_spill] sm:$0xff] %v12466_v56  ;;  %15027 = vst [vmem:[#allocation209_spill] sm:$0xff] %v12469_v40  ;;  %v12475_v1 = vld [vmem:[%s14923_s24 + $0x348] sm:$0xff]  ;;  %v12478_v57 = vld [vmem:[%s14923_s24 + $0x350] sm:$0xff] }
 0x233   :  { %15028 = vst [vmem:[#allocation210_spill] sm:$0xff] %v12472_v0  ;;  %15029 = vst [vmem:[#allocation211_spill] sm:$0xff] %v12475_v1  ;;  %v12481_v41 = vld [vmem:[%s14923_s24 + $0x358] sm:$0xff]  ;;  %v12484_v49 = vld [vmem:[%s14923_s24 + $0x360] sm:$0xff] }
 0x234   :  { %15030 = vst [vmem:[#allocation212_spill] sm:$0xff] %v12478_v57  ;;  %15031 = vst [vmem:[#allocation213_spill] sm:$0xff] %v12481_v41  ;;  %v12487_v56 = vld [vmem:[%s14923_s24 + $0x368] sm:$0xff]  ;;  %v12490_v40 = vld [vmem:[%s14923_s24 + $0x370] sm:$0xff] }
 0x235   :  { %15032 = vst [vmem:[#allocation214_spill] sm:$0xff] %v12484_v49  ;;  %15033 = vst [vmem:[#allocation215_spill] sm:$0xff] %v12487_v56  ;;  %v12493_v0 = vld [vmem:[%s14923_s24 + $0x378] sm:$0xff]  ;;  %v12496_v1 = vld [vmem:[%s14923_s24 + $0x380] sm:$0xff] }
 0x236   :  { %15034 = vst [vmem:[#allocation216_spill] sm:$0xff] %v12490_v40  ;;  %15035 = vst [vmem:[#allocation217_spill] sm:$0xff] %v12493_v0  ;;  %v12499_v48 = vld [vmem:[%s14923_s24 + $0x388] sm:$0xff]  ;;  %v12502_v57 = vld [vmem:[%s14923_s24 + $0x390] sm:$0xff] }
 0x237   :  { %15036 = vst [vmem:[#allocation218_spill] sm:$0xff] %v12496_v1  ;;  %15037 = vst [vmem:[#allocation219_spill] sm:$0xff] %v12499_v48  ;;  %v12505_v41 = vld [vmem:[%s14923_s24 + $0x398] sm:$0xff]  ;;  %v12508_v55 = vld [vmem:[%s14923_s24 + $0x3a0] sm:$0xff] }
 0x238   :  { %15038 = vst [vmem:[#allocation220_spill] sm:$0xff] %v12502_v57  ;;  %15039 = vst [vmem:[#allocation221_spill] sm:$0xff] %v12505_v41  ;;  %v12511_v49 = vld [vmem:[%s14923_s24 + $0x3a8] sm:$0xff]  ;;  %v12514_v56 = vld [vmem:[%s14923_s24 + $0x3b0] sm:$0xff] }
 0x239   :  { %15040 = vst [vmem:[#allocation222_spill] sm:$0xff] %v12508_v55  ;;  %15041 = vst [vmem:[#allocation223_spill] sm:$0xff] %v12511_v49  ;;  %v12517_v39 = vld [vmem:[%s14923_s24 + $0x3b8] sm:$0xff]  ;;  %v12520_v40 = vld [vmem:[%s14923_s24 + $0x3c0] sm:$0xff] }
 0x23a   :  { %15042 = vst [vmem:[#allocation224_spill] sm:$0xff] %v12514_v56  ;;  %15043 = vst [vmem:[#allocation225_spill] sm:$0xff] %v12517_v39  ;;  %v12523_v0 = vld [vmem:[%s14923_s24 + $0x3c8] sm:$0xff]  ;;  %v12526_v63 = vld [vmem:[%s14923_s24 + $0x3d0] sm:$0xff] }
 0x23b   :  { %15044 = vst [vmem:[#allocation226_spill] sm:$0xff] %v12520_v40  ;;  %15045 = vst [vmem:[#allocation227_spill] sm:$0xff] %v12523_v0  ;;  %v12529_v1 = vld [vmem:[%s14923_s24 + $0x3d8] sm:$0xff]  ;;  %v12532_v48 = vld [vmem:[%s14923_s24 + $0x3e0] sm:$0xff] }
 0x23c   :  { %15046 = vst [vmem:[#allocation228_spill] sm:$0xff] %v12526_v63  ;;  %15047 = vst [vmem:[#allocation229_spill] sm:$0xff] %v12529_v1  ;;  %v12535_v57 = vld [vmem:[%s14923_s24 + $0x3e8] sm:$0xff]  ;;  %v12538_v41 = vld [vmem:[%s14923_s24 + $0x3f0] sm:$0xff] }
 0x23d   :  { %15048 = vst [vmem:[#allocation230_spill] sm:$0xff] %v12532_v48  ;;  %15049 = vst [vmem:[#allocation231_spill] sm:$0xff] %v12535_v57  ;;  %v12541_v55 = vld [vmem:[%s14923_s24 + $0x3f8] sm:$0xff] }
 0x23e   :  { %15050 = vst [vmem:[#allocation232_spill] sm:$0xff] %v12538_v41  ;;  %15051 = vst [vmem:[#allocation233_spill] sm:$0xff] %v12541_v55 }
 0x23f   :  { %1086 = vsyncadd [#allocation6 + $0x1], 16384  ;;  %s15052_s7 = sld [smem:[#allocation65_spill]] }
 0x245   :  { %v1105_v39 = vld [vmem:[%s15052_s7] sm:$0xf]  ;;  %v1109_v49 = vld [vmem:[%s15052_s7 + $0x4] sm:$0xf]  ;;  %v1113_v57 = vld [vmem:[%s15052_s7 + $0x8] sm:$0xf] }
 0x246   :  { %v1107_v56 = vld [vmem:[%s15052_s7 + $0x40] sm:$0xf]  ;;  %1106 = vst [vmem:[#allocation4] sm:$0xf] %v1105_v39  ;;  %v1111_v41 = vld [vmem:[%s15052_s7 + $0x44] sm:$0xf] }
 0x247   :  { %1108 = vst [vmem:[#allocation4 + $0x4] sm:$0xf] %v1107_v56  ;;  %1110 = vst [vmem:[#allocation4 + $0x8] sm:$0xf] %v1109_v49  ;;  %v1115_v55 = vld [vmem:[%s15052_s7 + $0x48] sm:$0xf] }
 0x248   :  { %1112 = vst [vmem:[#allocation4 + $0xc] sm:$0xf] %v1111_v41  ;;  %1114 = vst [vmem:[#allocation4 + $0x10] sm:$0xf] %v1113_v57  ;;  %v1117_v48 = vld [vmem:[%s15052_s7 + $0xc] sm:$0xf] }
 0x249   :  { %v1119_v1 = vld [vmem:[%s15052_s7 + $0x4c] sm:$0xf]  ;;  %1116 = vst [vmem:[#allocation4 + $0x14] sm:$0xf] %v1115_v55  ;;  %1118 = vst [vmem:[#allocation4 + $0x18] sm:$0xf] %v1117_v48 }
 0x24a   :  { %1120 = vst [vmem:[#allocation4 + $0x1c] sm:$0xf] %v1119_v1  ;;  %v1121_v39 = vld [vmem:[%s15052_s7 + $0x10] sm:$0xf]  ;;  %v1125_v63 = vld [vmem:[%s15052_s7 + $0x14] sm:$0xf] }
 0x24b   :  { %v1123_v56 = vld [vmem:[%s15052_s7 + $0x50] sm:$0xf]  ;;  %1122 = vst [vmem:[#allocation4 + $0x20] sm:$0xf] %v1121_v39  ;;  %1126 = vst [vmem:[#allocation4 + $0x28] sm:$0xf] %v1125_v63 }
 0x24c   :  { %1124 = vst [vmem:[#allocation4 + $0x24] sm:$0xf] %v1123_v56  ;;  %v1127_v41 = vld [vmem:[%s15052_s7 + $0x54] sm:$0xf]  ;;  %v1129_v49 = vld [vmem:[%s15052_s7 + $0x18] sm:$0xf] }
 0x24d   :  { %v1131_v57 = vld [vmem:[%s15052_s7 + $0x58] sm:$0xf]  ;;  %1128 = vst [vmem:[#allocation4 + $0x2c] sm:$0xf] %v1127_v41  ;;  %1130 = vst [vmem:[#allocation4 + $0x30] sm:$0xf] %v1129_v49 }
 0x24e   :  { %1132 = vst [vmem:[#allocation4 + $0x34] sm:$0xf] %v1131_v57  ;;  %v1133_v48 = vld [vmem:[%s15052_s7 + $0x1c] sm:$0xf]  ;;  %v1137_v1 = vld [vmem:[%s15052_s7 + $0x20] sm:$0xf] }
 0x24f   :  { %v1135_v55 = vld [vmem:[%s15052_s7 + $0x5c] sm:$0xf]  ;;  %1134 = vst [vmem:[#allocation4 + $0x38] sm:$0xf] %v1133_v48  ;;  %1138 = vst [vmem:[#allocation4 + $0x40] sm:$0xf] %v1137_v1 }
 0x250   :  { %1136 = vst [vmem:[#allocation4 + $0x3c] sm:$0xf] %v1135_v55  ;;  %v1139_v39 = vld [vmem:[%s15052_s7 + $0x60] sm:$0xf]  ;;  %v1141_v63 = vld [vmem:[%s15052_s7 + $0x24] sm:$0xf] }
 0x251   :  { %v1143_v56 = vld [vmem:[%s15052_s7 + $0x64] sm:$0xf]  ;;  %1140 = vst [vmem:[#allocation4 + $0x44] sm:$0xf] %v1139_v39  ;;  %1142 = vst [vmem:[#allocation4 + $0x48] sm:$0xf] %v1141_v63 }
 0x252   :  { %1144 = vst [vmem:[#allocation4 + $0x4c] sm:$0xf] %v1143_v56  ;;  %v1145_v41 = vld [vmem:[%s15052_s7 + $0x28] sm:$0xf]  ;;  %v1149_v57 = vld [vmem:[%s15052_s7 + $0x2c] sm:$0xf] }
 0x253   :  { %v1147_v49 = vld [vmem:[%s15052_s7 + $0x68] sm:$0xf]  ;;  %1146 = vst [vmem:[#allocation4 + $0x50] sm:$0xf] %v1145_v41  ;;  %1150 = vst [vmem:[#allocation4 + $0x58] sm:$0xf] %v1149_v57 }
 0x254   :  { %1148 = vst [vmem:[#allocation4 + $0x54] sm:$0xf] %v1147_v49  ;;  %v1151_v48 = vld [vmem:[%s15052_s7 + $0x6c] sm:$0xf]  ;;  %v1153_v55 = vld [vmem:[%s15052_s7 + $0x30] sm:$0xf] }
 0x255   :  { %v1155_v1 = vld [vmem:[%s15052_s7 + $0x70] sm:$0xf]  ;;  %1152 = vst [vmem:[#allocation4 + $0x5c] sm:$0xf] %v1151_v48  ;;  %1154 = vst [vmem:[#allocation4 + $0x60] sm:$0xf] %v1153_v55 }
 0x256   :  { %1156 = vst [vmem:[#allocation4 + $0x64] sm:$0xf] %v1155_v1  ;;  %v1157_v39 = vld [vmem:[%s15052_s7 + $0x34] sm:$0xf]  ;;  %v1161_v56 = vld [vmem:[%s15052_s7 + $0x38] sm:$0xf] }
 0x257   :  { %v1159_v63 = vld [vmem:[%s15052_s7 + $0x74] sm:$0xf]  ;;  %1158 = vst [vmem:[#allocation4 + $0x68] sm:$0xf] %v1157_v39  ;;  %1162 = vst [vmem:[#allocation4 + $0x70] sm:$0xf] %v1161_v56 }
 0x258   :  { %1160 = vst [vmem:[#allocation4 + $0x6c] sm:$0xf] %v1159_v63  ;;  %v1163_v41 = vld [vmem:[%s15052_s7 + $0x78] sm:$0xf]  ;;  %v1165_v49 = vld [vmem:[%s15052_s7 + $0x3c] sm:$0xf] }
 0x259   :  { %v1167_v57 = vld [vmem:[%s15052_s7 + $0x7c] sm:$0xf]  ;;  %1164 = vst [vmem:[#allocation4 + $0x74] sm:$0xf] %v1163_v41  ;;  %1166 = vst [vmem:[#allocation4 + $0x78] sm:$0xf] %v1165_v49 }
 0x25a   :  { %1168 = vst [vmem:[#allocation4 + $0x7c] sm:$0xf] %v1167_v57  ;;  %v1169_v48 = vld [vmem:[%s15052_s7 + $0x80] sm:$0xf]  ;;  %v1173_v1 = vld [vmem:[%s15052_s7 + $0x84] sm:$0xf] }
 0x25b   :  { %v1171_v55 = vld [vmem:[%s15052_s7 + $0xc0] sm:$0xf]  ;;  %1170 = vst [vmem:[#allocation4 + $0x80] sm:$0xf] %v1169_v48  ;;  %1174 = vst [vmem:[#allocation4 + $0x88] sm:$0xf] %v1173_v1 }
 0x25c   :  { %1172 = vst [vmem:[#allocation4 + $0x84] sm:$0xf] %v1171_v55  ;;  %v1175_v39 = vld [vmem:[%s15052_s7 + $0xc4] sm:$0xf]  ;;  %v1177_v63 = vld [vmem:[%s15052_s7 + $0x88] sm:$0xf] }
 0x25d   :  { %v1179_v56 = vld [vmem:[%s15052_s7 + $0xc8] sm:$0xf]  ;;  %1176 = vst [vmem:[#allocation4 + $0x8c] sm:$0xf] %v1175_v39  ;;  %1178 = vst [vmem:[#allocation4 + $0x90] sm:$0xf] %v1177_v63 }
 0x25e   :  { %1180 = vst [vmem:[#allocation4 + $0x94] sm:$0xf] %v1179_v56  ;;  %v1181_v41 = vld [vmem:[%s15052_s7 + $0x8c] sm:$0xf]  ;;  %v1185_v57 = vld [vmem:[%s15052_s7 + $0x90] sm:$0xf] }
 0x25f   :  { %v1183_v49 = vld [vmem:[%s15052_s7 + $0xcc] sm:$0xf]  ;;  %1182 = vst [vmem:[#allocation4 + $0x98] sm:$0xf] %v1181_v41  ;;  %1186 = vst [vmem:[#allocation4 + $0xa0] sm:$0xf] %v1185_v57 }
 0x260   :  { %1184 = vst [vmem:[#allocation4 + $0x9c] sm:$0xf] %v1183_v49  ;;  %v1187_v48 = vld [vmem:[%s15052_s7 + $0xd0] sm:$0xf]  ;;  %v1189_v55 = vld [vmem:[%s15052_s7 + $0x94] sm:$0xf] }
 0x261   :  { %v1191_v1 = vld [vmem:[%s15052_s7 + $0xd4] sm:$0xf]  ;;  %1188 = vst [vmem:[#allocation4 + $0xa4] sm:$0xf] %v1187_v48  ;;  %1190 = vst [vmem:[#allocation4 + $0xa8] sm:$0xf] %v1189_v55 }
 0x262   :  { %1192 = vst [vmem:[#allocation4 + $0xac] sm:$0xf] %v1191_v1  ;;  %v1193_v39 = vld [vmem:[%s15052_s7 + $0x98] sm:$0xf]  ;;  %v1197_v56 = vld [vmem:[%s15052_s7 + $0x9c] sm:$0xf] }
 0x263   :  { %v1195_v63 = vld [vmem:[%s15052_s7 + $0xd8] sm:$0xf]  ;;  %1194 = vst [vmem:[#allocation4 + $0xb0] sm:$0xf] %v1193_v39  ;;  %1198 = vst [vmem:[#allocation4 + $0xb8] sm:$0xf] %v1197_v56 }
 0x264   :  { %1196 = vst [vmem:[#allocation4 + $0xb4] sm:$0xf] %v1195_v63  ;;  %v1199_v41 = vld [vmem:[%s15052_s7 + $0xdc] sm:$0xf]  ;;  %v1201_v49 = vld [vmem:[%s15052_s7 + $0xa0] sm:$0xf] }
 0x265   :  { %v1203_v57 = vld [vmem:[%s15052_s7 + $0xe0] sm:$0xf]  ;;  %1200 = vst [vmem:[#allocation4 + $0xbc] sm:$0xf] %v1199_v41  ;;  %1202 = vst [vmem:[#allocation4 + $0xc0] sm:$0xf] %v1201_v49 }
 0x266   :  { %1204 = vst [vmem:[#allocation4 + $0xc4] sm:$0xf] %v1203_v57  ;;  %v1205_v48 = vld [vmem:[%s15052_s7 + $0xa4] sm:$0xf]  ;;  %v1209_v1 = vld [vmem:[%s15052_s7 + $0xa8] sm:$0xf] }
 0x267   :  { %v1207_v55 = vld [vmem:[%s15052_s7 + $0xe4] sm:$0xf]  ;;  %1206 = vst [vmem:[#allocation4 + $0xc8] sm:$0xf] %v1205_v48  ;;  %1210 = vst [vmem:[#allocation4 + $0xd0] sm:$0xf] %v1209_v1 }
 0x268   :  { %1208 = vst [vmem:[#allocation4 + $0xcc] sm:$0xf] %v1207_v55  ;;  %v1211_v39 = vld [vmem:[%s15052_s7 + $0xe8] sm:$0xf]  ;;  %v1213_v63 = vld [vmem:[%s15052_s7 + $0xac] sm:$0xf] }
 0x269   :  { %v1215_v56 = vld [vmem:[%s15052_s7 + $0xec] sm:$0xf]  ;;  %1212 = vst [vmem:[#allocation4 + $0xd4] sm:$0xf] %v1211_v39  ;;  %1214 = vst [vmem:[#allocation4 + $0xd8] sm:$0xf] %v1213_v63 }
 0x26a   :  { %1216 = vst [vmem:[#allocation4 + $0xdc] sm:$0xf] %v1215_v56  ;;  %v1217_v41 = vld [vmem:[%s15052_s7 + $0xb0] sm:$0xf]  ;;  %v1221_v57 = vld [vmem:[%s15052_s7 + $0xb4] sm:$0xf] }
 0x26b   :  { %v1219_v49 = vld [vmem:[%s15052_s7 + $0xf0] sm:$0xf]  ;;  %1218 = vst [vmem:[#allocation4 + $0xe0] sm:$0xf] %v1217_v41  ;;  %1222 = vst [vmem:[#allocation4 + $0xe8] sm:$0xf] %v1221_v57 }
 0x26c   :  { %1220 = vst [vmem:[#allocation4 + $0xe4] sm:$0xf] %v1219_v49  ;;  %v1223_v0 = vld [vmem:[%s15052_s7 + $0xf4] sm:$0xf]  ;;  %v1225_v48 = vld [vmem:[%s15052_s7 + $0xb8] sm:$0xf] }
 0x26d   :  { %v1227_v40 = vld [vmem:[%s15052_s7 + $0xf8] sm:$0xf]  ;;  %1224 = vst [vmem:[#allocation4 + $0xec] sm:$0xf] %v1223_v0  ;;  %1226 = vst [vmem:[#allocation4 + $0xf0] sm:$0xf] %v1225_v48 }
 0x26e   :  { %1228 = vst [vmem:[#allocation4 + $0xf4] sm:$0xf] %v1227_v40  ;;  %v1229_v55 = vld [vmem:[%s15052_s7 + $0xbc] sm:$0xf] }
 0x26f   :  { %v1231_v1 = vld [vmem:[%s15052_s7 + $0xfc] sm:$0xf]  ;;  %1230 = vst [vmem:[#allocation4 + $0xf8] sm:$0xf] %v1229_v55 }
 0x270   :  { %1232 = vst [vmem:[#allocation4 + $0xfc] sm:$0xf] %v1231_v1 }
 0x271   :  { %1391 = vsyncadd [#allocation6 + $0x2], 4096  ;;  %s15053_s17 = sld [smem:[#allocation66_spill]] }
 0x277   :  { %v12608_v40 = vld [vmem:[%s15053_s17] sm:$0xff]  ;;  %v12611_v0 = vld [vmem:[%s15053_s17 + $0x8] sm:$0xff]  ;;  %v12614_v39 = vld [vmem:[%s15053_s17 + $0x10] sm:$0xff] }
 0x278   :  { %15054 = vst [vmem:[#allocation234_spill] sm:$0xff] %v12608_v40  ;;  %15055 = vst [vmem:[#allocation235_spill] sm:$0xff] %v12611_v0  ;;  %v12617_v63 = vld [vmem:[%s15053_s17 + $0x18] sm:$0xff]  ;;  %v12620_v56 = vld [vmem:[%s15053_s17 + $0x20] sm:$0xff] }
 0x279   :  { %15056 = vst [vmem:[#allocation236_spill] sm:$0xff] %v12614_v39  ;;  %15057 = vst [vmem:[#allocation237_spill] sm:$0xff] %v12617_v63  ;;  %v12623_v41 = vld [vmem:[%s15053_s17 + $0x28] sm:$0xff]  ;;  %v12626_v49 = vld [vmem:[%s15053_s17 + $0x30] sm:$0xff] }
 0x27a   :  { %15058 = vst [vmem:[#allocation238_spill] sm:$0xff] %v12620_v56  ;;  %15059 = vst [vmem:[#allocation239_spill] sm:$0xff] %v12623_v41  ;;  %v12629_v57 = vld [vmem:[%s15053_s17 + $0x38] sm:$0xff]  ;;  %v12632_v48 = vld [vmem:[%s15053_s17 + $0x40] sm:$0xff] }
 0x27b   :  { %15060 = vst [vmem:[#allocation240_spill] sm:$0xff] %v12626_v49  ;;  %15061 = vst [vmem:[#allocation241_spill] sm:$0xff] %v12629_v57  ;;  %v12635_v55 = vld [vmem:[%s15053_s17 + $0x48] sm:$0xff]  ;;  %v12638_v1 = vld [vmem:[%s15053_s17 + $0x50] sm:$0xff] }
 0x27c   :  { %15062 = vst [vmem:[#allocation242_spill] sm:$0xff] %v12632_v48  ;;  %15063 = vst [vmem:[#allocation243_spill] sm:$0xff] %v12635_v55  ;;  %v12641_v56 = vld [vmem:[%s15053_s17 + $0x58] sm:$0xff]  ;;  %v12644_v41 = vld [vmem:[%s15053_s17 + $0x60] sm:$0xff] }
 0x27d   :  { %15064 = vst [vmem:[#allocation244_spill] sm:$0xff] %v12638_v1  ;;  %15065 = vst [vmem:[#allocation245_spill] sm:$0xff] %v12641_v56  ;;  %v12647_v49 = vld [vmem:[%s15053_s17 + $0x68] sm:$0xff]  ;;  %v12650_v57 = vld [vmem:[%s15053_s17 + $0x70] sm:$0xff] }
 0x27e   :  { %15066 = vst [vmem:[#allocation246_spill] sm:$0xff] %v12644_v41  ;;  %15067 = vst [vmem:[#allocation247_spill] sm:$0xff] %v12647_v49  ;;  %v12653_v63 = vld [vmem:[%s15053_s17 + $0x78] sm:$0xff]  ;;  %v12656_v39 = vld [vmem:[%s15053_s17 + $0x80] sm:$0xff] }
 0x27f   :  { %15068 = vst [vmem:[#allocation248_spill] sm:$0xff] %v12650_v57  ;;  %15069 = vst [vmem:[#allocation249_spill] sm:$0xff] %v12653_v63  ;;  %v12659_v1 = vld [vmem:[%s15053_s17 + $0x88] sm:$0xff]  ;;  %v12662_v56 = vld [vmem:[%s15053_s17 + $0x90] sm:$0xff] }
 0x280   :  { %15070 = vst [vmem:[#allocation250_spill] sm:$0xff] %v12656_v39  ;;  %15071 = vst [vmem:[#allocation251_spill] sm:$0xff] %v12659_v1  ;;  %v12665_v41 = vld [vmem:[%s15053_s17 + $0x98] sm:$0xff]  ;;  %v12668_v49 = vld [vmem:[%s15053_s17 + $0xa0] sm:$0xff] }
 0x281   :  { %15072 = vst [vmem:[#allocation252_spill] sm:$0xff] %v12662_v56  ;;  %15073 = vst [vmem:[#allocation253_spill] sm:$0xff] %v12665_v41  ;;  %v12671_v57 = vld [vmem:[%s15053_s17 + $0xa8] sm:$0xff]  ;;  %v12674_v63 = vld [vmem:[%s15053_s17 + $0xb0] sm:$0xff] }
 0x282   :  { %15074 = vst [vmem:[#allocation254_spill] sm:$0xff] %v12668_v49  ;;  %15075 = vst [vmem:[#allocation255_spill] sm:$0xff] %v12671_v57  ;;  %v12677_v0 = vld [vmem:[%s15053_s17 + $0xb8] sm:$0xff]  ;;  %v12680_v1 = vld [vmem:[%s15053_s17 + $0xc0] sm:$0xff] }
 0x283   :  { %15076 = vst [vmem:[#allocation256_spill] sm:$0xff] %v12674_v63  ;;  %15077 = vst [vmem:[#allocation257_spill] sm:$0xff] %v12677_v0  ;;  %v12683_v56 = vld [vmem:[%s15053_s17 + $0xc8] sm:$0xff]  ;;  %v12686_v41 = vld [vmem:[%s15053_s17 + $0xd0] sm:$0xff] }
 0x284   :  { %15078 = vst [vmem:[#allocation258_spill] sm:$0xff] %v12680_v1  ;;  %15079 = vst [vmem:[#allocation259_spill] sm:$0xff] %v12683_v56  ;;  %v12689_v49 = vld [vmem:[%s15053_s17 + $0xd8] sm:$0xff]  ;;  %v12692_v57 = vld [vmem:[%s15053_s17 + $0xe0] sm:$0xff] }
 0x285   :  { %15080 = vst [vmem:[#allocation260_spill] sm:$0xff] %v12686_v41  ;;  %15081 = vst [vmem:[#allocation261_spill] sm:$0xff] %v12689_v49  ;;  %v12695_v63 = vld [vmem:[%s15053_s17 + $0xe8] sm:$0xff]  ;;  %v12698_v0 = vld [vmem:[%s15053_s17 + $0xf0] sm:$0xff] }
 0x286   :  { %15082 = vst [vmem:[#allocation262_spill] sm:$0xff] %v12692_v57  ;;  %15083 = vst [vmem:[#allocation263_spill] sm:$0xff] %v12695_v63  ;;  %v12701_v55 = vld [vmem:[%s15053_s17 + $0xf8] sm:$0xff]  ;;  %v12704_v56 = vld [vmem:[%s15053_s17 + $0x100] sm:$0xff] }
 0x287   :  { %15084 = vst [vmem:[#allocation264_spill] sm:$0xff] %v12698_v0  ;;  %15085 = vst [vmem:[#allocation265_spill] sm:$0xff] %v12701_v55  ;;  %v12707_v41 = vld [vmem:[%s15053_s17 + $0x108] sm:$0xff]  ;;  %v12710_v49 = vld [vmem:[%s15053_s17 + $0x110] sm:$0xff] }
 0x288   :  { %15086 = vst [vmem:[#allocation266_spill] sm:$0xff] %v12704_v56  ;;  %15087 = vst [vmem:[#allocation267_spill] sm:$0xff] %v12707_v41  ;;  %v12713_v57 = vld [vmem:[%s15053_s17 + $0x118] sm:$0xff]  ;;  %v12716_v63 = vld [vmem:[%s15053_s17 + $0x120] sm:$0xff] }
 0x289   :  { %15088 = vst [vmem:[#allocation268_spill] sm:$0xff] %v12710_v49  ;;  %15089 = vst [vmem:[#allocation269_spill] sm:$0xff] %v12713_v57  ;;  %v12719_v0 = vld [vmem:[%s15053_s17 + $0x128] sm:$0xff]  ;;  %v12722_v55 = vld [vmem:[%s15053_s17 + $0x130] sm:$0xff] }
 0x28a   :  { %15090 = vst [vmem:[#allocation270_spill] sm:$0xff] %v12716_v63  ;;  %15091 = vst [vmem:[#allocation271_spill] sm:$0xff] %v12719_v0  ;;  %v12725_v56 = vld [vmem:[%s15053_s17 + $0x138] sm:$0xff]  ;;  %v12728_v41 = vld [vmem:[%s15053_s17 + $0x140] sm:$0xff] }
 0x28b   :  { %15092 = vst [vmem:[#allocation272_spill] sm:$0xff] %v12722_v55  ;;  %15093 = vst [vmem:[#allocation273_spill] sm:$0xff] %v12725_v56  ;;  %v12731_v49 = vld [vmem:[%s15053_s17 + $0x148] sm:$0xff]  ;;  %v12734_v57 = vld [vmem:[%s15053_s17 + $0x150] sm:$0xff] }
 0x28c   :  { %15094 = vst [vmem:[#allocation274_spill] sm:$0xff] %v12728_v41  ;;  %15095 = vst [vmem:[#allocation275_spill] sm:$0xff] %v12731_v49  ;;  %v12737_v63 = vld [vmem:[%s15053_s17 + $0x158] sm:$0xff]  ;;  %v12740_v0 = vld [vmem:[%s15053_s17 + $0x160] sm:$0xff] }
 0x28d   :  { %15096 = vst [vmem:[#allocation276_spill] sm:$0xff] %v12734_v57  ;;  %15097 = vst [vmem:[#allocation277_spill] sm:$0xff] %v12737_v63  ;;  %v12743_v55 = vld [vmem:[%s15053_s17 + $0x168] sm:$0xff]  ;;  %v12746_v56 = vld [vmem:[%s15053_s17 + $0x170] sm:$0xff] }
 0x28e   :  { %15098 = vst [vmem:[#allocation278_spill] sm:$0xff] %v12740_v0  ;;  %15099 = vst [vmem:[#allocation279_spill] sm:$0xff] %v12743_v55  ;;  %v12749_v41 = vld [vmem:[%s15053_s17 + $0x178] sm:$0xff]  ;;  %v12752_v49 = vld [vmem:[%s15053_s17 + $0x180] sm:$0xff] }
 0x28f   :  { %15100 = vst [vmem:[#allocation280_spill] sm:$0xff] %v12746_v56  ;;  %15101 = vst [vmem:[#allocation281_spill] sm:$0xff] %v12749_v41  ;;  %v12755_v57 = vld [vmem:[%s15053_s17 + $0x188] sm:$0xff]  ;;  %v12758_v63 = vld [vmem:[%s15053_s17 + $0x190] sm:$0xff] }
 0x290   :  { %15102 = vst [vmem:[#allocation282_spill] sm:$0xff] %v12752_v49  ;;  %15103 = vst [vmem:[#allocation283_spill] sm:$0xff] %v12755_v57  ;;  %v12761_v0 = vld [vmem:[%s15053_s17 + $0x198] sm:$0xff]  ;;  %v12764_v55 = vld [vmem:[%s15053_s17 + $0x1a0] sm:$0xff] }
 0x291   :  { %15104 = vst [vmem:[#allocation284_spill] sm:$0xff] %v12758_v63  ;;  %15105 = vst [vmem:[#allocation285_spill] sm:$0xff] %v12761_v0  ;;  %v12767_v56 = vld [vmem:[%s15053_s17 + $0x1a8] sm:$0xff]  ;;  %v12770_v41 = vld [vmem:[%s15053_s17 + $0x1b0] sm:$0xff] }
 0x292   :  { %15106 = vst [vmem:[#allocation286_spill] sm:$0xff] %v12764_v55  ;;  %15107 = vst [vmem:[#allocation287_spill] sm:$0xff] %v12767_v56  ;;  %v12773_v49 = vld [vmem:[%s15053_s17 + $0x1b8] sm:$0xff]  ;;  %v12776_v57 = vld [vmem:[%s15053_s17 + $0x1c0] sm:$0xff] }
 0x293   :  { %15108 = vst [vmem:[#allocation288_spill] sm:$0xff] %v12770_v41  ;;  %15109 = vst [vmem:[#allocation289_spill] sm:$0xff] %v12773_v49  ;;  %v12779_v63 = vld [vmem:[%s15053_s17 + $0x1c8] sm:$0xff]  ;;  %v12782_v0 = vld [vmem:[%s15053_s17 + $0x1d0] sm:$0xff] }
 0x294   :  { %15110 = vst [vmem:[#allocation290_spill] sm:$0xff] %v12776_v57  ;;  %15111 = vst [vmem:[#allocation291_spill] sm:$0xff] %v12779_v63  ;;  %v12785_v55 = vld [vmem:[%s15053_s17 + $0x1d8] sm:$0xff]  ;;  %v12788_v56 = vld [vmem:[%s15053_s17 + $0x1e0] sm:$0xff] }
 0x295   :  { %15112 = vst [vmem:[#allocation292_spill] sm:$0xff] %v12782_v0  ;;  %15113 = vst [vmem:[#allocation293_spill] sm:$0xff] %v12785_v55  ;;  %v12791_v41 = vld [vmem:[%s15053_s17 + $0x1e8] sm:$0xff]  ;;  %v12794_v49 = vld [vmem:[%s15053_s17 + $0x1f0] sm:$0xff] }
 0x296   :  { %15114 = vst [vmem:[#allocation294_spill] sm:$0xff] %v12788_v56  ;;  %15115 = vst [vmem:[#allocation295_spill] sm:$0xff] %v12791_v41  ;;  %v12797_v57 = vld [vmem:[%s15053_s17 + $0x1f8] sm:$0xff]  ;;  %v12800_v63 = vld [vmem:[%s15053_s17 + $0x200] sm:$0xff] }
 0x297   :  { %15116 = vst [vmem:[#allocation296_spill] sm:$0xff] %v12794_v49  ;;  %15117 = vst [vmem:[#allocation297_spill] sm:$0xff] %v12797_v57  ;;  %v12803_v0 = vld [vmem:[%s15053_s17 + $0x208] sm:$0xff]  ;;  %v12806_v55 = vld [vmem:[%s15053_s17 + $0x210] sm:$0xff] }
 0x298   :  { %15118 = vst [vmem:[#allocation298_spill] sm:$0xff] %v12800_v63  ;;  %15119 = vst [vmem:[#allocation299_spill] sm:$0xff] %v12803_v0  ;;  %v12809_v56 = vld [vmem:[%s15053_s17 + $0x218] sm:$0xff]  ;;  %v12812_v41 = vld [vmem:[%s15053_s17 + $0x220] sm:$0xff] }
 0x299   :  { %15120 = vst [vmem:[#allocation300_spill] sm:$0xff] %v12806_v55  ;;  %15121 = vst [vmem:[#allocation301_spill] sm:$0xff] %v12809_v56  ;;  %v12815_v49 = vld [vmem:[%s15053_s17 + $0x228] sm:$0xff]  ;;  %v12818_v57 = vld [vmem:[%s15053_s17 + $0x230] sm:$0xff] }
 0x29a   :  { %15122 = vst [vmem:[#allocation302_spill] sm:$0xff] %v12812_v41  ;;  %15123 = vst [vmem:[#allocation303_spill] sm:$0xff] %v12815_v49  ;;  %v12821_v63 = vld [vmem:[%s15053_s17 + $0x238] sm:$0xff]  ;;  %v12824_v0 = vld [vmem:[%s15053_s17 + $0x240] sm:$0xff] }
 0x29b   :  { %15124 = vst [vmem:[#allocation304_spill] sm:$0xff] %v12818_v57  ;;  %15125 = vst [vmem:[#allocation305_spill] sm:$0xff] %v12821_v63  ;;  %v12827_v55 = vld [vmem:[%s15053_s17 + $0x248] sm:$0xff]  ;;  %v12830_v56 = vld [vmem:[%s15053_s17 + $0x250] sm:$0xff] }
 0x29c   :  { %15126 = vst [vmem:[#allocation306_spill] sm:$0xff] %v12824_v0  ;;  %15127 = vst [vmem:[#allocation307_spill] sm:$0xff] %v12827_v55  ;;  %v12833_v41 = vld [vmem:[%s15053_s17 + $0x258] sm:$0xff]  ;;  %v12836_v49 = vld [vmem:[%s15053_s17 + $0x260] sm:$0xff] }
 0x29d   :  { %15128 = vst [vmem:[#allocation308_spill] sm:$0xff] %v12830_v56  ;;  %15129 = vst [vmem:[#allocation309_spill] sm:$0xff] %v12833_v41  ;;  %v12839_v57 = vld [vmem:[%s15053_s17 + $0x268] sm:$0xff]  ;;  %v12842_v63 = vld [vmem:[%s15053_s17 + $0x270] sm:$0xff] }
 0x29e   :  { %15130 = vst [vmem:[#allocation310_spill] sm:$0xff] %v12836_v49  ;;  %15131 = vst [vmem:[#allocation311_spill] sm:$0xff] %v12839_v57  ;;  %v12845_v0 = vld [vmem:[%s15053_s17 + $0x278] sm:$0xff]  ;;  %v12848_v55 = vld [vmem:[%s15053_s17 + $0x280] sm:$0xff] }
 0x29f   :  { %15132 = vst [vmem:[#allocation312_spill] sm:$0xff] %v12842_v63  ;;  %15133 = vst [vmem:[#allocation313_spill] sm:$0xff] %v12845_v0  ;;  %v12851_v56 = vld [vmem:[%s15053_s17 + $0x288] sm:$0xff]  ;;  %v12854_v41 = vld [vmem:[%s15053_s17 + $0x290] sm:$0xff] }
 0x2a0   :  { %15134 = vst [vmem:[#allocation314_spill] sm:$0xff] %v12848_v55  ;;  %15135 = vst [vmem:[#allocation315_spill] sm:$0xff] %v12851_v56  ;;  %v12857_v49 = vld [vmem:[%s15053_s17 + $0x298] sm:$0xff]  ;;  %v12860_v57 = vld [vmem:[%s15053_s17 + $0x2a0] sm:$0xff] }
 0x2a1   :  { %15136 = vst [vmem:[#allocation316_spill] sm:$0xff] %v12854_v41  ;;  %15137 = vst [vmem:[#allocation317_spill] sm:$0xff] %v12857_v49  ;;  %v12863_v63 = vld [vmem:[%s15053_s17 + $0x2a8] sm:$0xff]  ;;  %v12866_v0 = vld [vmem:[%s15053_s17 + $0x2b0] sm:$0xff] }
 0x2a2   :  { %15138 = vst [vmem:[#allocation318_spill] sm:$0xff] %v12860_v57  ;;  %15139 = vst [vmem:[#allocation319_spill] sm:$0xff] %v12863_v63  ;;  %v12869_v55 = vld [vmem:[%s15053_s17 + $0x2b8] sm:$0xff]  ;;  %v12872_v56 = vld [vmem:[%s15053_s17 + $0x2c0] sm:$0xff] }
 0x2a3   :  { %15140 = vst [vmem:[#allocation320_spill] sm:$0xff] %v12866_v0  ;;  %15141 = vst [vmem:[#allocation321_spill] sm:$0xff] %v12869_v55  ;;  %v12875_v41 = vld [vmem:[%s15053_s17 + $0x2c8] sm:$0xff]  ;;  %v12878_v49 = vld [vmem:[%s15053_s17 + $0x2d0] sm:$0xff] }
 0x2a4   :  { %15142 = vst [vmem:[#allocation322_spill] sm:$0xff] %v12872_v56  ;;  %15143 = vst [vmem:[#allocation323_spill] sm:$0xff] %v12875_v41  ;;  %v12881_v57 = vld [vmem:[%s15053_s17 + $0x2d8] sm:$0xff]  ;;  %v12884_v63 = vld [vmem:[%s15053_s17 + $0x2e0] sm:$0xff] }
 0x2a5   :  { %15144 = vst [vmem:[#allocation324_spill] sm:$0xff] %v12878_v49  ;;  %15145 = vst [vmem:[#allocation325_spill] sm:$0xff] %v12881_v57  ;;  %v12887_v0 = vld [vmem:[%s15053_s17 + $0x2e8] sm:$0xff]  ;;  %v12890_v55 = vld [vmem:[%s15053_s17 + $0x2f0] sm:$0xff] }
 0x2a6   :  { %15146 = vst [vmem:[#allocation326_spill] sm:$0xff] %v12884_v63  ;;  %15147 = vst [vmem:[#allocation327_spill] sm:$0xff] %v12887_v0  ;;  %v12893_v56 = vld [vmem:[%s15053_s17 + $0x2f8] sm:$0xff]  ;;  %v12896_v41 = vld [vmem:[%s15053_s17 + $0x300] sm:$0xff] }
 0x2a7   :  { %15148 = vst [vmem:[#allocation328_spill] sm:$0xff] %v12890_v55  ;;  %15149 = vst [vmem:[#allocation329_spill] sm:$0xff] %v12893_v56  ;;  %v12899_v49 = vld [vmem:[%s15053_s17 + $0x308] sm:$0xff]  ;;  %v12902_v57 = vld [vmem:[%s15053_s17 + $0x310] sm:$0xff] }
 0x2a8   :  { %15150 = vst [vmem:[#allocation330_spill] sm:$0xff] %v12896_v41  ;;  %15151 = vst [vmem:[#allocation331_spill] sm:$0xff] %v12899_v49  ;;  %v12905_v63 = vld [vmem:[%s15053_s17 + $0x318] sm:$0xff]  ;;  %v12908_v0 = vld [vmem:[%s15053_s17 + $0x320] sm:$0xff] }
 0x2a9   :  { %15152 = vst [vmem:[#allocation332_spill] sm:$0xff] %v12902_v57  ;;  %15153 = vst [vmem:[#allocation333_spill] sm:$0xff] %v12905_v63  ;;  %v12911_v55 = vld [vmem:[%s15053_s17 + $0x328] sm:$0xff]  ;;  %v12914_v56 = vld [vmem:[%s15053_s17 + $0x330] sm:$0xff] }
 0x2aa   :  { %15154 = vst [vmem:[#allocation334_spill] sm:$0xff] %v12908_v0  ;;  %15155 = vst [vmem:[#allocation335_spill] sm:$0xff] %v12911_v55  ;;  %v12917_v41 = vld [vmem:[%s15053_s17 + $0x338] sm:$0xff]  ;;  %v12920_v49 = vld [vmem:[%s15053_s17 + $0x340] sm:$0xff] }
 0x2ab   :  { %15156 = vst [vmem:[#allocation336_spill] sm:$0xff] %v12914_v56  ;;  %15157 = vst [vmem:[#allocation337_spill] sm:$0xff] %v12917_v41  ;;  %v12923_v57 = vld [vmem:[%s15053_s17 + $0x348] sm:$0xff]  ;;  %v12926_v63 = vld [vmem:[%s15053_s17 + $0x350] sm:$0xff] }
 0x2ac   :  { %15158 = vst [vmem:[#allocation338_spill] sm:$0xff] %v12920_v49  ;;  %15159 = vst [vmem:[#allocation339_spill] sm:$0xff] %v12923_v57  ;;  %v12929_v0 = vld [vmem:[%s15053_s17 + $0x358] sm:$0xff]  ;;  %v12932_v55 = vld [vmem:[%s15053_s17 + $0x360] sm:$0xff] }
 0x2ad   :  { %15160 = vst [vmem:[#allocation340_spill] sm:$0xff] %v12926_v63  ;;  %15161 = vst [vmem:[#allocation341_spill] sm:$0xff] %v12929_v0  ;;  %v12935_v56 = vld [vmem:[%s15053_s17 + $0x368] sm:$0xff]  ;;  %v12938_v41 = vld [vmem:[%s15053_s17 + $0x370] sm:$0xff] }
 0x2ae   :  { %15162 = vst [vmem:[#allocation342_spill] sm:$0xff] %v12932_v55  ;;  %15163 = vst [vmem:[#allocation343_spill] sm:$0xff] %v12935_v56  ;;  %v12941_v49 = vld [vmem:[%s15053_s17 + $0x378] sm:$0xff]  ;;  %v12944_v57 = vld [vmem:[%s15053_s17 + $0x380] sm:$0xff] }
 0x2af   :  { %15164 = vst [vmem:[#allocation344_spill] sm:$0xff] %v12938_v41  ;;  %15165 = vst [vmem:[#allocation345_spill] sm:$0xff] %v12941_v49  ;;  %v12947_v39 = vld [vmem:[%s15053_s17 + $0x388] sm:$0xff]  ;;  %v12950_v63 = vld [vmem:[%s15053_s17 + $0x390] sm:$0xff] }
 0x2b0   :  { %15166 = vst [vmem:[#allocation346_spill] sm:$0xff] %v12944_v57  ;;  %15167 = vst [vmem:[#allocation347_spill] sm:$0xff] %v12947_v39  ;;  %v12953_v0 = vld [vmem:[%s15053_s17 + $0x398] sm:$0xff]  ;;  %v12956_v40 = vld [vmem:[%s15053_s17 + $0x3a0] sm:$0xff] }
 0x2b1   :  { %15168 = vst [vmem:[#allocation348_spill] sm:$0xff] %v12950_v63  ;;  %15169 = vst [vmem:[#allocation349_spill] sm:$0xff] %v12953_v0  ;;  %v12959_v55 = vld [vmem:[%s15053_s17 + $0x3a8] sm:$0xff]  ;;  %v12962_v56 = vld [vmem:[%s15053_s17 + $0x3b0] sm:$0xff] }
 0x2b2   :  { %15170 = vst [vmem:[#allocation350_spill] sm:$0xff] %v12956_v40  ;;  %15171 = vst [vmem:[#allocation351_spill] sm:$0xff] %v12959_v55  ;;  %v12965_v1 = vld [vmem:[%s15053_s17 + $0x3b8] sm:$0xff]  ;;  %v12968_v41 = vld [vmem:[%s15053_s17 + $0x3c0] sm:$0xff] }
 0x2b3   :  { %15172 = vst [vmem:[#allocation352_spill] sm:$0xff] %v12962_v56  ;;  %15173 = vst [vmem:[#allocation353_spill] sm:$0xff] %v12965_v1  ;;  %v12971_v49 = vld [vmem:[%s15053_s17 + $0x3c8] sm:$0xff]  ;;  %v12974_v48 = vld [vmem:[%s15053_s17 + $0x3d0] sm:$0xff] }
 0x2b4   :  { %15174 = vst [vmem:[#allocation354_spill] sm:$0xff] %v12968_v41  ;;  %15175 = vst [vmem:[#allocation355_spill] sm:$0xff] %v12971_v49  ;;  %v12977_v57 = vld [vmem:[%s15053_s17 + $0x3d8] sm:$0xff]  ;;  %v12980_v39 = vld [vmem:[%s15053_s17 + $0x3e0] sm:$0xff] }
 0x2b5   :  { %15176 = vst [vmem:[#allocation356_spill] sm:$0xff] %v12974_v48  ;;  %15177 = vst [vmem:[#allocation357_spill] sm:$0xff] %v12977_v57  ;;  %v12983_v63 = vld [vmem:[%s15053_s17 + $0x3e8] sm:$0xff]  ;;  %v12986_v0 = vld [vmem:[%s15053_s17 + $0x3f0] sm:$0xff] }
 0x2b6   :  { %15178 = vst [vmem:[#allocation358_spill] sm:$0xff] %v12980_v39  ;;  %15179 = vst [vmem:[#allocation359_spill] sm:$0xff] %v12983_v63  ;;  %v12989_v40 = vld [vmem:[%s15053_s17 + $0x3f8] sm:$0xff] }
 0x2b7   :  { %15180 = vst [vmem:[#allocation360_spill] sm:$0xff] %v12986_v0  ;;  %15181 = vst [vmem:[#allocation361_spill] sm:$0xff] %v12989_v40 }
 0x2b8   :  { %1688 = vsyncadd [#allocation6 + $0x3], 16384  ;;  %s15182_s13 = sld [smem:[#allocation102_spill]]  ;;  %s15183_s2 = sld [smem:[#allocation52_spill]]  ;;  %vm1769_vm0 = vcmask 261120   ;;  %vm2294_vm1 = vcmask 31744  }
 0x2b9   :  { %s15184_s10 = sld [smem:[#allocation57_spill]]  ;;  %s11654_s0 = smov 32   ;;  %v9278_v59 = vld [vmem:[#allocation29] ss:$0 sm:$0xff]  ;;  %vm13287_vm2 = vmpackc.low %vm2294_vm1, %vm2294_vm1  ;;  %vm11659_vm3 = vmmov 0  }
 0x2ba   :  { %s11655_s5 = smov 96   ;;  %s11656_s29 = smov 64  }
 0x2bb   :  { %s15207_s21 = sld [smem:[#allocation54_spill]]  ;;  %s15208_s30 = sld [smem:[#allocation59_spill]] }
 0x2bc   :  { %s15213_s4 = sld [smem:[#allocation61_spill]]  ;;  %s15221_s14 = sld [smem:[#allocation103_spill]] }
 0x2bd   :  { %s15220_s11 = sld [smem:[#allocation101_spill]]  ;;  %s15223_s16 = sld [smem:[#allocation104_spill]] }
 0x2be   :  { %v10899_v1 = vld [vmem:[%s15182_s13] sm:$0xff]   ;;  %v10900_v56 = vld [vmem:[%s15182_s13 + $0x8] sm:$0xff]   ;;  %v1691_v63 = vld [vmem:[%s15183_s2 + $0x10] sm:$0xff]  ;;  %s15224_s6 = sld [smem:[#allocation99_spill]]  ;;  %s15225_s19 = sld [smem:[#allocation58_spill]] }
 0x2bf   :  { %v1689_v55 = vld [vmem:[%s15183_s2] sm:$0xff]  ;;  %v1690_v39 = vld [vmem:[%s15183_s2 + $0x8] sm:$0xff]  ;;  %10354 = vmatprep.subr.bf16.mxu0 %v10899_v1  ;;  %v1692_v57 = vld [vmem:[%s15183_s2 + $0x18] sm:$0xff]  ;;  %s15230_s9 = sld [smem:[#allocation85_spill]]  ;;  %s15232_s28 = sld [smem:[#allocation83_spill]] }
 0x2c0   :  { %v1744_v0 = vpack.c.bf16 %v1690_v39, %v1689_v55  ;;  %v12996_v40 = vld [vmem:[%s15184_s10] sm:$0xff]  ;;  %10355 = vmatpush3.bf16.msra.mxu0 %v10899_v1  ;;  %v13003_v48 = vld [vmem:[%s15184_s10 + $0x10] sm:$0xff]  ;;  %v13007_v39 = vld [vmem:[%s15184_s10 + $0x8] sm:$0xff]  ;;  %v1745_v55 = vpack.c.bf16 %v1692_v57, %v1691_v63  ;;  %s15231_s18 = sld [smem:[#allocation53_spill]]  ;;  %s15233_s8 = sld [smem:[#allocation55_spill]] }
 0x2c1   :  { %15185 = vst [vmem:[#allocation362_spill] sm:$0xff] %v12996_v40  ;;  %1843 = vrot.lane.b32.xlu0 %v12996_v40, %s11654_s0  ;;  %15186 = vst [vmem:[#allocation363_spill] sm:$0xff] %v13003_v48  ;;  %10356 = vmatprep.subr.bf16.mxu0 %v10900_v56  ;;  %v13012_v1 = vld [vmem:[%s15184_s10 + $0x18] sm:$0xff]  ;;  %v13017_v49 = vld [vmem:[%s15184_s10 + $0x20] sm:$0xff]  ;;  %s15234_s15 = sld [smem:[#allocation60_spill]]  ;;  %s15236_s3 = sld [smem:[#allocation82_spill]] }
 0x2c2   :  { %10358 = vmatprep.mubr.msk.bf16.mxu0 %vm1769_vm0, %v1744_v0  ;;  %15187 = vst [vmem:[#allocation364_spill] sm:$0xff] %v13007_v39  ;;  %1847 = vrot.lane.b32.xlu1 %v13003_v48, %s11654_s0  ;;  %15188 = vst [vmem:[#allocation365_spill] sm:$0xff] %v13012_v1  ;;  %v13020_v41 = vld [vmem:[%s15184_s10 + $0x28] sm:$0xff]  ;;  %v13026_v0 = vld [vmem:[%s15184_s10 + $0x30] sm:$0xff]  ;;  %s15235_s23 = sld [smem:[#allocation84_spill]]  ;;  %s15237_s27 = sld [smem:[#allocation73_spill]] }
 0x2c3   :  { %15189 = vst [vmem:[#allocation366_spill] sm:$0xff] %v13017_v49  ;;  %15190 = vst [vmem:[#allocation367_spill] sm:$0xff] %v13020_v41  ;;  %v13031_v63 = vld [vmem:[%s15184_s10 + $0x38] sm:$0xff]  ;;  %v13041_v57 = vld [vmem:[%s15184_s10 + $0x48] sm:$0xff]  ;;  %s15238_s26 = sld [smem:[#allocation75_spill]]  ;;  %s15239_s22 = sld [smem:[#allocation77_spill]] }
 0x2c4   :  { %10357 = vmatpush3.bf16.msra.mxu0 %v10900_v56  ;;  %15191 = vst [vmem:[#allocation368_spill] sm:$0xff] %v13026_v0  ;;  %15192 = vst [vmem:[#allocation369_spill] sm:$0xff] %v13031_v63  ;;  %v13036_v56 = vld [vmem:[%s15184_s10 + $0x40] sm:$0xff]  ;;  %v13051_v47 = vld [vmem:[%s15184_s10 + $0x58] sm:$0xff]  ;;  %s15240_s20 = sld [smem:[#allocation76_spill]]  ;;  %s15241_s1 = sld [smem:[#allocation70_spill]] }
 0x2c5   :  { %1845 = vrot.lane.b32.xlu0 %v13007_v39, %s11654_s0  ;;  %15193 = vst [vmem:[#allocation370_spill] sm:$0xff] %v13036_v56  ;;  %15194 = vst [vmem:[#allocation371_spill] sm:$0xff] %v13041_v57  ;;  %v13056_v54 = vld [vmem:[%s15184_s10 + $0x60] sm:$0xff]  ;;  %v13061_v38 = vld [vmem:[%s15184_s10 + $0x68] sm:$0xff]  ;;  %s15243_s24 = sld [smem:[#allocation72_spill]]  ;;  %s15247_s17 = sld [smem:[#allocation74_spill]] }
 0x2c6   :  { %1849 = vrot.lane.b32.xlu1 %v13012_v1, %s11654_s0  ;;  %15196 = vst [vmem:[#allocation373_spill] sm:$0xff] %v13051_v47  ;;  %15197 = vst [vmem:[#allocation374_spill] sm:$0xff] %v13056_v54  ;;  %v13066_v62 = vld [vmem:[%s15184_s10 + $0x70] sm:$0xff]  ;;  %v13071_v46 = vld [vmem:[%s15184_s10 + $0x78] sm:$0xff]  ;;  %s15245_s7 = sld [smem:[#allocation56_spill]]  ;;  %s15248_s13 = sld [smem:[#allocation71_spill]] }
 0x2c7   :  { %10359 = vmatmul.mubr.msk.bf16.vlgmr.msra.gmra.mrb[0].mxu0 %vm1769_vm0, %v1745_v55  ;;  %v13046_v55 = vld [vmem:[%s15184_s10 + $0x50] sm:$0xff]  ;;  %15198 = vst [vmem:[#allocation375_spill] sm:$0xff] %v13061_v38  ;;  %15199 = vst [vmem:[#allocation376_spill] sm:$0xff] %v13066_v62  ;;  %v10946_v11 = vld [vmem:[%s15223_s16 + $0x180] sm:$0xff]  }
 0x2c8   :  { %15195 = vst [vmem:[#allocation372_spill] sm:$0xff] %v13046_v55  ;;  %15200 = vst [vmem:[#allocation377_spill] sm:$0xff] %v13071_v46  ;;  %v10948_v18 = vld [vmem:[%s15223_s16 + $0x1c8] sm:$0xff]  }
 0x2c9   :  { %1851 = vrot.lane.b32.xlu0 %v13017_v49, %s11654_s0 }
 0x2ca   :  { %1853 = vrot.lane.b32.xlu1 %v13020_v41, %s11654_s0 }
 0x2cd   :  { %1855 = vrot.lane.b32.xlu0 %v13026_v0, %s11654_s0 }
 0x2ce   :  { %1857 = vrot.lane.b32.xlu1 %v13031_v63, %s11654_s0 }
 0x2d1   :  { %1859 = vrot.lane.b32.xlu0 %v13036_v56, %s11654_s0 }
 0x2d2   :  { %1861 = vrot.lane.b32.xlu1 %v13041_v57, %s11654_s0 }
 0x2d5   :  { %1863 = vrot.lane.b32.xlu0 %v13046_v55, %s11654_s0 }
 0x2d6   :  { %1865 = vrot.lane.b32.xlu1 %v13051_v47, %s11654_s0 }
 0x2d9   :  { %1867 = vrot.lane.b32.xlu0 %v13056_v54, %s11654_s0 }
 0x2da   :  { %1869 = vrot.lane.b32.xlu1 %v13061_v38, %s11654_s0 }
 0x2dd   :  { %1871 = vrot.lane.b32.xlu0 %v13066_v62, %s11654_s0 }
 0x2de   :  { %1873 = vrot.lane.b32.xlu1 %v13071_v46, %s11654_s0 }
 0x333   :  { %v13081_v37 = vpop.permute.xlu0 %1843 }
 0x334   :  { %v13079_v53 = vpop.permute.xlu1 %1847 }
 0x337   :  { %v13085_v45 = vpop.permute.xlu0 %1845 }
 0x338   :  { %v13083_v61 = vpop.permute.xlu1 %1849 }
 0x33b   :  { %v13089_v36 = vpop.permute.xlu0 %1851 }
 0x33c   :  { %v13087_v52 = vpop.permute.xlu1 %1853  ;;  %15202 = vst [vmem:[#allocation379_spill] sm:$0xff] %v13089_v36 }
 0x33d   :  { %15201 = vst [vmem:[#allocation378_spill] sm:$0xff] %v13087_v52 }
 0x33f   :  { %v13093_v44 = vpop.permute.xlu0 %1855 }
 0x340   :  { %v13091_v60 = vpop.permute.xlu1 %1857 }
 0x343   :  { %v13097_v35 = vpop.permute.xlu0 %1859 }
 0x344   :  { %v13095_v51 = vpop.permute.xlu1 %1861 }
 0x345   :  { %15203 = vst [vmem:[#allocation380_spill] sm:$0xff] %v13095_v51 }
 0x347   :  { %v13103_v42 = vpop.permute.xlu0 %1863 }
 0x348   :  { %v13099_v43 = vpop.permute.xlu1 %1865 }
 0x34c   :  { %v13115_v16 = vpop.permute.xlu1 %1869 }
 0x34d   :  { %15204 = vst [vmem:[#allocation381_spill] sm:$0xff] %v13115_v16 }
 0x39a   :  { %v10360_v50 = vpop.f32.mrb[0].mxu0 }
 0x39b   :  { %v13101_v34 = vadd.f32 %v10360_v50, %v9278_v59  ;;  %v1810_v58 = vpop.f32.mrb[1].mxu0 }
 0x39c   :  { %v13105_v25 = vadd.f32 %v9278_v59, %v1810_v58  ;;  %v10361_v9 = vpop.f32.mrb[2].mxu0 }
 0x39d   :  { %v13107_v33 = vadd.f32 %v10361_v9, %v9278_v59  ;;  %v1813_v17 = vpop.f32.mrb[3].mxu0  ;;  %v1893_v8 = vmul.f32 %v13079_v53, %v13101_v34  ;;  %v1897_v15 = vmul.f32 %v13093_v44, %v13101_v34 }
 0x39e   :  { %v13109_v24 = vadd.f32 %v9278_v59, %v1813_v17  ;;  %v1891_v58 = vmul.f32 %v13081_v37, %v13105_v25  ;;  %v13125_v59 = vpop.permute.xlu0 %1867 }
 0x39f   :  { %v1894_v32 = vmul.f32 %v13083_v61, %v13107_v33  ;;  %v1898_v17 = vmul.f32 %v13091_v60, %v13107_v33  ;;  %15205 = vst [vmem:[#allocation382_spill] sm:$0xff] %v13125_v59  ;;  %v1902_v22 = vmul.f32 %v13099_v43, %v13107_v33 }
 0x3a0   :  { %v1825_v50 = vpack.c.bf16 %v13109_v24, %v13105_v25  ;;  %v1892_v9 = vmul.f32 %v13085_v45, %v13109_v24  ;;  %v1896_v31 = vmul.f32 %v13087_v52, %v13109_v24 }
 0x3a1   :  { %v1908_v23 = vpack.c.bf16 %v1894_v32, %v1893_v8  ;;  %v1895_v8 = vmul.f32 %v13089_v36, %v13105_v25  ;;  %v1910_v32 = vpack.c.bf16 %v1898_v17, %v1897_v15 }
 0x3a2   :  { %10378 = vmatprep.mubr.msk.bf16.mxu1 %vm1769_vm0, %v1825_v50  ;;  %v1907_v7 = vpack.c.bf16 %v1892_v9, %v1891_v58  ;;  %v13138_v50 = vpop.permute.xlu1 %1873  ;;  %v1900_v9 = vmul.f32 %v13095_v51, %v13109_v24  ;;  %v13145_v6 = vpop.permute.xlu0 %1871 }
 0x3a3   :  { %1997 = vrot.lane.b32.xlu1 %v1908_v23, %s11655_s5  ;;  %15206 = vst [vmem:[#allocation383_spill] sm:$0xff] %v13138_v50  ;;  %v1909_v58 = vpack.c.bf16 %v1896_v31, %v1895_v8  ;;  %v1901_v23 = vmul.f32 %v13103_v42, %v13101_v34  ;;  %v1906_v15 = vmul.f32 %v13138_v50, %v13107_v33 }
 0x3a4   :  { %1995 = vrot.lane.b32.xlu0 %v1907_v7, %s11655_s5  ;;  %v1899_v7 = vmul.f32 %v13097_v35, %v13105_v25  ;;  %v1904_v8 = vmul.f32 %v13115_v16, %v13109_v24 }
 0x3a5   :  { %v1912_v17 = vpack.c.bf16 %v1902_v22, %v1901_v23 }
 0x3a6   :  { %v1911_v31 = vpack.c.bf16 %v1900_v9, %v1899_v7 }
 0x3a7   :  { %2001 = vrot.lane.b32.xlu1 %v1910_v32, %s11655_s5  ;;  %v1905_v32 = vmul.f32 %v13145_v6, %v13101_v34 }
 0x3a8   :  { %1999 = vrot.lane.b32.xlu0 %v1909_v58, %s11655_s5  ;;  %v1903_v58 = vmul.f32 %v13125_v59, %v13105_v25 }
 0x3a9   :  { %v1914_v30 = vpack.c.bf16 %v1906_v15, %v1905_v32 }
 0x3aa   :  { %v1913_v14 = vpack.c.bf16 %v1904_v8, %v1903_v58 }
 0x3ab   :  { %2005 = vrot.lane.b32.xlu1 %v1912_v17, %s11655_s5 }
 0x3ac   :  { %2003 = vrot.lane.b32.xlu0 %v1911_v31, %s11655_s5 }
 0x3af   :  { %2009 = vrot.lane.b32.xlu1 %v1914_v30, %s11655_s5 }
 0x3b0   :  { %2007 = vrot.lane.b32.xlu0 %v1913_v14, %s11655_s5 }
 0x3b3   :  { %1917 = vrot.lane.b32.xlu1 %v13007_v39, %s11656_s29 }
 0x3b4   :  { %1915 = vrot.lane.b32.xlu0 %v12996_v40, %s11656_s29 }
 0x3b7   :  { %1921 = vrot.lane.b32.xlu1 %v13012_v1, %s11656_s29 }
 0x3b8   :  { %1919 = vrot.lane.b32.xlu0 %v13003_v48, %s11656_s29 }
 0x3bb   :  { %1925 = vrot.lane.b32.xlu1 %v13020_v41, %s11656_s29 }
 0x3bc   :  { %1923 = vrot.lane.b32.xlu0 %v13017_v49, %s11656_s29 }
 0x3bf   :  { %1929 = vrot.lane.b32.xlu1 %v13031_v63, %s11656_s29 }
 0x3c0   :  { %1927 = vrot.lane.b32.xlu0 %v13026_v0, %s11656_s29 }
 0x3c3   :  { %1933 = vrot.lane.b32.xlu1 %v13041_v57, %s11656_s29 }
 0x3c4   :  { %1931 = vrot.lane.b32.xlu0 %v13036_v56, %s11656_s29 }
 0x3c7   :  { %1937 = vrot.lane.b32.xlu1 %v13051_v47, %s11656_s29  ;;  %v15222_v47 = vmov 0  }
 0x3c8   :  { %1935 = vrot.lane.b32.xlu0 %v13046_v55, %s11656_s29 }
 0x3cb   :  { %1941 = vrot.lane.b32.xlu1 %v13061_v38, %s11656_s29 }
 0x3cc   :  { %1939 = vrot.lane.b32.xlu0 %v13056_v54, %s11656_s29 }
 0x3cf   :  { %1945 = vrot.lane.b32.xlu1 %v13071_v46, %s11656_s29 }
 0x3d0   :  { %1943 = vrot.lane.b32.xlu0 %v13066_v62, %s11656_s29  ;;  %v2582_v62 = vld [vmem:[%s15221_s14 + $0x68] sm:$0xff] }
 0x415   :  { %v1998_v14 = vpop.permute.xlu1 %1997 }
 0x416   :  { %v1996_v22 = vpop.permute.xlu0 %1995  ;;  %v2021_v17 = vsel %vm1769_vm0, %v1998_v14, 0 }
 0x417   :  { %10795 = vmatprep.subr.msk.bf16.mxu1 %vm1769_vm0, %v1996_v22  ;;  %v2018_v30 = vsel %vm1769_vm0, %v1996_v22, 0 }
 0x418   :  { %10363 = vmatpush3.bf16.xpose.msra.mxu1 %v2018_v30 }
 0x419   :  { %v2002_v9 = vpop.permute.xlu1 %2001  ;;  %10796 = vmatprep.subr.msk.bf16.mxu1 %vm1769_vm0, %v1998_v14 }
 0x41a   :  { %v2000_v23 = vpop.permute.xlu0 %1999 }
 0x41b   :  { %v2024_v38 = vsel %vm1769_vm0, %v2000_v23, 0 }
 0x41d   :  { %v2006_v7 = vpop.permute.xlu1 %2005 }
 0x41e   :  { %v2004_v15 = vpop.permute.xlu0 %2003 }
 0x420   :  { %10365 = vmatpush3.bf16.xpose.msra.mxu1 %v2021_v17 }
 0x421   :  { %v2010_v31 = vpop.permute.xlu1 %2009  ;;  %10797 = vmatprep.subr.msk.bf16.mxu1 %vm1769_vm0, %v2000_v23  ;;  %v2027_v23 = vsel %vm1769_vm0, %v2002_v9, 0 }
 0x422   :  { %v2008_v8 = vpop.permute.xlu0 %2007 }
 0x425   :  { %v1918_v32 = vpop.permute.xlu1 %1917 }
 0x426   :  { %v1916_v58 = vpop.permute.xlu0 %1915  ;;  %v1964_v14 = vmul.f32 %v1918_v32, %v13109_v24 }
 0x427   :  { %v1963_v17 = vmul.f32 %v1916_v58, %v13105_v25 }
 0x428   :  { %10367 = vmatpush3.bf16.xpose.msra.mxu1 %v2024_v38 }
 0x429   :  { %v1922_v22 = vpop.permute.xlu1 %1921  ;;  %10798 = vmatprep.subr.msk.bf16.mxu1 %vm1769_vm0, %v2002_v9  ;;  %v1979_v38 = vpack.c.bf16 %v1964_v14, %v1963_v17  ;;  %v2030_v9 = vsel %vm1769_vm0, %v2004_v15, 0 }
 0x42a   :  { %v1966_v30 = vmul.f32 %v1922_v22, %v13107_v33  ;;  %v1920_v54 = vpop.permute.xlu0 %1919 }
 0x42b   :  { %v1965_v57 = vmul.f32 %v1920_v54, %v13101_v34 }
 0x42d   :  { %v1980_v56 = vpack.c.bf16 %v1966_v30, %v1965_v57  ;;  %v1926_v41 = vpop.permute.xlu1 %1925 }
 0x42e   :  { %v1924_v49 = vpop.permute.xlu0 %1923 }
 0x42f   :  { %2122 = vrot.lane.b32.xlu0 %v1980_v56, %s11656_s29 }
 0x430   :  { %10369 = vmatpush3.bf16.xpose.msra.mxu1 %v2027_v23 }
 0x431   :  { %v1930_v39 = vpop.permute.xlu1 %1929  ;;  %10799 = vmatprep.subr.msk.bf16.mxu1 %vm1769_vm0, %v2004_v15 }
 0x432   :  { %v1970_v22 = vmul.f32 %v1930_v39, %v13107_v33  ;;  %v1928_v40 = vpop.permute.xlu0 %1927 }
 0x433   :  { %v1969_v54 = vmul.f32 %v1928_v40, %v13101_v34  ;;  %2120 = vrot.lane.b32.xlu0 %v1979_v38, %s11656_s29  ;;  %v1968_v38 = vmul.f32 %v1926_v41, %v13109_v24  ;;  %v2036_v41 = vsel %vm1769_vm0, %v2008_v8, 0 }
 0x435   :  { %v1982_v32 = vpack.c.bf16 %v1970_v22, %v1969_v54  ;;  %v1934_v57 = vpop.permute.xlu1 %1933  ;;  %v1967_v22 = vmul.f32 %v1924_v49, %v13105_v25 }
 0x436   :  { %v1972_v58 = vmul.f32 %v1934_v57, %v13109_v24  ;;  %v1932_v30 = vpop.permute.xlu0 %1931 }
 0x437   :  { %v1971_v56 = vmul.f32 %v1932_v30, %v13105_v25  ;;  %2126 = vrot.lane.b32.xlu1 %v1982_v32, %s11656_s29  ;;  %v2033_v30 = vsel %vm1769_vm0, %v2006_v7, 0 }
 0x438   :  { %10371 = vmatpush3.bf16.xpose.msra.mxu1 %v2030_v9 }
 0x439   :  { %v1983_v14 = vpack.c.bf16 %v1972_v58, %v1971_v56  ;;  %v1938_v17 = vpop.permute.xlu1 %1937  ;;  %10800 = vmatprep.subr.msk.bf16.mxu1 %vm1769_vm0, %v2006_v7  ;;  %v1981_v56 = vpack.c.bf16 %v1968_v38, %v1967_v22  ;;  %v1694_v38 = vld [vmem:[%s15207_s21] sm:$0xff] }
 0x43a   :  { %v1974_v40 = vmul.f32 %v1938_v17, %v13107_v33  ;;  %v1936_v39 = vpop.permute.xlu0 %1935 }
 0x43b   :  { %v1973_v23 = vmul.f32 %v1936_v39, %v13101_v34  ;;  %2128 = vrot.lane.b32.xlu0 %v1983_v14, %s11656_s29 }
 0x43d   :  { %v1984_v54 = vpack.c.bf16 %v1974_v40, %v1973_v23  ;;  %v1942_v32 = vpop.permute.xlu1 %1941  ;;  %v1696_v23 = vld [vmem:[%s15207_s21 + $0x10] sm:$0xff] }
 0x43e   :  { %v1976_v15 = vmul.f32 %v1942_v32, %v13109_v24  ;;  %v1940_v57 = vpop.permute.xlu0 %1939  ;;  %v2039_v24 = vsel %vm1769_vm0, %v2010_v31, 0 }
 0x43f   :  { %v1975_v58 = vmul.f32 %v1940_v57, %v13105_v25  ;;  %2130 = vrot.lane.b32.xlu1 %v1984_v54, %s11656_s29  ;;  %v1826_v25 = vpack.c.bf16 %v13107_v33, %v13101_v34 }
 0x440   :  { %10373 = vmatpush3.bf16.xpose.msra.mxu1 %v2033_v30  ;;  %v1697_v30 = vld [vmem:[%s15207_s21 + $0x18] sm:$0xff] }
 0x441   :  { %v1985_v9 = vpack.c.bf16 %v1976_v15, %v1975_v58  ;;  %10801 = vmatprep.subr.msk.bf16.mxu1 %vm1769_vm0, %v2008_v8  ;;  %v1946_v8 = vpop.permute.xlu1 %1945  ;;  %v1695_v15 = vld [vmem:[%s15207_s21 + $0x8] sm:$0xff] }
 0x442   :  { %v1944_v49 = vpop.permute.xlu0 %1943 }
 0x443   :  { %2124 = vrot.lane.b32.xlu1 %v1981_v56, %s11656_s29 }
 0x448   :  { %10375 = vmatpush3.bf16.xpose.msra.mxu1 %v2036_v41 }
 0x449   :  { %10802 = vmatprep.subr.msk.bf16.mxu1 %vm1769_vm0, %v2010_v31 }
 0x450   :  { %10377 = vmatpush3.bf16.xpose.msra.mxu1 %v2039_v24 }
 0x457   :  { %10379 = vmatmul.mubr.msk.bf16.vlgmr.msra.gmra.mrb[0].mxu1 %vm1769_vm0, %v1826_v25  ;;  %v1978_v25 = vmul.f32 %v1946_v8, %v13107_v33  ;;  %v13242_v8 = vld [vmem:[%s15208_s30] sm:$0xff]  }
 0x458   :  { %15209 = vst [vmem:[#allocation384_spill] sm:$0xff] %v13242_v8 }
 0x4a1   :  { %v2123_v7 = vpop.permute.xlu0 %2122 }
 0x4a5   :  { %v2121_v14 = vpop.permute.xlu0 %2120 }
 0x4a6   :  { %10382 = vmatprep.subr.bf16.mxu0 %v2121_v14 }
 0x4a7   :  { %10383 = vmatpush3.bf16.msra.mxu0 %v2121_v14 }
 0x4a8   :  { %10384 = vmatprep.subr.bf16.mxu0 %v2123_v7 }
 0x4a9   :  { %v2127_v17 = vpop.permute.xlu1 %2126 }
 0x4ab   :  { %10385 = vmatpush3.bf16.msra.mxu0 %v2123_v7  ;;  %v1977_v7 = vmul.f32 %v1944_v49, %v13101_v34 }
 0x4ad   :  { %v2129_v39 = vpop.permute.xlu0 %2128  ;;  %v1986_v14 = vpack.c.bf16 %v1978_v25, %v1977_v7  ;;  %v13246_v25 = vld [vmem:[%s15208_s30 + $0x8] sm:$0xff]   ;;  %v13251_v7 = vld [vmem:[%s15208_s30 + $0x10] sm:$0xff]  }
 0x4ae   :  { %15210 = vst [vmem:[#allocation385_spill] sm:$0xff] %v13246_v25  ;;  %15211 = vst [vmem:[#allocation386_spill] sm:$0xff] %v13251_v7 }
 0x4b1   :  { %v2131_v40 = vpop.permute.xlu1 %2130 }
 0x4b5   :  { %v2125_v31 = vpop.permute.xlu1 %2124 }
 0x4b6   :  { %10386 = vmatprep.subr.bf16.mxu0 %v2125_v31 }
 0x4b7   :  { %10387 = vmatpush3.bf16.msra.mxu0 %v2125_v31 }
 0x4b8   :  { %10388 = vmatprep.subr.bf16.mxu0 %v2127_v17 }
 0x4bb   :  { %10389 = vmatpush3.bf16.msra.mxu0 %v2127_v17 }
 0x4bc   :  { %10390 = vmatprep.subr.bf16.mxu0 %v2129_v39 }
 0x4bf   :  { %10391 = vmatpush3.bf16.msra.mxu0 %v2129_v39 }
 0x4c0   :  { %10392 = vmatprep.subr.bf16.mxu0 %v2131_v40 }
 0x4c3   :  { %10393 = vmatpush3.bf16.msra.mxu0 %v2131_v40 }
 0x52a   :  { %v10380_v22 = vpop.f32.mrb[0].mxu1 }
 0x52b   :  { %v2084_v54 = vadd.f32 %v10380_v22, %v1696_v23  ;;  %v2075_v32 = vpop.f32.mrb[1].mxu1 }
 0x52c   :  { %v2076_v57 = vadd.f32 %v2075_v32, %v1694_v38  ;;  %v10381_v58 = vpop.f32.mrb[2].mxu1 }
 0x52d   :  { %2094 = vmax.xlane.f32.xlu0 %v2084_v54  ;;  %v2078_v56 = vpop.f32.mrb[3].mxu1  ;;  %v2087_v24 = vadd.f32 %v10381_v58, %v1697_v30 }
 0x52e   :  { %v2079_v41 = vadd.f32 %v2078_v56, %v1695_v15  ;;  %2090 = vmax.xlane.f32.xlu1 %v2076_v57 }
 0x531   :  { %2092 = vmax.xlane.f32.xlu0 %v2079_v41 }
 0x532   :  { %2096 = vmax.xlane.f32.xlu1 %v2087_v24 }
 0x543   :  { %2134 = vrot.lane.b32.xlu1 %v1986_v14, %s11656_s29  ;;  %v13256_v14 = vld [vmem:[%s15208_s30 + $0x18] sm:$0xff]  }
 0x544   :  { %15212 = vst [vmem:[#allocation387_spill] sm:$0xff] %v13256_v14 }
 0x547   :  { %2132 = vrot.lane.b32.xlu0 %v1985_v9, %s11656_s29 }
 0x5ba   :  { %v2095_v17 = vpop.xlane.xlu0 %2094 }
 0x5bb   :  { %v2100_v40 = vsub.f32 %v2084_v54, %v2095_v17  ;;  %v2091_v31 = vpop.xlane.xlu1 %2090  ;;  %v13261_v17 = vld [vmem:[%s15208_s30 + $0x20] sm:$0xff]  }
 0x5bc   :  { %v2098_v39 = vsub.f32 %v2076_v57, %v2091_v31  ;;  %15214 = vst [vmem:[#allocation388_spill] sm:$0xff] %v13261_v17  ;;  %v13271_v31 = vld [vmem:[%s15208_s30 + $0x30] sm:$0xff]  }
 0x5bd   :  { %v2106_v23 = vmul.f32 1.442695, %v2100_v40  ;;  %v13266_v40 = vld [vmem:[%s15208_s30 + $0x28] sm:$0xff]   ;;  %15216 = vst [vmem:[#allocation390_spill] sm:$0xff] %v13271_v31 }
 0x5be   :  { %v2102_v38 = vmul.f32 1.442695, %v2098_v39  ;;  %v2093_v22 = vpop.xlane.xlu0 %2092  ;;  %15215 = vst [vmem:[#allocation389_spill] sm:$0xff] %v13266_v40  ;;  %v13276_v39 = vld [vmem:[%s15208_s30 + $0x38] sm:$0xff]  }
 0x5bf   :  { %v2099_v32 = vsub.f32 %v2079_v41, %v2093_v22  ;;  %v2097_v15 = vpop.xlane.xlu1 %2096  ;;  %11051 = vpow2.f32 %v2106_v23  ;;  %15217 = vst [vmem:[#allocation391_spill] sm:$0xff] %v13276_v39  ;;  %v1740_v23 = vld [vmem:[%s15213_s4] sm:$0xff] }
 0x5c0   :  { %v2101_v58 = vsub.f32 %v2087_v24, %v2097_v15  ;;  %11053 = vpow2.f32 %v2102_v38  ;;  %v1741_v38 = vld [vmem:[%s15213_s4 + $0x8] sm:$0xff]  ;;  %v1742_v15 = vld [vmem:[%s15213_s4 + $0x10] sm:$0xff] }
 0x5c1   :  { %v2104_v33 = vmul.f32 1.442695, %v2099_v32  ;;  %v13283_v22 = vpack.c.bf16 %v1741_v38, %v1740_v23 }
 0x5c2   :  { %v2108_v34 = vmul.f32 1.442695, %v2101_v58  ;;  %v2133_v49 = vpop.permute.xlu0 %2132  ;;  %v1743_v58 = vld [vmem:[%s15213_s4 + $0x18] sm:$0xff] }
 0x5c3   :  { %11055 = vpow2.f32 %v2104_v33  ;;  %10394 = vmatprep.subr.bf16.mxu0 %v2133_v49  ;;  %v2135_v9 = vpop.permute.xlu1 %2134  ;;  %10753 = vmatprep.subr.msk.bf16.mxu1 %vm13287_vm2, %v13283_v22  ;;  %v13299_v33 = vpack.c.bf16 %v1743_v58, %v1742_v15  ;;  %v10909_v58 = vld [vmem:[%s15220_s11] sm:$0xff]  }
 0x5c4   :  { %11057 = vpow2.f32 %v2108_v34  ;;  %10395 = vmatpush3.bf16.msra.mxu0 %v2133_v49  ;;  %10756 = vmatpush3.bf16.xpose.msk.msra.mxu1 %vm13287_vm2, %v13283_v22 }
 0x5c5   :  { %10396 = vmatprep.subr.bf16.mxu0 %v2135_v9  ;;  %10759 = vmatprep.subr.msk.bf16.mxu1 %vm13287_vm2, %v13299_v33 }
 0x5c8   :  { %10397 = vmatpush3.bf16.msra.mxu0 %v2135_v9 }
 0x5c9   :  { %10402 = vmatprep.subr.bf16.mxu0 %v13242_v8  ;;  %v11052_v54 = vpop.eup %11051 }
 0x5ca   :  { %v11054_v57 = vpop.eup %11053 }
 0x5cc   :  { %10762 = vmatpush3.bf16.xpose.msk.msra.mxu1 %vm13287_vm2, %v13299_v33 }
 0x5cd   :  { %v11056_v30 = vpop.eup %11055 }
 0x5ce   :  { %v11058_v56 = vpop.eup %11057  ;;  %v2110_v41 = vpack.c.bf16 %v11056_v30, %v11054_v57 }
 0x5cf   :  { %v2111_v24 = vpack.c.bf16 %v11058_v56, %v11052_v54 }
 0x5d0   :  { %10398 = vmatprep.mubr.bf16.mxu0 %v2110_v41 }
 0x5d1   :  { %10399 = vmatmul.mubr.bf16.vlgmr.msra.gmra.mrb[4].mxu0 %v2111_v24 }
 0x5d2   :  { %10403 = vmatpush3.bf16.msra.mxu0 %v13242_v8  ;;  %10418 = vmatprep.mubr.bf16.mxu0 %v2110_v41 }
 0x5d3   :  { %10404 = vmatprep.subr.bf16.mxu0 %v13246_v25 }
 0x5d6   :  { %10405 = vmatpush3.bf16.msra.mxu0 %v13246_v25 }
 0x5d7   :  { %10406 = vmatprep.subr.bf16.mxu0 %v13251_v7 }
 0x5da   :  { %10407 = vmatpush3.bf16.msra.mxu0 %v13251_v7 }
 0x5db   :  { %10408 = vmatprep.subr.bf16.mxu0 %v13256_v14 }
 0x5de   :  { %10409 = vmatpush3.bf16.msra.mxu0 %v13256_v14 }
 0x5df   :  { %10410 = vmatprep.subr.bf16.mxu0 %v13261_v17 }
 0x5e2   :  { %10411 = vmatpush3.bf16.msra.mxu0 %v13261_v17 }
 0x5e3   :  { %10412 = vmatprep.subr.bf16.mxu0 %v13266_v40 }
 0x5e6   :  { %10413 = vmatpush3.bf16.msra.mxu0 %v13266_v40 }
 0x5e7   :  { %10414 = vmatprep.subr.bf16.mxu0 %v13271_v31 }
 0x5ea   :  { %10415 = vmatpush3.bf16.msra.mxu0 %v13271_v31 }
 0x5eb   :  { %10416 = vmatprep.subr.bf16.mxu0 %v13276_v39 }
 0x5ee   :  { %10417 = vmatpush3.bf16.msra.mxu0 %v13276_v39 }
 0x5ef   :  { %10436 = vmatprep.subr.bf16.mxu0 %v10909_v58 }
 0x5f1   :  { %10419 = vmatmul.mubr.bf16.vlgmr.msra.gmra.mrb[8].mxu0 %v2111_v24 }
 0x5f2   :  { %10437 = vmatpush3.bf16.msra.mxu0 %v10909_v58 }
 0x6a4   :  { %v10400_v34 = vpop.f32.mrb[4].mxu0 }
 0x6a5   :  { %v2178_v49 = vpop.f32.mrb[5].mxu0 }
 0x6a6   :  { %v10401_v9 = vpop.f32.mrb[6].mxu0 }
 0x6a7   :  { %v2181_v54 = vpop.f32.mrb[7].mxu0 }
 0x6c4   :  { %v10420_v57 = vpop.f32.mrb[8].mxu0 }
 0x6c5   :  { %v2275_v30 = vpop.f32.mrb[9].mxu0 }
 0x6c6   :  { %11059 = vrcp.f32 %v2275_v30  ;;  %v10421_v56 = vpop.f32.mrb[10].mxu0  ;;  %v10910_v30 = vld [vmem:[%s15220_s11 + $0x8] sm:$0xff]  }
 0x6c7   :  { %v2278_v41 = vpop.f32.mrb[11].mxu0  ;;  %10438 = vmatprep.subr.bf16.mxu0 %v10910_v30 }
 0x6c8   :  { %11061 = vrcp.f32 %v2278_v41  ;;  %10439 = vmatpush3.bf16.msra.mxu0 %v10910_v30 }
 0x6c9   :  { %11063 = vrcp.f32 %v10420_v57 }
 0x6ca   :  { %11065 = vrcp.f32 %v10421_v56 }
 0x6d0   :  { %v11060_v24 = vpop.eup %11059 }
 0x6d1   :  { %10430 = vmatprep.mubr.msk.f32.mxu1 %vm2294_vm1, %v11060_v24 }
 0x6d2   :  { %v11062_v23 = vpop.eup %11061 }
 0x6d3   :  { %v11064_v38 = vpop.eup %11063  ;;  %10431 = vmatmul.mubr.msk.f32.vlgmr.msra.gmra.mrb[4].mxu1 %vm2294_vm1, %v11062_v23 }
 0x6d4   :  { %10433 = vmatprep.mubr.msk.f32.mxu1 %vm2294_vm1, %v11064_v38  ;;  %v11066_v15 = vpop.eup %11065 }
 0x6d7   :  { %10434 = vmatmul.mubr.msk.f32.gmra.mrb[6].mxu1 %vm2294_vm1, %v11066_v15  ;;  %v9301_v15 = vld [vmem:[#allocation28] ss:$0 sm:$0xff] }
 0x7a6   :  { %v10432_v57 = vpop.f32.mrb[4].mxu1 }
 0x7a7   :  { %v2405_v56 = vmul.f32 %v10432_v57, %v2181_v54  ;;  %v2385_v41 = vpop.f32.mrb[5].mxu1 }
 0x7a8   :  { %v2404_v39 = vmul.f32 %v2385_v41, %v2178_v49  ;;  %v11104_v41 = vld [vmem:[%s15183_s2 + $0x8] sm:$0xff] }
 0x7aa   :  { %v2408_v24 = vpack.c.bf16 %v2405_v56, %v2404_v39  ;;  %v10435_v31 = vpop.f32.mrb[6].mxu1  ;;  %v11103_v56 = vld [vmem:[%s15183_s2] sm:$0xff] }
 0x7ab   :  { %v2407_v40 = vmul.f32 %v10435_v31, %v10401_v9  ;;  %v2395_v23 = vpop.f32.mrb[7].mxu1 }
 0x7ac   :  { %v2406_v17 = vmul.f32 %v10400_v34, %v2395_v23  ;;  %10440 = vmatprep.mubr.msk.bf16.mxu0 %vm1769_vm0, %v2408_v24 }
 0x7ae   :  { %v2409_v38 = vpack.c.bf16 %v2407_v40, %v2406_v17  ;;  %v11105_v17 = vld [vmem:[%s15183_s2 + $0x10] sm:$0xff] }
 0x7b0   :  { %10441 = vmatmul.mubr.msk.bf16.vlgmr.msra.gmra.mrb[12].mxu0 %vm1769_vm0, %v2409_v38 }
 0x883   :  { %v10442_v58 = vpop.f32.mrb[12].mxu0 }
 0x884   :  { %v2473_v30 = vpop.f32.mrb[13].mxu0  ;;  %v2482_v14 = vadd.f32 %v10442_v58, %v9301_v15  ;;  %v11106_v58 = vld [vmem:[%s15183_s2 + $0x18] sm:$0xff]  ;;  %s15249_s2 = sld [smem:[#allocation79_spill]] }
 0x885   :  { %v2474_v54 = vadd.f32 %v9301_v15, %v2473_v30  ;;  %v10443_v49 = vpop.f32.mrb[14].mxu0 }
 0x886   :  { %v2476_v39 = vpop.f32.mrb[15].mxu0  ;;  %v2485_v9 = vadd.f32 %v10443_v49, %v9301_v15  ;;  %v2490_v40 = vadd.f32 %v11105_v17, %v2482_v14 }
 0x887   :  { %v2477_v57 = vadd.f32 %v9301_v15, %v2476_v39  ;;  %v2488_v31 = vadd.f32 %v11103_v56, %v2474_v54 }
 0x888   :  { %v2498_v38 = vsel %vm1769_vm0, %v2490_v40, 0.0  ;;  %v2491_v30 = vadd.f32 %v11106_v58, %v2485_v9 }
 0x889   :  { %v2492_v34 = vsel %vm1769_vm0, %v2488_v31, 0.0  ;;  %v2489_v24 = vadd.f32 %v11104_v41, %v2477_v57 }
 0x88a   :  { %2493 = vadd.xlane.f32.xlu0 %v2492_v34  ;;  %v2501_v39 = vsel %vm1769_vm0, %v2491_v30, 0.0 }
 0x88b   :  { %v2495_v23 = vsel %vm1769_vm0, %v2489_v24, 0.0 }
 0x88c   :  { %2496 = vadd.xlane.f32.xlu1 %v2495_v23 }
 0x88e   :  { %2499 = vadd.xlane.f32.xlu0 %v2498_v38 }
 0x892   :  { %2502 = vadd.xlane.f32.xlu0 %v2501_v39 }
 0x917   :  { %v2494_v54 = vpop.xlane.xlu0 %2493 }
 0x918   :  { %v2505_v15 = vmul.f32 0.03125, %v2494_v54 }
 0x919   :  { %v2497_v49 = vpop.xlane.xlu1 %2496 }
 0x91a   :  { %v13323_v56 = vsub.f32 %v2488_v31, %v2505_v15  ;;  %v2506_v57 = vmul.f32 0.03125, %v2497_v49 }
 0x91b   :  { %v2500_v41 = vpop.xlane.xlu0 %2499 }
 0x91c   :  { %v13325_v14 = vsub.f32 %v2489_v24, %v2506_v57  ;;  %v2507_v34 = vmul.f32 0.03125, %v2500_v41  ;;  %v2513_v17 = vmul.f32 %v13323_v56, %v13323_v56  ;;  %v2569_v57 = vld [vmem:[%s15221_s14] sm:$0xff] }
 0x91d   :  { %v2577_v41 = vld [vmem:[%s15221_s14 + $0x40] sm:$0xff] }
 0x91e   :  { %v13329_v23 = vsub.f32 %v2490_v40, %v2507_v34  ;;  %v2517_v9 = vsel %vm1769_vm0, %v2513_v17, 0.0  ;;  %v2514_v38 = vmul.f32 %v13325_v14, %v13325_v14  ;;  %v2570_v34 = vld [vmem:[%s15221_s14 + $0x8] sm:$0xff]  ;;  %v9309_v17 = vcombine.high %v2569_v57, %v2577_v41 }
 0x91f   :  { %2518 = vadd.xlane.f32.xlu1 %v2517_v9  ;;  %v2503_v31 = vpop.xlane.xlu0 %2502  ;;  %v2578_v9 = vld [vmem:[%s15221_s14 + $0x48] sm:$0xff] }
 0x920   :  { %v2508_v58 = vmul.f32 0.03125, %v2503_v31  ;;  %v2520_v24 = vsel %vm1769_vm0, %v2514_v38, 0.0  ;;  %v2515_v39 = vmul.f32 %v13329_v23, %v13329_v23  ;;  %v9310_v38 = vcombine.low %v2570_v34, %v2578_v9  ;;  %2851 = vmatprep.subr.bf16.mxu0 %v9309_v17  ;;  %v2572_v17 = vld [vmem:[%s15221_s14 + $0x18] sm:$0xff] }
 0x921   :  { %2521 = vadd.xlane.f32.xlu0 %v2520_v24  ;;  %v9311_v31 = vcombine.high %v2570_v34, %v2578_v9  ;;  %v2593_v24 = vld [vmem:[%s15221_s14 + $0xc0] sm:$0xff]  ;;  %v2579_v34 = vld [vmem:[%s15221_s14 + $0x50] sm:$0xff] }
 0x922   :  { %v13337_v54 = vsub.f32 %v2491_v30, %v2508_v58  ;;  %v2523_v40 = vsel %vm1769_vm0, %v2515_v39, 0.0  ;;  %v9308_v30 = vcombine.low %v2569_v57, %v2577_v41  ;;  %v2585_v58 = vld [vmem:[%s15221_s14 + $0x80] sm:$0xff]  ;;  %v2586_v39 = vld [vmem:[%s15221_s14 + $0x88] sm:$0xff]  ;;  %v14834_v57 = vmov 0   ;;  %v2571_v41 = vld [vmem:[%s15221_s14 + $0x10] sm:$0xff] }
 0x923   :  { %2524 = vadd.xlane.f32.xlu1 %v2523_v40  ;;  %2904 = vmatprep.subr.bf16.mxu1 %v9311_v31  ;;  %v9325_v40 = vcombine.high %v2585_v58, %v2593_v24  ;;  %v9312_v9 = vcombine.low %v2571_v41, %v2579_v34 }
 0x924   :  { %v2516_v15 = vmul.f32 %v13337_v54, %v13337_v54  ;;  %2852 = vmatpush1.bf16.msra.mxu0 %v9308_v30  ;;  %2905 = vmatpush1.bf16.msra.mxu1 %v9310_v38  ;;  %v9313_v30 = vcombine.high %v2571_v41, %v2579_v34  ;;  %v2580_v38 = vld [vmem:[%s15221_s14 + $0x58] sm:$0xff] }
 0x925   :  { %2853 = vmatprep.subr.bf16.mxu0 %v9325_v40  ;;  %2883 = vmatprep.mubr.bf16.mxu0 %v14834_v57  ;;  %v9314_v31 = vcombine.low %v2572_v17, %v2580_v38  ;;  %v9315_v8 = vcombine.high %v2572_v17, %v2580_v38  ;;  %v9306_v17 = vld [vmem:[#allocation23] ss:$0 sm:$0xff] }
 0x926   :  { %v2526_v49 = vsel %vm1769_vm0, %v2516_v15, 0.0  ;;  %v2594_v15 = vld [vmem:[%s15221_s14 + $0xc8] sm:$0xff]  ;;  %2936 = vmatprep.mubr.bf16.mxu1 %v14834_v57 }
 0x927   :  { %2527 = vadd.xlane.f32.xlu0 %v2526_v49  ;;  %v9324_v49 = vcombine.low %v2585_v58, %v2593_v24  ;;  %v9326_v7 = vcombine.low %v2586_v39, %v2594_v15  ;;  %v9327_v25 = vcombine.high %v2586_v39, %v2594_v15 }
 0x929   :  { %2906 = vmatprep.subr.bf16.mxu1 %v9327_v25  ;;  %2854 = vmatpush1.bf16.msra.mxu0 %v9324_v49 }
 0x92a   :  { %2907 = vmatpush1.bf16.msra.mxu1 %v9326_v7  ;;  %2957 = vmatprep.subr.bf16.mxu0 %v9313_v30 }
 0x92b   :  { %3010 = vmatprep.subr.bf16.mxu1 %v9315_v8 }
 0x9ac   :  { %v2519_v58 = vpop.xlane.xlu1 %2518 }
 0x9ad   :  { %v2529_v24 = vmul.f32 0.03125, %v2519_v58 }
 0x9ae   :  { %v2522_v25 = vpop.xlane.xlu0 %2521 }
 0x9af   :  { %v2533_v39 = vadd.f32 1e-05, %v2529_v24  ;;  %v2530_v7 = vmul.f32 0.03125, %v2522_v25 }
 0x9b0   :  { %v2525_v40 = vpop.xlane.xlu1 %2524 }
 0x9b1   :  { %11067 = vrsqrt.f32 %v2533_v39  ;;  %v2534_v15 = vadd.f32 1e-05, %v2530_v7  ;;  %v2531_v49 = vmul.f32 0.03125, %v2525_v40  ;;  %v9307_v39 = vld [vmem:[#allocation22] ss:$0 sm:$0xff] }
 0x9b2   :  { %v2587_v40 = vld [vmem:[%s15221_s14 + $0x90] sm:$0xff] }
 0x9b3   :  { %11069 = vrsqrt.f32 %v2534_v15  ;;  %v2535_v57 = vadd.f32 1e-05, %v2531_v49  ;;  %v2595_v49 = vld [vmem:[%s15221_s14 + $0xd0] sm:$0xff] }
 0x9b4   :  { %v2528_v46 = vpop.xlane.xlu0 %2527 }
 0x9b5   :  { %11071 = vrsqrt.f32 %v2535_v57  ;;  %v2532_v41 = vmul.f32 0.03125, %v2528_v46 }
 0x9b7   :  { %v2536_v34 = vadd.f32 1e-05, %v2532_v41  ;;  %v2596_v41 = vld [vmem:[%s15221_s14 + $0xd8] sm:$0xff] }
 0x9b9   :  { %11073 = vrsqrt.f32 %v2536_v34 }
 0x9bb   :  { %v11068_v8 = vpop.eup %11067 }
 0x9bc   :  { %v2541_v30 = vmul.f32 %v11068_v8, %v13323_v56  ;;  %v2588_v56 = vld [vmem:[%s15221_s14 + $0x98] sm:$0xff] }
 0x9bd   :  { %v11070_v38 = vpop.eup %11069 }
 0x9be   :  { %v2552_v58 = vmul.f32 %v9306_v17, %v2541_v30  ;;  %v2542_v24 = vmul.f32 %v11070_v38, %v13325_v14  ;;  %v9329_v30 = vcombine.high %v2587_v40, %v2595_v49  ;;  %v9331_v38 = vcombine.high %v2588_v56, %v2596_v41 }
 0x9bf   :  { %v11072_v25 = vpop.eup %11071 }
 0x9c0   :  { %v2553_v7 = vmul.f32 %v9306_v17, %v2542_v24  ;;  %v13360_v57 = vadd.f32 %v9307_v39, %v2552_v58  ;;  %v2543_v15 = vmul.f32 %v11072_v25, %v13329_v23  ;;  %v2573_v58 = vld [vmem:[%s15221_s14 + $0x20] sm:$0xff]  ;;  %v2574_v25 = vld [vmem:[%s15221_s14 + $0x28] sm:$0xff] }
 0x9c1   :  { %v2581_v23 = vld [vmem:[%s15221_s14 + $0x60] sm:$0xff] }
 0x9c2   :  { %v13362_v46 = vadd.f32 %v9307_v39, %v2553_v7  ;;  %v2554_v24 = vmul.f32 %v9306_v17, %v2543_v15  ;;  %v9317_v15 = vcombine.high %v2573_v58, %v2581_v23 }
 0x9c3   :  { %v11074_v34 = vpop.eup %11073 }
 0x9c4   :  { %v13370_v14 = vpack.c.bf16 %v13362_v46, %v13360_v57  ;;  %v2544_v8 = vmul.f32 %v11074_v34, %v13337_v54  ;;  %v9328_v54 = vcombine.low %v2587_v40, %v2595_v49  ;;  %v9319_v34 = vcombine.high %v2574_v25, %v2582_v62  ;;  %v2598_v40 = vld [vmem:[%s15221_s14 + $0xe8] sm:$0xff] }
 0x9c5   :  { %v9316_v49 = vcombine.low %v2573_v58, %v2581_v23 }
 0x9c6   :  { %v2555_v7 = vmul.f32 %v9306_v17, %v2544_v8  ;;  %9340 = vmatmul.mubr.msk.bf16.vlgmr.msra.gmra.mrb[16].mxu0 %vm1769_vm0, %v13370_v14  ;;  %9342 = vmatmul.mubr.msk.bf16.vlgmr.msra.gmra.mrb[8].mxu1 %vm1769_vm0, %v13370_v14  ;;  %v9330_v17 = vcombine.low %v2588_v56, %v2596_v41  ;;  %v13385_v8 = vadd.f32 %v9307_v39, %v2554_v24  ;;  %v2583_v24 = vld [vmem:[%s15221_s14 + $0x70] sm:$0xff] }
 0x9c7   :  { %2893 = vmatprep.mubr.bf16.mxu0 %v15222_v47  ;;  %2946 = vmatprep.mubr.bf16.mxu1 %v15222_v47  ;;  %v9318_v56 = vcombine.low %v2574_v25, %v2582_v62 }
 0x9c8   :  { %v13383_v55 = vadd.f32 %v9307_v39, %v2555_v7  ;;  %2958 = vmatpush1.bf16.msra.mxu0 %v9312_v9  ;;  %3011 = vmatpush1.bf16.msra.mxu1 %v9314_v31  ;;  %v2589_v9 = vld [vmem:[%s15221_s14 + $0xa0] sm:$0xff]  ;;  %v2590_v39 = vld [vmem:[%s15221_s14 + $0xa8] sm:$0xff]  ;;  %v2576_v7 = vld [vmem:[%s15221_s14 + $0x38] sm:$0xff] }
 0x9c9   :  { %2959 = vmatprep.subr.bf16.mxu0 %v9329_v30  ;;  %3012 = vmatprep.subr.bf16.mxu1 %v9331_v38  ;;  %v2597_v31 = vld [vmem:[%s15221_s14 + $0xe0] sm:$0xff]  ;;  %v9335_v30 = vcombine.high %v2590_v39, %v2598_v40  ;;  %v2575_v38 = vld [vmem:[%s15221_s14 + $0x30] sm:$0xff]  ;;  %v9334_v58 = vcombine.low %v2590_v39, %v2598_v40 }
 0x9ca   :  { %v13389_v63 = vpack.c.bf16 %v13383_v55, %v13385_v8  ;;  %v9333_v41 = vcombine.high %v2589_v9, %v2597_v31  ;;  %v9332_v62 = vcombine.low %v2589_v9, %v2597_v31  ;;  %v9321_v23 = vcombine.high %v2575_v38, %v2583_v24  ;;  %v2600_v9 = vld [vmem:[%s15221_s14 + $0xf8] sm:$0xff] }
 0x9cb   :  { %v9320_v31 = vcombine.low %v2575_v38, %v2583_v24  ;;  %v10912_v38 = vld [vmem:[%s15223_s16 + $0xc0] sm:$0xff]  }
 0x9cc   :  { %2960 = vmatpush1.bf16.msra.mxu0 %v9328_v54  ;;  %3013 = vmatpush1.bf16.msra.mxu1 %v9330_v17  ;;  %v2584_v54 = vld [vmem:[%s15221_s14 + $0x78] sm:$0xff]  ;;  %v2591_v17 = vld [vmem:[%s15221_s14 + $0xb0] sm:$0xff]  ;;  %v10913_v24 = vld [vmem:[%s15223_s16] sm:$0xff]  }
 0x9cd   :  { %3063 = vmatprep.subr.bf16.mxu0 %v9317_v15  ;;  %3116 = vmatprep.subr.bf16.mxu1 %v9319_v34  ;;  %v9323_v25 = vcombine.high %v2576_v7, %v2584_v54  ;;  %v2599_v15 = vld [vmem:[%s15221_s14 + $0xf0] sm:$0xff]  ;;  %v2592_v34 = vld [vmem:[%s15221_s14 + $0xb8] sm:$0xff]  ;;  %v9322_v39 = vcombine.low %v2576_v7, %v2584_v54  ;;  %v10914_v7 = vld [vmem:[%s15223_s16 + $0x80] sm:$0xff]  }
 0x9ce   :  { %9341 = vmatmul.mubr.msk.bf16.gmra.mrb[20].mxu0 %vm1769_vm0, %v13389_v63  ;;  %9343 = vmatmul.mubr.msk.bf16.gmra.mrb[12].mxu1 %vm1769_vm0, %v13389_v63  ;;  %v9337_v40 = vcombine.high %v2591_v17, %v2599_v15  ;;  %v10915_v54 = vld [vmem:[%s15223_s16 + $0x48] sm:$0xff]  }
 0x9cf   :  { %2989 = vmatprep.mubr.bf16.mxu0 %v15222_v47  ;;  %3042 = vmatprep.mubr.bf16.mxu1 %v15222_v47 }
 0x9d6   :  { %9344 = vmatmul.mubr.msk.bf16.vlgmr.msra.gmra.mrb[24].mxu0 %vm1769_vm0, %v13370_v14  ;;  %9346 = vmatmul.mubr.msk.bf16.vlgmr.msra.gmra.mrb[16].mxu1 %vm1769_vm0, %v13370_v14 }
 0x9d7   :  { %2999 = vmatprep.mubr.bf16.mxu0 %v15222_v47  ;;  %3052 = vmatprep.mubr.bf16.mxu1 %v15222_v47 }
 0x9d8   :  { %3064 = vmatpush1.bf16.msra.mxu0 %v9316_v49  ;;  %3117 = vmatpush1.bf16.msra.mxu1 %v9318_v56  ;;  %v9339_v49 = vcombine.high %v2592_v34, %v2600_v9  ;;  %v9336_v56 = vcombine.low %v2591_v17, %v2599_v15  ;;  %v10920_v17 = vld [vmem:[%s15223_s16 + $0xd0] sm:$0xff]  }
 0x9d9   :  { %3065 = vmatprep.subr.bf16.mxu0 %v9333_v41  ;;  %3118 = vmatprep.subr.bf16.mxu1 %v9335_v30  ;;  %v9338_v41 = vcombine.low %v2592_v34, %v2600_v9  ;;  %v10911_v30 = vld [vmem:[%s15223_s16 + $0x40] sm:$0xff]   ;;  %v10922_v15 = vld [vmem:[%s15223_s16 + $0x90] sm:$0xff]   ;;  %v10923_v34 = vld [vmem:[%s15223_s16 + $0x58] sm:$0xff]  }
 0x9da   :  { %v10924_v9 = vld [vmem:[%s15223_s16 + $0xd8] sm:$0xff]  }
 0x9dc   :  { %3066 = vmatpush1.bf16.msra.mxu0 %v9332_v62  ;;  %3119 = vmatpush1.bf16.msra.mxu1 %v9334_v58  ;;  %v10916_v62 = vld [vmem:[%s15223_s16 + $0xc8] sm:$0xff]  }
 0x9dd   :  { %3169 = vmatprep.subr.bf16.mxu0 %v9321_v23  ;;  %3222 = vmatprep.subr.bf16.mxu1 %v9323_v25  ;;  %v10917_v58 = vld [vmem:[%s15223_s16 + $0x8] sm:$0xff]   ;;  %v10919_v25 = vld [vmem:[%s15223_s16 + $0x50] sm:$0xff]  }
 0x9de   :  { %9345 = vmatmul.mubr.msk.bf16.gmra.mrb[28].mxu0 %vm1769_vm0, %v13389_v63  ;;  %9347 = vmatmul.mubr.msk.bf16.gmra.mrb[20].mxu1 %vm1769_vm0, %v13389_v63  ;;  %v10918_v23 = vld [vmem:[%s15223_s16 + $0x88] sm:$0xff]  }
 0x9df   :  { %3095 = vmatprep.mubr.bf16.mxu0 %v15222_v47  ;;  %3148 = vmatprep.mubr.bf16.mxu1 %v15222_v47 }
 0x9e6   :  { %9348 = vmatmul.mubr.msk.bf16.vlgmr.msra.gmra.mrb[32].mxu0 %vm1769_vm0, %v13370_v14  ;;  %9350 = vmatmul.mubr.msk.bf16.vlgmr.msra.gmra.mrb[24].mxu1 %vm1769_vm0, %v13370_v14 }
 0x9e7   :  { %3105 = vmatprep.mubr.bf16.mxu0 %v15222_v47  ;;  %3158 = vmatprep.mubr.bf16.mxu1 %v15222_v47 }
 0x9e8   :  { %3170 = vmatpush1.bf16.msra.mxu0 %v9320_v31  ;;  %3223 = vmatpush1.bf16.msra.mxu1 %v9322_v39  ;;  %v10925_v31 = vld [vmem:[%s15223_s16 + $0x18] sm:$0xff]  }
 0x9e9   :  { %3171 = vmatprep.subr.bf16.mxu0 %v9337_v40  ;;  %3224 = vmatprep.subr.bf16.mxu1 %v9339_v49  ;;  %v10926_v39 = vld [vmem:[%s15223_s16 + $0x98] sm:$0xff]   ;;  %v10927_v40 = vld [vmem:[%s15223_s16 + $0x60] sm:$0xff]  }
 0x9ea   :  { %v10928_v49 = vld [vmem:[%s15223_s16 + $0xe0] sm:$0xff]  }
 0x9ec   :  { %3172 = vmatpush1.bf16.msra.mxu0 %v9336_v56  ;;  %3225 = vmatpush1.bf16.msra.mxu1 %v9338_v41  ;;  %v10929_v56 = vld [vmem:[%s15223_s16 + $0x20] sm:$0xff]  }
 0x9ed   :  { %9648 = vmatprep.subr.bf16.mxu0 %v10911_v30  ;;  %9676 = vmatprep.subr.bf16.mxu1 %v10912_v38  ;;  %v10930_v41 = vld [vmem:[%s15223_s16 + $0xa0] sm:$0xff]   ;;  %v10932_v30 = vld [vmem:[%s15223_s16 + $0xe8] sm:$0xff]  }
 0x9ee   :  { %9349 = vmatmul.mubr.msk.bf16.gmra.mrb[36].mxu0 %vm1769_vm0, %v13389_v63  ;;  %9351 = vmatmul.mubr.msk.bf16.gmra.mrb[28].mxu1 %vm1769_vm0, %v13389_v63  ;;  %v10933_v38 = vld [vmem:[%s15223_s16 + $0x28] sm:$0xff]  }
 0x9ef   :  { %3201 = vmatprep.mubr.bf16.mxu0 %v15222_v47  ;;  %3254 = vmatprep.mubr.bf16.mxu1 %v15222_v47 }
 0x9f6   :  { %9352 = vmatmul.mubr.msk.bf16.vlgmr.msra.gmra.mrb[40].mxu0 %vm1769_vm0, %v13370_v14  ;;  %9354 = vmatmul.mubr.msk.bf16.vlgmr.msra.gmra.mrb[32].mxu1 %vm1769_vm0, %v13370_v14  ;;  %v10921_v14 = vld [vmem:[%s15223_s16 + $0x10] sm:$0xff]  }
 0x9f7   :  { %3211 = vmatprep.mubr.bf16.mxu0 %v15222_v47  ;;  %3264 = vmatprep.mubr.bf16.mxu1 %v15222_v47 }
 0x9f8   :  { %9649 = vmatpush3.bf16.msra.mxu0 %v10913_v24  ;;  %9677 = vmatpush3.bf16.msra.mxu1 %v10914_v7  ;;  %v10934_v24 = vld [vmem:[%s15223_s16 + $0xa8] sm:$0xff]   ;;  %v10935_v7 = vld [vmem:[%s15223_s16 + $0x70] sm:$0xff]  }
 0x9f9   :  { %9650 = vmatprep.subr.bf16.mxu0 %v10915_v54  ;;  %9678 = vmatprep.subr.bf16.mxu1 %v10916_v62  ;;  %v10936_v54 = vld [vmem:[%s15223_s16 + $0xf0] sm:$0xff]  }
 0x9fa   :  { %v10937_v62 = vld [vmem:[%s15223_s16 + $0x30] sm:$0xff]  }
 0x9fc   :  { %9651 = vmatpush3.bf16.msra.mxu0 %v10917_v58  ;;  %9679 = vmatpush3.bf16.msra.mxu1 %v10918_v23  ;;  %v10938_v58 = vld [vmem:[%s15223_s16 + $0xb0] sm:$0xff]   ;;  %v10939_v23 = vld [vmem:[%s15223_s16 + $0x78] sm:$0xff]  }
 0x9fd   :  { %9652 = vmatprep.subr.bf16.mxu0 %v10919_v25  ;;  %9680 = vmatprep.subr.bf16.mxu1 %v10920_v17  ;;  %v10940_v25 = vld [vmem:[%s15223_s16 + $0xf8] sm:$0xff]  }
 0x9fe   :  { %9353 = vmatmul.mubr.msk.bf16.gmra.mrb[44].mxu0 %vm1769_vm0, %v13389_v63  ;;  %9355 = vmatmul.mubr.msk.bf16.gmra.mrb[36].mxu1 %vm1769_vm0, %v13389_v63  ;;  %v10931_v63 = vld [vmem:[%s15223_s16 + $0x68] sm:$0xff]   ;;  %v10941_v17 = vld [vmem:[%s15223_s16 + $0x38] sm:$0xff]  }
 0xa00   :  { %9653 = vmatpush3.bf16.msra.mxu0 %v10921_v14  ;;  %9681 = vmatpush3.bf16.msra.mxu1 %v10922_v15  ;;  %v10942_v14 = vld [vmem:[%s15223_s16 + $0xb8] sm:$0xff]   ;;  %v10943_v15 = vld [vmem:[%s15223_s16 + $0x140] sm:$0xff]  }
 0xa01   :  { %9654 = vmatprep.subr.bf16.mxu0 %v10923_v34  ;;  %9682 = vmatprep.subr.bf16.mxu1 %v10924_v9  ;;  %v10944_v34 = vld [vmem:[%s15223_s16 + $0x1c0] sm:$0xff]   ;;  %v2605_v9 = vlaneseq }
 0xa04   :  { %9655 = vmatpush3.bf16.msra.mxu0 %v10925_v31  ;;  %9683 = vmatpush3.bf16.msra.mxu1 %v10926_v39  ;;  %v2606_v31 = vshrl.u32 %v2605_v9, 7 }
 0xa05   :  { %9656 = vmatprep.subr.bf16.mxu0 %v10927_v40  ;;  %9684 = vmatprep.subr.bf16.mxu1 %v10928_v49  ;;  %v13482_v49 = vld [vmem:[%s15224_s6] sm:$0xff] }
 0xa06   :  { %v13477_v39 = vsub.s32 0, %v2606_v31  ;;  %v13479_v40 = vsub.s32 2, %v2606_v31  ;;  %v13513_v13 = vsub.s32 6, %v2606_v31  ;;  %v13516_v12 = vsub.s32 5, %v2606_v31 }
 0xa08   :  { %9657 = vmatpush3.bf16.msra.mxu0 %v10929_v56  ;;  %9685 = vmatpush3.bf16.msra.mxu1 %v10930_v41  ;;  %15226 = vst [vmem:[#allocation392_spill] sm:$0xff] %v13477_v39  ;;  %15227 = vst [vmem:[#allocation393_spill] sm:$0xff] %v13479_v40  ;;  %v13484_v56 = vsub.s32 1, %v2606_v31  ;;  %v13486_v41 = vsub.s32 3, %v2606_v31 }
 0xa09   :  { %9658 = vmatprep.subr.bf16.mxu0 %v10931_v63  ;;  %9686 = vmatprep.subr.bf16.mxu1 %v10932_v30  ;;  %v2608_v63 = vrot.slane %v13482_v49, %v13477_v39  ;;  %v2616_v30 = vrot.slane %v13482_v49, %v13479_v40 }
 0xa0a   :  { %15228 = vst [vmem:[#allocation394_spill] sm:$0xff] %v13484_v56  ;;  %15229 = vst [vmem:[#allocation395_spill] sm:$0xff] %v13486_v41 }
 0xa0c   :  { %9659 = vmatpush3.bf16.msra.mxu0 %v10933_v38  ;;  %9687 = vmatpush3.bf16.msra.mxu1 %v10934_v24  ;;  %v1716_v38 = vld [vmem:[%s15225_s19] sm:$0xff]  ;;  %v13495_v24 = vrot.slane %v13482_v49, %v13484_v56 }
 0xa0d   :  { %9660 = vmatprep.subr.bf16.mxu0 %v10935_v7  ;;  %9688 = vmatprep.subr.bf16.mxu1 %v10936_v54  ;;  %v13499_v7 = vrot.slane %v13482_v49, %v13486_v41  ;;  %v1717_v54 = vld [vmem:[%s15225_s19 + $0x8] sm:$0xff] }
 0xa0e   :  { %5018 = vrot.lane.b32.xlu1 %v1716_v38, %s11654_s0  ;;  %5020 = vrot.lane.b32.xlu0 %v1717_v54, %s11654_s0  ;;  %v1719_v54 = vld [vmem:[%s15225_s19 + $0x18] sm:$0xff] }
 0xa10   :  { %9661 = vmatpush3.bf16.msra.mxu0 %v10937_v62  ;;  %9689 = vmatpush3.bf16.msra.mxu1 %v10938_v58  ;;  %v1718_v62 = vld [vmem:[%s15225_s19 + $0x10] sm:$0xff] }
 0xa11   :  { %9662 = vmatprep.subr.bf16.mxu0 %v10939_v23  ;;  %9690 = vmatprep.subr.bf16.mxu1 %v10940_v25 }
 0xa12   :  { %5022 = vrot.lane.b32.xlu1 %v1718_v62, %s11654_s0 }
 0xa14   :  { %9663 = vmatpush3.bf16.msra.mxu0 %v10941_v17  ;;  %9691 = vmatpush3.bf16.msra.mxu1 %v10942_v14 }
 0xa15   :  { %9704 = vmatprep.subr.bf16.mxu0 %v10943_v15  ;;  %9732 = vmatprep.subr.bf16.mxu1 %v10944_v34 }
 0xa16   :  { %5024 = vrot.lane.b32.xlu1 %v1719_v54, %s11654_s0 }
 0xa99   :  { %v2885_v58 = vpop.f32.mrb[16].mxu0  ;;  %v2938_v23 = vpop.f32.mrb[8].mxu1 }
 0xa9a   :  { %v2886_v25 = vadd.f32 %v2885_v58, %v2608_v63  ;;  %v2939_v17 = vadd.f32 %v2938_v23, %v2616_v30  ;;  %v2887_v14 = vpop.f32.mrb[17].mxu0  ;;  %v2940_v15 = vpop.f32.mrb[9].mxu1  ;;  %v13511_v23 = vsub.s32 4, %v2606_v31 }
 0xa9b   :  { %v2888_v34 = vadd.f32 %v2887_v14, %v13495_v24  ;;  %v2941_v9 = vadd.f32 %v2940_v15, %v13499_v7  ;;  %v2889_v1 = vpop.f32.mrb[18].mxu0  ;;  %v2942_v0 = vpop.f32.mrb[10].mxu1 }
 0xa9c   :  { %v2890_v38 = vadd.f32 %v2889_v1, %v2608_v63  ;;  %v2943_v48 = vadd.f32 %v2942_v0, %v2616_v30  ;;  %v2891_v21 = vpop.f32.mrb[19].mxu0  ;;  %v2944_v5 = vpop.f32.mrb[11].mxu1  ;;  %v3275_v14 = vmax.f32 %v2886_v25, 0.0  ;;  %v3277_v15 = vmax.f32 %v2939_v17, 0.0  ;;  %v10945_v17 = vld [vmem:[%s15223_s16 + $0x100] sm:$0xff]  }
 0xa9d   :  { %v2892_v29 = vadd.f32 %v2891_v21, %v13495_v24  ;;  %v2945_v58 = vadd.f32 %v2944_v5, %v13499_v7  ;;  %v3276_v62 = vmax.f32 %v2888_v34, 0.0  ;;  %v3278_v1 = vmax.f32 %v2941_v9, 0.0 }
 0xa9e   :  { %v3291_v20 = vmax.f32 %v2890_v38, 0.0  ;;  %v3293_v4 = vmax.f32 %v2943_v48, 0.0  ;;  %v13520_v38 = vsub.s32 7, %v2606_v31 }
 0xa9f   :  { %v3292_v0 = vmax.f32 %v2892_v29, 0.0  ;;  %v3294_v28 = vmax.f32 %v2945_v58, 0.0  ;;  %v10947_v58 = vld [vmem:[%s15223_s16 + $0x148] sm:$0xff]  }
 0xaa0   :  { %v3339_v21 = vpack.c.bf16 %v3291_v20, %v3275_v14  ;;  %v3341_v5 = vpack.c.bf16 %v3293_v4, %v3277_v15  ;;  %v13526_v20 = vrot.slane %v13482_v49, %v13511_v23 }
 0xaa1   :  { %v3340_v19 = vpack.c.bf16 %v3292_v0, %v3276_v62  ;;  %v3342_v3 = vpack.c.bf16 %v3294_v28, %v3278_v1  ;;  %v2895_v25 = vpop.f32.mrb[20].mxu0  ;;  %v2948_v27 = vpop.f32.mrb[12].mxu1  ;;  %v13536_v0 = vrot.slane %v13482_v49, %v13516_v12 }
 0xaa2   :  { %v2896_v48 = vadd.f32 %v2895_v25, %v2608_v63  ;;  %v2949_v34 = vadd.f32 %v2948_v27, %v2616_v30  ;;  %v2897_v29 = vpop.f32.mrb[21].mxu0  ;;  %v2950_v9 = vpop.f32.mrb[13].mxu1  ;;  %v13532_v27 = vrot.slane %v13482_v49, %v13513_v13 }
 0xaa3   :  { %v2898_v4 = vadd.f32 %v2897_v29, %v13495_v24  ;;  %v2951_v28 = vadd.f32 %v2950_v9, %v13499_v7  ;;  %v2899_v54 = vpop.f32.mrb[22].mxu0  ;;  %v2952_v14 = vpop.f32.mrb[14].mxu1  ;;  %4434 = vmatprep.mubr.bf16.mxu0 %v3340_v19  ;;  %4483 = vmatprep.mubr.bf16.mxu1 %v3342_v3  ;;  %v10949_v19 = vld [vmem:[%s15223_s16 + $0x108] sm:$0xff]  }
 0xaa4   :  { %v2900_v31 = vadd.f32 %v2899_v54, %v2608_v63  ;;  %v2953_v15 = vadd.f32 %v2952_v14, %v2616_v30  ;;  %v2901_v62 = vpop.f32.mrb[23].mxu0  ;;  %v2954_v1 = vpop.f32.mrb[15].mxu1  ;;  %4435 = vmatmul.mubr.bf16.vlgmr.msra.gmra.mrb[48].mxu0 %v3339_v21  ;;  %4484 = vmatmul.mubr.bf16.vlgmr.msra.gmra.mrb[40].mxu1 %v3341_v5  ;;  %v10950_v29 = vld [vmem:[%s15223_s16 + $0x188] sm:$0xff]   ;;  %v13544_v63 = vrot.slane %v13482_v49, %v13520_v38  ;;  %v3307_v30 = vmax.f32 %v2896_v48, 0.0  ;;  %v10951_v54 = vld [vmem:[%s15223_s16 + $0x150] sm:$0xff]  }
 0xaa5   :  { %v2902_v25 = vadd.f32 %v2901_v62, %v13495_v24  ;;  %v2955_v3 = vadd.f32 %v2954_v1, %v13499_v7  ;;  %9705 = vmatpush3.bf16.msra.mxu0 %v10945_v17  ;;  %9733 = vmatpush3.bf16.msra.mxu1 %v10946_v11  ;;  %v3309_v21 = vmax.f32 %v2949_v34, 0.0  ;;  %v10952_v24 = vld [vmem:[%s15223_s16 + $0x1d0] sm:$0xff]   ;;  %v3308_v14 = vmax.f32 %v2898_v4, 0.0 }
 0xaa6   :  { %v3323_v5 = vmax.f32 %v2900_v31, 0.0  ;;  %v3325_v9 = vmax.f32 %v2953_v15, 0.0  ;;  %9706 = vmatprep.subr.bf16.mxu0 %v10947_v58  ;;  %9734 = vmatprep.subr.bf16.mxu1 %v10948_v18  ;;  %v3310_v7 = vmax.f32 %v2951_v28, 0.0  ;;  %v10953_v58 = vld [vmem:[%s15223_s16 + $0x110] sm:$0xff]  }
 0xaa7   :  { %v3324_v17 = vmax.f32 %v2902_v25, 0.0  ;;  %v3326_v11 = vmax.f32 %v2955_v3, 0.0  ;;  %v10954_v31 = vld [vmem:[%s15223_s16 + $0x190] sm:$0xff]   ;;  %v10955_v25 = vld [vmem:[%s15223_s16 + $0x158] sm:$0xff]  }
 0xaa8   :  { %v3355_v62 = vpack.c.bf16 %v3323_v5, %v3307_v30  ;;  %v3357_v1 = vpack.c.bf16 %v3325_v9, %v3309_v21  ;;  %v10956_v3 = vld [vmem:[%s15223_s16 + $0x1d8] sm:$0xff]  }
 0xaa9   :  { %v3356_v49 = vpack.c.bf16 %v3324_v17, %v3308_v14  ;;  %v3358_v2 = vpack.c.bf16 %v3326_v11, %v3310_v7  ;;  %9707 = vmatpush3.bf16.msra.mxu0 %v10949_v19  ;;  %9735 = vmatpush3.bf16.msra.mxu1 %v10950_v29  ;;  %v2991_v48 = vpop.f32.mrb[24].mxu0  ;;  %v3044_v34 = vpop.f32.mrb[16].mxu1  ;;  %v10957_v17 = vld [vmem:[%s15223_s16 + $0x118] sm:$0xff]  }
 0xaaa   :  { %v2992_v18 = vadd.f32 %v2991_v48, %v13526_v20  ;;  %v3045_v15 = vadd.f32 %v3044_v34, %v13532_v27  ;;  %v2993_v4 = vpop.f32.mrb[25].mxu0  ;;  %v3046_v28 = vpop.f32.mrb[17].mxu1  ;;  %9708 = vmatprep.subr.bf16.mxu0 %v10951_v54  ;;  %9736 = vmatprep.subr.bf16.mxu1 %v10952_v24  ;;  %v10958_v11 = vld [vmem:[%s15223_s16 + $0x198] sm:$0xff]  }
 0xaab   :  { %v2994_v30 = vadd.f32 %v2993_v4, %v13536_v0  ;;  %v3047_v19 = vadd.f32 %v3046_v28, %v13544_v63  ;;  %v2995_v29 = vpop.f32.mrb[26].mxu0  ;;  %v3048_v21 = vpop.f32.mrb[18].mxu1  ;;  %4442 = vmatprep.mubr.bf16.mxu0 %v3356_v49  ;;  %4491 = vmatprep.mubr.bf16.mxu1 %v3358_v2  ;;  %v10959_v4 = vld [vmem:[%s15223_s16 + $0x160] sm:$0xff]  }
 0xaac   :  { %v2996_v5 = vadd.f32 %v2995_v29, %v13526_v20  ;;  %v3049_v9 = vadd.f32 %v3048_v21, %v13532_v27  ;;  %v2997_v14 = vpop.f32.mrb[27].mxu0  ;;  %v3050_v54 = vpop.f32.mrb[19].mxu1  ;;  %4443 = vmatmul.mubr.bf16.gmra.mrb[52].mxu0 %v3355_v62  ;;  %4492 = vmatmul.mubr.bf16.gmra.mrb[44].mxu1 %v3357_v1  ;;  %v3279_v2 = vmax.f32 %v2992_v18, 0.0  ;;  %v3281_v49 = vmax.f32 %v3045_v15, 0.0  ;;  %v10960_v62 = vld [vmem:[%s15223_s16 + $0x1e0] sm:$0xff]  }
 0xaad   :  { %v2998_v24 = vadd.f32 %v2997_v14, %v13536_v0  ;;  %v3051_v7 = vadd.f32 %v3050_v54, %v13544_v63  ;;  %9709 = vmatpush3.bf16.msra.mxu0 %v10953_v58  ;;  %9737 = vmatpush3.bf16.msra.mxu1 %v10954_v31  ;;  %v3280_v1 = vmax.f32 %v2994_v30, 0.0  ;;  %v3282_v28 = vmax.f32 %v3047_v19, 0.0  ;;  %v13569_v31 = vld [vmem:[%s15224_s6 + $0x8] sm:$0xff] }
 0xaae   :  { %v3295_v48 = vmax.f32 %v2996_v5, 0.0  ;;  %v3297_v34 = vmax.f32 %v3049_v9, 0.0  ;;  %9710 = vmatprep.subr.bf16.mxu0 %v10955_v25  ;;  %9738 = vmatprep.subr.bf16.mxu1 %v10956_v3  ;;  %v10961_v5 = vld [vmem:[%s15223_s16 + $0x120] sm:$0xff]  }
 0xaaf   :  { %v3296_v29 = vmax.f32 %v2998_v24, 0.0  ;;  %v3298_v21 = vmax.f32 %v3051_v7, 0.0  ;;  %v10962_v9 = vld [vmem:[%s15223_s16 + $0x1a0] sm:$0xff]   ;;  %v10963_v7 = vld [vmem:[%s15223_s16 + $0x168] sm:$0xff]  }
 0xab0   :  { %v13564_v14 = vpack.c.bf16 %v3295_v48, %v3279_v2  ;;  %v13566_v58 = vpack.c.bf16 %v3297_v34, %v3281_v49  ;;  %v10964_v2 = vld [vmem:[%s15223_s16 + $0x1e8] sm:$0xff]   ;;  %v13581_v34 = vrot.slane %v13569_v31, %v13477_v39  ;;  %v10976_v39 = vld [vmem:[%s15223_s16 + $0x2c0] sm:$0xff]  }
 0xab1   :  { %v3344_v18 = vpack.c.bf16 %v3296_v29, %v3280_v1  ;;  %v3346_v15 = vpack.c.bf16 %v3298_v21, %v3282_v28  ;;  %9711 = vmatpush3.bf16.msra.mxu0 %v10957_v17  ;;  %9739 = vmatpush3.bf16.msra.mxu1 %v10958_v11  ;;  %v3001_v25 = vpop.f32.mrb[28].mxu0  ;;  %v3054_v3 = vpop.f32.mrb[20].mxu1  ;;  %v13587_v29 = vrot.slane %v13569_v31, %v13479_v40 }
 0xab2   :  { %v3002_v30 = vadd.f32 %v3001_v25, %v13526_v20  ;;  %v3055_v19 = vadd.f32 %v3054_v3, %v13532_v27  ;;  %v3003_v54 = vpop.f32.mrb[29].mxu0  ;;  %v3056_v24 = vpop.f32.mrb[21].mxu1  ;;  %9712 = vmatprep.subr.bf16.mxu0 %v10959_v4  ;;  %9740 = vmatprep.subr.bf16.mxu1 %v10960_v62  ;;  %v13591_v21 = vrot.slane %v13569_v31, %v13484_v56 }
 0xab3   :  { %v3004_v49 = vadd.f32 %v3003_v54, %v13536_v0  ;;  %v3057_v48 = vadd.f32 %v3056_v24, %v13544_v63  ;;  %v3005_v17 = vpop.f32.mrb[30].mxu0  ;;  %v3058_v11 = vpop.f32.mrb[22].mxu1  ;;  %4532 = vmatprep.mubr.bf16.mxu0 %v3344_v18  ;;  %4581 = vmatprep.mubr.bf16.mxu1 %v3346_v15  ;;  %v13599_v25 = vrot.slane %v13569_v31, %v13486_v41 }
 0xab4   :  { %v3006_v1 = vadd.f32 %v3005_v17, %v13526_v20  ;;  %v3059_v4 = vadd.f32 %v3058_v11, %v13532_v27  ;;  %v3007_v62 = vpop.f32.mrb[31].mxu0  ;;  %v3060_v28 = vpop.f32.mrb[23].mxu1  ;;  %v10965_v20 = vld [vmem:[%s15223_s16 + $0x128] sm:$0xff]   ;;  %v3311_v3 = vmax.f32 %v3002_v30, 0.0  ;;  %v3313_v54 = vmax.f32 %v3055_v19, 0.0  ;;  %v10967_v11 = vld [vmem:[%s15223_s16 + $0x170] sm:$0xff]  }
 0xab5   :  { %v3008_v18 = vadd.f32 %v3007_v62, %v13536_v0  ;;  %v3061_v15 = vadd.f32 %v3060_v28, %v13544_v63  ;;  %9713 = vmatpush3.bf16.msra.mxu0 %v10961_v5  ;;  %9741 = vmatpush3.bf16.msra.mxu1 %v10962_v9  ;;  %v10966_v27 = vld [vmem:[%s15223_s16 + $0x1a8] sm:$0xff]   ;;  %v10968_v0 = vld [vmem:[%s15223_s16 + $0x1f0] sm:$0xff]   ;;  %v3312_v62 = vmax.f32 %v3004_v49, 0.0  ;;  %v3314_v63 = vmax.f32 %v3057_v48, 0.0 }
 0xab6   :  { %v3327_v24 = vmax.f32 %v3006_v1, 0.0  ;;  %v3329_v17 = vmax.f32 %v3059_v4, 0.0  ;;  %9714 = vmatprep.subr.bf16.mxu0 %v10963_v7  ;;  %9742 = vmatprep.subr.bf16.mxu1 %v10964_v2  ;;  %v10969_v1 = vld [vmem:[%s15223_s16 + $0x130] sm:$0xff]  }
 0xab7   :  { %v3328_v5 = vmax.f32 %v3008_v18, 0.0  ;;  %v3330_v9 = vmax.f32 %v3061_v15, 0.0  ;;  %v10970_v4 = vld [vmem:[%s15223_s16 + $0x1b0] sm:$0xff]  }
 0xab8   :  { %v13603_v28 = vpack.c.bf16 %v3327_v24, %v3311_v3  ;;  %v13605_v56 = vpack.c.bf16 %v3329_v17, %v3313_v54  ;;  %v10971_v3 = vld [vmem:[%s15223_s16 + $0x178] sm:$0xff]  }
 0xab9   :  { %v13607_v30 = vpack.c.bf16 %v3328_v5, %v3312_v62  ;;  %v13609_v19 = vpack.c.bf16 %v3330_v9, %v3314_v63  ;;  %9715 = vmatpush3.bf16.msra.mxu0 %v10965_v20  ;;  %9743 = vmatpush3.bf16.msra.mxu1 %v10966_v27  ;;  %v3097_v7 = vpop.f32.mrb[32].mxu0  ;;  %v3150_v2 = vpop.f32.mrb[24].mxu1  ;;  %v10972_v54 = vld [vmem:[%s15223_s16 + $0x1f8] sm:$0xff]  }
 0xaba   :  { %v3098_v49 = vadd.f32 %v3097_v7, %v13581_v34  ;;  %v3151_v48 = vadd.f32 %v3150_v2, %v13587_v29  ;;  %v3099_v18 = vpop.f32.mrb[33].mxu0  ;;  %v3152_v15 = vpop.f32.mrb[25].mxu1  ;;  %9716 = vmatprep.subr.bf16.mxu0 %v10967_v11  ;;  %9744 = vmatprep.subr.bf16.mxu1 %v10968_v0  ;;  %v10973_v7 = vld [vmem:[%s15223_s16 + $0x138] sm:$0xff]  }
 0xabb   :  { %v3100_v24 = vadd.f32 %v3099_v18, %v13591_v21  ;;  %v3153_v20 = vadd.f32 %v3152_v15, %v13599_v25  ;;  %v3101_v27 = vpop.f32.mrb[34].mxu0  ;;  %v3154_v17 = vpop.f32.mrb[26].mxu1  ;;  %v10974_v2 = vld [vmem:[%s15223_s16 + $0x1b8] sm:$0xff]  }
 0xabc   :  { %v3102_v62 = vadd.f32 %v3101_v27, %v13581_v34  ;;  %v3155_v63 = vadd.f32 %v3154_v17, %v13587_v29  ;;  %v3103_v5 = vpop.f32.mrb[35].mxu0  ;;  %v3156_v9 = vpop.f32.mrb[27].mxu1  ;;  %v3283_v18 = vmax.f32 %v3098_v49, 0.0  ;;  %v3285_v15 = vmax.f32 %v3151_v48, 0.0  ;;  %v10975_v27 = vld [vmem:[%s15223_s16 + $0x240] sm:$0xff]  }
 0xabd   :  { %v3104_v11 = vadd.f32 %v3103_v5, %v13591_v21  ;;  %v3157_v0 = vadd.f32 %v3156_v9, %v13599_v25  ;;  %9717 = vmatpush3.bf16.msra.mxu0 %v10969_v1  ;;  %9745 = vmatpush3.bf16.msra.mxu1 %v10970_v4  ;;  %v3284_v17 = vmax.f32 %v3100_v24, 0.0  ;;  %v3286_v26 = vmax.f32 %v3153_v20, 0.0  ;;  %v10979_v9 = vld [vmem:[%s15223_s16 + $0x248] sm:$0xff]  }
 0xabe   :  { %v3299_v41 = vmax.f32 %v3102_v62, 0.0  ;;  %v3301_v40 = vmax.f32 %v3155_v63, 0.0  ;;  %9718 = vmatprep.subr.bf16.mxu0 %v10971_v3  ;;  %9746 = vmatprep.subr.bf16.mxu1 %v10972_v54 }
 0xabf   :  { %v3300_v10 = vmax.f32 %v3104_v11, 0.0  ;;  %v3302_v47 = vmax.f32 %v3157_v0, 0.0  ;;  %v10980_v11 = vld [vmem:[%s15223_s16 + $0x2c8] sm:$0xff]   ;;  %v13645_v0 = vrot.slane %v13569_v31, %v13511_v23 }
 0xac0   :  { %v13627_v5 = vpack.c.bf16 %v3299_v41, %v3283_v18  ;;  %v13629_v1 = vpack.c.bf16 %v3301_v40, %v3285_v15  ;;  %v10977_v40 = vld [vmem:[%s15223_s16 + $0x200] sm:$0xff]  }
 0xac1   :  { %v13631_v4 = vpack.c.bf16 %v3300_v10, %v3284_v17  ;;  %v13633_v49 = vpack.c.bf16 %v3302_v47, %v3286_v26  ;;  %9719 = vmatpush3.bf16.msra.mxu0 %v10973_v7  ;;  %9747 = vmatpush3.bf16.msra.mxu1 %v10974_v2  ;;  %v3107_v48 = vpop.f32.mrb[36].mxu0  ;;  %v3160_v3 = vpop.f32.mrb[28].mxu1  ;;  %v10978_v41 = vld [vmem:[%s15223_s16 + $0x280] sm:$0xff]   ;;  %v13649_v7 = vrot.slane %v13569_v31, %v13513_v13 }
 0xac2   :  { %v3108_v54 = vadd.f32 %v3107_v48, %v13581_v34  ;;  %v3161_v24 = vadd.f32 %v3160_v3, %v13587_v29  ;;  %v3109_v20 = vpop.f32.mrb[37].mxu0  ;;  %v3162_v62 = vpop.f32.mrb[29].mxu1  ;;  %9760 = vmatprep.subr.bf16.mxu0 %v10975_v27  ;;  %9788 = vmatprep.subr.bf16.mxu1 %v10976_v39  ;;  %v13657_v27 = vrot.slane %v13569_v31, %v13516_v12 }
 0xac3   :  { %v3110_v10 = vadd.f32 %v3109_v20, %v13591_v21  ;;  %v3163_v26 = vadd.f32 %v3162_v62, %v13599_v25  ;;  %v3111_v47 = vpop.f32.mrb[38].mxu0  ;;  %v3164_v63 = vpop.f32.mrb[30].mxu1  ;;  %v10981_v20 = vld [vmem:[%s15223_s16 + $0x208] sm:$0xff]  }
 0xac4   :  { %v3112_v39 = vadd.f32 %v3111_v47, %v13581_v34  ;;  %v3165_v2 = vadd.f32 %v3164_v63, %v13587_v29  ;;  %4533 = vmatmul.mubr.bf16.vlgmr.msra.gmra.mrb[56].mxu0 %v13564_v14  ;;  %4582 = vmatmul.mubr.bf16.vlgmr.msra.gmra.mrb[48].mxu1 %v13566_v58  ;;  %v3113_v18 = vpop.f32.mrb[39].mxu0  ;;  %v3166_v15 = vpop.f32.mrb[31].mxu1  ;;  %v13665_v14 = vrot.slane %v13569_v31, %v13520_v38  ;;  %v3315_v58 = vmax.f32 %v3108_v54, 0.0  ;;  %v10984_v31 = vld [vmem:[%s15223_s16 + $0x2d0] sm:$0xff]  }
 0xac5   :  { %v3114_v17 = vadd.f32 %v3113_v18, %v13591_v21  ;;  %v3167_v48 = vadd.f32 %v3166_v15, %v13599_v25  ;;  %4540 = vmatprep.mubr.bf16.mxu0 %v13607_v30  ;;  %4589 = vmatprep.mubr.bf16.mxu1 %v13609_v19  ;;  %v3317_v34 = vmax.f32 %v3161_v24, 0.0  ;;  %v10982_v21 = vld [vmem:[%s15223_s16 + $0x288] sm:$0xff]   ;;  %v3316_v62 = vmax.f32 %v3110_v10, 0.0  ;;  %v10983_v19 = vld [vmem:[%s15223_s16 + $0x250] sm:$0xff]  }
 0xac6   :  { %v3331_v29 = vmax.f32 %v3112_v39, 0.0  ;;  %v3333_v3 = vmax.f32 %v3165_v2, 0.0  ;;  %9761 = vmatpush3.bf16.msra.mxu0 %v10977_v40  ;;  %9789 = vmatpush3.bf16.msra.mxu1 %v10978_v41  ;;  %v3318_v25 = vmax.f32 %v3163_v26, 0.0  ;;  %v10985_v2 = vld [vmem:[%s15223_s16 + $0x210] sm:$0xff]  }
 0xac7   :  { %v3332_v47 = vmax.f32 %v3114_v17, 0.0  ;;  %v3334_v30 = vmax.f32 %v3167_v48, 0.0  ;;  %9762 = vmatprep.subr.bf16.mxu0 %v10979_v9  ;;  %9790 = vmatprep.subr.bf16.mxu1 %v10980_v11  ;;  %v10986_v18 = vld [vmem:[%s15223_s16 + $0x290] sm:$0xff]  }
 0xac8   :  { %v13671_v63 = vpack.c.bf16 %v3331_v29, %v3315_v58  ;;  %v13673_v54 = vpack.c.bf16 %v3333_v3, %v3317_v34  ;;  %v10987_v34 = vld [vmem:[%s15223_s16 + $0x258] sm:$0xff]  }
 0xac9   :  { %v13675_v24 = vpack.c.bf16 %v3332_v47, %v3316_v62  ;;  %v13677_v40 = vpack.c.bf16 %v3334_v30, %v3318_v25  ;;  %v3203_v41 = vpop.f32.mrb[40].mxu0  ;;  %v3256_v10 = vpop.f32.mrb[32].mxu1  ;;  %v10988_v29 = vld [vmem:[%s15223_s16 + $0x2d8] sm:$0xff]  }
 0xaca   :  { %9763 = vmatpush3.bf16.msra.mxu0 %v10981_v20  ;;  %9791 = vmatpush3.bf16.msra.mxu1 %v10982_v21  ;;  %v3204_v26 = vadd.f32 %v3203_v41, %v13645_v0  ;;  %v3257_v9 = vadd.f32 %v3256_v10, %v13649_v7  ;;  %v3205_v11 = vpop.f32.mrb[41].mxu0  ;;  %v3258_v39 = vpop.f32.mrb[33].mxu1 }
 0xacb   :  { %v3206_v15 = vadd.f32 %v3205_v11, %v13657_v27  ;;  %v3259_v17 = vadd.f32 %v3258_v39, %v13665_v14  ;;  %v3207_v48 = vpop.f32.mrb[42].mxu0  ;;  %v3260_v58 = vpop.f32.mrb[34].mxu1  ;;  %9764 = vmatprep.subr.bf16.mxu0 %v10983_v19  ;;  %9792 = vmatprep.subr.bf16.mxu1 %v10984_v31 }
 0xacc   :  { %v3208_v3 = vadd.f32 %v3207_v48, %v13645_v0  ;;  %v3261_v20 = vadd.f32 %v3260_v58, %v13649_v7  ;;  %4541 = vmatmul.mubr.bf16.gmra.mrb[60].mxu0 %v13603_v28  ;;  %4590 = vmatmul.mubr.bf16.gmra.mrb[52].mxu1 %v13605_v56  ;;  %v3209_v21 = vpop.f32.mrb[43].mxu0  ;;  %v3262_v62 = vpop.f32.mrb[35].mxu1  ;;  %v3287_v30 = vmax.f32 %v3204_v26, 0.0  ;;  %v3289_v19 = vmax.f32 %v3257_v9, 0.0  ;;  %v10989_v28 = vld [vmem:[%s15223_s16 + $0x218] sm:$0xff]   ;;  %v10992_v58 = vld [vmem:[%s15223_s16 + $0x2e0] sm:$0xff]  }
 0xacd   :  { %v3210_v25 = vadd.f32 %v3209_v21, %v13657_v27  ;;  %v3263_v47 = vadd.f32 %v3262_v62, %v13665_v14  ;;  %4630 = vmatprep.mubr.bf16.mxu0 %v13631_v4  ;;  %4679 = vmatprep.mubr.bf16.mxu1 %v13633_v49  ;;  %v10990_v56 = vld [vmem:[%s15223_s16 + $0x298] sm:$0xff]   ;;  %v3288_v10 = vmax.f32 %v3206_v15, 0.0  ;;  %v3290_v11 = vmax.f32 %v3259_v17, 0.0  ;;  %v10991_v4 = vld [vmem:[%s15223_s16 + $0x260] sm:$0xff]  }
 0xace   :  { %v3303_v31 = vmax.f32 %v3208_v3, 0.0  ;;  %v3305_v41 = vmax.f32 %v3261_v20, 0.0  ;;  %9765 = vmatpush3.bf16.msra.mxu0 %v10985_v2  ;;  %9793 = vmatpush3.bf16.msra.mxu1 %v10986_v18  ;;  %v10993_v20 = vld [vmem:[%s15223_s16 + $0x220] sm:$0xff]  }
 0xacf   :  { %v3304_v39 = vmax.f32 %v3210_v25, 0.0  ;;  %v3306_v48 = vmax.f32 %v3263_v47, 0.0  ;;  %9766 = vmatprep.subr.bf16.mxu0 %v10987_v34  ;;  %9794 = vmatprep.subr.bf16.mxu1 %v10988_v29  ;;  %v10994_v21 = vld [vmem:[%s15223_s16 + $0x2a0] sm:$0xff]  }
 0xad0   :  { %v13699_v49 = vpack.c.bf16 %v3303_v31, %v3287_v30  ;;  %v13701_v26 = vpack.c.bf16 %v3305_v41, %v3289_v19  ;;  %v10995_v19 = vld [vmem:[%s15223_s16 + $0x268] sm:$0xff]  }
 0xad1   :  { %v13703_v9 = vpack.c.bf16 %v3304_v39, %v3288_v10  ;;  %v13705_v2 = vpack.c.bf16 %v3306_v48, %v3290_v11  ;;  %v3213_v18 = vpop.f32.mrb[44].mxu0  ;;  %v3266_v15 = vpop.f32.mrb[36].mxu1  ;;  %v10996_v31 = vld [vmem:[%s15223_s16 + $0x2e8] sm:$0xff]  }
 0xad2   :  { %9767 = vmatpush3.bf16.msra.mxu0 %v10989_v28  ;;  %9795 = vmatpush3.bf16.msra.mxu1 %v10990_v56  ;;  %v3214_v17 = vadd.f32 %v3213_v18, %v13645_v0  ;;  %v3267_v34 = vadd.f32 %v3266_v15, %v13649_v7  ;;  %v3215_v29 = vpop.f32.mrb[45].mxu0  ;;  %v3268_v3 = vpop.f32.mrb[37].mxu1 }
 0xad3   :  { %v3216_v62 = vadd.f32 %v3215_v29, %v13657_v27  ;;  %v3269_v25 = vadd.f32 %v3268_v3, %v13665_v14  ;;  %v3217_v47 = vpop.f32.mrb[46].mxu0  ;;  %v3270_v30 = vpop.f32.mrb[38].mxu1  ;;  %9768 = vmatprep.subr.bf16.mxu0 %v10991_v4  ;;  %9796 = vmatprep.subr.bf16.mxu1 %v10992_v58  ;;  %v10997_v58 = vld [vmem:[%s15223_s16 + $0x228] sm:$0xff]  }
 0xad4   :  { %v3218_v41 = vadd.f32 %v3217_v47, %v13645_v0  ;;  %v3271_v28 = vadd.f32 %v3270_v30, %v13649_v7  ;;  %v3219_v56 = vpop.f32.mrb[47].mxu0  ;;  %v3272_v10 = vpop.f32.mrb[39].mxu1  ;;  %v3319_v48 = vmax.f32 %v3214_v17, 0.0  ;;  %v3321_v18 = vmax.f32 %v3267_v34, 0.0  ;;  %v10998_v29 = vld [vmem:[%s15223_s16 + $0x2a8] sm:$0xff]   ;;  %v11003_v30 = vld [vmem:[%s15223_s16 + $0x278] sm:$0xff]  }
 0xad5   :  { %v3220_v11 = vadd.f32 %v3219_v56, %v13657_v27  ;;  %v3273_v39 = vadd.f32 %v3272_v10, %v13665_v14  ;;  %v3320_v0 = vmax.f32 %v3216_v62, 0.0  ;;  %v3322_v7 = vmax.f32 %v3269_v25, 0.0  ;;  %v10999_v27 = vld [vmem:[%s15223_s16 + $0x270] sm:$0xff]   ;;  %v11008_v56 = vld [vmem:[%s15223_s16 + $0x3c0] sm:$0xff]  }
 0xad6   :  { %v3335_v4 = vmax.f32 %v3218_v41, 0.0  ;;  %v3337_v15 = vmax.f32 %v3271_v28, 0.0  ;;  %9769 = vmatpush3.bf16.msra.mxu0 %v10993_v20  ;;  %9797 = vmatpush3.bf16.msra.mxu1 %v10994_v21  ;;  %v11000_v14 = vld [vmem:[%s15223_s16 + $0x2f0] sm:$0xff]   ;;  %v11006_v41 = vld [vmem:[%s15223_s16 + $0x2b8] sm:$0xff]   ;;  %v11007_v28 = vld [vmem:[%s15223_s16 + $0x340] sm:$0xff]  }
 0xad7   :  { %v3336_v3 = vmax.f32 %v3220_v11, 0.0  ;;  %v3338_v47 = vmax.f32 %v3273_v39, 0.0  ;;  %9770 = vmatprep.subr.bf16.mxu0 %v10995_v19  ;;  %9798 = vmatprep.subr.bf16.mxu1 %v10996_v31  ;;  %v11001_v62 = vld [vmem:[%s15223_s16 + $0x230] sm:$0xff]   ;;  %v11004_v19 = vld [vmem:[%s15223_s16 + $0x2f8] sm:$0xff]   ;;  %v11009_v10 = vld [vmem:[%s15223_s16 + $0x300] sm:$0xff]  }
 0xad8   :  { %v13723_v17 = vpack.c.bf16 %v3335_v4, %v3319_v48  ;;  %v13725_v34 = vpack.c.bf16 %v3337_v15, %v3321_v18  ;;  %v11002_v25 = vld [vmem:[%s15223_s16 + $0x2b0] sm:$0xff]   ;;  %v11005_v31 = vld [vmem:[%s15223_s16 + $0x238] sm:$0xff]   ;;  %v11010_v11 = vld [vmem:[%s15223_s16 + $0x380] sm:$0xff]  }
 0xad9   :  { %v13727_v20 = vpack.c.bf16 %v3336_v3, %v3320_v0  ;;  %v13729_v21 = vpack.c.bf16 %v3338_v47, %v3322_v7  ;;  %v11011_v39 = vld [vmem:[%s15223_s16 + $0x348] sm:$0xff]   ;;  %v11015_v15 = vld [vmem:[%s15223_s16 + $0x350] sm:$0xff]   ;;  %v11022_v0 = vld [vmem:[%s15223_s16 + $0x398] sm:$0xff]  }
 0xada   :  { %9771 = vmatpush3.bf16.msra.mxu0 %v10997_v58  ;;  %9799 = vmatpush3.bf16.msra.mxu1 %v10998_v29  ;;  %v11012_v48 = vld [vmem:[%s15223_s16 + $0x3c8] sm:$0xff]   ;;  %v11016_v58 = vld [vmem:[%s15223_s16 + $0x3d0] sm:$0xff]   ;;  %v11021_v29 = vld [vmem:[%s15223_s16 + $0x318] sm:$0xff]  }
 0xadb   :  { %9772 = vmatprep.subr.bf16.mxu0 %v10999_v27  ;;  %9800 = vmatprep.subr.bf16.mxu1 %v11000_v14  ;;  %v11013_v18 = vld [vmem:[%s15223_s16 + $0x308] sm:$0xff]   ;;  %v11023_v7 = vld [vmem:[%s15223_s16 + $0x360] sm:$0xff]   ;;  %v11031_v14 = vld [vmem:[%s15223_s16 + $0x370] sm:$0xff]  }
 0xadc   :  { %v11014_v4 = vld [vmem:[%s15223_s16 + $0x388] sm:$0xff]   ;;  %v11024_v3 = vld [vmem:[%s15223_s16 + $0x3e0] sm:$0xff]  }
 0xadd   :  { %v11029_v47 = vld [vmem:[%s15223_s16 + $0x328] sm:$0xff]  }
 0xade   :  { %9773 = vmatpush3.bf16.msra.mxu0 %v11001_v62  ;;  %9801 = vmatpush3.bf16.msra.mxu1 %v11002_v25  ;;  %v11030_v27 = vld [vmem:[%s15223_s16 + $0x3a8] sm:$0xff]   ;;  %v11032_v62 = vld [vmem:[%s15223_s16 + $0x3f0] sm:$0xff]  }
 0xadf   :  { %9774 = vmatprep.subr.bf16.mxu0 %v11003_v30  ;;  %9802 = vmatprep.subr.bf16.mxu1 %v11004_v19  ;;  %v11033_v25 = vld [vmem:[%s15223_s16 + $0x330] sm:$0xff]   ;;  %v11035_v19 = vld [vmem:[%s15223_s16 + $0x378] sm:$0xff]  }
 0xae0   :  { %v11034_v30 = vld [vmem:[%s15223_s16 + $0x3b0] sm:$0xff]  }
 0xae2   :  { %9775 = vmatpush3.bf16.msra.mxu0 %v11005_v31  ;;  %9803 = vmatpush3.bf16.msra.mxu1 %v11006_v41  ;;  %v11036_v31 = vld [vmem:[%s15223_s16 + $0x3f8] sm:$0xff]  }
 0xae3   :  { %9816 = vmatprep.subr.bf16.mxu0 %v11007_v28  ;;  %9844 = vmatprep.subr.bf16.mxu1 %v11008_v56  ;;  %v11037_v41 = vld [vmem:[%s15223_s16 + $0x338] sm:$0xff]   ;;  %v14855_v56 = vmov 0.0  }
 0xae4   :  { %v11038_v28 = vld [vmem:[%s15223_s16 + $0x3b8] sm:$0xff]  }
 0xae5   :  { %4631 = vmatmul.mubr.bf16.vlgmr.msra.gmra.mrb[64].mxu0 %v13627_v5  ;;  %4680 = vmatmul.mubr.bf16.vlgmr.msra.gmra.mrb[56].mxu1 %v13629_v1  ;;  %v11017_v5 = vld [vmem:[%s15223_s16 + $0x310] sm:$0xff]  }
 0xae6   :  { %4638 = vmatprep.mubr.bf16.mxu0 %v13675_v24  ;;  %4687 = vmatprep.mubr.bf16.mxu1 %v13677_v40  ;;  %v11018_v1 = vld [vmem:[%s15223_s16 + $0x390] sm:$0xff]   ;;  %v11019_v24 = vld [vmem:[%s15223_s16 + $0x358] sm:$0xff]  }
 0xae7   :  { %9817 = vmatpush3.bf16.msra.mxu0 %v11009_v10  ;;  %9845 = vmatpush3.bf16.msra.mxu1 %v11010_v11  ;;  %v11020_v40 = vld [vmem:[%s15223_s16 + $0x3d8] sm:$0xff]   ;;  %v11039_v10 = vld [vmem:[%s15230_s9] sm:$0xff]   ;;  %v11040_v11 = vld [vmem:[%s15230_s9 + $0x8] sm:$0xff]  }
 0xae8   :  { %9818 = vmatprep.subr.bf16.mxu0 %v11011_v39  ;;  %9846 = vmatprep.subr.bf16.mxu1 %v11012_v48 }
 0xaeb   :  { %9819 = vmatpush3.bf16.msra.mxu0 %v11013_v18  ;;  %9847 = vmatpush3.bf16.msra.mxu1 %v11014_v4 }
 0xaec   :  { %9820 = vmatprep.subr.bf16.mxu0 %v11015_v15  ;;  %9848 = vmatprep.subr.bf16.mxu1 %v11016_v58 }
 0xaed   :  { %4639 = vmatmul.mubr.bf16.gmra.mrb[68].mxu0 %v13671_v63  ;;  %4688 = vmatmul.mubr.bf16.gmra.mrb[60].mxu1 %v13673_v54  ;;  %v11025_v63 = vld [vmem:[%s15223_s16 + $0x320] sm:$0xff]  }
 0xaee   :  { %4728 = vmatprep.mubr.bf16.mxu0 %v13703_v9  ;;  %4777 = vmatprep.mubr.bf16.mxu1 %v13705_v2  ;;  %v11026_v54 = vld [vmem:[%s15223_s16 + $0x3a0] sm:$0xff]   ;;  %v11027_v9 = vld [vmem:[%s15223_s16 + $0x368] sm:$0xff]  }
 0xaef   :  { %9821 = vmatpush3.bf16.msra.mxu0 %v11017_v5  ;;  %9849 = vmatpush3.bf16.msra.mxu1 %v11018_v1  ;;  %v11028_v2 = vld [vmem:[%s15223_s16 + $0x3e8] sm:$0xff]  }
 0xaf0   :  { %9822 = vmatprep.subr.bf16.mxu0 %v11019_v24  ;;  %9850 = vmatprep.subr.bf16.mxu1 %v11020_v40 }
 0xaf3   :  { %9823 = vmatpush3.bf16.msra.mxu0 %v11021_v29  ;;  %9851 = vmatpush3.bf16.msra.mxu1 %v11022_v0 }
 0xaf4   :  { %9824 = vmatprep.subr.bf16.mxu0 %v11023_v7  ;;  %9852 = vmatprep.subr.bf16.mxu1 %v11024_v3 }
 0xaf7   :  { %9825 = vmatpush3.bf16.msra.mxu0 %v11025_v63  ;;  %9853 = vmatpush3.bf16.msra.mxu1 %v11026_v54 }
 0xaf8   :  { %9826 = vmatprep.subr.bf16.mxu0 %v11027_v9  ;;  %9854 = vmatprep.subr.bf16.mxu1 %v11028_v2 }
 0xafb   :  { %9827 = vmatpush3.bf16.msra.mxu0 %v11029_v47  ;;  %9855 = vmatpush3.bf16.msra.mxu1 %v11030_v27 }
 0xafc   :  { %9828 = vmatprep.subr.bf16.mxu0 %v11031_v14  ;;  %9856 = vmatprep.subr.bf16.mxu1 %v11032_v62 }
 0xaff   :  { %9829 = vmatpush3.bf16.msra.mxu0 %v11033_v25  ;;  %9857 = vmatpush3.bf16.msra.mxu1 %v11034_v30 }
 0xb00   :  { %9830 = vmatprep.subr.bf16.mxu0 %v11035_v19  ;;  %9858 = vmatprep.subr.bf16.mxu1 %v11036_v31 }
 0xb03   :  { %9831 = vmatpush3.bf16.msra.mxu0 %v11037_v41  ;;  %9859 = vmatpush3.bf16.msra.mxu1 %v11038_v28 }
 0xb04   :  { %10444 = vmatprep.subr.bf16.mxu0 %v14855_v56  ;;  %10452 = vmatprep.subr.bf16.mxu1 %v14855_v56 }
 0xb06   :  { %4729 = vmatmul.mubr.bf16.vlgmr.msra.gmra.mrb[72].mxu0 %v13699_v49  ;;  %4778 = vmatmul.mubr.bf16.vlgmr.msra.gmra.mrb[64].mxu1 %v13701_v26  ;;  %v13792_v49 = vld [vmem:[%s15231_s18] sm:$0xff] }
 0xb07   :  { %4736 = vmatprep.mubr.bf16.mxu0 %v13727_v20  ;;  %4785 = vmatprep.mubr.bf16.mxu1 %v13729_v21  ;;  %v4946_v26 = vpack.c.bf16 %v13792_v49, %v13792_v49 }
 0xb08   :  { %10445 = vmatpush3.bf16.msra.mxu0 %v11039_v10 }
 0xb09   :  { %10446 = vmatprep.subr.bf16.mxu0 %v14855_v56 }
 0xb0c   :  { %10447 = vmatpush3.bf16.msra.mxu0 %v11040_v11 }
 0xb0d   :  { %10460 = vmatprep.subr.bf16.mxu0 %v14855_v56 }
 0xb0e   :  { %4737 = vmatmul.mubr.bf16.gmra.mrb[76].mxu0 %v13723_v17  ;;  %4786 = vmatmul.mubr.bf16.gmra.mrb[68].mxu1 %v13725_v34  ;;  %v9356_v34 = vld [vmem:[#allocation20] ss:$0 sm:$0xff] }
 0xb0f   :  { %10448 = vmatprep.mubr.msk.bf16.mxu0 %vm11659_vm3, %v14855_v56  ;;  %10456 = vmatprep.mubr.msk.bf16.mxu1 %vm11659_vm3, %v14855_v56 }
 0xb16   :  { %10449 = vmatmul.mubr.msk.bf16.vlgmr.msra.gmra.mrb[80].mxu0 %vm1769_vm0, %v4946_v26 }
 0xb17   :  { %10464 = vmatprep.mubr.msk.bf16.mxu0 %vm11659_vm3, %v14855_v56 }
 0xb77   :  { %v9664_v17 = vpop.f32.mrb[48].mxu0  ;;  %v9692_v20 = vpop.f32.mrb[40].mxu1 }
 0xb78   :  { %v9665_v21 = vpop.f32.mrb[49].mxu0  ;;  %v9693_v39 = vpop.f32.mrb[41].mxu1 }
 0xb79   :  { %v9666_v48 = vadd.f32 %v9665_v21, %v9664_v17  ;;  %v9694_v18 = vadd.f32 %v9693_v39, %v9692_v20  ;;  %v9667_v4 = vpop.f32.mrb[50].mxu0  ;;  %v9695_v15 = vpop.f32.mrb[42].mxu1 }
 0xb7a   :  { %v9668_v58 = vpop.f32.mrb[51].mxu0  ;;  %v9696_v5 = vpop.f32.mrb[43].mxu1 }
 0xb7b   :  { %v4437_v1 = vadd.f32 %v9666_v48, %v9356_v34  ;;  %v9669_v24 = vadd.f32 %v9668_v58, %v9667_v4  ;;  %v9697_v40 = vadd.f32 %v9696_v5, %v9695_v15 }
 0xb7d   :  { %v4486_v29 = vadd.f32 %v9694_v18, %v4437_v1  ;;  %v4440_v0 = vadd.f32 %v9669_v24, %v9356_v34 }
 0xb7f   :  { %v4489_v7 = vadd.f32 %v9697_v40, %v4440_v0  ;;  %v9670_v3 = vpop.f32.mrb[52].mxu0  ;;  %v9698_v63 = vpop.f32.mrb[44].mxu1 }
 0xb80   :  { %v9671_v54 = vpop.f32.mrb[53].mxu0  ;;  %v9699_v9 = vpop.f32.mrb[45].mxu1 }
 0xb81   :  { %v9672_v2 = vadd.f32 %v9671_v54, %v9670_v3  ;;  %v9700_v47 = vadd.f32 %v9699_v9, %v9698_v63  ;;  %v9673_v27 = vpop.f32.mrb[54].mxu0  ;;  %v9701_v14 = vpop.f32.mrb[46].mxu1 }
 0xb82   :  { %v9674_v62 = vpop.f32.mrb[55].mxu0  ;;  %v9702_v25 = vpop.f32.mrb[47].mxu1 }
 0xb83   :  { %v4445_v30 = vadd.f32 %v9672_v2, %v9356_v34  ;;  %v9675_v19 = vadd.f32 %v9674_v62, %v9673_v27  ;;  %v9703_v31 = vadd.f32 %v9702_v25, %v9701_v14 }
 0xb85   :  { %v4494_v41 = vadd.f32 %v9700_v47, %v4445_v30  ;;  %v4448_v28 = vadd.f32 %v9675_v19, %v9356_v34 }
 0xb87   :  { %v4497_v10 = vadd.f32 %v9703_v31, %v4448_v28 }
 0xb97   :  { %v9720_v11 = vpop.f32.mrb[56].mxu0  ;;  %v9748_v26 = vpop.f32.mrb[48].mxu1 }
 0xb98   :  { %v9721_v17 = vpop.f32.mrb[57].mxu0  ;;  %v9749_v20 = vpop.f32.mrb[49].mxu1 }
 0xb99   :  { %v9722_v21 = vadd.f32 %v9721_v17, %v9720_v11  ;;  %v9750_v39 = vadd.f32 %v9749_v20, %v9748_v26  ;;  %v9723_v48 = vpop.f32.mrb[58].mxu0  ;;  %v9751_v18 = vpop.f32.mrb[50].mxu1 }
 0xb9a   :  { %v9724_v4 = vpop.f32.mrb[59].mxu0  ;;  %v9752_v15 = vpop.f32.mrb[51].mxu1 }
 0xb9b   :  { %v4535_v58 = vadd.f32 %v9722_v21, %v4486_v29  ;;  %v9725_v5 = vadd.f32 %v9724_v4, %v9723_v48  ;;  %v9753_v1 = vadd.f32 %v9752_v15, %v9751_v18 }
 0xb9d   :  { %v4584_v24 = vadd.f32 %v9750_v39, %v4535_v58  ;;  %v4538_v40 = vadd.f32 %v9725_v5, %v4489_v7 }
 0xb9f   :  { %v4587_v0 = vadd.f32 %v9753_v1, %v4538_v40  ;;  %v9726_v3 = vpop.f32.mrb[60].mxu0  ;;  %v9754_v63 = vpop.f32.mrb[52].mxu1 }
 0xba0   :  { %v9727_v34 = vpop.f32.mrb[61].mxu0  ;;  %v9755_v54 = vpop.f32.mrb[53].mxu1 }
 0xba1   :  { %v9728_v9 = vadd.f32 %v9727_v34, %v9726_v3  ;;  %v9756_v2 = vadd.f32 %v9755_v54, %v9754_v63  ;;  %v9729_v47 = vpop.f32.mrb[62].mxu0  ;;  %v9757_v27 = vpop.f32.mrb[54].mxu1 }
 0xba2   :  { %v9730_v14 = vpop.f32.mrb[63].mxu0  ;;  %v9758_v62 = vpop.f32.mrb[55].mxu1 }
 0xba3   :  { %v4543_v25 = vadd.f32 %v9728_v9, %v4494_v41  ;;  %v9731_v30 = vadd.f32 %v9730_v14, %v9729_v47  ;;  %v9759_v19 = vadd.f32 %v9758_v62, %v9757_v27 }
 0xba5   :  { %v4592_v31 = vadd.f32 %v9756_v2, %v4543_v25  ;;  %v4546_v29 = vadd.f32 %v9731_v30, %v4497_v10 }
 0xba7   :  { %v4595_v28 = vadd.f32 %v9759_v19, %v4546_v29 }
 0xbb8   :  { %v9776_v11 = vpop.f32.mrb[64].mxu0  ;;  %v9804_v26 = vpop.f32.mrb[56].mxu1 }
 0xbb9   :  { %v9777_v7 = vpop.f32.mrb[65].mxu0  ;;  %v9805_v17 = vpop.f32.mrb[57].mxu1 }
 0xbba   :  { %v9778_v20 = vadd.f32 %v9777_v7, %v9776_v11  ;;  %v9806_v21 = vadd.f32 %v9805_v17, %v9804_v26  ;;  %v9779_v39 = vpop.f32.mrb[66].mxu0  ;;  %v9807_v48 = vpop.f32.mrb[58].mxu1 }
 0xbbb   :  { %v9780_v18 = vpop.f32.mrb[67].mxu0  ;;  %v9808_v4 = vpop.f32.mrb[59].mxu1 }
 0xbbc   :  { %v4633_v15 = vadd.f32 %v9778_v20, %v4584_v24  ;;  %v9781_v58 = vadd.f32 %v9780_v18, %v9779_v39  ;;  %v9809_v5 = vadd.f32 %v9808_v4, %v9807_v48  ;;  %v13801_v11 = vpop.permute.xlu1 %5018 }
 0xbbe   :  { %v4682_v1 = vadd.f32 %v9806_v21, %v4633_v15  ;;  %v4636_v41 = vadd.f32 %v9781_v58, %v4587_v0 }
 0xbc0   :  { %v4685_v40 = vadd.f32 %v9809_v5, %v4636_v41  ;;  %v9782_v3 = vpop.f32.mrb[68].mxu0  ;;  %v9810_v63 = vpop.f32.mrb[60].mxu1 }
 0xbc1   :  { %v9783_v10 = vpop.f32.mrb[69].mxu0  ;;  %v9811_v34 = vpop.f32.mrb[61].mxu1 }
 0xbc2   :  { %v9784_v54 = vadd.f32 %v9783_v10, %v9782_v3  ;;  %v9812_v9 = vadd.f32 %v9811_v34, %v9810_v63  ;;  %v9785_v2 = vpop.f32.mrb[70].mxu0  ;;  %v9813_v47 = vpop.f32.mrb[62].mxu1 }
 0xbc3   :  { %v9786_v27 = vpop.f32.mrb[71].mxu0  ;;  %v9814_v14 = vpop.f32.mrb[63].mxu1 }
 0xbc4   :  { %v4641_v62 = vadd.f32 %v9784_v54, %v4592_v31  ;;  %v9787_v25 = vadd.f32 %v9786_v27, %v9785_v2  ;;  %v9815_v30 = vadd.f32 %v9814_v14, %v9813_v47 }
 0xbc6   :  { %v4690_v19 = vadd.f32 %v9812_v9, %v4641_v62  ;;  %v4644_v24 = vadd.f32 %v9787_v25, %v4595_v28  ;;  %v13805_v28 = vpop.permute.xlu1 %5022 }
 0xbc8   :  { %v4693_v29 = vadd.f32 %v9815_v30, %v4644_v24 }
 0xbd9   :  { %v9832_v0 = vpop.f32.mrb[72].mxu0  ;;  %v9860_v26 = vpop.f32.mrb[64].mxu1 }
 0xbda   :  { %v9833_v7 = vpop.f32.mrb[73].mxu0  ;;  %v9861_v17 = vpop.f32.mrb[65].mxu1 }
 0xbdb   :  { %v9834_v20 = vadd.f32 %v9833_v7, %v9832_v0  ;;  %v9862_v21 = vadd.f32 %v9861_v17, %v9860_v26  ;;  %v9835_v39 = vpop.f32.mrb[74].mxu0  ;;  %v9863_v48 = vpop.f32.mrb[66].mxu1  ;;  %v9489_v0 = vld [vmem:[%s15232_s28] ss:$0 sm:$0xff] }
 0xbdc   :  { %v9836_v18 = vpop.f32.mrb[75].mxu0  ;;  %v9864_v4 = vpop.f32.mrb[67].mxu1 }
 0xbdd   :  { %v4731_v15 = vadd.f32 %v9834_v20, %v4682_v1  ;;  %v9837_v58 = vadd.f32 %v9836_v18, %v9835_v39  ;;  %v9865_v31 = vadd.f32 %v9864_v4, %v9863_v48  ;;  %v13812_v26 = vpop.permute.xlu1 %5024  ;;  %v13816_v20 = vpop.permute.xlu0 %5020 }
 0xbdf   :  { %v13803_v5 = vadd.f32 %v9862_v21, %v4731_v15  ;;  %v4734_v41 = vadd.f32 %v9837_v58, %v4685_v40 }
 0xbe1   :  { %v13807_v3 = vadd.f32 %v9865_v31, %v4734_v41  ;;  %v9838_v63 = vpop.f32.mrb[76].mxu0  ;;  %v9866_v10 = vpop.f32.mrb[68].mxu1  ;;  %v11107_v41 = vld [vmem:[%s15225_s19] sm:$0xff] }
 0xbe2   :  { %v9839_v34 = vpop.f32.mrb[77].mxu0  ;;  %v9867_v54 = vpop.f32.mrb[69].mxu1 }
 0xbe3   :  { %v9840_v9 = vadd.f32 %v9839_v34, %v9838_v63  ;;  %v9868_v2 = vadd.f32 %v9867_v54, %v9866_v10  ;;  %v9841_v47 = vpop.f32.mrb[78].mxu0  ;;  %v9869_v27 = vpop.f32.mrb[70].mxu1  ;;  %v11108_v63 = vld [vmem:[%s15225_s19 + $0x8] sm:$0xff]  ;;  %v11109_v10 = vld [vmem:[%s15225_s19 + $0x10] sm:$0xff]  ;;  %v11110_v34 = vld [vmem:[%s15225_s19 + $0x18] sm:$0xff] }
 0xbe4   :  { %v9842_v14 = vpop.f32.mrb[79].mxu0  ;;  %v9870_v1 = vpop.f32.mrb[71].mxu1 }
 0xbe5   :  { %v4739_v62 = vadd.f32 %v9840_v9, %v4690_v19  ;;  %v9843_v25 = vadd.f32 %v9842_v14, %v9841_v47  ;;  %v9871_v30 = vadd.f32 %v9870_v1, %v9869_v27 }
 0xbe7   :  { %v13809_v24 = vadd.f32 %v9868_v2, %v4739_v62  ;;  %v4742_v40 = vadd.f32 %v9843_v25, %v4693_v29 }
 0xbe9   :  { %v13814_v7 = vadd.f32 %v9871_v30, %v4742_v40  ;;  %v5007_v17 = vpop.f32.mrb[80].mxu0 }
 0xbea   :  { %v5008_v21 = vadd.f32 %v9489_v0, %v5007_v17  ;;  %v10450_v39 = vpop.f32.mrb[81].mxu0 }
 0xbeb   :  { %v5010_v48 = vpop.f32.mrb[82].mxu0 }
 0xbec   :  { %v5032_v19 = vmul.f32 %v13805_v28, %v5008_v21  ;;  %v5033_v18 = vmul.f32 %v13812_v26, %v5008_v21  ;;  %v5030_v29 = vmul.f32 %v13801_v11, %v5008_v21  ;;  %v5031_v4 = vmul.f32 %v13816_v20, %v5008_v21  ;;  %v10451_v15 = vpop.f32.mrb[83].mxu0 }
 0xbed   :  { %v5013_v40 = vpack.c.bf16 %v5008_v21, %v5008_v21 }
 0xbee   :  { %v5035_v58 = vpack.c.bf16 %v5033_v18, %v5032_v19  ;;  %v5034_v31 = vpack.c.bf16 %v5031_v4, %v5030_v29  ;;  %v4794_v19 = vadd.f32 %v13803_v5, %v13360_v57  ;;  %v4795_v57 = vadd.f32 %v13807_v3, %v13362_v46 }
 0xbf0   :  { %5058 = vrot.lane.b32.xlu1 %v5035_v58, %s11655_s5  ;;  %5056 = vrot.lane.b32.xlu0 %v5034_v31, %s11655_s5  ;;  %v4798_v18 = vsel %vm1769_vm0, %v4794_v19, 0.0 }
 0xbf4   :  { %5036 = vrot.lane.b32.xlu1 %v11107_v41, %s11656_s29 }
 0xbf8   :  { %5038 = vrot.lane.b32.xlu1 %v11108_v63, %s11656_s29 }
 0xbfc   :  { %5040 = vrot.lane.b32.xlu1 %v11109_v10, %s11656_s29 }
 0xc00   :  { %5042 = vrot.lane.b32.xlu1 %v11110_v34, %s11656_s29 }
 0xc62   :  { %v5059_v54 = vpop.permute.xlu1 %5058  ;;  %v5057_v9 = vpop.permute.xlu0 %5056 }
 0xc63   :  { %v5064_v2 = vsel %vm1769_vm0, %v5057_v9, 0  ;;  %v5067_v14 = vsel %vm1769_vm0, %v5059_v54, 0  ;;  %v4801_v54 = vsel %vm1769_vm0, %v4795_v57, 0.0  ;;  %v4796_v9 = vadd.f32 %v13809_v24, %v13385_v8  ;;  %v13878_v8 = vld [vmem:[%s15234_s15 + $0x8] sm:$0xff]  }
 0xc64   :  { %10453 = vmatpush3.bf16.xpose.msra.mxu1 %v5064_v2 }
 0xc65   :  { %10454 = vmatprep.subr.bf16.mxu1 %v14855_v56 }
 0xc66   :  { %v13834_v47 = vpop.permute.xlu1 %5036 }
 0xc67   :  { %v5048_v1 = vmul.f32 %v13834_v47, %v5008_v21 }
 0xc6a   :  { %v13836_v27 = vpop.permute.xlu1 %5038 }
 0xc6b   :  { %v5049_v62 = vmul.f32 %v13836_v27, %v5008_v21 }
 0xc6c   :  { %10455 = vmatpush3.bf16.xpose.msra.mxu1 %v5067_v14  ;;  %v4804_v14 = vsel %vm1769_vm0, %v4796_v9, 0.0 }
 0xc6d   :  { %v5052_v25 = vpack.c.bf16 %v5049_v62, %v5048_v1  ;;  %10468 = vmatprep.subr.bf16.mxu1 %v14855_v56  ;;  %v4797_v1 = vadd.f32 %v13814_v7, %v13383_v55 }
 0xc6e   :  { %v13842_v30 = vpop.permute.xlu1 %5040 }
 0xc6f   :  { %5118 = vrot.lane.b32.xlu1 %v5052_v25, %s11656_s29  ;;  %v5050_v17 = vmul.f32 %v13842_v30, %v5008_v21  ;;  %v4807_v46 = vsel %vm1769_vm0, %v4797_v1, 0.0  ;;  %v13873_v25 = vld [vmem:[%s15234_s15] sm:$0xff]  }
 0xc72   :  { %v13845_v0 = vpop.permute.xlu1 %5042 }
 0xc73   :  { %v5051_v39 = vmul.f32 %v13845_v0, %v5008_v21  ;;  %10457 = vmatmul.mubr.msk.bf16.vlgmr.msra.gmra.mrb[72].mxu1 %vm1769_vm0, %v5013_v40  ;;  %v13858_v21 = vld [vmem:[%s15233_s8] sm:$0xff] }
 0xc74   :  { %10472 = vmatprep.mubr.msk.bf16.mxu1 %vm11659_vm3, %v14855_v56  ;;  %10469 = vmatpush3.bf16.msra.mxu1 %v13873_v25 }
 0xc75   :  { %v5053_v48 = vpack.c.bf16 %v5051_v39, %v5050_v17  ;;  %10470 = vmatprep.subr.bf16.mxu1 %v14855_v56 }
 0xc77   :  { %5120 = vrot.lane.b32.xlu1 %v5053_v48, %s11656_s29 }
 0xc78   :  { %10471 = vmatpush3.bf16.msra.mxu1 %v13878_v8 }
 0xc79   :  { %10487 = vmatprep.subr.bf16.mxu1 %v14855_v56 }
 0xc9b   :  { %4799 = vadd.xlane.f32.xlu1 %v4798_v18 }
 0xce1   :  { %v5119_v29 = vpop.permute.xlu1 %5118 }
 0xce2   :  { %10461 = vmatpush3.bf16.msra.mxu0 %v5119_v29 }
 0xce3   :  { %10462 = vmatprep.subr.bf16.mxu0 %v14855_v56 }
 0xce9   :  { %v5121_v4 = vpop.permute.xlu1 %5120 }
 0xcea   :  { %10463 = vmatpush3.bf16.msra.mxu0 %v5121_v4 }
 0xd28   :  { %v4800_v5 = vpop.xlane.xlu1 %4799 }
 0xd29   :  { %v4810_v34 = vmul.f32 0.03125, %v4800_v5 }
 0xd2b   :  { %v4814_v2 = vsub.f32 %v4794_v19, %v4810_v34 }
 0xd2d   :  { %v4818_v3 = vmul.f32 %v4814_v2, %v4814_v2 }
 0xd2f   :  { %v4822_v62 = vsel %vm1769_vm0, %v4818_v3, 0.0 }
 0xd46   :  { %v5103_v15 = vpop.f32.mrb[72].mxu1 }
 0xd47   :  { %v5104_v58 = vadd.f32 %v5103_v15, %v13858_v21  ;;  %v10458_v31 = vpop.f32.mrb[73].mxu1 }
 0xd48   :  { %v5106_v41 = vpop.f32.mrb[74].mxu1 }
 0xd49   :  { %v10459_v63 = vpop.f32.mrb[75].mxu1  ;;  %v5109_v10 = vsel %vm1769_vm0, %v5104_v58, -inf }
 0xd4a   :  { %5110 = vmax.xlane.f32.xlu0 %v5109_v10 }
 0xd4e   :  { %4802 = vadd.xlane.f32.xlu0 %v4801_v54 }
 0xd52   :  { %4805 = vadd.xlane.f32.xlu0 %v4804_v14 }
 0xd56   :  { %4808 = vadd.xlane.f32.xlu0 %v4807_v46  ;;  %v9485_v46 = vld [vmem:[#allocation26] ss:$0 sm:$0xff] }
 0xd5a   :  { %4823 = vadd.xlane.f32.xlu0 %v4822_v62  ;;  %v9486_v62 = vld [vmem:[#allocation25] ss:$0 sm:$0xff] }
 0xdd7   :  { %v5111_v55 = vpop.xlane.xlu0 %5110 }
 0xdd8   :  { %v5112_v24 = vsub.f32 %v5104_v58, %v5111_v55 }
 0xdda   :  { %v5113_v7 = vmul.f32 1.442695, %v5112_v24 }
 0xddb   :  { %v4803_v40 = vpop.xlane.xlu0 %4802 }
 0xddc   :  { %11075 = vpow2.f32 %v5113_v7  ;;  %v4811_v17 = vmul.f32 0.03125, %v4803_v40  ;;  %v14853_v40 = vmov 0.0|0.0  }
 0xddd   :  { %10763 = vmatprep.subr.bf16.mxu0 %v14853_v40 }
 0xdde   :  { %v4815_v39 = vsub.f32 %v4795_v57, %v4811_v17 }
 0xddf   :  { %v4806_v48 = vpop.xlane.xlu0 %4805 }
 0xde0   :  { %v4812_v19 = vmul.f32 0.03125, %v4806_v48  ;;  %v4819_v18 = vmul.f32 %v4815_v39, %v4815_v39 }
 0xde2   :  { %v4816_v29 = vsub.f32 %v4796_v9, %v4812_v19  ;;  %v4825_v4 = vsel %vm1769_vm0, %v4819_v18, 0.0 }
 0xde3   :  { %4826 = vadd.xlane.f32.xlu0 %v4825_v4  ;;  %v4809_v15 = vpop.xlane.xlu0 %4808 }
 0xde4   :  { %v4813_v31 = vmul.f32 0.03125, %v4809_v15  ;;  %v4820_v41 = vmul.f32 %v4816_v29, %v4816_v29 }
 0xde6   :  { %v11076_v63 = vpop.eup %11075  ;;  %v4817_v10 = vsub.f32 %v4797_v1, %v4813_v31  ;;  %v4828_v5 = vsel %vm1769_vm0, %v4820_v41, 0.0 }
 0xde7   :  { %v5115_v58 = vpack.c.bf16 %v11076_v63, %v11076_v63  ;;  %4829 = vadd.xlane.f32.xlu0 %v4828_v5  ;;  %v4824_v34 = vpop.xlane.xlu0 %4823 }
 0xde8   :  { %v4834_v54 = vmul.f32 0.03125, %v4824_v34  ;;  %v4821_v14 = vmul.f32 %v4817_v10, %v4817_v10 }
 0xde9   :  { %10465 = vmatmul.mubr.msk.bf16.vlgmr.msra.gmra.mrb[84].mxu0 %vm1769_vm0, %v5115_v58  ;;  %10473 = vmatmul.mubr.msk.bf16.vlgmr.msra.gmra.mrb[76].mxu1 %vm1769_vm0, %v5115_v58 }
 0xdea   :  { %v4838_v57 = vadd.f32 1e-05, %v4834_v54  ;;  %v4831_v9 = vsel %vm1769_vm0, %v4821_v14, 0.0  ;;  %10484 = vmatprep.mubr.msk.f32.mxu0 %vm11659_vm3, %v14855_v56  ;;  %10491 = vmatprep.mubr.msk.bf16.mxu1 %vm11659_vm3, %v14855_v56 }
 0xdeb   :  { %4832 = vadd.xlane.f32.xlu0 %v4831_v9  ;;  %10766 = vmatpush3.bf16.xpose.msk.msra.mxu0 %vm13287_vm2, %v13283_v22 }
 0xdec   :  { %11077 = vrsqrt.f32 %v4838_v57  ;;  %10767 = vmatprep.subr.bf16.mxu0 %v14853_v40 }
 0xdf3   :  { %10770 = vmatpush3.bf16.xpose.msk.msra.mxu0 %vm13287_vm2, %v13299_v33 }
 0xdf6   :  { %v11078_v1 = vpop.eup %11077 }
 0xdf7   :  { %v4846_v3 = vmul.f32 %v11078_v1, %v4814_v2 }
 0xdf9   :  { %v4857_v55 = vmul.f32 %v9485_v46, %v4846_v3 }
 0xdfb   :  { %v4868_v24 = vadd.f32 %v9486_v62, %v4857_v55 }
 0xdfd   :  { %v4872_v7 = vsel %vm1769_vm0, %v4868_v24, 0.0 }
 0xdfe   :  { %4873 = vadd.xlane.f32.xlu0 %v4872_v7 }
 0xe70   :  { %v4827_v2 = vpop.xlane.xlu0 %4826 }
 0xe71   :  { %v4835_v17 = vmul.f32 0.03125, %v4827_v2 }
 0xe73   :  { %v4839_v48 = vadd.f32 1e-05, %v4835_v17 }
 0xe74   :  { %v4830_v19 = vpop.xlane.xlu0 %4829 }
 0xe75   :  { %11079 = vrsqrt.f32 %v4839_v48  ;;  %v4836_v18 = vmul.f32 0.03125, %v4830_v19 }
 0xe77   :  { %v4840_v4 = vadd.f32 1e-05, %v4836_v18 }
 0xe78   :  { %v4833_v15 = vpop.xlane.xlu0 %4832 }
 0xe79   :  { %11081 = vrsqrt.f32 %v4840_v4  ;;  %v4837_v31 = vmul.f32 0.03125, %v4833_v15  ;;  %v11043_v15 = vld [vmem:[%s15235_s23] sm:$0xff]  }
 0xe7a   :  { %10488 = vmatpush3.bf16.msra.mxu1 %v11043_v15 }
 0xe7b   :  { %v4841_v41 = vadd.f32 1e-05, %v4837_v31  ;;  %10489 = vmatprep.subr.bf16.mxu1 %v14855_v56 }
 0xe7d   :  { %11083 = vrsqrt.f32 %v4841_v41 }
 0xe7f   :  { %v11080_v63 = vpop.eup %11079 }
 0xe80   :  { %v4847_v5 = vmul.f32 %v11080_v63, %v4815_v39 }
 0xe82   :  { %v4858_v58 = vmul.f32 %v9485_v46, %v4847_v5 }
 0xe83   :  { %v11082_v34 = vpop.eup %11081 }
 0xe84   :  { %v4869_v54 = vadd.f32 %v9486_v62, %v4858_v58  ;;  %v4848_v14 = vmul.f32 %v11082_v34, %v4816_v29 }
 0xe86   :  { %v4875_v57 = vsel %vm1769_vm0, %v4869_v54, 0.0  ;;  %v4859_v9 = vmul.f32 %v9485_v46, %v4848_v14 }
 0xe87   :  { %v11084_v1 = vpop.eup %11083  ;;  %4876 = vadd.xlane.f32.xlu1 %v4875_v57 }
 0xe88   :  { %v4870_v3 = vadd.f32 %v9486_v62, %v4859_v9  ;;  %v4849_v55 = vmul.f32 %v11084_v1, %v4817_v10  ;;  %v11044_v9 = vld [vmem:[%s15235_s23 + $0x8] sm:$0xff]  }
 0xe89   :  { %10490 = vmatpush3.bf16.msra.mxu1 %v11044_v9 }
 0xe8a   :  { %v4878_v7 = vsel %vm1769_vm0, %v4870_v3, 0.0  ;;  %v4860_v2 = vmul.f32 %v9485_v46, %v4849_v55  ;;  %10495 = vmatprep.subr.bf16.mxu1 %v14855_v56 }
 0xe8b   :  { %4879 = vadd.xlane.f32.xlu0 %v4878_v7  ;;  %v4874_v17 = vpop.xlane.xlu0 %4873 }
 0xe8c   :  { %v4884_v48 = vmul.f32 0.03125, %v4874_v17  ;;  %v4871_v19 = vadd.f32 %v9486_v62, %v4860_v2 }
 0xe8e   :  { %v13902_v39 = vsub.f32 %v4868_v24, %v4884_v48  ;;  %v4881_v18 = vsel %vm1769_vm0, %v4871_v19, 0.0 }
 0xe8f   :  { %4882 = vadd.xlane.f32.xlu1 %v4881_v18 }
 0xe90   :  { %v4892_v29 = vmul.f32 %v13902_v39, %v13902_v39 }
 0xe92   :  { %v4896_v4 = vsel %vm1769_vm0, %v4892_v29, 0.0 }
 0xe93   :  { %4897 = vadd.xlane.f32.xlu1 %v4896_v4  ;;  %v9503_v4 = vld [vmem:[%s15236_s3] ss:$0 sm:$0xff] }
 0xebc   :  { %v5161_v10 = vpop.f32.mrb[84].mxu0  ;;  %v5213_v46 = vpop.f32.mrb[76].mxu1 }
 0xebd   :  { %11085 = vrcp.f32 %v5213_v46  ;;  %v10466_v62 = vpop.f32.mrb[85].mxu0  ;;  %v10474_v24 = vpop.f32.mrb[77].mxu1 }
 0xebe   :  { %v5164_v31 = vpop.f32.mrb[86].mxu0  ;;  %v5216_v41 = vpop.f32.mrb[78].mxu1 }
 0xebf   :  { %v10467_v63 = vpop.f32.mrb[87].mxu0  ;;  %v10475_v5 = vpop.f32.mrb[79].mxu1 }
 0xec7   :  { %v11086_v58 = vpop.eup %11085 }
 0xec8   :  { %10485 = vmatmul.mubr.msk.f32.vlgmr.msra.gmra.mrb[88].mxu0 %vm2294_vm1, %v11086_v58 }
 0xf18   :  { %v4880_v34 = vpop.xlane.xlu0 %4879 }
 0xf19   :  { %v4886_v14 = vmul.f32 0.03125, %v4880_v34 }
 0xf1b   :  { %v13911_v57 = vsub.f32 %v4870_v3, %v4886_v14  ;;  %v4877_v3 = vpop.xlane.xlu1 %4876 }
 0xf1c   :  { %v4885_v18 = vmul.f32 0.03125, %v4877_v3 }
 0xf1d   :  { %v4894_v1 = vmul.f32 %v13911_v57, %v13911_v57 }
 0xf1e   :  { %v4889_v46 = vsub.f32 %v4869_v54, %v4885_v18 }
 0xf1f   :  { %v4902_v55 = vsel %vm1769_vm0, %v4894_v1, 0.0  ;;  %v4883_v29 = vpop.xlane.xlu1 %4882  ;;  %v11045_v1 = vld [vmem:[%s15237_s27] sm:$0xff]  }
 0xf20   :  { %4903 = vadd.xlane.f32.xlu1 %v4902_v55  ;;  %v4887_v62 = vmul.f32 0.03125, %v4883_v29  ;;  %v4893_v34 = vmul.f32 %v4889_v46, %v4889_v46  ;;  %10503 = vmatprep.subr.bf16.mxu0 %v11045_v1  ;;  %v11046_v55 = vld [vmem:[%s15237_s27 + $0x8] sm:$0xff]  }
 0xf21   :  { %10504 = vmatpush3.bf16.msra.mxu0 %v11045_v1 }
 0xf22   :  { %v4891_v5 = vsub.f32 %v4871_v19, %v4887_v62  ;;  %v4899_v14 = vsel %vm1769_vm0, %v4893_v34, 0.0  ;;  %10505 = vmatprep.subr.bf16.mxu0 %v11046_v55 }
 0xf24   :  { %v4895_v9 = vmul.f32 %v4891_v5, %v4891_v5 }
 0xf25   :  { %10506 = vmatpush3.bf16.msra.mxu0 %v11046_v55 }
 0xf26   :  { %v4905_v54 = vsel %vm1769_vm0, %v4895_v9, 0.0  ;;  %10531 = vmatprep.subr.bf16.mxu0 %v14855_v56 }
 0xf9b   :  { %v5289_v7 = vpop.f32.mrb[88].mxu0 }
 0xf9c   :  { %v5293_v2 = vmul.f32 %v5289_v7, %v5161_v10  ;;  %v10486_v17 = vpop.f32.mrb[89].mxu0 }
 0xf9e   :  { %v5294_v48 = vpack.c.bf16 %v5293_v2, %v5293_v2 }
 0xfa0   :  { %10492 = vmatmul.mubr.msk.bf16.vlgmr.msra.gmra.mrb[80].mxu1 %vm1769_vm0, %v5294_v48 }
 0xfa1   :  { %10499 = vmatprep.mubr.msk.bf16.mxu1 %vm11659_vm3, %v14855_v56 }
0x1073   :  { %v5355_v15 = vpop.f32.mrb[80].mxu1 }
0x1074   :  { %v5356_v24 = vadd.f32 %v9503_v4, %v5355_v15  ;;  %v10493_v31 = vpop.f32.mrb[81].mxu1 }
0x1075   :  { %v5358_v41 = vpop.f32.mrb[82].mxu1 }
0x1076   :  { %v10494_v10 = vpop.f32.mrb[83].mxu1  ;;  %v5361_v63 = vadd.f32 %v5356_v24, %v13792_v49  ;;  %v4898_v49 = vpop.xlane.xlu1 %4897 }
0x1077   :  { %v4908_v19 = vmul.f32 0.03125, %v4898_v49 }
0x1078   :  { %v5362_v58 = vsel %vm1769_vm0, %v5361_v63, 0.0 }
0x1079   :  { %5363 = vadd.xlane.f32.xlu0 %v5362_v58  ;;  %v4912_v2 = vadd.f32 1e-05, %v4908_v19  ;;  %v9488_v19 = vld [vmem:[#allocation31] ss:$0 sm:$0xff] }
0x107a   :  { %v4904_v7 = vpop.xlane.xlu1 %4903 }
0x107b   :  { %v4910_v17 = vmul.f32 0.03125, %v4904_v7  ;;  %11087 = vrsqrt.f32 %v4912_v2 }
0x107d   :  { %4900 = vadd.xlane.f32.xlu0 %v4899_v14  ;;  %v4914_v18 = vadd.f32 1e-05, %v4910_v17 }
0x107f   :  { %11089 = vrsqrt.f32 %v4914_v18 }
0x1081   :  { %4906 = vadd.xlane.f32.xlu0 %v4905_v54  ;;  %v9487_v54 = vld [vmem:[#allocation32] ss:$0 sm:$0xff] }
0x1085   :  { %v11088_v34 = vpop.eup %11087 }
0x1086   :  { %v4920_v14 = vmul.f32 %v11088_v34, %v13902_v39 }
0x1088   :  { %v4931_v49 = vmul.f32 %v9487_v54, %v4920_v14  ;;  %v9508_v14 = vld [vmem:[%s15240_s20] ss:$0 sm:$0xff] }
0x1089   :  { %v11090_v9 = vpop.eup %11089 }
0x1106   :  { %v5364_v48 = vpop.xlane.xlu0 %5363 }
0x1107   :  { %v5365_v3 = vmul.f32 0.03125, %v5364_v48 }
0x1109   :  { %v5366_v29 = vsub.f32 %v5361_v63, %v5365_v3  ;;  %v4922_v63 = vmul.f32 %v11090_v9, %v13911_v57  ;;  %v4942_v3 = vadd.f32 %v9488_v19, %v4931_v49 }
0x110a   :  { %v4901_v4 = vpop.xlane.xlu0 %4900 }
0x110b   :  { %v4909_v15 = vmul.f32 0.03125, %v4901_v4  ;;  %v5367_v62 = vmul.f32 %v5366_v29, %v5366_v29  ;;  %v4933_v17 = vmul.f32 %v9487_v54, %v4922_v63  ;;  %v9513_v63 = vld [vmem:[%s15241_s1] ss:$0 sm:$0xff] }
0x110d   :  { %v4913_v24 = vadd.f32 1e-05, %v4909_v15  ;;  %v5368_v31 = vsel %vm1769_vm0, %v5367_v62, 0.0  ;;  %v4944_v39 = vadd.f32 %v9488_v19, %v4933_v17  ;;  %v11048_v62 = vld [vmem:[%s15238_s26 + $0x8] sm:$0xff]  }
0x110e   :  { %5369 = vadd.xlane.f32.xlu1 %v5368_v31  ;;  %v4907_v41 = vpop.xlane.xlu0 %4906 }
0x110f   :  { %11091 = vrsqrt.f32 %v4913_v24  ;;  %v4911_v10 = vmul.f32 0.03125, %v4907_v41 }
0x1111   :  { %v4915_v58 = vadd.f32 1e-05, %v4911_v10 }
0x1113   :  { %11093 = vrsqrt.f32 %v4915_v58  ;;  %v9507_v58 = vld [vmem:[%s15239_s22] ss:$0 sm:$0xff] }
0x1119   :  { %v11092_v1 = vpop.eup %11091 }
0x111a   :  { %v4921_v55 = vmul.f32 %v11092_v1, %v4889_v46 }
0x111c   :  { %v4932_v7 = vmul.f32 %v9487_v54, %v4921_v55 }
0x111d   :  { %v11094_v2 = vpop.eup %11093 }
0x111e   :  { %v4923_v48 = vmul.f32 %v11094_v2, %v4891_v5  ;;  %v4943_v18 = vadd.f32 %v9488_v19, %v4932_v7  ;;  %v11047_v5 = vld [vmem:[%s15238_s26] sm:$0xff]  }
0x111f   :  { %10496 = vmatpush3.bf16.msra.mxu1 %v11047_v5 }
0x1120   :  { %v4934_v4 = vmul.f32 %v9487_v54, %v4923_v48  ;;  %v13932_v15 = vpack.c.bf16 %v4943_v18, %v4942_v3  ;;  %10497 = vmatprep.subr.bf16.mxu1 %v14855_v56 }
0x1122   :  { %10507 = vmatprep.mubr.msk.bf16.mxu0 %vm1769_vm0, %v13932_v15  ;;  %v4945_v57 = vadd.f32 %v9488_v19, %v4934_v4 }
0x1123   :  { %10498 = vmatpush3.bf16.msra.mxu1 %v11048_v62 }
0x1124   :  { %v13936_v46 = vpack.c.bf16 %v4945_v57, %v4944_v39  ;;  %10511 = vmatprep.subr.bf16.mxu1 %v14855_v56  ;;  %v11111_v57 = vld [vmem:[%s15184_s10] sm:$0xff] }
0x1126   :  { %10508 = vmatmul.mubr.msk.bf16.vlgmr.msra.gmra.mrb[92].mxu0 %vm1769_vm0, %v13936_v46 }
0x1127   :  { %10547 = vmatprep.mubr.msk.bf16.mxu0 %vm11659_vm3, %v14855_v56 }
0x119b   :  { %v5370_v24 = vpop.xlane.xlu1 %5369 }
0x119c   :  { %v5371_v31 = vmul.f32 0.03125, %v5370_v24 }
0x119e   :  { %v5372_v41 = vadd.f32 1e-05, %v5371_v31 }
0x11a0   :  { %11095 = vrsqrt.f32 %v5372_v41 }
0x11aa   :  { %v11096_v10 = vpop.eup %11095 }
0x11ab   :  { %v5374_v34 = vmul.f32 %v11096_v10, %v5366_v29 }
0x11ad   :  { %v5382_v9 = vmul.f32 %v9507_v58, %v5374_v34  ;;  %v11112_v34 = vld [vmem:[%s15184_s10 + $0x8] sm:$0xff] }
0x11af   :  { %v13948_v54 = vadd.f32 %v9508_v14, %v5382_v9 }
0x11b1   :  { %v5391_v1 = vpack.c.bf16 %v13948_v54, %v13948_v54 }
0x11b3   :  { %10500 = vmatmul.mubr.msk.bf16.vlgmr.msra.gmra.mrb[84].mxu1 %vm1769_vm0, %v5391_v1 }
0x11b4   :  { %10527 = vmatprep.mubr.msk.bf16.mxu1 %vm11659_vm3, %v14855_v56 }
0x11f9   :  { %v10509_v55 = vpop.f32.mrb[92].mxu0 }
0x11fa   :  { %v13956_v49 = vadd.f32 %v10509_v55, %v9513_v63  ;;  %v5523_v19 = vpop.f32.mrb[93].mxu0 }
0x11fb   :  { %v5524_v7 = vadd.f32 %v9513_v63, %v5523_v19  ;;  %v10510_v29 = vpop.f32.mrb[94].mxu0 }
0x11fc   :  { %v13958_v2 = vadd.f32 %v10510_v29, %v9513_v63  ;;  %v5526_v17 = vpop.f32.mrb[95].mxu0  ;;  %v5565_v48 = vmul.f32 %v13956_v49, %v13079_v53  ;;  %v5569_v3 = vmul.f32 %v13956_v49, %v13093_v44  ;;  %v13966_v18 = vmul.f32 %v13956_v49, %v13103_v42  ;;  %v11113_v29 = vld [vmem:[%s15184_s10 + $0x10] sm:$0xff] }
0x11fd   :  { %v5527_v4 = vadd.f32 %v9513_v63, %v5526_v17  ;;  %v5563_v39 = vmul.f32 %v5524_v7, %v13081_v37  ;;  %v5539_v5 = vmul.f32 %v11111_v57, %v5524_v7  ;;  %v5567_v62 = vmul.f32 %v5524_v7, %v13089_v36 }
0x11fe   :  { %v5566_v24 = vmul.f32 %v13958_v2, %v13083_v61  ;;  %v5570_v31 = vmul.f32 %v13958_v2, %v13091_v60  ;;  %v5574_v41 = vmul.f32 %v13958_v2, %v13099_v43  ;;  %v5571_v10 = vmul.f32 %v5524_v7, %v13097_v35 }
0x11ff   :  { %v5564_v58 = vmul.f32 %v5527_v4, %v13085_v45  ;;  %v5540_v14 = vmul.f32 %v11112_v34, %v5527_v4  ;;  %v5568_v9 = vmul.f32 %v5527_v4, %v13087_v52  ;;  %v5572_v1 = vmul.f32 %v5527_v4, %v13095_v51  ;;  %v11114_v34 = vld [vmem:[%s15184_s10 + $0x18] sm:$0xff] }
0x1200   :  { %v5580_v63 = vpack.c.bf16 %v5566_v24, %v5565_v48  ;;  %v5582_v55 = vpack.c.bf16 %v5570_v31, %v5569_v3  ;;  %v5584_v19 = vpack.c.bf16 %v5574_v41, %v13966_v18  ;;  %v5541_v17 = vmul.f32 %v11113_v29, %v13956_v49  ;;  %v11115_v18 = vld [vmem:[%s15184_s10 + $0x20] sm:$0xff]  ;;  %v11117_v31 = vld [vmem:[%s15184_s10 + $0x30] sm:$0xff]  ;;  %v11120_v29 = vld [vmem:[%s15184_s10 + $0x48] sm:$0xff] }
0x1201   :  { %v5579_v57 = vpack.c.bf16 %v5564_v58, %v5563_v39  ;;  %v5555_v40 = vpack.c.bf16 %v5540_v14, %v5539_v5  ;;  %v5581_v56 = vpack.c.bf16 %v5568_v9, %v5567_v62  ;;  %v5583_v36 = vpack.c.bf16 %v5572_v1, %v5571_v10  ;;  %v11116_v5 = vld [vmem:[%s15184_s10 + $0x28] sm:$0xff]  ;;  %v11118_v10 = vld [vmem:[%s15184_s10 + $0x38] sm:$0xff]  ;;  %v11119_v1 = vld [vmem:[%s15184_s10 + $0x40] sm:$0xff] }
0x1202   :  { %5670 = vrot.lane.b32.xlu1 %v5580_v63, %s11655_s5  ;;  %v5542_v52 = vmul.f32 %v11114_v34, %v13958_v2  ;;  %v5575_v48 = vmul.f32 %v5524_v7, %v13125_v59  ;;  %v5576_v3 = vmul.f32 %v5527_v4, %v13115_v16  ;;  %v5543_v24 = vmul.f32 %v11115_v18, %v5524_v7  ;;  %v11122_v16 = vld [vmem:[%s15184_s10 + $0x58] sm:$0xff] }
0x1203   :  { %5668 = vrot.lane.b32.xlu0 %v5579_v57, %s11655_s5  ;;  %v5591_v39 = vsel %vm1769_vm0, %v5555_v40, 0  ;;  %v5544_v62 = vmul.f32 %v11116_v5, %v5527_v4  ;;  %v5545_v41 = vmul.f32 %v11117_v31, %v13956_v49  ;;  %v5546_v58 = vmul.f32 %v11118_v10, %v13958_v2  ;;  %v11121_v5 = vld [vmem:[%s15184_s10 + $0x50] sm:$0xff] }
0x1204   :  { %10512 = vmatpush3.bf16.xpose.msra.mxu1 %v5591_v39  ;;  %v5556_v14 = vpack.c.bf16 %v5542_v52, %v5541_v17  ;;  %v5585_v9 = vpack.c.bf16 %v5576_v3, %v5575_v48  ;;  %v5547_v63 = vmul.f32 %v11119_v1, %v5524_v7  ;;  %v5548_v57 = vmul.f32 %v11120_v29, %v5527_v4  ;;  %v11123_v17 = vld [vmem:[%s15184_s10 + $0x60] sm:$0xff]  ;;  %v11124_v3 = vld [vmem:[%s15184_s10 + $0x68] sm:$0xff] }
0x1205   :  { %v15242_v40 = vmov 0.0   ;;  %v5557_v34 = vpack.c.bf16 %v5544_v62, %v5543_v24  ;;  %v5558_v18 = vpack.c.bf16 %v5546_v58, %v5545_v41  ;;  %v5549_v31 = vmul.f32 %v11121_v5, %v13956_v49  ;;  %v11125_v24 = vld [vmem:[%s15184_s10 + $0x70] sm:$0xff]  ;;  %v11126_v41 = vld [vmem:[%s15184_s10 + $0x78] sm:$0xff]  ;;  %s15250_s10 = sld [smem:[#allocation78_spill]] }
0x1206   :  { %10513 = vmatprep.subr.bf16.mxu1 %v15242_v40  ;;  %v5550_v39 = vmul.f32 %v11122_v16, %v13958_v2  ;;  %5674 = vrot.lane.b32.xlu1 %v5582_v55, %s11655_s5  ;;  %v5559_v52 = vpack.c.bf16 %v5548_v57, %v5547_v63  ;;  %v5551_v48 = vmul.f32 %v11123_v17, %v5524_v7  ;;  %v15244_v63 = vmov 0.0|0.0  }
0x1207   :  { %v5552_v10 = vmul.f32 %v11124_v3, %v5527_v4  ;;  %5672 = vrot.lane.b32.xlu0 %v5581_v56, %s11655_s5  ;;  %v5553_v62 = vmul.f32 %v11125_v24, %v13956_v49  ;;  %v5554_v58 = vmul.f32 %v11126_v41, %v13958_v2  ;;  %v14015_v16 = vmul.f32 %v13956_v49, %v13145_v6 }
0x1208   :  { %v5560_v1 = vpack.c.bf16 %v5550_v39, %v5549_v31  ;;  %v14019_v55 = vmul.f32 %v13958_v2, %v13138_v50  ;;  %v5594_v56 = vsel %vm1769_vm0, %v5556_v14, 0  ;;  %v5597_v49 = vsel %vm1769_vm0, %v5557_v34, 0  ;;  %v9509_v31 = vld [vmem:[%s15243_s24] ss:$0 sm:$0xff] }
0x1209   :  { %v5561_v29 = vpack.c.bf16 %v5552_v10, %v5551_v48  ;;  %v5562_v7 = vpack.c.bf16 %v5554_v58, %v5553_v62  ;;  %v5600_v2 = vsel %vm1769_vm0, %v5558_v18, 0  ;;  %v14059_v62 = vld [vmem:[%s15245_s7] sm:$0xff] }
0x120a   :  { %5678 = vrot.lane.b32.xlu1 %v5584_v19, %s11655_s5  ;;  %v5586_v4 = vpack.c.bf16 %v14019_v55, %v14015_v16  ;;  %v5606_v19 = vsel %vm1769_vm0, %v5560_v1, 0  ;;  %15246 = vst [vmem:[#allocation396_spill] sm:$0xff] %v14059_v62 }
0x120b   :  { %5676 = vrot.lane.b32.xlu0 %v5583_v36, %s11655_s5  ;;  %v5603_v36 = vsel %vm1769_vm0, %v5559_v52, 0  ;;  %v5609_v14 = vsel %vm1769_vm0, %v5561_v29, 0 }
0x120c   :  { %10514 = vmatpush3.bf16.xpose.msra.mxu1 %v5594_v56 }
0x120d   :  { %10515 = vmatprep.subr.bf16.mxu1 %v15242_v40 }
0x120f   :  { %5680 = vrot.lane.b32.xlu0 %v5585_v9, %s11655_s5  ;;  %v5612_v9 = vsel %vm1769_vm0, %v5562_v7, 0 }
0x1214   :  { %10516 = vmatpush3.bf16.xpose.msra.mxu1 %v5597_v49 }
0x1215   :  { %10517 = vmatprep.subr.bf16.mxu1 %v15242_v40 }
0x121c   :  { %10518 = vmatpush3.bf16.xpose.msra.mxu1 %v5600_v2 }
0x121d   :  { %10519 = vmatprep.subr.bf16.mxu1 %v15242_v40 }
0x1224   :  { %10520 = vmatpush3.bf16.xpose.msra.mxu1 %v5603_v36 }
0x1225   :  { %10521 = vmatprep.subr.bf16.mxu1 %v15242_v40 }
0x122c   :  { %10522 = vmatpush3.bf16.xpose.msra.mxu1 %v5606_v19 }
0x122d   :  { %10523 = vmatprep.subr.bf16.mxu1 %v15242_v40 }
0x1234   :  { %10524 = vmatpush3.bf16.xpose.msra.mxu1 %v5609_v14 }
0x1235   :  { %10525 = vmatprep.subr.bf16.mxu1 %v15242_v40 }
0x123c   :  { %10526 = vmatpush3.bf16.xpose.msra.mxu1 %v5612_v9  ;;  %v11127_v9 = vld [vmem:[%s15208_s30] sm:$0xff]  }
0x123d   :  { %10771 = vmatprep.subr.bf16.mxu1 %v15244_v63 }
0x1274   :  { %v5671_v34 = vpop.permute.xlu1 %5670 }
0x1275   :  { %v5669_v57 = vpop.permute.xlu0 %5668 }
0x1276   :  { %10532 = vmatpush3.bf16.msra.mxu0 %v5669_v57  ;;  %v11129_v57 = vld [vmem:[%s15208_s30 + $0x10] sm:$0xff]  }
0x1277   :  { %10533 = vmatprep.subr.bf16.mxu0 %v15242_v40 }
0x1278   :  { %v5675_v5 = vpop.permute.xlu1 %5674 }
0x1279   :  { %v5673_v18 = vpop.permute.xlu0 %5672 }
0x127a   :  { %10534 = vmatpush3.bf16.msra.mxu0 %v5671_v34  ;;  %v11130_v34 = vld [vmem:[%s15208_s30 + $0x18] sm:$0xff]  }
0x127b   :  { %10535 = vmatprep.subr.bf16.mxu0 %v15242_v40 }
0x127c   :  { %v5679_v10 = vpop.permute.xlu1 %5678 }
0x127d   :  { %v5677_v39 = vpop.permute.xlu0 %5676 }
0x127e   :  { %10536 = vmatpush3.bf16.msra.mxu0 %v5673_v18  ;;  %v11131_v18 = vld [vmem:[%s15208_s30 + $0x20] sm:$0xff]  }
0x127f   :  { %10537 = vmatprep.subr.bf16.mxu0 %v15242_v40 }
0x1281   :  { %v5681_v24 = vpop.permute.xlu0 %5680 }
0x1282   :  { %10538 = vmatpush3.bf16.msra.mxu0 %v5675_v5  ;;  %v11132_v5 = vld [vmem:[%s15208_s30 + $0x28] sm:$0xff]  }
0x1283   :  { %10539 = vmatprep.subr.bf16.mxu0 %v15242_v40 }
0x1286   :  { %v5452_v52 = vpop.f32.mrb[84].mxu1  ;;  %10540 = vmatpush3.bf16.msra.mxu0 %v5677_v39  ;;  %v11134_v39 = vld [vmem:[%s15208_s30 + $0x38] sm:$0xff]  }
0x1287   :  { %v5453_v17 = vadd.f32 %v9509_v31, %v5452_v52  ;;  %v10501_v48 = vpop.f32.mrb[85].mxu1  ;;  %10541 = vmatprep.subr.bf16.mxu0 %v15242_v40  ;;  %v11133_v31 = vld [vmem:[%s15208_s30 + $0x30] sm:$0xff]   ;;  %v11049_v52 = vld [vmem:[%s15247_s17] sm:$0xff]  }
0x1288   :  { %v5455_v3 = vpop.f32.mrb[86].mxu1 }
0x1289   :  { %v5538_v1 = vpack.c.bf16 %v5453_v17, %v5453_v17  ;;  %v10502_v29 = vpop.f32.mrb[87].mxu1 }
0x128a   :  { %10542 = vmatpush3.bf16.msra.mxu0 %v5679_v10 }
0x128b   :  { %10528 = vmatmul.mubr.msk.bf16.vlgmr.msra.gmra.mrb[88].mxu1 %vm1769_vm0, %v5538_v1  ;;  %10543 = vmatprep.subr.bf16.mxu0 %v15242_v40 }
0x128c   :  { %10774 = vmatpush3.bf16.xpose.msk.msra.mxu1 %vm13287_vm2, %v13283_v22  ;;  %10579 = vmatprep.mubr.msk.f32.mxu1 %vm11659_vm3, %v15242_v40 }
0x128d   :  { %10775 = vmatprep.subr.bf16.mxu1 %v15244_v63 }
0x128e   :  { %10544 = vmatpush3.bf16.msra.mxu0 %v5681_v24 }
0x128f   :  { %10545 = vmatprep.subr.bf16.mxu0 %v15242_v40 }
0x1294   :  { %10778 = vmatpush3.bf16.xpose.msk.msra.mxu1 %vm13287_vm2, %v13299_v33 }
0x135e   :  { %v5648_v41 = vpop.f32.mrb[88].mxu1 }
0x135f   :  { %v5649_v58 = vadd.f32 %v5648_v41, %v14059_v62  ;;  %v10529_v16 = vpop.f32.mrb[89].mxu1 }
0x1360   :  { %v5651_v55 = vpop.f32.mrb[90].mxu1  ;;  %v11050_v16 = vld [vmem:[%s15247_s17 + $0x8] sm:$0xff]  }
0x1361   :  { %5654 = vmax.xlane.f32.xlu1 %v5649_v58  ;;  %v10530_v7 = vpop.f32.mrb[91].mxu1 }
0x1372   :  { %5682 = vrot.lane.b32.xlu1 %v5586_v4, %s11655_s5  ;;  %v11128_v4 = vld [vmem:[%s15208_s30 + $0x8] sm:$0xff]  }
0x13ee   :  { %v5655_v56 = vpop.xlane.xlu1 %5654 }
0x13ef   :  { %v5656_v49 = vsub.f32 %v5649_v58, %v5655_v56 }
0x13f1   :  { %v5657_v2 = vmul.f32 1.442695, %v5656_v49 }
0x13f2   :  { %v5683_v36 = vpop.permute.xlu1 %5682 }
0x13f3   :  { %11097 = vpow2.f32 %v5657_v2  ;;  %10546 = vmatpush3.bf16.msra.mxu0 %v5683_v36  ;;  %v9524_v2 = vld [vmem:[%s15248_s13] ss:$0 sm:$0xff] }
0x13f4   :  { %10551 = vmatprep.subr.bf16.mxu0 %v15242_v40 }
0x13fd   :  { %v11098_v19 = vpop.eup %11097 }
0x13fe   :  { %v5659_v14 = vpack.c.bf16 %v11098_v19, %v11098_v19 }
0x1400   :  { %10548 = vmatmul.mubr.bf16.vlgmr.msra.gmra.mrb[96].mxu0 %v5659_v14 }
0x1401   :  { %10552 = vmatpush3.bf16.msra.mxu0 %v11127_v9  ;;  %10567 = vmatprep.mubr.msk.bf16.mxu0 %vm11659_vm3, %v15242_v40 }
0x1402   :  { %10553 = vmatprep.subr.bf16.mxu0 %v15242_v40 }
0x1405   :  { %10554 = vmatpush3.bf16.msra.mxu0 %v11128_v4 }
0x1406   :  { %10555 = vmatprep.subr.bf16.mxu0 %v15242_v40 }
0x1409   :  { %10556 = vmatpush3.bf16.msra.mxu0 %v11129_v57 }
0x140a   :  { %10557 = vmatprep.subr.bf16.mxu0 %v15242_v40 }
0x140d   :  { %10558 = vmatpush3.bf16.msra.mxu0 %v11130_v34 }
0x140e   :  { %10559 = vmatprep.subr.bf16.mxu0 %v15242_v40 }
0x1411   :  { %10560 = vmatpush3.bf16.msra.mxu0 %v11131_v18 }
0x1412   :  { %10561 = vmatprep.subr.bf16.mxu0 %v15242_v40 }
0x1415   :  { %10562 = vmatpush3.bf16.msra.mxu0 %v11132_v5 }
0x1416   :  { %10563 = vmatprep.subr.bf16.mxu0 %v15242_v40 }
0x1419   :  { %10564 = vmatpush3.bf16.msra.mxu0 %v11133_v31 }
0x141a   :  { %10565 = vmatprep.subr.bf16.mxu0 %v15242_v40 }
0x141d   :  { %10566 = vmatpush3.bf16.msra.mxu0 %v11134_v39 }
0x141e   :  { %10582 = vmatprep.subr.bf16.mxu0 %v15242_v40 }
0x1420   :  { %10568 = vmatmul.mubr.bf16.vlgmr.msra.gmra.mrb[100].mxu0 %v5659_v14 }
0x1421   :  { %10586 = vmatprep.mubr.msk.bf16.mxu0 %vm11659_vm3, %v15242_v40  ;;  %10583 = vmatpush3.bf16.msra.mxu0 %v11049_v52 }
0x1422   :  { %10584 = vmatprep.subr.bf16.mxu0 %v15242_v40 }
0x1425   :  { %10585 = vmatpush3.bf16.msra.mxu0 %v11050_v16 }
0x14d3   :  { %v5726_v17 = vpop.f32.mrb[96].mxu0 }
0x14d4   :  { %v10549_v48 = vpop.f32.mrb[97].mxu0 }
0x14d5   :  { %v5729_v3 = vpop.f32.mrb[98].mxu0 }
0x14d6   :  { %v10550_v10 = vpop.f32.mrb[99].mxu0 }
0x14f3   :  { %v5766_v1 = vpop.f32.mrb[100].mxu0 }
0x14f4   :  { %11099 = vrcp.f32 %v5766_v1  ;;  %v10569_v29 = vpop.f32.mrb[101].mxu0  ;;  %v9528_v1 = vld [vmem:[%s15249_s2] ss:$0 sm:$0xff] }
0x14f5   :  { %v5769_v24 = vpop.f32.mrb[102].mxu0 }
0x14f6   :  { %v10570_v41 = vpop.f32.mrb[103].mxu0 }
0x14fe   :  { %v11100_v58 = vpop.eup %11099 }
0x14ff   :  { %10580 = vmatmul.mubr.msk.f32.vlgmr.msra.gmra.mrb[92].mxu1 %vm2294_vm1, %v11100_v58 }
0x15d2   :  { %v5842_v55 = vpop.f32.mrb[92].mxu1 }
0x15d3   :  { %v5846_v7 = vmul.f32 %v5842_v55, %v5726_v17  ;;  %v10581_v56 = vpop.f32.mrb[93].mxu1 }
0x15d5   :  { %v5847_v49 = vpack.c.bf16 %v5846_v7, %v5846_v7 }
0x15d7   :  { %10587 = vmatmul.mubr.msk.bf16.vlgmr.msra.gmra.mrb[104].mxu0 %vm1769_vm0, %v5847_v49 }
0x16aa   :  { %v5908_v36 = vpop.f32.mrb[104].mxu0 }
0x16ab   :  { %v5909_v19 = vadd.f32 %v9524_v2, %v5908_v36  ;;  %v10588_v14 = vpop.f32.mrb[105].mxu0 }
0x16ac   :  { %v5911_v9 = vpop.f32.mrb[106].mxu0 }
0x16ad   :  { %v5914_v4 = vadd.f32 %v5909_v19, %v13948_v54  ;;  %v10589_v57 = vpop.f32.mrb[107].mxu0  ;;  %v9529_v54 = vld [vmem:[%s15250_s10] ss:$0 sm:$0xff] }
0x16af   :  { %v5915_v34 = vsel %vm1769_vm0, %v5914_v4, 0.0 }
0x16b0   :  { %5916 = vadd.xlane.f32.xlu0 %v5915_v34 }
0x173d   :  { %v5917_v18 = vpop.xlane.xlu0 %5916 }
0x173e   :  { %v5918_v5 = vmul.f32 0.03125, %v5917_v18 }
0x1740   :  { %v5919_v31 = vsub.f32 %v5914_v4, %v5918_v5 }
0x1742   :  { %v5920_v39 = vmul.f32 %v5919_v31, %v5919_v31 }
0x1744   :  { %v5921_v52 = vsel %vm1769_vm0, %v5920_v39, 0.0 }
0x1745   :  { %5922 = vadd.xlane.f32.xlu1 %v5921_v52 }
0x17d2   :  { %v5923_v17 = vpop.xlane.xlu1 %5922 }
0x17d3   :  { %v5924_v48 = vmul.f32 0.03125, %v5923_v17 }
0x17d5   :  { %v5925_v3 = vadd.f32 1e-05, %v5924_v48 }
0x17d7   :  { %11101 = vrsqrt.f32 %v5925_v3 }
0x17e1   :  { %v11102_v10 = vpop.eup %11101 }
0x17e2   :  { %v5927_v29 = vmul.f32 %v11102_v10, %v5919_v31 }
0x17e4   :  { %v5935_v24 = vmul.f32 %v9528_v1, %v5927_v29 }
0x17e6   :  { %v14095_v41 = vadd.f32 %v9529_v54, %v5935_v24 }
0x17e7   :  { %11557 = dma.done.wait [#allocation6], 4096 }
0x17e8   :  { %11558 = vsyncadd [#allocation6], 4294963200 }
0x17e9   :  { %11559 = dma.done.wait [#allocation6 + $0x1], 16384 }
0x17ea   :  { %11560 = vsyncadd [#allocation6 + $0x1], 4294950912  ;;  %v15251_v58 = vmov 0   ;;  %v5954_v16 = vld [vmem:[#allocation2 + $0x8] sm:$0xff]  ;;  %v5956_v55 = vld [vmem:[#allocation2 + $0x18] sm:$0xff]  ;;  %v14101_v4 = vpack.c.bf16 %v14095_v41, %v14095_v41  ;;  %s15272_s0 = sld [smem:[#allocation68_spill]] }
0x17eb   :  { %6104 = vmatprep.mubr.bf16.mxu0 %v15251_v58  ;;  %6145 = vmatprep.mubr.bf16.mxu1 %v15251_v58  ;;  %v5953_v7 = vld [vmem:[#allocation2] sm:$0xff]  ;;  %v5955_v56 = vld [vmem:[#allocation2 + $0x10] sm:$0xff]  ;;  %v5970_v49 = vld [vmem:[#allocation2 + $0x88] sm:$0xff]  ;;  %s15381_s21 = sld [smem:[#allocation69_spill]]  ;;  %s15386_s30 = sld [smem:[#allocation98_spill]] }
0x17ec   :  { %6072 = vmatprep.subr.bf16.mxu0 %v5954_v16  ;;  %6113 = vmatprep.subr.bf16.mxu1 %v5956_v55  ;;  %v5972_v2 = vld [vmem:[#allocation2 + $0x98] sm:$0xff]  ;;  %v5969_v36 = vld [vmem:[#allocation2 + $0x80] sm:$0xff]  ;;  %v5971_v19 = vld [vmem:[#allocation2 + $0x90] sm:$0xff]  ;;  %s15387_s4 = sld [smem:[#allocation81_spill]]  ;;  %s15388_s11 = sld [smem:[#allocation80_spill]] }
0x17ed   :  { %6073 = vmatpush1.bf16.msra.mxu0 %v5953_v7  ;;  %6114 = vmatpush1.bf16.msra.mxu1 %v5955_v56  ;;  %v5958_v14 = vld [vmem:[#allocation2 + $0x28] sm:$0xff]  ;;  %v5960_v9 = vld [vmem:[#allocation2 + $0x38] sm:$0xff]  ;;  %v5957_v57 = vld [vmem:[#allocation2 + $0x20] sm:$0xff]  ;;  %s15389_s14 = sld [smem:[#allocation97_spill]]  ;;  %s15391_s16 = sld [smem:[#allocation93_spill]] }
0x17ee   :  { %6074 = vmatprep.subr.bf16.mxu0 %v5970_v49  ;;  %6115 = vmatprep.subr.bf16.mxu1 %v5972_v2  ;;  %v5959_v34 = vld [vmem:[#allocation2 + $0x30] sm:$0xff]  ;;  %v5974_v18 = vld [vmem:[#allocation2 + $0xa8] sm:$0xff]  ;;  %v5976_v5 = vld [vmem:[#allocation2 + $0xb8] sm:$0xff]  ;;  %s15392_s6 = sld [smem:[#allocation88_spill]]  ;;  %s15403_s19 = sld [smem:[#allocation95_spill]] }
0x17ef   :  { %v5973_v31 = vld [vmem:[#allocation2 + $0xa0] sm:$0xff]  ;;  %v5975_v39 = vld [vmem:[#allocation2 + $0xb0] sm:$0xff]  ;;  %v5962_v52 = vld [vmem:[#allocation2 + $0x48] sm:$0xff]  ;;  %s15405_s9 = sld [smem:[#allocation94_spill]]  ;;  %s15415_s18 = sld [smem:[#allocation90_spill]] }
0x17f0   :  { %v5964_v17 = vld [vmem:[#allocation2 + $0x58] sm:$0xff]  ;;  %v5961_v48 = vld [vmem:[#allocation2 + $0x40] sm:$0xff]  ;;  %v5963_v3 = vld [vmem:[#allocation2 + $0x50] sm:$0xff]  ;;  %s15428_s28 = sld [smem:[#allocation89_spill]]  ;;  %s15429_s8 = sld [smem:[#allocation96_spill]] }
0x17f1   :  { %6075 = vmatpush1.bf16.msra.mxu0 %v5969_v36  ;;  %6116 = vmatpush1.bf16.msra.mxu1 %v5971_v19  ;;  %v5978_v10 = vld [vmem:[#allocation2 + $0xc8] sm:$0xff]  ;;  %v5980_v1 = vld [vmem:[#allocation2 + $0xd8] sm:$0xff]  ;;  %v5977_v29 = vld [vmem:[#allocation2 + $0xc0] sm:$0xff] }
0x17f2   :  { %6154 = vmatprep.subr.bf16.mxu0 %v5958_v14  ;;  %6195 = vmatprep.subr.bf16.mxu1 %v5960_v9  ;;  %v5979_v54 = vld [vmem:[#allocation2 + $0xd0] sm:$0xff]  ;;  %v5966_v24 = vld [vmem:[#allocation2 + $0x68] sm:$0xff]  ;;  %v5968_v16 = vld [vmem:[#allocation2 + $0x78] sm:$0xff] }
0x17f3   :  { %v5965_v55 = vld [vmem:[#allocation2 + $0x60] sm:$0xff]  ;;  %v5967_v7 = vld [vmem:[#allocation2 + $0x70] sm:$0xff]  ;;  %v5982_v56 = vld [vmem:[#allocation2 + $0xe8] sm:$0xff] }
0x17f4   :  { %9530 = vmatmul.mubr.msk.bf16.vlgmr.msra.gmra.mrb[108].mxu0 %vm1769_vm0, %v14101_v4  ;;  %9531 = vmatmul.mubr.msk.bf16.vlgmr.msra.gmra.mrb[96].mxu1 %vm1769_vm0, %v14101_v4  ;;  %v5984_v49 = vld [vmem:[#allocation2 + $0xf8] sm:$0xff]  ;;  %v5981_v2 = vld [vmem:[#allocation2 + $0xe0] sm:$0xff]  ;;  %v5983_v36 = vld [vmem:[#allocation2 + $0xf0] sm:$0xff] }
0x17f5   :  { %6155 = vmatpush1.bf16.msra.mxu0 %v5957_v57  ;;  %6196 = vmatpush1.bf16.msra.mxu1 %v5959_v34  ;;  %v15252_v19 = vld [vmem:[#allocation114_spill] sm:$0xff]  ;;  %v15256_v34 = vld [vmem:[#allocation115_spill] sm:$0xff]  ;;  %v15317_v51 = vld [vmem:[#allocation153_spill] sm:$0xff] }
0x17f6   :  { %6156 = vmatprep.subr.bf16.mxu0 %v5974_v18  ;;  %6197 = vmatprep.subr.bf16.mxu1 %v5976_v5  ;;  %v15253_v14 = vld [vmem:[#allocation130_spill] sm:$0xff]  ;;  %v15257_v18 = vld [vmem:[#allocation131_spill] sm:$0xff] }
0x17f7   :  { %6186 = vmatprep.mubr.bf16.mxu0 %v15251_v58  ;;  %6227 = vmatprep.mubr.bf16.mxu1 %v15251_v58  ;;  %v15254_v9 = vld [vmem:[#allocation106_spill] sm:$0xff]  ;;  %v15258_v5 = vld [vmem:[#allocation107_spill] sm:$0xff] }
0x17f8   :  { %v15255_v57 = vld [vmem:[#allocation122_spill] sm:$0xff]  ;;  %v15311_v50 = vld [vmem:[#allocation143_spill] sm:$0xff] }
0x17f9   :  { %6157 = vmatpush1.bf16.msra.mxu0 %v5973_v31  ;;  %6198 = vmatpush1.bf16.msra.mxu1 %v5975_v39  ;;  %v15259_v31 = vld [vmem:[#allocation123_spill] sm:$0xff]  ;;  %v15260_v39 = vld [vmem:[#allocation116_spill] sm:$0xff] }
0x17fa   :  { %6236 = vmatprep.subr.bf16.mxu0 %v5962_v52  ;;  %6277 = vmatprep.subr.bf16.mxu1 %v5964_v17  ;;  %v15261_v52 = vld [vmem:[#allocation132_spill] sm:$0xff] }
0x17fb   :  { %v15262_v17 = vld [vmem:[#allocation108_spill] sm:$0xff] }
0x17fc   :  { %9532 = vmatmul.mubr.msk.bf16.vlgmr.msra.gmra.mrb[112].mxu0 %vm1769_vm0, %v14101_v4  ;;  %9533 = vmatmul.mubr.msk.bf16.vlgmr.msra.gmra.mrb[100].mxu1 %vm1769_vm0, %v14101_v4 }
0x17fd   :  { %6237 = vmatpush1.bf16.msra.mxu0 %v5961_v48  ;;  %6278 = vmatpush1.bf16.msra.mxu1 %v5963_v3  ;;  %v15263_v48 = vld [vmem:[#allocation124_spill] sm:$0xff]  ;;  %v15265_v3 = vld [vmem:[#allocation133_spill] sm:$0xff] }
0x17fe   :  { %6238 = vmatprep.subr.bf16.mxu0 %v5978_v10  ;;  %6279 = vmatprep.subr.bf16.mxu1 %v5980_v1  ;;  %v15266_v10 = vld [vmem:[#allocation109_spill] sm:$0xff] }
0x17ff   :  { %6268 = vmatprep.mubr.bf16.mxu0 %v15251_v58  ;;  %6309 = vmatprep.mubr.bf16.mxu1 %v15251_v58  ;;  %v15267_v1 = vld [vmem:[#allocation125_spill] sm:$0xff] }
0x1801   :  { %6239 = vmatpush1.bf16.msra.mxu0 %v5977_v29  ;;  %6280 = vmatpush1.bf16.msra.mxu1 %v5979_v54  ;;  %v15268_v29 = vld [vmem:[#allocation118_spill] sm:$0xff] }
0x1802   :  { %6318 = vmatprep.subr.bf16.mxu0 %v5966_v24  ;;  %6359 = vmatprep.subr.bf16.mxu1 %v5968_v16  ;;  %v15269_v54 = vld [vmem:[#allocation134_spill] sm:$0xff] }
0x1803   :  { %v15270_v24 = vld [vmem:[#allocation110_spill] sm:$0xff] }
0x1804   :  { %9534 = vmatmul.mubr.msk.bf16.vlgmr.msra.gmra.mrb[116].mxu0 %vm1769_vm0, %v14101_v4  ;;  %9535 = vmatmul.mubr.msk.bf16.vlgmr.msra.gmra.mrb[104].mxu1 %vm1769_vm0, %v14101_v4  ;;  %v15271_v16 = vld [vmem:[#allocation126_spill] sm:$0xff] }
0x1805   :  { %6319 = vmatpush1.bf16.msra.mxu0 %v5965_v55  ;;  %6360 = vmatpush1.bf16.msra.mxu1 %v5967_v7  ;;  %v15273_v55 = vld [vmem:[#allocation119_spill] sm:$0xff] }
0x1806   :  { %6320 = vmatprep.subr.bf16.mxu0 %v5982_v56  ;;  %6361 = vmatprep.subr.bf16.mxu1 %v5984_v49  ;;  %v15274_v7 = vld [vmem:[#allocation135_spill] sm:$0xff] }
0x1807   :  { %6350 = vmatprep.mubr.bf16.mxu0 %v15251_v58  ;;  %6391 = vmatprep.mubr.bf16.mxu1 %v15251_v58  ;;  %v15275_v56 = vld [vmem:[#allocation111_spill] sm:$0xff] }
0x1808   :  { %v15276_v49 = vld [vmem:[#allocation127_spill] sm:$0xff] }
0x1809   :  { %6321 = vmatpush1.bf16.msra.mxu0 %v5981_v2  ;;  %6362 = vmatpush1.bf16.msra.mxu1 %v5983_v36  ;;  %v15277_v2 = vld [vmem:[#allocation120_spill] sm:$0xff] }
0x180a   :  { %9934 = vmatprep.subr.bf16.mxu0 %v15252_v19  ;;  %9956 = vmatprep.subr.bf16.mxu1 %v15253_v14  ;;  %v15278_v36 = vld [vmem:[#allocation136_spill] sm:$0xff] }
0x180b   :  { %v15279_v19 = vld [vmem:[#allocation112_spill] sm:$0xff] }
0x180c   :  { %9536 = vmatmul.mubr.msk.bf16.vlgmr.msra.gmra.mrb[120].mxu0 %vm1769_vm0, %v14101_v4  ;;  %9537 = vmatmul.mubr.msk.bf16.vlgmr.msra.gmra.mrb[108].mxu1 %vm1769_vm0, %v14101_v4  ;;  %v15264_v4 = vld [vmem:[#allocation117_spill] sm:$0xff]  ;;  %v15280_v14 = vld [vmem:[#allocation128_spill] sm:$0xff] }
0x180d   :  { %9935 = vmatpush3.bf16.msra.mxu0 %v15254_v9  ;;  %9957 = vmatpush3.bf16.msra.mxu1 %v15255_v57  ;;  %v15281_v9 = vld [vmem:[#allocation121_spill] sm:$0xff] }
0x180e   :  { %9936 = vmatprep.subr.bf16.mxu0 %v15256_v34  ;;  %9958 = vmatprep.subr.bf16.mxu1 %v15257_v18  ;;  %v15282_v57 = vld [vmem:[#allocation137_spill] sm:$0xff] }
0x180f   :  { %v15283_v34 = vld [vmem:[#allocation113_spill] sm:$0xff] }
0x1810   :  { %v15284_v18 = vld [vmem:[#allocation129_spill] sm:$0xff] }
0x1811   :  { %9937 = vmatpush3.bf16.msra.mxu0 %v15258_v5  ;;  %9959 = vmatpush3.bf16.msra.mxu1 %v15259_v31  ;;  %v15285_v5 = vld [vmem:[#allocation146_spill] sm:$0xff] }
0x1812   :  { %9938 = vmatprep.subr.bf16.mxu0 %v15260_v39  ;;  %9960 = vmatprep.subr.bf16.mxu1 %v15261_v52  ;;  %v15286_v31 = vld [vmem:[#allocation162_spill] sm:$0xff]  ;;  %v15287_v52 = vld [vmem:[#allocation392_spill] sm:$0xff] }
0x1813   :  { %v14160_v39 = vld [vmem:[%s15272_s0] sm:$0xff] }
0x1814   :  { %v6012_v59 = vrot.slane %v14160_v39, %v13516_v12 }
0x1815   :  { %9939 = vmatpush3.bf16.msra.mxu0 %v15262_v17  ;;  %9961 = vmatpush3.bf16.msra.mxu1 %v15263_v48  ;;  %v5992_v17 = vrot.slane %v14160_v39, %v15287_v52  ;;  %v15288_v48 = vld [vmem:[#allocation393_spill] sm:$0xff] }
0x1816   :  { %9940 = vmatprep.subr.bf16.mxu0 %v15264_v4  ;;  %9962 = vmatprep.subr.bf16.mxu1 %v15265_v3  ;;  %v6000_v4 = vrot.slane %v14160_v39, %v15288_v48  ;;  %v15289_v3 = vld [vmem:[#allocation394_spill] sm:$0xff] }
0x1819   :  { %9941 = vmatpush3.bf16.msra.mxu0 %v15266_v10  ;;  %9963 = vmatpush3.bf16.msra.mxu1 %v15267_v1  ;;  %v5996_v10 = vrot.slane %v14160_v39, %v15289_v3  ;;  %v15290_v1 = vld [vmem:[#allocation395_spill] sm:$0xff] }
0x181a   :  { %9942 = vmatprep.subr.bf16.mxu0 %v15268_v29  ;;  %9964 = vmatprep.subr.bf16.mxu1 %v15269_v54  ;;  %v6004_v29 = vrot.slane %v14160_v39, %v15290_v1 }
0x181d   :  { %9943 = vmatpush3.bf16.msra.mxu0 %v15270_v24  ;;  %9965 = vmatpush3.bf16.msra.mxu1 %v15271_v16 }
0x181e   :  { %9944 = vmatprep.subr.bf16.mxu0 %v15273_v55  ;;  %9966 = vmatprep.subr.bf16.mxu1 %v15274_v7 }
0x1821   :  { %9945 = vmatpush3.bf16.msra.mxu0 %v15275_v56  ;;  %9967 = vmatpush3.bf16.msra.mxu1 %v15276_v49 }
0x1822   :  { %9946 = vmatprep.subr.bf16.mxu0 %v15277_v2  ;;  %9968 = vmatprep.subr.bf16.mxu1 %v15278_v36 }
0x1825   :  { %9947 = vmatpush3.bf16.msra.mxu0 %v15279_v19  ;;  %9969 = vmatpush3.bf16.msra.mxu1 %v15280_v14 }
0x1826   :  { %9948 = vmatprep.subr.bf16.mxu0 %v15281_v9  ;;  %9970 = vmatprep.subr.bf16.mxu1 %v15282_v57 }
0x1829   :  { %9949 = vmatpush3.bf16.msra.mxu0 %v15283_v34  ;;  %9971 = vmatpush3.bf16.msra.mxu1 %v15284_v18 }
0x182a   :  { %9978 = vmatprep.subr.bf16.mxu0 %v15285_v5  ;;  %10000 = vmatprep.subr.bf16.mxu1 %v15286_v31 }
0x18c7   :  { %v6106_v54 = vpop.f32.mrb[108].mxu0  ;;  %v6147_v24 = vpop.f32.mrb[96].mxu1 }
0x18c8   :  { %v6107_v16 = vadd.f32 %v6106_v54, %v5992_v17  ;;  %v6148_v55 = vadd.f32 %v6147_v24, %v6000_v4  ;;  %v6108_v7 = vpop.f32.mrb[109].mxu0  ;;  %v6149_v56 = vpop.f32.mrb[97].mxu1  ;;  %v6020_v17 = vrot.slane %v14160_v39, %v13520_v38 }
0x18c9   :  { %v6109_v49 = vadd.f32 %v6108_v7, %v5996_v10  ;;  %v6150_v2 = vadd.f32 %v6149_v56, %v6004_v29  ;;  %v6110_v36 = vpop.f32.mrb[110].mxu0  ;;  %v6151_v19 = vpop.f32.mrb[98].mxu1 }
0x18ca   :  { %v6400_v14 = vmax.f32 %v6107_v16, 0.0  ;;  %v6402_v9 = vmax.f32 %v6148_v55, 0.0  ;;  %v6111_v57 = vpop.f32.mrb[111].mxu0  ;;  %v6152_v34 = vpop.f32.mrb[99].mxu1  ;;  %v15291_v16 = vld [vmem:[#allocation138_spill] sm:$0xff]  ;;  %v15293_v36 = vld [vmem:[#allocation147_spill] sm:$0xff] }
0x18cb   :  { %v6401_v18 = vmax.f32 %v6109_v49, 0.0  ;;  %v6403_v5 = vmax.f32 %v6150_v2, 0.0  ;;  %v15292_v55 = vld [vmem:[#allocation154_spill] sm:$0xff]  ;;  %v15294_v19 = vld [vmem:[#allocation163_spill] sm:$0xff] }
0x18cc   :  { %v6418_v31 = vpack.c.bf16 %v6402_v9, %v6402_v9  ;;  %v6416_v4 = vpack.c.bf16 %v6400_v14, %v6400_v14  ;;  %v15295_v57 = vld [vmem:[#allocation139_spill] sm:$0xff] }
0x18cd   :  { %v6417_v58 = vpack.c.bf16 %v6401_v18, %v6401_v18  ;;  %v6419_v62 = vpack.c.bf16 %v6403_v5, %v6403_v5  ;;  %v15296_v34 = vld [vmem:[#allocation155_spill] sm:$0xff] }
0x18cf   :  { %6599 = vmatprep.mubr.bf16.mxu0 %v6417_v58  ;;  %6639 = vmatprep.mubr.bf16.mxu1 %v6419_v62  ;;  %v6188_v10 = vpop.f32.mrb[112].mxu0  ;;  %v6229_v29 = vpop.f32.mrb[100].mxu1 }
0x18d0   :  { %6600 = vmatmul.mubr.bf16.vlgmr.msra.gmra.mrb[124].mxu0 %v6416_v4  ;;  %6640 = vmatmul.mubr.bf16.vlgmr.msra.gmra.mrb[112].mxu1 %v6418_v31  ;;  %v6190_v54 = vpop.f32.mrb[113].mxu0  ;;  %v6231_v24 = vpop.f32.mrb[101].mxu1  ;;  %v15297_v31 = vld [vmem:[#allocation148_spill] sm:$0xff] }
0x18d1   :  { %9979 = vmatpush3.bf16.msra.mxu0 %v15291_v16  ;;  %10001 = vmatpush3.bf16.msra.mxu1 %v15292_v55  ;;  %v6191_v7 = vadd.f32 %v6190_v54, %v6012_v59  ;;  %v6192_v56 = vpop.f32.mrb[114].mxu0  ;;  %v6232_v49 = vadd.f32 %v6231_v24, %v6020_v17  ;;  %v6233_v2 = vpop.f32.mrb[102].mxu1  ;;  %v15298_v59 = vld [vmem:[#allocation164_spill] sm:$0xff] }
0x18d2   :  { %9980 = vmatprep.subr.bf16.mxu0 %v15293_v36  ;;  %10002 = vmatprep.subr.bf16.mxu1 %v15294_v19  ;;  %v6193_v58 = vpop.f32.mrb[115].mxu0  ;;  %v6234_v62 = vpop.f32.mrb[103].mxu1  ;;  %v15299_v16 = vld [vmem:[#allocation140_spill] sm:$0xff]  ;;  %v15302_v2 = vld [vmem:[#allocation165_spill] sm:$0xff] }
0x18d3   :  { %v6405_v14 = vmax.f32 %v6191_v7, 0.0  ;;  %v6407_v9 = vmax.f32 %v6232_v49, 0.0  ;;  %v15300_v55 = vld [vmem:[#allocation156_spill] sm:$0xff]  ;;  %v15301_v49 = vld [vmem:[#allocation149_spill] sm:$0xff] }
0x18d4   :  { %v15303_v58 = vld [vmem:[#allocation141_spill] sm:$0xff] }
0x18d5   :  { %9981 = vmatpush3.bf16.msra.mxu0 %v15295_v57  ;;  %10003 = vmatpush3.bf16.msra.mxu1 %v15296_v34  ;;  %v6421_v18 = vpack.c.bf16 %v6405_v14, %v6405_v14  ;;  %v6423_v5 = vpack.c.bf16 %v6407_v9, %v6407_v9  ;;  %v15304_v62 = vld [vmem:[#allocation157_spill] sm:$0xff]  ;;  %v15305_v14 = vld [vmem:[#allocation150_spill] sm:$0xff] }
0x18d6   :  { %9982 = vmatprep.subr.bf16.mxu0 %v15297_v31  ;;  %10004 = vmatprep.subr.bf16.mxu1 %v15298_v59  ;;  %v15306_v9 = vld [vmem:[#allocation166_spill] sm:$0xff] }
0x18d7   :  { %6679 = vmatprep.mubr.bf16.mxu0 %v6421_v18  ;;  %6719 = vmatprep.mubr.bf16.mxu1 %v6423_v5  ;;  %v14182_v17 = vpop.f32.mrb[116].mxu0  ;;  %v14184_v4 = vpop.f32.mrb[104].mxu1  ;;  %v6008_v18 = vrot.slane %v14160_v39, %v13511_v23  ;;  %v6016_v5 = vrot.slane %v14160_v39, %v13513_v13  ;;  %v14203_v31 = vld [vmem:[%s15272_s0 + $0x8] sm:$0xff] }
0x18d8   :  { %v6272_v54 = vpop.f32.mrb[117].mxu0  ;;  %v6313_v24 = vpop.f32.mrb[105].mxu1  ;;  %v6028_v39 = vrot.slane %v14203_v31, %v15289_v3  ;;  %v15316_v3 = vld [vmem:[#allocation160_spill] sm:$0xff] }
0x18d9   :  { %9983 = vmatpush3.bf16.msra.mxu0 %v15299_v16  ;;  %10005 = vmatpush3.bf16.msra.mxu1 %v15300_v55  ;;  %v6274_v7 = vpop.f32.mrb[118].mxu0  ;;  %v6315_v56 = vpop.f32.mrb[106].mxu1  ;;  %v15307_v55 = vld [vmem:[#allocation142_spill] sm:$0xff] }
0x18da   :  { %9984 = vmatprep.subr.bf16.mxu0 %v15301_v49  ;;  %10006 = vmatprep.subr.bf16.mxu1 %v15302_v2  ;;  %v6275_v36 = vpop.f32.mrb[119].mxu0  ;;  %v6316_v19 = vpop.f32.mrb[107].mxu1  ;;  %v15308_v7 = vld [vmem:[#allocation158_spill] sm:$0xff]  ;;  %v15309_v2 = vld [vmem:[#allocation151_spill] sm:$0xff] }
0x18db   :  { %v15310_v36 = vld [vmem:[#allocation167_spill] sm:$0xff] }
0x18dd   :  { %9985 = vmatpush3.bf16.msra.mxu0 %v15303_v58  ;;  %10007 = vmatpush3.bf16.msra.mxu1 %v15304_v62  ;;  %v6036_v62 = vrot.slane %v14203_v31, %v15290_v1 }
0x18de   :  { %9986 = vmatprep.subr.bf16.mxu0 %v15305_v14  ;;  %10008 = vmatprep.subr.bf16.mxu1 %v15306_v9  ;;  %v6189_v14 = vadd.f32 %v6188_v10, %v6008_v18  ;;  %v6230_v9 = vadd.f32 %v6229_v29, %v6016_v5  ;;  %v15318_v10 = vld [vmem:[#allocation169_spill] sm:$0xff] }
0x18df   :  { %v14194_v57 = vpop.f32.mrb[120].mxu0  ;;  %v14196_v34 = vpop.f32.mrb[108].mxu1 }
0x18e0   :  { %v14205_v59 = vpop.f32.mrb[121].mxu0  ;;  %v14207_v16 = vpop.f32.mrb[109].mxu1 }
0x18e1   :  { %9987 = vmatpush3.bf16.msra.mxu0 %v15307_v55  ;;  %10009 = vmatpush3.bf16.msra.mxu1 %v15308_v7  ;;  %v6356_v56 = vpop.f32.mrb[122].mxu0  ;;  %v6397_v49 = vpop.f32.mrb[110].mxu1  ;;  %v15312_v55 = vld [vmem:[#allocation159_spill] sm:$0xff]  ;;  %v15313_v7 = vld [vmem:[#allocation152_spill] sm:$0xff] }
0x18e2   :  { %9988 = vmatprep.subr.bf16.mxu0 %v15309_v2  ;;  %10010 = vmatprep.subr.bf16.mxu1 %v15310_v36  ;;  %v6357_v19 = vpop.f32.mrb[123].mxu0  ;;  %v6398_v58 = vpop.f32.mrb[111].mxu1  ;;  %v15314_v56 = vld [vmem:[#allocation168_spill] sm:$0xff]  ;;  %v6273_v49 = vadd.f32 %v6272_v54, %v6028_v39  ;;  %v6314_v2 = vadd.f32 %v6313_v24, %v6036_v62  ;;  %v6404_v36 = vmax.f32 %v6189_v14, 0.0  ;;  %v15321_v54 = vld [vmem:[#allocation178_spill] sm:$0xff]  ;;  %v15325_v14 = vld [vmem:[#allocation179_spill] sm:$0xff] }
0x18e3   :  { %v6406_v19 = vmax.f32 %v6230_v9, 0.0  ;;  %v15315_v58 = vld [vmem:[#allocation144_spill] sm:$0xff]  ;;  %v15322_v24 = vld [vmem:[#allocation194_spill] sm:$0xff]  ;;  %v15326_v9 = vld [vmem:[#allocation195_spill] sm:$0xff] }
0x18e4   :  { %v6409_v29 = vmax.f32 %v6273_v49, 0.0  ;;  %v6420_v18 = vpack.c.bf16 %v6404_v36, %v6404_v36  ;;  %v15328_v49 = vld [vmem:[#allocation187_spill] sm:$0xff]  ;;  %v15330_v36 = vld [vmem:[#allocation196_spill] sm:$0xff] }
0x18e5   :  { %9989 = vmatpush3.bf16.msra.mxu0 %v15311_v50  ;;  %10011 = vmatpush3.bf16.msra.mxu1 %v15312_v55  ;;  %v6411_v50 = vmax.f32 %v6314_v2, 0.0  ;;  %v6422_v5 = vpack.c.bf16 %v6406_v19, %v6406_v19  ;;  %v15319_v55 = vld [vmem:[#allocation145_spill] sm:$0xff]  ;;  %v15329_v2 = vld [vmem:[#allocation180_spill] sm:$0xff] }
0x18e6   :  { %9990 = vmatprep.subr.bf16.mxu0 %v15313_v7  ;;  %10012 = vmatprep.subr.bf16.mxu1 %v15314_v56  ;;  %v15320_v7 = vld [vmem:[#allocation161_spill] sm:$0xff]  ;;  %v6425_v39 = vpack.c.bf16 %v6409_v29, %v6409_v29  ;;  %v15327_v56 = vld [vmem:[#allocation171_spill] sm:$0xff]  ;;  %v15331_v19 = vld [vmem:[#allocation172_spill] sm:$0xff] }
0x18e7   :  { %v6427_v62 = vpack.c.bf16 %v6411_v50, %v6411_v50  ;;  %v15334_v29 = vld [vmem:[#allocation197_spill] sm:$0xff] }
0x18e8   :  { %v15335_v50 = vld [vmem:[#allocation173_spill] sm:$0xff] }
0x18e9   :  { %9991 = vmatpush3.bf16.msra.mxu0 %v15315_v58  ;;  %10013 = vmatpush3.bf16.msra.mxu1 %v15316_v3  ;;  %v15323_v3 = vld [vmem:[#allocation170_spill] sm:$0xff]  ;;  %v15332_v58 = vld [vmem:[#allocation188_spill] sm:$0xff] }
0x18ea   :  { %9992 = vmatprep.subr.bf16.mxu0 %v15317_v51  ;;  %10014 = vmatprep.subr.bf16.mxu1 %v15318_v10  ;;  %v15324_v51 = vld [vmem:[#allocation186_spill] sm:$0xff]  ;;  %v15333_v10 = vld [vmem:[#allocation181_spill] sm:$0xff] }
0x18ed   :  { %9993 = vmatpush3.bf16.msra.mxu0 %v15319_v55  ;;  %10015 = vmatpush3.bf16.msra.mxu1 %v15320_v7  ;;  %v15338_v55 = vld [vmem:[#allocation198_spill] sm:$0xff]  ;;  %v6024_v7 = vrot.slane %v14203_v31, %v15287_v52 }
0x18ee   :  { %10022 = vmatprep.subr.bf16.mxu0 %v15321_v54  ;;  %10044 = vmatprep.subr.bf16.mxu1 %v15322_v24  ;;  %v6032_v54 = vrot.slane %v14203_v31, %v15288_v48  ;;  %v15339_v24 = vld [vmem:[#allocation174_spill] sm:$0xff] }
0x18f0   :  { %6680 = vmatmul.mubr.bf16.vlgmr.msra.gmra.mrb[128].mxu0 %v6420_v18  ;;  %6720 = vmatmul.mubr.bf16.vlgmr.msra.gmra.mrb[116].mxu1 %v6422_v5  ;;  %v15336_v18 = vld [vmem:[#allocation189_spill] sm:$0xff]  ;;  %v15337_v5 = vld [vmem:[#allocation182_spill] sm:$0xff] }
0x18f1   :  { %10023 = vmatpush3.bf16.msra.mxu0 %v15323_v3  ;;  %10045 = vmatpush3.bf16.msra.mxu1 %v15324_v51  ;;  %v15342_v3 = vld [vmem:[#allocation199_spill] sm:$0xff]  ;;  %v6044_v51 = vrot.slane %v14203_v31, %v13516_v12 }
0x18f2   :  { %10024 = vmatprep.subr.bf16.mxu0 %v15325_v14  ;;  %10046 = vmatprep.subr.bf16.mxu1 %v15326_v9  ;;  %v6052_v14 = vrot.slane %v14203_v31, %v13520_v38  ;;  %v6271_v9 = vadd.f32 %v14182_v17, %v6024_v7  ;;  %v15349_v17 = vld [vmem:[#allocation185_spill] sm:$0xff] }
0x18f3   :  { %6759 = vmatprep.mubr.bf16.mxu0 %v6425_v39  ;;  %6799 = vmatprep.mubr.bf16.mxu1 %v6427_v62  ;;  %v15340_v39 = vld [vmem:[#allocation190_spill] sm:$0xff]  ;;  %v15341_v62 = vld [vmem:[#allocation183_spill] sm:$0xff] }
0x18f5   :  { %10025 = vmatpush3.bf16.msra.mxu0 %v15327_v56  ;;  %10047 = vmatpush3.bf16.msra.mxu1 %v15328_v49  ;;  %v6312_v56 = vadd.f32 %v14184_v4, %v6032_v54  ;;  %v15343_v49 = vld [vmem:[#allocation175_spill] sm:$0xff]  ;;  %v15350_v4 = vld [vmem:[#allocation201_spill] sm:$0xff] }
0x18f6   :  { %10026 = vmatprep.subr.bf16.mxu0 %v15329_v2  ;;  %10048 = vmatprep.subr.bf16.mxu1 %v15330_v36  ;;  %v15344_v2 = vld [vmem:[#allocation191_spill] sm:$0xff]  ;;  %v15345_v36 = vld [vmem:[#allocation184_spill] sm:$0xff] }
0x18f9   :  { %10027 = vmatpush3.bf16.msra.mxu0 %v15331_v19  ;;  %10049 = vmatpush3.bf16.msra.mxu1 %v15332_v58  ;;  %v15346_v19 = vld [vmem:[#allocation200_spill] sm:$0xff]  ;;  %v6355_v58 = vadd.f32 %v14205_v59, %v6044_v51  ;;  %v15353_v59 = vld [vmem:[#allocation210_spill] sm:$0xff] }
0x18fa   :  { %10028 = vmatprep.subr.bf16.mxu0 %v15333_v10  ;;  %10050 = vmatprep.subr.bf16.mxu1 %v15334_v29  ;;  %v6396_v10 = vadd.f32 %v14207_v16, %v6052_v14  ;;  %v6408_v29 = vmax.f32 %v6271_v9, 0.0  ;;  %v15354_v16 = vld [vmem:[#allocation226_spill] sm:$0xff] }
0x18fb   :  { %v15355_v14 = vld [vmem:[#allocation202_spill] sm:$0xff] }
0x18fc   :  { %v6415_v7 = vmax.f32 %v6396_v10, 0.0  ;;  %v6424_v54 = vpack.c.bf16 %v6408_v29, %v6408_v29  ;;  %v15356_v9 = vld [vmem:[#allocation218_spill] sm:$0xff]  ;;  %v15363_v10 = vld [vmem:[#allocation204_spill] sm:$0xff] }
0x18fd   :  { %10029 = vmatpush3.bf16.msra.mxu0 %v15335_v50  ;;  %10051 = vmatpush3.bf16.msra.mxu1 %v15336_v18  ;;  %v6410_v50 = vmax.f32 %v6312_v56, 0.0  ;;  %v15347_v18 = vld [vmem:[#allocation176_spill] sm:$0xff]  ;;  %v15357_v56 = vld [vmem:[#allocation211_spill] sm:$0xff] }
0x18fe   :  { %10030 = vmatprep.subr.bf16.mxu0 %v15337_v5  ;;  %10052 = vmatprep.subr.bf16.mxu1 %v15338_v55  ;;  %v15348_v5 = vld [vmem:[#allocation192_spill] sm:$0xff]  ;;  %v6413_v55 = vmax.f32 %v6355_v58, 0.0  ;;  %v6431_v51 = vpack.c.bf16 %v6415_v7, %v6415_v7  ;;  %v6048_v7 = vrot.slane %v14203_v31, %v13513_v13 }
0x18ff   :  { %v15362_v58 = vld [vmem:[#allocation228_spill] sm:$0xff] }
0x1900   :  { %v15364_v29 = vld [vmem:[#allocation220_spill] sm:$0xff] }
0x1901   :  { %10031 = vmatpush3.bf16.msra.mxu0 %v15339_v24  ;;  %10053 = vmatpush3.bf16.msra.mxu1 %v15340_v39  ;;  %v6426_v24 = vpack.c.bf16 %v6410_v50, %v6410_v50  ;;  %v15351_v39 = vld [vmem:[#allocation177_spill] sm:$0xff] }
0x1902   :  { %10032 = vmatprep.subr.bf16.mxu0 %v15341_v62  ;;  %10054 = vmatprep.subr.bf16.mxu1 %v15342_v3  ;;  %v15352_v62 = vld [vmem:[#allocation193_spill] sm:$0xff]  ;;  %v6429_v3 = vpack.c.bf16 %v6413_v55, %v6413_v55  ;;  %v15370_v55 = vld [vmem:[#allocation230_spill] sm:$0xff] }
0x1903   :  { %v15365_v50 = vld [vmem:[#allocation213_spill] sm:$0xff] }
0x1905   :  { %10033 = vmatpush3.bf16.msra.mxu0 %v15343_v49  ;;  %10055 = vmatpush3.bf16.msra.mxu1 %v15344_v2  ;;  %v15358_v49 = vld [vmem:[#allocation227_spill] sm:$0xff] }
0x1906   :  { %10034 = vmatprep.subr.bf16.mxu0 %v15345_v36  ;;  %10056 = vmatprep.subr.bf16.mxu1 %v15346_v19  ;;  %v15359_v2 = vld [vmem:[#allocation203_spill] sm:$0xff]  ;;  %v15361_v19 = vld [vmem:[#allocation212_spill] sm:$0xff] }
0x1907   :  { %v15360_v36 = vld [vmem:[#allocation219_spill] sm:$0xff] }
0x1909   :  { %10035 = vmatpush3.bf16.msra.mxu0 %v15347_v18  ;;  %10057 = vmatpush3.bf16.msra.mxu1 %v15348_v5  ;;  %v15366_v18 = vld [vmem:[#allocation229_spill] sm:$0xff] }
0x190a   :  { %10036 = vmatprep.subr.bf16.mxu0 %v15349_v17  ;;  %10058 = vmatprep.subr.bf16.mxu1 %v15350_v4  ;;  %v15367_v5 = vld [vmem:[#allocation205_spill] sm:$0xff]  ;;  %v15369_v4 = vld [vmem:[#allocation214_spill] sm:$0xff] }
0x190b   :  { %v15368_v17 = vld [vmem:[#allocation221_spill] sm:$0xff] }
0x190d   :  { %10037 = vmatpush3.bf16.msra.mxu0 %v15351_v39  ;;  %10059 = vmatpush3.bf16.msra.mxu1 %v15352_v62  ;;  %v6040_v39 = vrot.slane %v14203_v31, %v13511_v23  ;;  %v15373_v62 = vld [vmem:[#allocation215_spill] sm:$0xff]  ;;  %v15380_v31 = vld [vmem:[#allocation224_spill] sm:$0xff] }
0x190e   :  { %10066 = vmatprep.subr.bf16.mxu0 %v15353_v59  ;;  %10088 = vmatprep.subr.bf16.mxu1 %v15354_v16  ;;  %v15374_v59 = vld [vmem:[#allocation231_spill] sm:$0xff]  ;;  %v6394_v16 = vadd.f32 %v14196_v34, %v6048_v7  ;;  %v15383_v34 = vld [vmem:[#allocation233_spill] sm:$0xff] }
0x1910   :  { %6760 = vmatmul.mubr.bf16.vlgmr.msra.gmra.mrb[132].mxu0 %v6424_v54  ;;  %6800 = vmatmul.mubr.bf16.vlgmr.msra.gmra.mrb[120].mxu1 %v6426_v24  ;;  %v15371_v54 = vld [vmem:[#allocation206_spill] sm:$0xff] }
0x1911   :  { %10067 = vmatpush3.bf16.msra.mxu0 %v15355_v14  ;;  %10089 = vmatpush3.bf16.msra.mxu1 %v15356_v9  ;;  %v15372_v24 = vld [vmem:[#allocation222_spill] sm:$0xff]  ;;  %v6353_v14 = vadd.f32 %v14194_v57, %v6040_v39  ;;  %v15377_v9 = vld [vmem:[#allocation216_spill] sm:$0xff] }
0x1912   :  { %10068 = vmatprep.subr.bf16.mxu0 %v15357_v56  ;;  %10090 = vmatprep.subr.bf16.mxu1 %v15358_v49  ;;  %v15378_v56 = vld [vmem:[#allocation232_spill] sm:$0xff]  ;;  %v6414_v49 = vmax.f32 %v6394_v16, 0.0 }
0x1913   :  { %6839 = vmatprep.mubr.bf16.mxu0 %v6429_v3  ;;  %6879 = vmatprep.mubr.bf16.mxu1 %v6431_v51  ;;  %v15375_v3 = vld [vmem:[#allocation207_spill] sm:$0xff] }
0x1914   :  { %v15376_v51 = vld [vmem:[#allocation223_spill] sm:$0xff] }
0x1915   :  { %10069 = vmatpush3.bf16.msra.mxu0 %v15359_v2  ;;  %10091 = vmatpush3.bf16.msra.mxu1 %v15360_v36  ;;  %v15379_v2 = vld [vmem:[#allocation208_spill] sm:$0xff]  ;;  %v6412_v36 = vmax.f32 %v6353_v14, 0.0 }
0x1916   :  { %10070 = vmatprep.subr.bf16.mxu0 %v15361_v19  ;;  %10092 = vmatprep.subr.bf16.mxu1 %v15362_v58  ;;  %v15382_v19 = vld [vmem:[#allocation217_spill] sm:$0xff]  ;;  %v6430_v58 = vpack.c.bf16 %v6414_v49, %v6414_v49 }
0x1917   :  { %v6428_v57 = vpack.c.bf16 %v6412_v36, %v6412_v36 }
0x1919   :  { %10071 = vmatpush3.bf16.msra.mxu0 %v15363_v10  ;;  %10093 = vmatpush3.bf16.msra.mxu1 %v15364_v29  ;;  %v15384_v10 = vld [vmem:[#allocation209_spill] sm:$0xff] }
0x191a   :  { %10072 = vmatprep.subr.bf16.mxu0 %v15365_v50  ;;  %10094 = vmatprep.subr.bf16.mxu1 %v15366_v18  ;;  %v15385_v29 = vld [vmem:[#allocation225_spill] sm:$0xff] }
0x191d   :  { %10073 = vmatpush3.bf16.msra.mxu0 %v15367_v5  ;;  %10095 = vmatpush3.bf16.msra.mxu1 %v15368_v17  ;;  %v9538_v5 = vld [vmem:[%s15381_s21] ss:$0 sm:$0xff] }
0x191e   :  { %10074 = vmatprep.subr.bf16.mxu0 %v15369_v4  ;;  %10096 = vmatprep.subr.bf16.mxu1 %v15370_v55 }
0x1921   :  { %10075 = vmatpush3.bf16.msra.mxu0 %v15371_v54  ;;  %10097 = vmatpush3.bf16.msra.mxu1 %v15372_v24 }
0x1922   :  { %10076 = vmatprep.subr.bf16.mxu0 %v15373_v62  ;;  %10098 = vmatprep.subr.bf16.mxu1 %v15374_v59 }
0x1925   :  { %10077 = vmatpush3.bf16.msra.mxu0 %v15375_v3  ;;  %10099 = vmatpush3.bf16.msra.mxu1 %v15376_v51 }
0x1926   :  { %10078 = vmatprep.subr.bf16.mxu0 %v15377_v9  ;;  %10100 = vmatprep.subr.bf16.mxu1 %v15378_v56 }
0x1929   :  { %10079 = vmatpush3.bf16.msra.mxu0 %v15379_v2  ;;  %10101 = vmatpush3.bf16.msra.mxu1 %v15380_v31 }
0x192a   :  { %10080 = vmatprep.subr.bf16.mxu0 %v15382_v19  ;;  %10102 = vmatprep.subr.bf16.mxu1 %v15383_v34 }
0x192d   :  { %10081 = vmatpush3.bf16.msra.mxu0 %v15384_v10  ;;  %10103 = vmatpush3.bf16.msra.mxu1 %v15385_v29 }
0x192e   :  { %10590 = vmatprep.subr.bf16.mxu0 %v15242_v40  ;;  %10598 = vmatprep.subr.bf16.mxu1 %v15242_v40 }
0x1930   :  { %6840 = vmatmul.mubr.bf16.vlgmr.msra.gmra.mrb[136].mxu0 %v6428_v57  ;;  %6880 = vmatmul.mubr.bf16.vlgmr.msra.gmra.mrb[124].mxu1 %v6430_v58 }
0x1931   :  { %10594 = vmatprep.mubr.msk.bf16.mxu0 %vm11659_vm3, %v15242_v40  ;;  %10602 = vmatprep.mubr.msk.bf16.mxu1 %vm11659_vm3, %v15242_v40 }
0x19a3   :  { %v9950_v50 = vpop.f32.mrb[124].mxu0  ;;  %v9972_v18 = vpop.f32.mrb[112].mxu1 }
0x19a4   :  { %v9951_v17 = vpop.f32.mrb[125].mxu0  ;;  %v9973_v4 = vpop.f32.mrb[113].mxu1 }
0x19a5   :  { %v9952_v55 = vadd.f32 %v9951_v17, %v9950_v50  ;;  %v9974_v7 = vadd.f32 %v9973_v4, %v9972_v18  ;;  %v9953_v54 = vpop.f32.mrb[126].mxu0  ;;  %v9975_v24 = vpop.f32.mrb[114].mxu1 }
0x19a6   :  { %v9954_v39 = vpop.f32.mrb[127].mxu0  ;;  %v9976_v62 = vpop.f32.mrb[115].mxu1 }
0x19a7   :  { %v6602_v59 = vadd.f32 %v9952_v55, %v9538_v5 }
0x19a9   :  { %v6642_v16 = vadd.f32 %v9974_v7, %v6602_v59 }
0x19c3   :  { %v9994_v3 = vpop.f32.mrb[128].mxu0  ;;  %v10016_v51 = vpop.f32.mrb[116].mxu1 }
0x19c4   :  { %v9995_v14 = vpop.f32.mrb[129].mxu0  ;;  %v10017_v9 = vpop.f32.mrb[117].mxu1 }
0x19c5   :  { %v9996_v56 = vadd.f32 %v9995_v14, %v9994_v3  ;;  %v10018_v49 = vadd.f32 %v10017_v9, %v10016_v51  ;;  %v9997_v2 = vpop.f32.mrb[130].mxu0  ;;  %v10019_v31 = vpop.f32.mrb[118].mxu1 }
0x19c6   :  { %v9998_v36 = vpop.f32.mrb[131].mxu0  ;;  %v10020_v19 = vpop.f32.mrb[119].mxu1 }
0x19c7   :  { %v6682_v34 = vadd.f32 %v9996_v56, %v6642_v16 }
0x19c9   :  { %v6722_v58 = vadd.f32 %v10018_v49, %v6682_v34 }
0x19e3   :  { %v10038_v10 = vpop.f32.mrb[132].mxu0  ;;  %v10060_v29 = vpop.f32.mrb[120].mxu1 }
0x19e4   :  { %v10039_v57 = vpop.f32.mrb[133].mxu0  ;;  %v10061_v50 = vpop.f32.mrb[121].mxu1 }
0x19e5   :  { %v10040_v18 = vadd.f32 %v10039_v57, %v10038_v10  ;;  %v10062_v17 = vadd.f32 %v10061_v50, %v10060_v29  ;;  %v10041_v5 = vpop.f32.mrb[134].mxu0  ;;  %v10063_v4 = vpop.f32.mrb[122].mxu1  ;;  %v11135_v50 = vld [vmem:[%s15386_s30] sm:$0xff]  }
0x19e6   :  { %v10042_v55 = vpop.f32.mrb[135].mxu0  ;;  %v10064_v7 = vpop.f32.mrb[123].mxu1  ;;  %10591 = vmatpush3.bf16.msra.mxu0 %v11135_v50 }
0x19e7   :  { %v6762_v54 = vadd.f32 %v10040_v18, %v6722_v58  ;;  %v11136_v18 = vld [vmem:[%s15386_s30 + $0x8] sm:$0xff]   ;;  %10592 = vmatprep.subr.bf16.mxu0 %v15242_v40  ;;  %v9539_v55 = vld [vmem:[%s15387_s4] ss:$0 sm:$0xff] }
0x19e9   :  { %v6802_v24 = vadd.f32 %v10062_v17, %v6762_v54  ;;  %v9540_v54 = vld [vmem:[%s15388_s11] ss:$0 sm:$0xff] }
0x19ea   :  { %10593 = vmatpush3.bf16.msra.mxu0 %v11136_v18 }
0x19eb   :  { %10606 = vmatprep.subr.bf16.mxu0 %v15242_v40 }
0x1a03   :  { %v10082_v39 = vpop.f32.mrb[136].mxu0  ;;  %v10104_v62 = vpop.f32.mrb[124].mxu1 }
0x1a04   :  { %v10083_v59 = vpop.f32.mrb[137].mxu0  ;;  %v10105_v3 = vpop.f32.mrb[125].mxu1 }
0x1a05   :  { %v10084_v51 = vadd.f32 %v10083_v59, %v10082_v39  ;;  %v10106_v14 = vadd.f32 %v10105_v3, %v10104_v62  ;;  %v10085_v16 = vpop.f32.mrb[138].mxu0  ;;  %v10107_v9 = vpop.f32.mrb[126].mxu1  ;;  %v9541_v59 = vld [vmem:[#allocation16] ss:$0 sm:$0xff] }
0x1a06   :  { %v10086_v56 = vpop.f32.mrb[139].mxu0  ;;  %v10108_v49 = vpop.f32.mrb[127].mxu1 }
0x1a07   :  { %v6842_v2 = vadd.f32 %v10084_v51, %v6802_v24 }
0x1a09   :  { %v6882_v31 = vadd.f32 %v10106_v14, %v6842_v2 }
0x1a0b   :  { %v6887_v36 = vadd.f32 %v6882_v31, %v14095_v41 }
0x1a0d   :  { %v6888_v19 = vsel %vm1769_vm0, %v6887_v36, 0.0 }
0x1a0e   :  { %6889 = vadd.xlane.f32.xlu0 %v6888_v19 }
0x1a9b   :  { %v6890_v34 = vpop.xlane.xlu0 %6889 }
0x1a9c   :  { %v6891_v58 = vmul.f32 0.03125, %v6890_v34 }
0x1a9e   :  { %v6892_v10 = vsub.f32 %v6887_v36, %v6891_v58 }
0x1aa0   :  { %v6893_v29 = vmul.f32 %v6892_v10, %v6892_v10 }
0x1aa2   :  { %v6894_v57 = vsel %vm1769_vm0, %v6893_v29, 0.0 }
0x1aa3   :  { %6895 = vadd.xlane.f32.xlu0 %v6894_v57 }
0x1b30   :  { %v6896_v41 = vpop.xlane.xlu0 %6895 }
0x1b31   :  { %v6897_v17 = vmul.f32 0.03125, %v6896_v41 }
0x1b33   :  { %v6898_v5 = vadd.f32 1e-05, %v6897_v17 }
0x1b35   :  { %11145 = vrsqrt.f32 %v6898_v5 }
0x1b3f   :  { %v11146_v4 = vpop.eup %11145 }
0x1b40   :  { %v6900_v7 = vmul.f32 %v11146_v4, %v6892_v10 }
0x1b42   :  { %v6908_v24 = vmul.f32 %v9539_v55, %v6900_v7 }
0x1b44   :  { %v14325_v39 = vadd.f32 %v9540_v54, %v6908_v24 }
0x1b46   :  { %v6917_v62 = vpack.c.bf16 %v14325_v39, %v14325_v39 }
0x1b48   :  { %10595 = vmatmul.mubr.msk.bf16.vlgmr.msra.gmra.mrb[140].mxu0 %vm1769_vm0, %v6917_v62 }
0x1b49   :  { %10610 = vmatprep.mubr.msk.bf16.mxu0 %vm11659_vm3, %v15242_v40 }
0x1c1b   :  { %v6978_v3 = vpop.f32.mrb[140].mxu0 }
0x1c1c   :  { %v6979_v51 = vadd.f32 %v9541_v59, %v6978_v3  ;;  %v10596_v14 = vpop.f32.mrb[141].mxu0 }
0x1c1d   :  { %v6981_v16 = vpop.f32.mrb[142].mxu0 }
0x1c1e   :  { %v10597_v9 = vpop.f32.mrb[143].mxu0  ;;  %v6985_v56 = vmul.f32 %v6979_v51, %v13801_v11  ;;  %v6986_v49 = vmul.f32 %v6979_v51, %v13816_v20  ;;  %v6987_v31 = vmul.f32 %v6979_v51, %v13805_v28  ;;  %v6988_v36 = vmul.f32 %v6979_v51, %v13812_v26 }
0x1c1f   :  { %v6991_v34 = vmul.f32 %v6979_v51, %v13834_v47  ;;  %v6992_v58 = vmul.f32 %v6979_v51, %v13836_v27  ;;  %v6984_v47 = vpack.c.bf16 %v6979_v51, %v6979_v51  ;;  %v6993_v5 = vmul.f32 %v6979_v51, %v13842_v30  ;;  %v11137_v30 = vld [vmem:[%s15389_s14] sm:$0xff]  }
0x1c20   :  { %v6989_v2 = vpack.c.bf16 %v6986_v49, %v6985_v56  ;;  %v6990_v19 = vpack.c.bf16 %v6988_v36, %v6987_v31  ;;  %v6994_v4 = vmul.f32 %v6979_v51, %v13845_v0  ;;  %v11138_v49 = vld [vmem:[%s15389_s14 + $0x8] sm:$0xff]  }
0x1c21   :  { %v6995_v10 = vpack.c.bf16 %v6992_v58, %v6991_v34  ;;  %v9553_v34 = vld [vmem:[#allocation14] ss:$0 sm:$0xff] }
0x1c22   :  { %6999 = vrot.lane.b32.xlu1 %v6989_v2, %s11655_s5  ;;  %v6996_v55 = vpack.c.bf16 %v6994_v4, %v6993_v5 }
0x1c26   :  { %7001 = vrot.lane.b32.xlu1 %v6990_v19, %s11655_s5 }
0x1c2a   :  { %7061 = vrot.lane.b32.xlu1 %v6995_v10, %s11656_s29 }
0x1c94   :  { %v7000_v11 = vpop.permute.xlu1 %6999 }
0x1c95   :  { %v7007_v20 = vsel %vm1769_vm0, %v7000_v11, 0 }
0x1c96   :  { %10599 = vmatpush3.bf16.xpose.msra.mxu1 %v7007_v20 }
0x1c97   :  { %10600 = vmatprep.subr.bf16.mxu1 %v15242_v40 }
0x1c98   :  { %v7002_v28 = vpop.permute.xlu1 %7001 }
0x1c99   :  { %v7010_v29 = vsel %vm1769_vm0, %v7002_v28, 0 }
0x1c9c   :  { %v7062_v26 = vpop.permute.xlu1 %7061 }
0x1c9d   :  { %10607 = vmatpush3.bf16.msra.mxu0 %v7062_v26 }
0x1c9e   :  { %10601 = vmatpush3.bf16.xpose.msra.mxu1 %v7010_v29  ;;  %10608 = vmatprep.subr.bf16.mxu0 %v15242_v40 }
0x1c9f   :  { %10779 = vmatprep.subr.bf16.mxu1 %v15244_v63 }
0x1ca5   :  { %10603 = vmatmul.mubr.msk.bf16.vlgmr.msra.gmra.mrb[128].mxu1 %vm1769_vm0, %v6984_v47 }
0x1ca6   :  { %10782 = vmatpush3.bf16.xpose.msk.msra.mxu1 %vm13287_vm2, %v13283_v22  ;;  %10630 = vmatprep.mubr.msk.f32.mxu1 %vm11659_vm3, %v15242_v40 }
0x1ca7   :  { %10783 = vmatprep.subr.bf16.mxu1 %v15244_v63 }
0x1cae   :  { %10786 = vmatpush3.bf16.xpose.msk.msra.mxu1 %vm13287_vm2, %v13299_v33 }
0x1d78   :  { %v7046_v27 = vpop.f32.mrb[128].mxu1 }
0x1d79   :  { %v7047_v57 = vadd.f32 %v7046_v27, %v13858_v21  ;;  %v10604_v50 = vpop.f32.mrb[129].mxu1 }
0x1d7a   :  { %v7049_v18 = vpop.f32.mrb[130].mxu1 }
0x1d7b   :  { %v10605_v41 = vpop.f32.mrb[131].mxu1  ;;  %v7052_v17 = vsel %vm1769_vm0, %v7047_v57, -inf }
0x1d7c   :  { %7053 = vmax.xlane.f32.xlu0 %v7052_v17  ;;  %v11141_v41 = vld [vmem:[%s15391_s16] sm:$0xff]   ;;  %v11142_v17 = vld [vmem:[%s15391_s16 + $0x8] sm:$0xff]  }
0x1d92   :  { %7063 = vrot.lane.b32.xlu0 %v6996_v55, %s11656_s29  ;;  %s15390_s29 = sld [smem:[#allocation91_spill]] }
0x1d98   :  { %v11139_v29 = vld [vmem:[%s15390_s29] sm:$0xff]   ;;  %v11140_v47 = vld [vmem:[%s15390_s29 + $0x8] sm:$0xff]  }
0x1d99   :  { %10649 = vmatprep.subr.bf16.mxu1 %v11139_v29 }
0x1e09   :  { %v7054_v7 = vpop.xlane.xlu0 %7053 }
0x1e0a   :  { %v7055_v54 = vsub.f32 %v7047_v57, %v7054_v7 }
0x1e0c   :  { %v7056_v24 = vmul.f32 1.442695, %v7055_v54 }
0x1e0d   :  { %v7064_v62 = vpop.permute.xlu0 %7063 }
0x1e0e   :  { %11147 = vpow2.f32 %v7056_v24  ;;  %10609 = vmatpush3.bf16.msra.mxu0 %v7064_v62 }
0x1e0f   :  { %10614 = vmatprep.subr.bf16.mxu0 %v15242_v40 }
0x1e18   :  { %v11148_v21 = vpop.eup %11147 }
0x1e19   :  { %v7058_v59 = vpack.c.bf16 %v11148_v21, %v11148_v21  ;;  %v15393_v21 = vld [vmem:[#allocation363_spill] sm:$0xff] }
0x1e1b   :  { %10611 = vmatmul.mubr.msk.bf16.vlgmr.msra.gmra.mrb[144].mxu0 %vm1769_vm0, %v7058_v59 }
0x1e1c   :  { %10615 = vmatpush3.bf16.msra.mxu0 %v13873_v25  ;;  %10618 = vmatprep.mubr.msk.bf16.mxu0 %vm11659_vm3, %v15242_v40 }
0x1e1d   :  { %10616 = vmatprep.subr.bf16.mxu0 %v15242_v40 }
0x1e20   :  { %10617 = vmatpush3.bf16.msra.mxu0 %v13878_v8 }
0x1e21   :  { %10633 = vmatprep.subr.bf16.mxu0 %v15242_v40 }
0x1e23   :  { %10619 = vmatmul.mubr.msk.bf16.vlgmr.msra.gmra.mrb[148].mxu0 %vm1769_vm0, %v7058_v59 }
0x1e24   :  { %10637 = vmatprep.mubr.msk.bf16.mxu0 %vm11659_vm3, %v15242_v40  ;;  %10634 = vmatpush3.bf16.msra.mxu0 %v11137_v30  ;;  %v15394_v30 = vld [vmem:[#allocation368_spill] sm:$0xff] }
0x1e25   :  { %10635 = vmatprep.subr.bf16.mxu0 %v15242_v40 }
0x1e28   :  { %10636 = vmatpush3.bf16.msra.mxu0 %v11138_v49 }
0x1e29   :  { %10641 = vmatprep.subr.bf16.mxu0 %v15242_v40 }
0x1eee   :  { %v7104_v0 = vpop.f32.mrb[144].mxu0 }
0x1eef   :  { %v10612_v25 = vpop.f32.mrb[145].mxu0 }
0x1ef0   :  { %v7107_v3 = vpop.f32.mrb[146].mxu0 }
0x1ef1   :  { %v10613_v51 = vpop.f32.mrb[147].mxu0 }
0x1ef6   :  { %v7144_v14 = vpop.f32.mrb[148].mxu0 }
0x1ef7   :  { %11149 = vrcp.f32 %v7144_v14  ;;  %v10620_v16 = vpop.f32.mrb[149].mxu0  ;;  %v15395_v14 = vld [vmem:[#allocation365_spill] sm:$0xff] }
0x1ef8   :  { %v7147_v8 = vpop.f32.mrb[150].mxu0 }
0x1ef9   :  { %v10621_v9 = vpop.f32.mrb[151].mxu0  ;;  %v15396_v8 = vld [vmem:[#allocation369_spill] sm:$0xff] }
0x1f01   :  { %v11150_v56 = vpop.eup %11149 }
0x1f02   :  { %10631 = vmatmul.mubr.msk.f32.vlgmr.msra.gmra.mrb[94].mxu1 %vm2294_vm1, %v11150_v56 }
0x1f03   :  { %10653 = vmatprep.mubr.msk.bf16.mxu1 %vm1769_vm0, %v13932_v15  ;;  %10650 = vmatpush3.bf16.msra.mxu1 %v11139_v29 }
0x1f04   :  { %10651 = vmatprep.subr.bf16.mxu1 %v11140_v47 }
0x1f07   :  { %10652 = vmatpush3.bf16.msra.mxu1 %v11140_v47  ;;  %v15400_v47 = vld [vmem:[#allocation383_spill] sm:$0xff] }
0x1f08   :  { %10677 = vmatprep.subr.bf16.mxu1 %v15242_v40 }
0x1f0a   :  { %10654 = vmatmul.mubr.msk.bf16.vlgmr.msra.gmra.mrb[132].mxu1 %vm1769_vm0, %v13936_v46  ;;  %v9563_v46 = vld [vmem:[%s15392_s6] ss:$0 sm:$0xff] }
0x1f0b   :  { %10693 = vmatprep.mubr.msk.bf16.mxu1 %vm11659_vm3, %v15242_v40 }
0x1fd5   :  { %v7220_v2 = vpop.f32.mrb[94].mxu1 }
0x1fd6   :  { %v7224_v31 = vmul.f32 %v7220_v2, %v7104_v0  ;;  %v10632_v36 = vpop.f32.mrb[95].mxu1 }
0x1fd8   :  { %v7225_v19 = vpack.c.bf16 %v7224_v31, %v7224_v31 }
0x1fda   :  { %10638 = vmatmul.mubr.msk.bf16.vlgmr.msra.gmra.mrb[152].mxu0 %vm1769_vm0, %v7225_v19 }
0x1fdb   :  { %10645 = vmatprep.mubr.msk.bf16.mxu0 %vm11659_vm3, %v15242_v40  ;;  %10642 = vmatpush3.bf16.msra.mxu0 %v11141_v41 }
0x1fdc   :  { %10643 = vmatprep.subr.bf16.mxu0 %v15242_v40 }
0x1fdd   :  { %v10655_v5 = vpop.f32.mrb[132].mxu1 }
0x1fde   :  { %v7455_v4 = vadd.f32 %v10655_v5, %v9563_v46  ;;  %v7446_v55 = vpop.f32.mrb[133].mxu1 }
0x1fdf   :  { %10644 = vmatpush3.bf16.msra.mxu0 %v11142_v17  ;;  %v14401_v7 = vadd.f32 %v9563_v46, %v7446_v55  ;;  %v10656_v54 = vpop.f32.mrb[134].mxu1 }
0x1fe0   :  { %10657 = vmatprep.subr.bf16.mxu0 %v15242_v40  ;;  %v7458_v24 = vadd.f32 %v10656_v54, %v9563_v46  ;;  %v7449_v62 = vpop.f32.mrb[135].mxu1  ;;  %v7464_v59 = vmul.f32 %v7455_v4, %v15393_v21  ;;  %v14405_v0 = vmul.f32 %v7455_v4, %v15394_v30  ;;  %v7488_v25 = vmul.f32 %v7455_v4, %v13079_v53 }
0x1fe1   :  { %v14408_v3 = vadd.f32 %v9563_v46, %v7449_v62  ;;  %v7486_v51 = vmul.f32 %v14401_v7, %v13081_v37  ;;  %v7492_v36 = vmul.f32 %v7455_v4, %v13093_v44  ;;  %v7494_v44 = vmul.f32 %v14401_v7, %v13097_v35  ;;  %v15406_v46 = vld [vmem:[#allocation381_spill] sm:$0xff]  ;;  %v15407_v62 = vld [vmem:[#allocation362_spill] sm:$0xff] }
0x1fe2   :  { %v7465_v16 = vmul.f32 %v7458_v24, %v15395_v14  ;;  %v14414_v9 = vmul.f32 %v7458_v24, %v15396_v8  ;;  %v7489_v56 = vmul.f32 %v7458_v24, %v13083_v61  ;;  %v7493_v37 = vmul.f32 %v7458_v24, %v13091_v60  ;;  %v15399_v60 = vld [vmem:[#allocation380_spill] sm:$0xff]  ;;  %v9558_v14 = vld [vmem:[%s15405_s9] ss:$0 sm:$0xff] }
0x1fe3   :  { %v7487_v49 = vmul.f32 %v14408_v3, %v13085_v45  ;;  %v7496_v45 = vmul.f32 %v7455_v4, %v13103_v42  ;;  %v15402_v42 = vld [vmem:[#allocation377_spill] sm:$0xff]  ;;  %v7499_v5 = vmul.f32 %v14408_v3, %v15406_v46  ;;  %v7462_v21 = vmul.f32 %v14401_v7, %v15407_v62  ;;  %v15417_v62 = vld [vmem:[#allocation379_spill] sm:$0xff] }
0x1fe4   :  { %v7479_v2 = vpack.c.bf16 %v7465_v16, %v7464_v59  ;;  %v7481_v31 = vpack.c.bf16 %v14414_v9, %v14405_v0  ;;  %v7503_v53 = vpack.c.bf16 %v7489_v56, %v7488_v25  ;;  %v15408_v59 = vld [vmem:[#allocation364_spill] sm:$0xff]  ;;  %v9557_v25 = vld [vmem:[%s15403_s19] ss:$0 sm:$0xff] }
0x1fe5   :  { %v7502_v19 = vpack.c.bf16 %v7487_v49, %v7486_v51  ;;  %v7463_v30 = vmul.f32 %v14408_v3, %v15408_v59 }
0x1fe7   :  { %v7478_v8 = vpack.c.bf16 %v7463_v30, %v7462_v21  ;;  %v7490_v21 = vmul.f32 %v14401_v7, %v15417_v62 }
0x1fe9   :  { %v7514_v49 = vsel %vm1769_vm0, %v7478_v8, 0 }
0x20ad   :  { %v7286_v58 = vpop.f32.mrb[152].mxu0 }
0x20ae   :  { %v7287_v10 = vadd.f32 %v9553_v34, %v7286_v58  ;;  %v10639_v11 = vpop.f32.mrb[153].mxu0  ;;  %v15397_v34 = vld [vmem:[#allocation372_spill] sm:$0xff] }
0x20af   :  { %v7289_v15 = vpop.f32.mrb[154].mxu0  ;;  %v14424_v58 = vmul.f32 %v7455_v4, %v15397_v34  ;;  %v7505_v11 = vpack.c.bf16 %v7493_v37, %v7492_v36 }
0x20b0   :  { %v10640_v20 = vpop.f32.mrb[155].mxu0  ;;  %v7292_v28 = vadd.f32 %v7287_v10, %v14325_v39  ;;  %v15398_v10 = vld [vmem:[#allocation373_spill] sm:$0xff] }
0x20b1   :  { %v7473_v61 = vmul.f32 %v7458_v24, %v15398_v10  ;;  %v7497_v20 = vmul.f32 %v7458_v24, %v13099_v43  ;;  %v15404_v43 = vld [vmem:[#allocation382_spill] sm:$0xff]  ;;  %v7523_v10 = vsel %vm1769_vm0, %v7481_v31, 0 }
0x20b2   :  { %v7293_v26 = vsel %vm1769_vm0, %v7292_v28, 0.0  ;;  %v7498_v35 = vmul.f32 %v14401_v7, %v15404_v43 }
0x20b3   :  { %7294 = vadd.xlane.f32.xlu1 %v7293_v26  ;;  %v7483_v15 = vpack.c.bf16 %v7473_v61, %v14424_v58  ;;  %v7495_v26 = vmul.f32 %v14408_v3, %v15399_v60  ;;  %v7507_v29 = vpack.c.bf16 %v7497_v20, %v7496_v45  ;;  %v15411_v61 = vld [vmem:[#allocation370_spill] sm:$0xff] }
0x20b4   :  { %v15413_v60 = vld [vmem:[#allocation374_spill] sm:$0xff] }
0x20b5   :  { %v7474_v31 = vmul.f32 %v14401_v7, %v15413_v60 }
0x20c4   :  { %7591 = vrot.lane.b32.xlu1 %v7502_v19, %s11655_s5  ;;  %v15410_v19 = vld [vmem:[#allocation367_spill] sm:$0xff] }
0x20c5   :  { %v7467_v37 = vmul.f32 %v14408_v3, %v15410_v19  ;;  %v15425_v19 = vld [vmem:[#allocation389_spill] sm:$0xff] }
0x20c8   :  { %7593 = vrot.lane.b32.xlu1 %v7503_v53, %s11655_s5  ;;  %v15409_v53 = vld [vmem:[#allocation366_spill] sm:$0xff] }
0x20c9   :  { %v7466_v36 = vmul.f32 %v14401_v7, %v15409_v53  ;;  %v15423_v53 = vld [vmem:[#allocation387_spill] sm:$0xff] }
0x20cb   :  { %v7480_v34 = vpack.c.bf16 %v7467_v37, %v7466_v36  ;;  %v15424_v36 = vld [vmem:[#allocation388_spill] sm:$0xff]  ;;  %v15426_v37 = vld [vmem:[#allocation390_spill] sm:$0xff] }
0x20cc   :  { %7597 = vrot.lane.b32.xlu1 %v7505_v11, %s11655_s5  ;;  %v15412_v11 = vld [vmem:[#allocation371_spill] sm:$0xff] }
0x20cd   :  { %v7520_v58 = vsel %vm1769_vm0, %v7480_v34, 0  ;;  %v7471_v45 = vmul.f32 %v14408_v3, %v15412_v11  ;;  %v15427_v34 = vld [vmem:[#allocation391_spill] sm:$0xff] }
0x2140   :  { %v7295_v39 = vpop.xlane.xlu1 %7294 }
0x2141   :  { %v7296_v27 = vmul.f32 0.03125, %v7295_v39  ;;  %v7501_v39 = vmul.f32 %v7458_v24, %v15400_v47 }
0x2143   :  { %v14391_v57 = vsub.f32 %v7292_v28, %v7296_v27  ;;  %v7500_v28 = vmul.f32 %v7455_v4, %v13145_v6  ;;  %v15401_v27 = vld [vmem:[#allocation376_spill] sm:$0xff]  ;;  %v7506_v6 = vpack.c.bf16 %v7495_v26, %v7494_v44  ;;  %v7529_v44 = vsel %vm1769_vm0, %v7483_v15, 0  ;;  %v15414_v26 = vld [vmem:[#allocation375_spill] sm:$0xff] }
0x2144   :  { %v7592_v15 = vpop.permute.xlu1 %7591 }
0x2145   :  { %v7298_v50 = vmul.f32 %v14391_v57, %v14391_v57  ;;  %v7509_v41 = vpack.c.bf16 %v7501_v39, %v7500_v28  ;;  %7599 = vrot.lane.b32.xlu1 %v7506_v6, %s11655_s5  ;;  %10678 = vmatpush3.bf16.msra.mxu1 %v7592_v15 }
0x2146   :  { %10679 = vmatprep.subr.bf16.mxu1 %v15242_v40 }
0x2147   :  { %v7299_v18 = vsel %vm1769_vm0, %v7298_v50, 0.0  ;;  %v7476_v50 = vmul.f32 %v7455_v4, %v15401_v27  ;;  %v7508_v4 = vpack.c.bf16 %v7499_v5, %v7498_v35  ;;  %v15416_v5 = vld [vmem:[#allocation396_spill] sm:$0xff] }
0x2148   :  { %7300 = vadd.xlane.f32.xlu0 %v7299_v18  ;;  %v7477_v18 = vmul.f32 %v7458_v24, %v15402_v42  ;;  %v9559_v42 = vld [vmem:[%s15415_s18] ss:$0 sm:$0xff] }
0x2149   :  { %7601 = vrot.lane.b32.xlu1 %v7507_v29, %s11655_s5  ;;  %v7475_v29 = vmul.f32 %v14408_v3, %v15414_v26 }
0x214a   :  { %v7485_v17 = vpack.c.bf16 %v7477_v18, %v7476_v50  ;;  %v7594_v50 = vpop.permute.xlu1 %7593 }
0x214b   :  { %v7484_v47 = vpack.c.bf16 %v7475_v29, %v7474_v31  ;;  %10680 = vmatpush3.bf16.msra.mxu1 %v7594_v50 }
0x214c   :  { %v7535_v27 = vsel %vm1769_vm0, %v7485_v17, 0  ;;  %10681 = vmatprep.subr.bf16.mxu1 %v15242_v40 }
0x214d   :  { %7603 = vrot.lane.b32.xlu1 %v7508_v4, %s11655_s5  ;;  %v7532_v39 = vsel %vm1769_vm0, %v7484_v47, 0 }
0x2151   :  { %7605 = vrot.lane.b32.xlu1 %v7509_v41, %s11655_s5 }
0x21d5   :  { %v7301_v55 = vpop.xlane.xlu0 %7300 }
0x21d6   :  { %v7302_v54 = vmul.f32 0.03125, %v7301_v55 }
0x21d8   :  { %v7303_v24 = vadd.f32 1e-05, %v7302_v54 }
0x21da   :  { %11151 = vrsqrt.f32 %v7303_v24 }
0x21e4   :  { %v11152_v0 = vpop.eup %11151 }
0x21e5   :  { %v7305_v51 = vmul.f32 %v11152_v0, %v14391_v57  ;;  %v7517_v57 = vsel %vm1769_vm0, %v7479_v2, 0  ;;  %v7470_v2 = vmul.f32 %v14401_v7, %v15411_v61 }
0x21e7   :  { %v7313_v16 = vmul.f32 %v9557_v25, %v7305_v51  ;;  %v7482_v20 = vpack.c.bf16 %v7471_v45, %v7470_v2 }
0x21e9   :  { %v14456_v9 = vadd.f32 %v9558_v14, %v7313_v16  ;;  %v7526_v28 = vsel %vm1769_vm0, %v7482_v20, 0 }
0x21eb   :  { %v7322_v56 = vpack.c.bf16 %v14456_v9, %v14456_v9 }
0x21ed   :  { %10646 = vmatmul.mubr.msk.bf16.vlgmr.msra.gmra.mrb[156].mxu0 %vm1769_vm0, %v7322_v56  ;;  %v15419_v56 = vld [vmem:[#allocation384_spill] sm:$0xff] }
0x21ee   :  { %10658 = vmatpush3.bf16.xpose.msra.mxu0 %v7514_v49  ;;  %10673 = vmatprep.mubr.msk.bf16.mxu0 %vm11659_vm3, %v15242_v40  ;;  %v15420_v49 = vld [vmem:[#allocation385_spill] sm:$0xff] }
0x21ef   :  { %10659 = vmatprep.subr.bf16.mxu0 %v15242_v40 }
0x21f6   :  { %10660 = vmatpush3.bf16.xpose.msra.mxu0 %v7517_v57  ;;  %v15422_v57 = vld [vmem:[#allocation386_spill] sm:$0xff] }
0x21f7   :  { %10661 = vmatprep.subr.bf16.mxu0 %v15242_v40 }
0x21fe   :  { %10662 = vmatpush3.bf16.xpose.msra.mxu0 %v7520_v58 }
0x21ff   :  { %10663 = vmatprep.subr.bf16.mxu0 %v15242_v40 }
0x2206   :  { %10664 = vmatpush3.bf16.xpose.msra.mxu0 %v7523_v10 }
0x2207   :  { %10665 = vmatprep.subr.bf16.mxu0 %v15242_v40 }
0x220e   :  { %10666 = vmatpush3.bf16.xpose.msra.mxu0 %v7526_v28 }
0x220f   :  { %10667 = vmatprep.subr.bf16.mxu0 %v15242_v40 }
0x2216   :  { %10668 = vmatpush3.bf16.xpose.msra.mxu0 %v7529_v44 }
0x2217   :  { %10669 = vmatprep.subr.bf16.mxu0 %v15242_v40 }
0x221e   :  { %10670 = vmatpush3.bf16.xpose.msra.mxu0 %v7532_v39 }
0x221f   :  { %10671 = vmatprep.subr.bf16.mxu0 %v15242_v40 }
0x2226   :  { %10672 = vmatpush3.bf16.xpose.msra.mxu0 %v7535_v27  ;;  %v9574_v27 = vld [vmem:[%s15428_s28] ss:$0 sm:$0xff] }
0x2227   :  { %10787 = vmatprep.subr.bf16.mxu0 %v15244_v63 }
0x22c0   :  { %v7383_v18 = vpop.f32.mrb[156].mxu0 }
0x22c1   :  { %v7384_v41 = vadd.f32 %v9559_v42, %v7383_v18  ;;  %v10647_v6 = vpop.f32.mrb[157].mxu0 }
0x22c2   :  { %v7386_v43 = vpop.f32.mrb[158].mxu0 }
0x22c3   :  { %v7461_v35 = vpack.c.bf16 %v7384_v41, %v7384_v41  ;;  %v10648_v46 = vpop.f32.mrb[159].mxu0 }
0x22c5   :  { %10674 = vmatmul.mubr.msk.bf16.vlgmr.msra.gmra.mrb[160].mxu0 %vm1769_vm0, %v7461_v35 }
0x22c6   :  { %10790 = vmatpush3.bf16.xpose.msk.msra.mxu0 %vm13287_vm2, %v13283_v22  ;;  %10725 = vmatprep.mubr.msk.f32.mxu0 %vm11659_vm3, %v15242_v40  ;;  %v15418_v22 = vld [vmem:[#allocation378_spill] sm:$0xff] }
0x22c7   :  { %10791 = vmatprep.subr.bf16.mxu0 %v15244_v63  ;;  %v7491_v59 = vmul.f32 %v14408_v3, %v15418_v22  ;;  %v7598_v63 = vpop.permute.xlu1 %7597 }
0x22c9   :  { %v7504_v30 = vpack.c.bf16 %v7491_v59, %v7490_v21  ;;  %v9578_v21 = vld [vmem:[#allocation9] ss:$0 sm:$0xff]  ;;  %v9579_v59 = vld [vmem:[%s15429_s8] ss:$0 sm:$0xff] }
0x22cb   :  { %v7600_v25 = vpop.permute.xlu1 %7599 }
0x22ce   :  { %10794 = vmatpush3.bf16.xpose.msk.msra.mxu0 %vm13287_vm2, %v13299_v33 }
0x22cf   :  { %v7602_v14 = vpop.permute.xlu1 %7601 }
0x22d3   :  { %v7604_v7 = vpop.permute.xlu1 %7603 }
0x22d7   :  { %v7606_v16 = vpop.permute.xlu1 %7605 }
0x2398   :  { %v7571_v17 = vpop.f32.mrb[160].mxu0 }
0x2399   :  { %v7572_v4 = vadd.f32 %v7571_v17, %v15416_v5  ;;  %v10675_v55 = vpop.f32.mrb[161].mxu0 }
0x239a   :  { %v7574_v54 = vpop.f32.mrb[162].mxu0 }
0x239b   :  { %7577 = vmax.xlane.f32.xlu0 %v7572_v4  ;;  %v10676_v24 = vpop.f32.mrb[163].mxu0 }
0x23b1   :  { %7595 = vrot.lane.b32.xlu0 %v7504_v30, %s11655_s5  ;;  %s15421_s5 = sld [smem:[#allocation92_spill]] }
0x23b7   :  { %v11143_v58 = vld [vmem:[%s15421_s5] sm:$0xff]   ;;  %v11144_v31 = vld [vmem:[%s15421_s5 + $0x8] sm:$0xff]  }
0x2428   :  { %v7578_v0 = vpop.xlane.xlu0 %7577 }
0x2429   :  { %v7579_v33 = vsub.f32 %v7572_v4, %v7578_v0 }
0x242b   :  { %v7580_v51 = vmul.f32 1.442695, %v7579_v33 }
0x242c   :  { %v7596_v32 = vpop.permute.xlu0 %7595 }
0x242d   :  { %10682 = vmatpush3.bf16.msra.mxu1 %v7596_v32  ;;  %11153 = vpow2.f32 %v7580_v51 }
0x242e   :  { %10683 = vmatprep.subr.bf16.mxu1 %v15242_v40 }
0x2431   :  { %10684 = vmatpush3.bf16.msra.mxu1 %v7598_v63 }
0x2432   :  { %10685 = vmatprep.subr.bf16.mxu1 %v15242_v40 }
0x2435   :  { %10686 = vmatpush3.bf16.msra.mxu1 %v7600_v25 }
0x2436   :  { %10687 = vmatprep.subr.bf16.mxu1 %v15242_v40 }
0x2437   :  { %v11154_v3 = vpop.eup %11153 }
0x2438   :  { %v7582_v8 = vpack.c.bf16 %v11154_v3, %v11154_v3 }
0x2439   :  { %10688 = vmatpush3.bf16.msra.mxu1 %v7602_v14 }
0x243a   :  { %10689 = vmatprep.subr.bf16.mxu1 %v15242_v40 }
0x243d   :  { %10690 = vmatpush3.bf16.msra.mxu1 %v7604_v7 }
0x243e   :  { %10691 = vmatprep.subr.bf16.mxu1 %v15242_v40 }
0x2441   :  { %10692 = vmatpush3.bf16.msra.mxu1 %v7606_v16 }
0x2442   :  { %10697 = vmatprep.subr.bf16.mxu1 %v15242_v40 }
0x2444   :  { %10694 = vmatmul.mubr.bf16.vlgmr.msra.gmra.mrb[136].mxu1 %v7582_v8 }
0x2445   :  { %10698 = vmatpush3.bf16.msra.mxu1 %v15419_v56  ;;  %10713 = vmatprep.mubr.msk.bf16.mxu1 %vm11659_vm3, %v15242_v40 }
0x2446   :  { %10699 = vmatprep.subr.bf16.mxu1 %v15242_v40 }
0x2449   :  { %10700 = vmatpush3.bf16.msra.mxu1 %v15420_v49 }
0x244a   :  { %10701 = vmatprep.subr.bf16.mxu1 %v15242_v40 }
0x244d   :  { %10702 = vmatpush3.bf16.msra.mxu1 %v15422_v57 }
0x244e   :  { %10703 = vmatprep.subr.bf16.mxu1 %v15242_v40 }
0x2451   :  { %10704 = vmatpush3.bf16.msra.mxu1 %v15423_v53 }
0x2452   :  { %10705 = vmatprep.subr.bf16.mxu1 %v15242_v40 }
0x2455   :  { %10706 = vmatpush3.bf16.msra.mxu1 %v15424_v36 }
0x2456   :  { %10707 = vmatprep.subr.bf16.mxu1 %v15242_v40 }
0x2459   :  { %10708 = vmatpush3.bf16.msra.mxu1 %v15425_v19 }
0x245a   :  { %10709 = vmatprep.subr.bf16.mxu1 %v15242_v40 }
0x245d   :  { %10710 = vmatpush3.bf16.msra.mxu1 %v15426_v37 }
0x245e   :  { %10711 = vmatprep.subr.bf16.mxu1 %v15242_v40 }
0x2461   :  { %10712 = vmatpush3.bf16.msra.mxu1 %v15427_v34 }
0x2462   :  { %10728 = vmatprep.subr.bf16.mxu1 %v15242_v40 }
0x2464   :  { %10714 = vmatmul.mubr.bf16.vlgmr.msra.gmra.mrb[140].mxu1 %v7582_v8 }
0x2465   :  { %10732 = vmatprep.mubr.msk.bf16.mxu1 %vm11659_vm3, %v15242_v40  ;;  %10729 = vmatpush3.bf16.msra.mxu1 %v11143_v58 }
0x2466   :  { %10730 = vmatprep.subr.bf16.mxu1 %v15242_v40 }
0x2469   :  { %10731 = vmatpush3.bf16.msra.mxu1 %v11144_v31 }
0x2517   :  { %v7649_v10 = vpop.f32.mrb[136].mxu1 }
0x2518   :  { %v10695_v61 = vpop.f32.mrb[137].mxu1 }
0x2519   :  { %v7652_v2 = vpop.f32.mrb[138].mxu1 }
0x251a   :  { %v10696_v11 = vpop.f32.mrb[139].mxu1 }
0x2537   :  { %v7689_v45 = vpop.f32.mrb[140].mxu1 }
0x2538   :  { %11155 = vrcp.f32 %v7689_v45  ;;  %v10715_v20 = vpop.f32.mrb[141].mxu1 }
0x2539   :  { %v7692_v28 = vpop.f32.mrb[142].mxu1 }
0x253a   :  { %v10716_v44 = vpop.f32.mrb[143].mxu1 }
0x2542   :  { %v11156_v60 = vpop.eup %11155 }
0x2543   :  { %10726 = vmatmul.mubr.msk.f32.vlgmr.msra.gmra.mrb[90].mxu0 %vm2294_vm1, %v11156_v60 }
0x2616   :  { %v7765_v26 = vpop.f32.mrb[90].mxu0 }
0x2617   :  { %v7769_v29 = vmul.f32 %v7765_v26, %v7649_v10  ;;  %v10727_v47 = vpop.f32.mrb[91].mxu0 }
0x2619   :  { %v7770_v39 = vpack.c.bf16 %v7769_v29, %v7769_v29 }
0x261b   :  { %10733 = vmatmul.mubr.msk.bf16.vlgmr.msra.gmra.mrb[144].mxu1 %vm1769_vm0, %v7770_v39 }
0x26ee   :  { %v7831_v15 = vpop.f32.mrb[144].mxu1 }
0x26ef   :  { %v7832_v50 = vadd.f32 %v9574_v27, %v7831_v15  ;;  %v10734_v42 = vpop.f32.mrb[145].mxu1 }
0x26f0   :  { %v7834_v18 = vpop.f32.mrb[146].mxu1 }
0x26f1   :  { %v10735_v41 = vpop.f32.mrb[147].mxu1  ;;  %v7837_v6 = vadd.f32 %v7832_v50, %v14456_v9 }
0x26f3   :  { %v7838_v43 = vsel %vm1769_vm0, %v7837_v6, 0.0 }
0x26f4   :  { %7839 = vadd.xlane.f32.xlu1 %v7838_v43 }
0x2781   :  { %v7840_v35 = vpop.xlane.xlu1 %7839 }
0x2782   :  { %v7841_v46 = vmul.f32 0.03125, %v7840_v35 }
0x2784   :  { %v7842_v17 = vsub.f32 %v7837_v6, %v7841_v46 }
0x2786   :  { %v7843_v5 = vmul.f32 %v7842_v17, %v7842_v17 }
0x2788   :  { %v7844_v4 = vsel %vm1769_vm0, %v7843_v5, 0.0 }
0x2789   :  { %7845 = vadd.xlane.f32.xlu0 %v7844_v4 }
0x2816   :  { %v7846_v55 = vpop.xlane.xlu0 %7845 }
0x2817   :  { %v7847_v54 = vmul.f32 0.03125, %v7846_v55 }
0x2819   :  { %v7848_v24 = vadd.f32 1e-05, %v7847_v54 }
0x281b   :  { %11157 = vrsqrt.f32 %v7848_v24 }
0x2825   :  { %v11158_v62 = vpop.eup %11157 }
0x2826   :  { %v7850_v22 = vmul.f32 %v11158_v62, %v7842_v17 }
0x2828   :  { %v7858_v9 = vmul.f32 %v9578_v21, %v7850_v22 }
0x282a   :  { %v14546_v30 = vadd.f32 %v9579_v59, %v7858_v9 }
0x282b   :  { %11561 = dma.done.wait [#allocation6 + $0x2], 4096 }
0x282c   :  { %11562 = vsyncadd [#allocation6 + $0x2], 4294963200 }
0x282d   :  { %11563 = dma.done.wait [#allocation6 + $0x3], 16384 }
0x282e   :  { %11564 = vsyncadd [#allocation6 + $0x3], 4294950912  ;;  %v15430_v63 = vmov 0   ;;  %v7873_v0 = vld [vmem:[#allocation4 + $0x8] sm:$0xff]  ;;  %v7875_v32 = vld [vmem:[#allocation4 + $0x18] sm:$0xff]  ;;  %v14554_v56 = vpack.c.bf16 %v14546_v30, %v14546_v30  ;;  %s15451_s15 = sld [smem:[#allocation86_spill]] }
0x282f   :  { %8023 = vmatprep.mubr.bf16.mxu1 %v15430_v63  ;;  %8064 = vmatprep.mubr.bf16.mxu0 %v15430_v63  ;;  %v7872_v33 = vld [vmem:[#allocation4] sm:$0xff]  ;;  %v7874_v25 = vld [vmem:[#allocation4 + $0x10] sm:$0xff]  ;;  %v7889_v51 = vld [vmem:[#allocation4 + $0x88] sm:$0xff]  ;;  %s15557_s23 = sld [smem:[#allocation87_spill]]  ;;  %s15562_s3 = sld [smem:[#allocation67_spill]]  ;;  %vm8955_vm4 = vcmask 64512  }
0x2830   :  { %11159 = vset.pattern.permute.xlu0 %v15430_v63  ;;  %11160 = vset.pattern.permute.xlu1 %v15430_v63  ;;  %v7891_v14 = vld [vmem:[#allocation4 + $0x98] sm:$0xff]  ;;  %v7888_v7 = vld [vmem:[#allocation4 + $0x80] sm:$0xff]  ;;  %v7890_v3 = vld [vmem:[#allocation4 + $0x90] sm:$0xff]  ;;  %s15563_s27 = sld [smem:[#allocation62_spill]]  ;;  %vm8952_vm5 = vcmask 57344   ;;  %vm9116_vm6 = vcmask 8192  }
0x2831   :  { %7991 = vmatprep.subr.bf16.mxu1 %v7873_v0  ;;  %8032 = vmatprep.subr.bf16.mxu0 %v7875_v32  ;;  %v7877_v16 = vld [vmem:[#allocation4 + $0x28] sm:$0xff]  ;;  %v7879_v8 = vld [vmem:[#allocation4 + $0x38] sm:$0xff]  ;;  %v7876_v49 = vld [vmem:[#allocation4 + $0x20] sm:$0xff] }
0x2832   :  { %7992 = vmatpush1.bf16.msra.mxu1 %v7872_v33  ;;  %8033 = vmatpush1.bf16.msra.mxu0 %v7874_v25  ;;  %v7878_v57 = vld [vmem:[#allocation4 + $0x30] sm:$0xff]  ;;  %v7893_v53 = vld [vmem:[#allocation4 + $0xa8] sm:$0xff]  ;;  %v7895_v36 = vld [vmem:[#allocation4 + $0xb8] sm:$0xff] }
0x2833   :  { %7993 = vmatprep.subr.bf16.mxu1 %v7889_v51  ;;  %8034 = vmatprep.subr.bf16.mxu0 %v7891_v14  ;;  %v7892_v19 = vld [vmem:[#allocation4 + $0xa0] sm:$0xff]  ;;  %v7894_v37 = vld [vmem:[#allocation4 + $0xb0] sm:$0xff]  ;;  %v7881_v34 = vld [vmem:[#allocation4 + $0x48] sm:$0xff] }
0x2834   :  { %v7883_v58 = vld [vmem:[#allocation4 + $0x58] sm:$0xff]  ;;  %v7880_v10 = vld [vmem:[#allocation4 + $0x40] sm:$0xff]  ;;  %v7882_v61 = vld [vmem:[#allocation4 + $0x50] sm:$0xff] }
0x2835   :  { %v7897_v2 = vld [vmem:[#allocation4 + $0xc8] sm:$0xff]  ;;  %v7899_v11 = vld [vmem:[#allocation4 + $0xd8] sm:$0xff]  ;;  %v7896_v45 = vld [vmem:[#allocation4 + $0xc0] sm:$0xff] }
0x2836   :  { %7994 = vmatpush1.bf16.msra.mxu1 %v7888_v7  ;;  %8035 = vmatpush1.bf16.msra.mxu0 %v7890_v3  ;;  %v7898_v20 = vld [vmem:[#allocation4 + $0xd0] sm:$0xff]  ;;  %v7885_v28 = vld [vmem:[#allocation4 + $0x68] sm:$0xff]  ;;  %v7887_v44 = vld [vmem:[#allocation4 + $0x78] sm:$0xff] }
0x2837   :  { %8073 = vmatprep.subr.bf16.mxu1 %v7877_v16  ;;  %8114 = vmatprep.subr.bf16.mxu0 %v7879_v8  ;;  %v7884_v60 = vld [vmem:[#allocation4 + $0x60] sm:$0xff]  ;;  %v7886_v31 = vld [vmem:[#allocation4 + $0x70] sm:$0xff]  ;;  %v7901_v26 = vld [vmem:[#allocation4 + $0xe8] sm:$0xff] }
0x2838   :  { %v7903_v29 = vld [vmem:[#allocation4 + $0xf8] sm:$0xff]  ;;  %v7900_v47 = vld [vmem:[#allocation4 + $0xe0] sm:$0xff]  ;;  %v7902_v39 = vld [vmem:[#allocation4 + $0xf0] sm:$0xff] }
0x2839   :  { %9580 = vmatmul.mubr.msk.bf16.vlgmr.msra.gmra.mrb[148].mxu1 %vm1769_vm0, %v14554_v56  ;;  %9581 = vmatmul.mubr.msk.bf16.vlgmr.msra.gmra.mrb[164].mxu0 %vm1769_vm0, %v14554_v56  ;;  %v15431_v27 = vld [vmem:[#allocation242_spill] sm:$0xff]  ;;  %v15435_v18 = vld [vmem:[#allocation243_spill] sm:$0xff]  ;;  %v15439_v35 = vld [vmem:[#allocation244_spill] sm:$0xff] }
0x283a   :  { %8074 = vmatpush1.bf16.msra.mxu1 %v7876_v49  ;;  %8115 = vmatpush1.bf16.msra.mxu0 %v7878_v57  ;;  %v15432_v15 = vld [vmem:[#allocation258_spill] sm:$0xff]  ;;  %v15436_v41 = vld [vmem:[#allocation259_spill] sm:$0xff]  ;;  %v15440_v46 = vld [vmem:[#allocation260_spill] sm:$0xff] }
0x283b   :  { %8075 = vmatprep.subr.bf16.mxu1 %v7893_v53  ;;  %8116 = vmatprep.subr.bf16.mxu0 %v7895_v36  ;;  %v15433_v50 = vld [vmem:[#allocation234_spill] sm:$0xff]  ;;  %v15437_v6 = vld [vmem:[#allocation235_spill] sm:$0xff]  ;;  %v15441_v17 = vld [vmem:[#allocation236_spill] sm:$0xff] }
0x283c   :  { %8105 = vmatprep.mubr.bf16.mxu1 %v15430_v63  ;;  %8146 = vmatprep.mubr.bf16.mxu0 %v15430_v63  ;;  %v15434_v42 = vld [vmem:[#allocation250_spill] sm:$0xff]  ;;  %v15438_v43 = vld [vmem:[#allocation251_spill] sm:$0xff]  ;;  %v15442_v5 = vld [vmem:[#allocation252_spill] sm:$0xff] }
0x283d   :  { %v15443_v4 = vld [vmem:[#allocation245_spill] sm:$0xff]  ;;  %v15447_v62 = vld [vmem:[#allocation246_spill] sm:$0xff]  ;;  %v15452_v9 = vld [vmem:[#allocation247_spill] sm:$0xff] }
0x283e   :  { %8076 = vmatpush1.bf16.msra.mxu1 %v7892_v19  ;;  %8117 = vmatpush1.bf16.msra.mxu0 %v7894_v37  ;;  %v15444_v55 = vld [vmem:[#allocation261_spill] sm:$0xff]  ;;  %v15448_v21 = vld [vmem:[#allocation262_spill] sm:$0xff]  ;;  %v15454_v0 = vld [vmem:[#allocation239_spill] sm:$0xff] }
0x283f   :  { %8155 = vmatprep.subr.bf16.mxu1 %v7881_v34  ;;  %8196 = vmatprep.subr.bf16.mxu0 %v7883_v58  ;;  %v15445_v54 = vld [vmem:[#allocation237_spill] sm:$0xff]  ;;  %v15449_v22 = vld [vmem:[#allocation238_spill] sm:$0xff]  ;;  %v15455_v32 = vld [vmem:[#allocation255_spill] sm:$0xff] }
0x2840   :  { %v15446_v24 = vld [vmem:[#allocation253_spill] sm:$0xff]  ;;  %v15450_v59 = vld [vmem:[#allocation254_spill] sm:$0xff]  ;;  %v15456_v33 = vld [vmem:[#allocation248_spill] sm:$0xff] }
0x2841   :  { %9582 = vmatmul.mubr.msk.bf16.vlgmr.msra.gmra.mrb[152].mxu1 %vm1769_vm0, %v14554_v56  ;;  %9583 = vmatmul.mubr.msk.bf16.vlgmr.msra.gmra.mrb[168].mxu0 %vm1769_vm0, %v14554_v56  ;;  %v15457_v25 = vld [vmem:[#allocation264_spill] sm:$0xff]  ;;  %v15460_v7 = vld [vmem:[#allocation249_spill] sm:$0xff]  ;;  %v15465_v49 = vld [vmem:[#allocation290_spill] sm:$0xff] }
0x2842   :  { %8156 = vmatpush1.bf16.msra.mxu1 %v7880_v10  ;;  %8197 = vmatpush1.bf16.msra.mxu0 %v7882_v61  ;;  %v15458_v51 = vld [vmem:[#allocation240_spill] sm:$0xff]  ;;  %v15461_v3 = vld [vmem:[#allocation265_spill] sm:$0xff]  ;;  %v15466_v19 = vld [vmem:[#allocation394_spill] sm:$0xff] }
0x2843   :  { %8157 = vmatprep.subr.bf16.mxu1 %v7897_v2  ;;  %8198 = vmatprep.subr.bf16.mxu0 %v7899_v11  ;;  %v15459_v14 = vld [vmem:[#allocation256_spill] sm:$0xff]  ;;  %v15462_v16 = vld [vmem:[#allocation241_spill] sm:$0xff] }
0x2844   :  { %8187 = vmatprep.mubr.bf16.mxu1 %v15430_v63  ;;  %8228 = vmatprep.mubr.bf16.mxu0 %v15430_v63  ;;  %v15463_v8 = vld [vmem:[#allocation257_spill] sm:$0xff] }
0x2845   :  { %v14613_v57 = vld [vmem:[%s15451_s15] sm:$0xff] }
0x2846   :  { %8158 = vmatpush1.bf16.msra.mxu1 %v7896_v45  ;;  %8199 = vmatpush1.bf16.msra.mxu0 %v7898_v20  ;;  %v7911_v53 = vrot.slane %v14613_v57, %v15287_v52  ;;  %v7919_v36 = vrot.slane %v14613_v57, %v15288_v48  ;;  %v7915_v37 = vrot.slane %v14613_v57, %v15466_v19 }
0x2847   :  { %8237 = vmatprep.subr.bf16.mxu1 %v7885_v28  ;;  %8278 = vmatprep.subr.bf16.mxu0 %v7887_v44  ;;  %v7923_v34 = vrot.slane %v14613_v57, %v15290_v1 }
0x2849   :  { %9584 = vmatmul.mubr.msk.bf16.vlgmr.msra.gmra.mrb[156].mxu1 %vm1769_vm0, %v14554_v56  ;;  %9585 = vmatmul.mubr.msk.bf16.vlgmr.msra.gmra.mrb[172].mxu0 %vm1769_vm0, %v14554_v56 }
0x284a   :  { %8238 = vmatpush1.bf16.msra.mxu1 %v7884_v60  ;;  %8279 = vmatpush1.bf16.msra.mxu0 %v7886_v31 }
0x284b   :  { %8239 = vmatprep.subr.bf16.mxu1 %v7901_v26  ;;  %8280 = vmatprep.subr.bf16.mxu0 %v7903_v29 }
0x284c   :  { %8269 = vmatprep.mubr.bf16.mxu1 %v15430_v63  ;;  %8310 = vmatprep.mubr.bf16.mxu0 %v15430_v63  ;;  %v15453_v63 = vld [vmem:[#allocation263_spill] sm:$0xff] }
0x284e   :  { %8240 = vmatpush1.bf16.msra.mxu1 %v7900_v47  ;;  %8281 = vmatpush1.bf16.msra.mxu0 %v7902_v39 }
0x284f   :  { %10172 = vmatprep.subr.bf16.mxu1 %v15431_v27  ;;  %10194 = vmatprep.subr.bf16.mxu0 %v15432_v15 }
0x2851   :  { %9586 = vmatmul.mubr.msk.bf16.vlgmr.msra.gmra.mrb[160].mxu1 %vm1769_vm0, %v14554_v56  ;;  %9587 = vmatmul.mubr.msk.bf16.vlgmr.msra.gmra.mrb[176].mxu0 %vm1769_vm0, %v14554_v56  ;;  %v15464_v56 = vld [vmem:[#allocation274_spill] sm:$0xff] }
0x2852   :  { %10173 = vmatpush3.bf16.msra.mxu1 %v15433_v50  ;;  %10195 = vmatpush3.bf16.msra.mxu0 %v15434_v42 }
0x2853   :  { %10174 = vmatprep.subr.bf16.mxu1 %v15435_v18  ;;  %10196 = vmatprep.subr.bf16.mxu0 %v15436_v41  ;;  %v7931_v18 = vrot.slane %v14613_v57, %v13516_v12  ;;  %v7939_v41 = vrot.slane %v14613_v57, %v13520_v38 }
0x2856   :  { %10175 = vmatpush3.bf16.msra.mxu1 %v15437_v6  ;;  %10197 = vmatpush3.bf16.msra.mxu0 %v15438_v43 }
0x2857   :  { %10176 = vmatprep.subr.bf16.mxu1 %v15439_v35  ;;  %10198 = vmatprep.subr.bf16.mxu0 %v15440_v46 }
0x285a   :  { %10177 = vmatpush3.bf16.msra.mxu1 %v15441_v17  ;;  %10199 = vmatpush3.bf16.msra.mxu0 %v15442_v5  ;;  %v15467_v5 = vld [vmem:[#allocation266_spill] sm:$0xff] }
0x285b   :  { %10178 = vmatprep.subr.bf16.mxu1 %v15443_v4  ;;  %10200 = vmatprep.subr.bf16.mxu0 %v15444_v55  ;;  %v15468_v4 = vld [vmem:[#allocation282_spill] sm:$0xff] }
0x285e   :  { %10179 = vmatpush3.bf16.msra.mxu1 %v15445_v54  ;;  %10201 = vmatpush3.bf16.msra.mxu0 %v15446_v24 }
0x285f   :  { %10180 = vmatprep.subr.bf16.mxu1 %v15447_v62  ;;  %10202 = vmatprep.subr.bf16.mxu0 %v15448_v21  ;;  %v15469_v21 = vld [vmem:[#allocation275_spill] sm:$0xff] }
0x2862   :  { %10181 = vmatpush3.bf16.msra.mxu1 %v15449_v22  ;;  %10203 = vmatpush3.bf16.msra.mxu0 %v15450_v59  ;;  %v15470_v22 = vld [vmem:[#allocation291_spill] sm:$0xff] }
0x2863   :  { %10182 = vmatprep.subr.bf16.mxu1 %v15452_v9  ;;  %10204 = vmatprep.subr.bf16.mxu0 %v15453_v63 }
0x2866   :  { %10183 = vmatpush3.bf16.msra.mxu1 %v15454_v0  ;;  %10205 = vmatpush3.bf16.msra.mxu0 %v15455_v32  ;;  %v15471_v32 = vld [vmem:[#allocation267_spill] sm:$0xff] }
0x2867   :  { %10184 = vmatprep.subr.bf16.mxu1 %v15456_v33  ;;  %10206 = vmatprep.subr.bf16.mxu0 %v15457_v25  ;;  %v15472_v33 = vld [vmem:[#allocation283_spill] sm:$0xff] }
0x286a   :  { %10185 = vmatpush3.bf16.msra.mxu1 %v15458_v51  ;;  %10207 = vmatpush3.bf16.msra.mxu0 %v15459_v14  ;;  %v15473_v14 = vld [vmem:[#allocation276_spill] sm:$0xff] }
0x286b   :  { %10186 = vmatprep.subr.bf16.mxu1 %v15460_v7  ;;  %10208 = vmatprep.subr.bf16.mxu0 %v15461_v3  ;;  %v15474_v7 = vld [vmem:[#allocation292_spill] sm:$0xff] }
0x286e   :  { %10187 = vmatpush3.bf16.msra.mxu1 %v15462_v16  ;;  %10209 = vmatpush3.bf16.msra.mxu0 %v15463_v8 }
0x286f   :  { %10216 = vmatprep.subr.bf16.mxu1 %v15464_v56  ;;  %10238 = vmatprep.subr.bf16.mxu0 %v15465_v49  ;;  %v15475_v49 = vld [vmem:[#allocation268_spill] sm:$0xff] }
0x290c   :  { %v8025_v58 = vpop.f32.mrb[148].mxu1  ;;  %v8066_v10 = vpop.f32.mrb[164].mxu0 }
0x290d   :  { %v8026_v61 = vadd.f32 %v8025_v58, %v7911_v53  ;;  %v8067_v2 = vadd.f32 %v8066_v10, %v7919_v36  ;;  %v8027_v11 = vpop.f32.mrb[149].mxu1  ;;  %v8068_v45 = vpop.f32.mrb[165].mxu0  ;;  %v15476_v53 = vld [vmem:[#allocation284_spill] sm:$0xff]  ;;  %v15478_v58 = vld [vmem:[#allocation293_spill] sm:$0xff] }
0x290e   :  { %v8028_v20 = vadd.f32 %v8027_v11, %v7915_v37  ;;  %v8069_v28 = vadd.f32 %v8068_v45, %v7923_v34  ;;  %v8029_v44 = vpop.f32.mrb[150].mxu1  ;;  %v8070_v60 = vpop.f32.mrb[166].mxu0  ;;  %v15477_v34 = vld [vmem:[#allocation277_spill] sm:$0xff]  ;;  %v15481_v45 = vld [vmem:[#allocation278_spill] sm:$0xff] }
0x290f   :  { %v8319_v31 = vmax.f32 %v8026_v61, 0.0  ;;  %v8321_v26 = vmax.f32 %v8067_v2, 0.0  ;;  %v8030_v29 = vpop.f32.mrb[151].mxu1  ;;  %v8071_v47 = vpop.f32.mrb[167].mxu0  ;;  %v15479_v2 = vld [vmem:[#allocation269_spill] sm:$0xff]  ;;  %v7927_v60 = vrot.slane %v14613_v57, %v13511_v23 }
0x2910   :  { %v8320_v39 = vmax.f32 %v8028_v20, 0.0  ;;  %v8322_v27 = vmax.f32 %v8069_v28, 0.0  ;;  %v15480_v11 = vld [vmem:[#allocation285_spill] sm:$0xff]  ;;  %v15482_v20 = vld [vmem:[#allocation294_spill] sm:$0xff] }
0x2911   :  { %v8337_v15 = vpack.c.bf16 %v8321_v26, %v8321_v26  ;;  %v8335_v6 = vpack.c.bf16 %v8319_v31, %v8319_v31  ;;  %v7935_v31 = vrot.slane %v14613_v57, %v13513_v13  ;;  %v14656_v26 = vld [vmem:[%s15451_s15 + $0x8] sm:$0xff] }
0x2912   :  { %v8336_v50 = vpack.c.bf16 %v8320_v39, %v8320_v39  ;;  %v8338_v42 = vpack.c.bf16 %v8322_v27, %v8322_v27  ;;  %v15483_v39 = vld [vmem:[#allocation270_spill] sm:$0xff]  ;;  %v7947_v57 = vrot.slane %v14656_v26, %v15466_v19  ;;  %v15492_v19 = vld [vmem:[#allocation288_spill] sm:$0xff] }
0x2913   :  { %v15484_v27 = vld [vmem:[#allocation286_spill] sm:$0xff] }
0x2914   :  { %8518 = vmatprep.mubr.bf16.mxu1 %v8336_v50  ;;  %8558 = vmatprep.mubr.bf16.mxu0 %v8338_v42  ;;  %v8107_v43 = vpop.f32.mrb[152].mxu1  ;;  %v8148_v35 = vpop.f32.mrb[168].mxu0  ;;  %v15485_v42 = vld [vmem:[#allocation279_spill] sm:$0xff] }
0x2915   :  { %8519 = vmatmul.mubr.bf16.vlgmr.msra.gmra.mrb[164].mxu1 %v8335_v6  ;;  %8559 = vmatmul.mubr.bf16.vlgmr.msra.gmra.mrb[180].mxu0 %v8337_v15  ;;  %v8109_v46 = vpop.f32.mrb[153].mxu1  ;;  %v8150_v17 = vpop.f32.mrb[169].mxu0 }
0x2916   :  { %10217 = vmatpush3.bf16.msra.mxu1 %v15467_v5  ;;  %10239 = vmatpush3.bf16.msra.mxu0 %v15468_v4  ;;  %v8110_v55 = vadd.f32 %v8109_v46, %v7931_v18  ;;  %v8111_v54 = vpop.f32.mrb[154].mxu1  ;;  %v8151_v24 = vadd.f32 %v8150_v17, %v7939_v41  ;;  %v8152_v62 = vpop.f32.mrb[170].mxu0  ;;  %v15486_v18 = vld [vmem:[#allocation295_spill] sm:$0xff]  ;;  %v7955_v46 = vrot.slane %v14656_v26, %v15290_v1  ;;  %v15494_v1 = vld [vmem:[#allocation297_spill] sm:$0xff] }
0x2917   :  { %10218 = vmatprep.subr.bf16.mxu1 %v15469_v21  ;;  %10240 = vmatprep.subr.bf16.mxu0 %v15470_v22  ;;  %v8112_v59 = vpop.f32.mrb[155].mxu1  ;;  %v8153_v9 = vpop.f32.mrb[171].mxu0  ;;  %v8108_v17 = vadd.f32 %v8107_v43, %v7927_v60  ;;  %v8149_v5 = vadd.f32 %v8148_v35, %v7935_v31  ;;  %v15487_v4 = vld [vmem:[#allocation271_spill] sm:$0xff]  ;;  %v15489_v54 = vld [vmem:[#allocation280_spill] sm:$0xff]  ;;  %v15512_v60 = vld [vmem:[#allocation317_spill] sm:$0xff] }
0x2918   :  { %v8324_v63 = vmax.f32 %v8110_v55, 0.0  ;;  %v8326_v0 = vmax.f32 %v8151_v24, 0.0  ;;  %v15488_v55 = vld [vmem:[#allocation287_spill] sm:$0xff]  ;;  %v15490_v24 = vld [vmem:[#allocation296_spill] sm:$0xff]  ;;  %v15513_v31 = vld [vmem:[#allocation310_spill] sm:$0xff] }
0x2919   :  { %v8323_v22 = vmax.f32 %v8108_v17, 0.0  ;;  %v8325_v59 = vmax.f32 %v8149_v5, 0.0  ;;  %v15491_v9 = vld [vmem:[#allocation272_spill] sm:$0xff]  ;;  %v15519_v5 = vld [vmem:[#allocation303_spill] sm:$0xff] }
0x291a   :  { %10219 = vmatpush3.bf16.msra.mxu1 %v15471_v32  ;;  %10241 = vmatpush3.bf16.msra.mxu0 %v15472_v33  ;;  %v8340_v25 = vpack.c.bf16 %v8324_v63, %v8324_v63  ;;  %v8342_v51 = vpack.c.bf16 %v8326_v0, %v8326_v0  ;;  %v15493_v63 = vld [vmem:[#allocation281_spill] sm:$0xff] }
0x291b   :  { %10220 = vmatprep.subr.bf16.mxu1 %v15473_v14  ;;  %10242 = vmatprep.subr.bf16.mxu0 %v15474_v7  ;;  %v8339_v0 = vpack.c.bf16 %v8323_v22, %v8323_v22  ;;  %v8341_v32 = vpack.c.bf16 %v8325_v59, %v8325_v59  ;;  %v15495_v33 = vld [vmem:[#allocation273_spill] sm:$0xff]  ;;  %v15498_v14 = vld [vmem:[#allocation322_spill] sm:$0xff] }
0x291c   :  { %8598 = vmatprep.mubr.bf16.mxu1 %v8340_v25  ;;  %8638 = vmatprep.mubr.bf16.mxu0 %v8342_v51  ;;  %v14635_v3 = vpop.f32.mrb[156].mxu1  ;;  %v14637_v16 = vpop.f32.mrb[172].mxu0  ;;  %v15496_v25 = vld [vmem:[#allocation289_spill] sm:$0xff]  ;;  %v15497_v51 = vld [vmem:[#allocation306_spill] sm:$0xff] }
0x291d   :  { %v8191_v8 = vpop.f32.mrb[157].mxu1  ;;  %v8232_v56 = vpop.f32.mrb[173].mxu0 }
0x291e   :  { %10221 = vmatpush3.bf16.msra.mxu1 %v15475_v49  ;;  %10243 = vmatpush3.bf16.msra.mxu0 %v15476_v53  ;;  %v8193_v36 = vpop.f32.mrb[158].mxu1  ;;  %v8234_v37 = vpop.f32.mrb[174].mxu0  ;;  %v8192_v62 = vadd.f32 %v8191_v8, %v7947_v57  ;;  %v8233_v21 = vadd.f32 %v8232_v56, %v7955_v46  ;;  %v15499_v56 = vld [vmem:[#allocation298_spill] sm:$0xff]  ;;  %v15501_v53 = vld [vmem:[#allocation307_spill] sm:$0xff]  ;;  %v7971_v57 = vrot.slane %v14656_v26, %v13520_v38  ;;  %v15524_v38 = vld [vmem:[#allocation320_spill] sm:$0xff] }
0x291f   :  { %10222 = vmatprep.subr.bf16.mxu1 %v15477_v34  ;;  %10244 = vmatprep.subr.bf16.mxu0 %v15478_v58  ;;  %v8194_v10 = vpop.f32.mrb[159].mxu1  ;;  %v8235_v61 = vpop.f32.mrb[175].mxu0  ;;  %v15500_v49 = vld [vmem:[#allocation314_spill] sm:$0xff]  ;;  %v15502_v36 = vld [vmem:[#allocation323_spill] sm:$0xff]  ;;  %v15505_v58 = vld [vmem:[#allocation308_spill] sm:$0xff] }
0x2920   :  { %v8328_v43 = vmax.f32 %v8192_v62, 0.0  ;;  %v8330_v35 = vmax.f32 %v8233_v21, 0.0  ;;  %v15503_v37 = vld [vmem:[#allocation299_spill] sm:$0xff]  ;;  %v15506_v10 = vld [vmem:[#allocation324_spill] sm:$0xff] }
0x2921   :  { %v15504_v34 = vld [vmem:[#allocation315_spill] sm:$0xff]  ;;  %v15507_v61 = vld [vmem:[#allocation300_spill] sm:$0xff] }
0x2922   :  { %10223 = vmatpush3.bf16.msra.mxu1 %v15479_v2  ;;  %10245 = vmatpush3.bf16.msra.mxu0 %v15480_v11  ;;  %v8344_v7 = vpack.c.bf16 %v8328_v43, %v8328_v43  ;;  %v8346_v8 = vpack.c.bf16 %v8330_v35, %v8330_v35  ;;  %v15508_v2 = vld [vmem:[#allocation316_spill] sm:$0xff]  ;;  %v15509_v11 = vld [vmem:[#allocation309_spill] sm:$0xff] }
0x2923   :  { %10224 = vmatprep.subr.bf16.mxu1 %v15481_v45  ;;  %10246 = vmatprep.subr.bf16.mxu0 %v15482_v20  ;;  %v15510_v45 = vld [vmem:[#allocation325_spill] sm:$0xff]  ;;  %v15523_v21 = vld [vmem:[#allocation304_spill] sm:$0xff] }
0x2924   :  { %v14647_v28 = vpop.f32.mrb[160].mxu1  ;;  %v14649_v44 = vpop.f32.mrb[176].mxu0  ;;  %v15511_v20 = vld [vmem:[#allocation301_spill] sm:$0xff] }
0x2925   :  { %v14658_v29 = vpop.f32.mrb[161].mxu1  ;;  %v14660_v47 = vpop.f32.mrb[177].mxu0 }
0x2926   :  { %10225 = vmatpush3.bf16.msra.mxu1 %v15483_v39  ;;  %10247 = vmatpush3.bf16.msra.mxu0 %v15484_v27  ;;  %v8275_v15 = vpop.f32.mrb[162].mxu1  ;;  %v8316_v50 = vpop.f32.mrb[178].mxu0  ;;  %v15514_v39 = vld [vmem:[#allocation326_spill] sm:$0xff]  ;;  %v7943_v27 = vrot.slane %v14656_v26, %v15287_v52 }
0x2927   :  { %10226 = vmatprep.subr.bf16.mxu1 %v15485_v42  ;;  %10248 = vmatprep.subr.bf16.mxu0 %v15486_v18  ;;  %v8276_v41 = vpop.f32.mrb[163].mxu1  ;;  %v8317_v6 = vpop.f32.mrb[179].mxu0  ;;  %v7951_v15 = vrot.slane %v14656_v26, %v15288_v48  ;;  %v15515_v50 = vld [vmem:[#allocation302_spill] sm:$0xff]  ;;  %v15517_v18 = vld [vmem:[#allocation311_spill] sm:$0xff] }
0x2928   :  { %v15516_v42 = vld [vmem:[#allocation318_spill] sm:$0xff]  ;;  %v15518_v41 = vld [vmem:[#allocation327_spill] sm:$0xff]  ;;  %v7963_v6 = vrot.slane %v14656_v26, %v13516_v12  ;;  %v8190_v46 = vadd.f32 %v14635_v3, %v7943_v27  ;;  %v15525_v3 = vld [vmem:[#allocation313_spill] sm:$0xff] }
0x2929   :  { %v8231_v17 = vadd.f32 %v14637_v16, %v7951_v15  ;;  %v15520_v48 = vld [vmem:[#allocation319_spill] sm:$0xff]  ;;  %v15526_v16 = vld [vmem:[#allocation329_spill] sm:$0xff] }
0x292a   :  { %10227 = vmatpush3.bf16.msra.mxu1 %v15487_v4  ;;  %10249 = vmatpush3.bf16.msra.mxu0 %v15488_v55  ;;  %v15521_v4 = vld [vmem:[#allocation312_spill] sm:$0xff]  ;;  %v8327_v12 = vmax.f32 %v8190_v46, 0.0  ;;  %v15552_v27 = vld [vmem:[#allocation351_spill] sm:$0xff]  ;;  %v15561_v46 = vld [vmem:[#allocation353_spill] sm:$0xff] }
0x292b   :  { %10228 = vmatprep.subr.bf16.mxu1 %v15489_v54  ;;  %10250 = vmatprep.subr.bf16.mxu0 %v15490_v24  ;;  %v15522_v55 = vld [vmem:[#allocation328_spill] sm:$0xff]  ;;  %v8274_v54 = vadd.f32 %v14658_v29, %v7963_v6  ;;  %v8315_v24 = vadd.f32 %v14660_v47, %v7971_v57  ;;  %v8329_v62 = vmax.f32 %v8231_v17, 0.0  ;;  %v15529_v29 = vld [vmem:[#allocation338_spill] sm:$0xff]  ;;  %v15560_v57 = vld [vmem:[#allocation337_spill] sm:$0xff] }
0x292c   :  { %v15530_v47 = vld [vmem:[#allocation354_spill] sm:$0xff] }
0x292d   :  { %v8332_v22 = vmax.f32 %v8274_v54, 0.0  ;;  %v8334_v59 = vmax.f32 %v8315_v24, 0.0 }
0x292e   :  { %10229 = vmatpush3.bf16.msra.mxu1 %v15491_v9  ;;  %10251 = vmatpush3.bf16.msra.mxu0 %v15492_v19  ;;  %v8343_v9 = vpack.c.bf16 %v8327_v12, %v8327_v12  ;;  %v8345_v19 = vpack.c.bf16 %v8329_v62, %v8329_v62 }
0x292f   :  { %10230 = vmatprep.subr.bf16.mxu1 %v15493_v63  ;;  %10252 = vmatprep.subr.bf16.mxu0 %v15494_v1  ;;  %v15527_v63 = vld [vmem:[#allocation305_spill] sm:$0xff]  ;;  %v8348_v43 = vpack.c.bf16 %v8332_v22, %v8332_v22  ;;  %v8350_v35 = vpack.c.bf16 %v8334_v59, %v8334_v59 }
0x2930   :  { %v15528_v1 = vld [vmem:[#allocation321_spill] sm:$0xff] }
0x2932   :  { %10231 = vmatpush3.bf16.msra.mxu1 %v15495_v33  ;;  %10253 = vmatpush3.bf16.msra.mxu0 %v15496_v25  ;;  %v15533_v33 = vld [vmem:[#allocation339_spill] sm:$0xff] }
0x2933   :  { %10260 = vmatprep.subr.bf16.mxu1 %v15497_v51  ;;  %10282 = vmatprep.subr.bf16.mxu0 %v15498_v14  ;;  %v15534_v25 = vld [vmem:[#allocation355_spill] sm:$0xff] }
0x2934   :  { %v15535_v51 = vld [vmem:[#allocation331_spill] sm:$0xff] }
0x2935   :  { %8599 = vmatmul.mubr.bf16.vlgmr.msra.gmra.mrb[168].mxu1 %v8339_v0  ;;  %8639 = vmatmul.mubr.bf16.vlgmr.msra.gmra.mrb[184].mxu0 %v8341_v32  ;;  %v15531_v0 = vld [vmem:[#allocation330_spill] sm:$0xff]  ;;  %v15536_v14 = vld [vmem:[#allocation347_spill] sm:$0xff] }
0x2936   :  { %10261 = vmatpush3.bf16.msra.mxu1 %v15499_v56  ;;  %10283 = vmatpush3.bf16.msra.mxu0 %v15500_v49  ;;  %v15532_v32 = vld [vmem:[#allocation346_spill] sm:$0xff]  ;;  %v15539_v56 = vld [vmem:[#allocation332_spill] sm:$0xff] }
0x2937   :  { %10262 = vmatprep.subr.bf16.mxu1 %v15501_v53  ;;  %10284 = vmatprep.subr.bf16.mxu0 %v15502_v36  ;;  %v15540_v49 = vld [vmem:[#allocation348_spill] sm:$0xff]  ;;  %v15541_v53 = vld [vmem:[#allocation341_spill] sm:$0xff] }
0x2938   :  { %8678 = vmatprep.mubr.bf16.mxu1 %v8344_v7  ;;  %8718 = vmatprep.mubr.bf16.mxu0 %v8346_v8  ;;  %v15537_v7 = vld [vmem:[#allocation340_spill] sm:$0xff]  ;;  %v15542_v36 = vld [vmem:[#allocation357_spill] sm:$0xff] }
0x2939   :  { %v15538_v8 = vld [vmem:[#allocation356_spill] sm:$0xff] }
0x293a   :  { %10263 = vmatpush3.bf16.msra.mxu1 %v15503_v37  ;;  %10285 = vmatpush3.bf16.msra.mxu0 %v15504_v34  ;;  %v15543_v37 = vld [vmem:[#allocation333_spill] sm:$0xff] }
0x293b   :  { %10264 = vmatprep.subr.bf16.mxu1 %v15505_v58  ;;  %10286 = vmatprep.subr.bf16.mxu0 %v15506_v10  ;;  %v15544_v34 = vld [vmem:[#allocation349_spill] sm:$0xff]  ;;  %v15545_v58 = vld [vmem:[#allocation342_spill] sm:$0xff] }
0x293c   :  { %v15546_v10 = vld [vmem:[#allocation358_spill] sm:$0xff] }
0x293e   :  { %10265 = vmatpush3.bf16.msra.mxu1 %v15507_v61  ;;  %10287 = vmatpush3.bf16.msra.mxu0 %v15508_v2  ;;  %v7967_v61 = vrot.slane %v14656_v26, %v13513_v13  ;;  %v15547_v2 = vld [vmem:[#allocation334_spill] sm:$0xff]  ;;  %v15553_v13 = vld [vmem:[#allocation344_spill] sm:$0xff] }
0x293f   :  { %10266 = vmatprep.subr.bf16.mxu1 %v15509_v11  ;;  %10288 = vmatprep.subr.bf16.mxu0 %v15510_v45  ;;  %v15548_v11 = vld [vmem:[#allocation350_spill] sm:$0xff]  ;;  %v7959_v45 = vrot.slane %v14656_v26, %v13511_v23  ;;  %v15556_v23 = vld [vmem:[#allocation352_spill] sm:$0xff] }
0x2941   :  { %v8272_v15 = vadd.f32 %v14647_v28, %v7959_v45 }
0x2942   :  { %10267 = vmatpush3.bf16.msra.mxu1 %v15511_v20  ;;  %10289 = vmatpush3.bf16.msra.mxu0 %v15512_v60  ;;  %v15549_v20 = vld [vmem:[#allocation343_spill] sm:$0xff] }
0x2943   :  { %10268 = vmatprep.subr.bf16.mxu1 %v15513_v31  ;;  %10290 = vmatprep.subr.bf16.mxu0 %v15514_v39  ;;  %v15550_v60 = vld [vmem:[#allocation359_spill] sm:$0xff]  ;;  %v8313_v31 = vadd.f32 %v14649_v44, %v7967_v61  ;;  %v8331_v26 = vmax.f32 %v8272_v15, 0.0  ;;  %v15559_v44 = vld [vmem:[#allocation361_spill] sm:$0xff] }
0x2944   :  { %v15551_v39 = vld [vmem:[#allocation335_spill] sm:$0xff] }
0x2945   :  { %v8347_v28 = vpack.c.bf16 %v8331_v26, %v8331_v26 }
0x2946   :  { %10269 = vmatpush3.bf16.msra.mxu1 %v15515_v50  ;;  %10291 = vmatpush3.bf16.msra.mxu0 %v15516_v42  ;;  %v15554_v50 = vld [vmem:[#allocation360_spill] sm:$0xff]  ;;  %v8333_v42 = vmax.f32 %v8313_v31, 0.0 }
0x2947   :  { %10270 = vmatprep.subr.bf16.mxu1 %v15517_v18  ;;  %10292 = vmatprep.subr.bf16.mxu0 %v15518_v41  ;;  %v15555_v18 = vld [vmem:[#allocation336_spill] sm:$0xff]  ;;  %v15558_v41 = vld [vmem:[#allocation345_spill] sm:$0xff] }
0x2948   :  { %v8349_v6 = vpack.c.bf16 %v8333_v42, %v8333_v42 }
0x294a   :  { %10271 = vmatpush3.bf16.msra.mxu1 %v15519_v5  ;;  %10293 = vmatpush3.bf16.msra.mxu0 %v15520_v48  ;;  %v9588_v48 = vld [vmem:[%s15557_s23] ss:$0 sm:$0xff] }
0x294b   :  { %10272 = vmatprep.subr.bf16.mxu1 %v15521_v4  ;;  %10294 = vmatprep.subr.bf16.mxu0 %v15522_v55 }
0x294e   :  { %10273 = vmatpush3.bf16.msra.mxu1 %v15523_v21  ;;  %10295 = vmatpush3.bf16.msra.mxu0 %v15524_v38 }
0x294f   :  { %10274 = vmatprep.subr.bf16.mxu1 %v15525_v3  ;;  %10296 = vmatprep.subr.bf16.mxu0 %v15526_v16 }
0x2952   :  { %10275 = vmatpush3.bf16.msra.mxu1 %v15527_v63  ;;  %10297 = vmatpush3.bf16.msra.mxu0 %v15528_v1 }
0x2953   :  { %10304 = vmatprep.subr.bf16.mxu1 %v15529_v29  ;;  %10326 = vmatprep.subr.bf16.mxu0 %v15530_v47 }
0x2955   :  { %8679 = vmatmul.mubr.bf16.vlgmr.msra.gmra.mrb[172].mxu1 %v8343_v9  ;;  %8719 = vmatmul.mubr.bf16.vlgmr.msra.gmra.mrb[188].mxu0 %v8345_v19 }
0x2956   :  { %10305 = vmatpush3.bf16.msra.mxu1 %v15531_v0  ;;  %10327 = vmatpush3.bf16.msra.mxu0 %v15532_v32 }
0x2957   :  { %10306 = vmatprep.subr.bf16.mxu1 %v15533_v33  ;;  %10328 = vmatprep.subr.bf16.mxu0 %v15534_v25 }
0x2958   :  { %8758 = vmatprep.mubr.bf16.mxu1 %v8348_v43  ;;  %8798 = vmatprep.mubr.bf16.mxu0 %v8350_v35 }
0x295a   :  { %10307 = vmatpush3.bf16.msra.mxu1 %v15535_v51  ;;  %10329 = vmatpush3.bf16.msra.mxu0 %v15536_v14 }
0x295b   :  { %10308 = vmatprep.subr.bf16.mxu1 %v15537_v7  ;;  %10330 = vmatprep.subr.bf16.mxu0 %v15538_v8 }
0x295e   :  { %10309 = vmatpush3.bf16.msra.mxu1 %v15539_v56  ;;  %10331 = vmatpush3.bf16.msra.mxu0 %v15540_v49 }
0x295f   :  { %10310 = vmatprep.subr.bf16.mxu1 %v15541_v53  ;;  %10332 = vmatprep.subr.bf16.mxu0 %v15542_v36 }
0x2962   :  { %10311 = vmatpush3.bf16.msra.mxu1 %v15543_v37  ;;  %10333 = vmatpush3.bf16.msra.mxu0 %v15544_v34 }
0x2963   :  { %10312 = vmatprep.subr.bf16.mxu1 %v15545_v58  ;;  %10334 = vmatprep.subr.bf16.mxu0 %v15546_v10 }
0x2966   :  { %10313 = vmatpush3.bf16.msra.mxu1 %v15547_v2  ;;  %10335 = vmatpush3.bf16.msra.mxu0 %v15548_v11 }
0x2967   :  { %10314 = vmatprep.subr.bf16.mxu1 %v15549_v20  ;;  %10336 = vmatprep.subr.bf16.mxu0 %v15550_v60 }
0x296a   :  { %10315 = vmatpush3.bf16.msra.mxu1 %v15551_v39  ;;  %10337 = vmatpush3.bf16.msra.mxu0 %v15552_v27 }
0x296b   :  { %10316 = vmatprep.subr.bf16.mxu1 %v15553_v13  ;;  %10338 = vmatprep.subr.bf16.mxu0 %v15554_v50 }
0x296e   :  { %10317 = vmatpush3.bf16.msra.mxu1 %v15555_v18  ;;  %10339 = vmatpush3.bf16.msra.mxu0 %v15556_v23 }
0x296f   :  { %10318 = vmatprep.subr.bf16.mxu1 %v15558_v41  ;;  %10340 = vmatprep.subr.bf16.mxu0 %v15559_v44 }
0x2972   :  { %10319 = vmatpush3.bf16.msra.mxu1 %v15560_v57  ;;  %10341 = vmatpush3.bf16.msra.mxu0 %v15561_v46 }
0x2973   :  { %10736 = vmatprep.subr.mxu1 %v15242_v40  ;;  %10746 = vmatprep.subr.mxu0 %v15242_v40 }
0x2975   :  { %8759 = vmatmul.mubr.bf16.vlgmr.msra.gmra.mrb[176].mxu1 %v8347_v28  ;;  %8799 = vmatmul.mubr.bf16.vlgmr.msra.gmra.mrb[192].mxu0 %v8349_v6  ;;  %v9589_v28 = vld [vmem:[#allocation13] ss:$0 sm:$0xff] }
0x2976   :  { %10738 = vmatprep.mubr.msk.f32.mxu1 %vm11659_vm3, %v15242_v40  ;;  %10748 = vmatprep.mubr.msk.f32.mxu0 %vm11659_vm3, %v15242_v40 }
0x29e8   :  { %v10188_v17 = vpop.f32.mrb[164].mxu1  ;;  %v10210_v5 = vpop.f32.mrb[180].mxu0 }
0x29e9   :  { %v10189_v4 = vpop.f32.mrb[165].mxu1  ;;  %v10211_v55 = vpop.f32.mrb[181].mxu0 }
0x29ea   :  { %v10190_v54 = vadd.f32 %v10189_v4, %v10188_v17  ;;  %v10212_v24 = vadd.f32 %v10211_v55, %v10210_v5  ;;  %v10191_v12 = vpop.f32.mrb[166].mxu1  ;;  %v10213_v62 = vpop.f32.mrb[182].mxu0  ;;  %v9590_v5 = vld [vmem:[#allocation11] ss:$0 sm:$0xff] }
0x29eb   :  { %v10192_v21 = vpop.f32.mrb[167].mxu1  ;;  %v10214_v38 = vpop.f32.mrb[183].mxu0 }
0x29ec   :  { %v8521_v3 = vadd.f32 %v10190_v54, %v9588_v48  ;;  %v8866_v21 = vld [vmem:[#allocation7] sm:$0x1] }
0x29ee   :  { %v8561_v16 = vadd.f32 %v10212_v24, %v8521_v3 }
0x2a08   :  { %v10232_v22 = vpop.f32.mrb[168].mxu1  ;;  %v10254_v59 = vpop.f32.mrb[184].mxu0 }
0x2a09   :  { %v10233_v9 = vpop.f32.mrb[169].mxu1  ;;  %v10255_v19 = vpop.f32.mrb[185].mxu0 }
0x2a0a   :  { %v10234_v63 = vadd.f32 %v10233_v9, %v10232_v22  ;;  %v10256_v1 = vadd.f32 %v10255_v19, %v10254_v59  ;;  %v10235_v29 = vpop.f32.mrb[170].mxu1  ;;  %v10257_v47 = vpop.f32.mrb[186].mxu0  ;;  %v9591_v59 = vld [vmem:[#allocation19] ss:$0 sm:$0xff]  ;;  %v9592_v19 = vld [vmem:[#allocation17] ss:$0 sm:$0xff] }
0x2a0b   :  { %v10236_v43 = vpop.f32.mrb[171].mxu1  ;;  %v10258_v35 = vpop.f32.mrb[187].mxu0  ;;  %v8865_v29 = vld [vmem:[%s15562_s3] sm:$0x1] }
0x2a0c   :  { %v8601_v0 = vadd.f32 %v10234_v63, %v8561_v16  ;;  %v8954_v47 = vld [vmem:[%s15563_s27] sm:$0x3] }
0x2a0d   :  { %v9030_v43 = vld [vmem:[#allocation8] sm:$0x1] }
0x2a0e   :  { %v8641_v32 = vadd.f32 %v10256_v1, %v8601_v0 }
0x2a28   :  { %v10276_v33 = vpop.f32.mrb[172].mxu1  ;;  %v10298_v25 = vpop.f32.mrb[188].mxu0 }
0x2a29   :  { %v10277_v51 = vpop.f32.mrb[173].mxu1  ;;  %v10299_v14 = vpop.f32.mrb[189].mxu0 }
0x2a2a   :  { %v10278_v7 = vadd.f32 %v10277_v51, %v10276_v33  ;;  %v10300_v8 = vadd.f32 %v10299_v14, %v10298_v25  ;;  %v10279_v56 = vpop.f32.mrb[174].mxu1  ;;  %v10301_v49 = vpop.f32.mrb[190].mxu0 }
0x2a2b   :  { %v10280_v53 = vpop.f32.mrb[175].mxu1  ;;  %v10302_v36 = vpop.f32.mrb[191].mxu0 }
0x2a2c   :  { %v8681_v37 = vadd.f32 %v10278_v7, %v8641_v32  ;;  %v9029_v7 = vld [vmem:[#allocation34] sm:$0x1] }
0x2a2e   :  { %v8721_v34 = vadd.f32 %v10300_v8, %v8681_v37 }
0x2a48   :  { %v10320_v58 = vpop.f32.mrb[176].mxu1  ;;  %v10342_v10 = vpop.f32.mrb[192].mxu0 }
0x2a49   :  { %v10321_v61 = vpop.f32.mrb[177].mxu1  ;;  %v10343_v2 = vpop.f32.mrb[193].mxu0 }
0x2a4a   :  { %v10322_v11 = vadd.f32 %v10321_v61, %v10320_v58  ;;  %v10344_v45 = vadd.f32 %v10343_v2, %v10342_v10  ;;  %v10323_v20 = vpop.f32.mrb[178].mxu1  ;;  %v10345_v60 = vpop.f32.mrb[194].mxu0 }
0x2a4b   :  { %v10324_v31 = vpop.f32.mrb[179].mxu1  ;;  %v10346_v39 = vpop.f32.mrb[195].mxu0 }
0x2a4c   :  { %v8761_v27 = vadd.f32 %v10322_v11, %v8721_v34 }
0x2a4e   :  { %v8801_v15 = vadd.f32 %v10344_v45, %v8761_v27 }
0x2a50   :  { %v8806_v13 = vadd.f32 %v8801_v15, %v14546_v30 }
0x2a52   :  { %v8807_v50 = vsel %vm1769_vm0, %v8806_v13, 0.0 }
0x2a53   :  { %8808 = vadd.xlane.f32.xlu0 %v8807_v50 }
0x2ae0   :  { %v8809_v42 = vpop.xlane.xlu0 %8808 }
0x2ae1   :  { %v8810_v18 = vmul.f32 0.03125, %v8809_v42 }
0x2ae3   :  { %v8811_v23 = vsub.f32 %v8806_v13, %v8810_v18 }
0x2ae5   :  { %v8812_v26 = vmul.f32 %v8811_v23, %v8811_v23 }
0x2ae7   :  { %v8813_v41 = vsel %vm1769_vm0, %v8812_v26, 0.0 }
0x2ae8   :  { %8814 = vadd.xlane.f32.xlu0 %v8813_v41 }
0x2afe   :  { %8869 = vperm.xlu0 %11159, %v8866_v21  }
0x2b75   :  { %v8815_v44 = vpop.xlane.xlu0 %8814 }
0x2b76   :  { %v8816_v6 = vmul.f32 0.03125, %v8815_v44 }
0x2b78   :  { %v8817_v57 = vadd.f32 1e-05, %v8816_v6 }
0x2b7a   :  { %11161 = vrsqrt.f32 %v8817_v57 }
0x2b7d   :  { %v8870_v35 = vpop.permute.xlu0 %8869 }
0x2b7e   :  { %v8875_v0 = vrot.slane %v8870_v35, %v15287_v52 }
0x2b84   :  { %v11162_v46 = vpop.eup %11161 }
0x2b85   :  { %v8819_v17 = vmul.f32 %v11162_v46, %v8811_v23 }
0x2b87   :  { %v8827_v48 = vmul.f32 %v9589_v28, %v8819_v17 }
0x2b89   :  { %v8835_v30 = vadd.f32 %v9590_v5, %v8827_v48 }
0x2b8b   :  { %v8836_v4 = vsel %vm1769_vm0, %v8835_v30, 0.0 }
0x2b8c   :  { %8837 = vadd.xlane.f32.xlu1 %v8836_v4 }
0x2c19   :  { %v8838_v55 = vpop.xlane.xlu1 %8837 }
0x2c1a   :  { %v8839_v54 = vmul.f32 0.03125, %v8838_v55 }
0x2c1c   :  { %v8840_v24 = vsub.f32 %v8835_v30, %v8839_v54 }
0x2c1e   :  { %v8841_v12 = vmul.f32 %v8840_v24, %v8840_v24 }
0x2c20   :  { %v8842_v62 = vsel %vm1769_vm0, %v8841_v12, 0.0 }
0x2c21   :  { %8843 = vadd.xlane.f32.xlu1 %v8842_v62 }
0x2c32   :  { %9033 = vperm.xlu1 %11160, %v9030_v43  }
0x2cae   :  { %v8844_v38 = vpop.xlane.xlu1 %8843 }
0x2caf   :  { %v8845_v3 = vmul.f32 0.03125, %v8844_v38 }
0x2cb1   :  { %v8846_v16 = vadd.f32 1e-05, %v8845_v3 }
0x2cb3   :  { %11163 = vrsqrt.f32 %v8846_v16 }
0x2cbd   :  { %v11164_v22 = vpop.eup %11163 }
0x2cbe   :  { %v8848_v9 = vmul.f32 %v11164_v22, %v8840_v24 }
0x2cc0   :  { %v8856_v63 = vmul.f32 %v9591_v59, %v8848_v9 }
0x2cc2   :  { %v8864_v1 = vadd.f32 %v9592_v19, %v8856_v63 }
0x2cc4   :  { %10737 = vmatpush3.xpose.msk.msra.mxu1 %vm1769_vm0, %v8864_v1 }
0x2cc5   :  { %10741 = vmatprep.subr.mxu1 %v15242_v40 }
0x2cc7   :  { %10739 = vmatmul.mubr.msk.f32.vlgmr.msra.gmra.mrb[180].mxu1 %vm1769_vm0, %v8865_v29 }
0x2cc8   :  { %10742 = vmatpush3.msra.mxu1 %v8864_v1  ;;  %10743 = vmatprep.mubr.msk.f32.mxu1 %vm11659_vm3, %v15242_v40  ;;  %v9034_v40 = vpop.permute.xlu1 %9033 }
0x2cc9   :  { %v9039_v8 = vrot.slane %v9034_v40, %v15287_v52 }
0x2ccb   :  { %10744 = vmatmul.mubr.msk.f32.vlgmr.msra.gmra.mrb[182].mxu1 %vm8955_vm4, %v8954_v47 }
0x2d9a   :  { %v8948_v32 = vpop.f32.mrb[180].mxu1 }
0x2d9b   :  { %v8949_v33 = vadd.f32 %v8948_v32, %v8875_v0  ;;  %v10740_v25 = vpop.f32.mrb[181].mxu1 }
0x2d9d   :  { %8953 = vst.msk [vmem:[%s12020_s12] sm:$0x1] %vm8952_vm5, %v8949_v33 }
0x2d9e   :  { %v9025_v51 = vpop.f32.mrb[182].mxu1 }
0x2d9f   :  { %v10745_v14 = vpop.f32.mrb[183].mxu1  ;;  %10747 = vmatpush3.xpose.msk.msra.mxu0 %vm1769_vm0, %v9025_v51 }
0x2da2   :  { %10749 = vmatmul.mubr.msk.f32.vlgmr.msra.gmra.mrb[196].mxu0 %vm1769_vm0, %v9029_v7 }
0x2e75   :  { %v9112_v56 = vpop.f32.mrb[196].mxu0 }
0x2e76   :  { %v9113_v49 = vadd.f32 %v9112_v56, %v9039_v8  ;;  %v10750_v53 = vpop.f32.mrb[197].mxu0 }
0x2e78   :  { %9117 = vst.msk [vmem:[%s12025_s25] sm:$0x1] %vm9116_vm6, %v9113_v49 }
0x2e79   :  { %9126 = vsyncpa [#allocation10], 1 }
0x2e7a   :  { %9127 = vsyncpa [#allocation12], 1 }
0x2e7b   :  { %9128 = vsyncpa [#allocation15], 1 }
0x2e7c   :  { %9129 = vsyncpa [#allocation18], 1 }
0x2e7d   :  { %9130 = vsyncpa [#allocation21], 1 }
0x2e7e   :  { %9131 = vsyncpa [#allocation24], 1 }
0x2e7f   :  { %9132 = vsyncpa [#allocation27], 1 }
0x2e80   :  { %9133 = vsyncpa [#allocation30], 1 }
0x2e81   :  { %9134 = vsyncpa [#allocation33], 1 }
0x2e82   :  { %9135 = vsyncmov [#allocation6] }
0x2e85   :  { %s9136_s12 = vpop.sfrf %9135 }
0x2e86   :  { %p9598_p10 = scmp.ne.s32.totalorder %s9136_s12, 0 }
0x2e88   :  { %9140 = shalt.err (%p9598_p10)  }
0x2e89   :  { %9142 = vsyncmov [#allocation6 + $0x1] }
0x2e8c   :  { %s9143_s26 = vpop.sfrf %9142 }
0x2e8d   :  { %p9599_p11 = scmp.ne.s32.totalorder %s9143_s26, 0 }
0x2e8f   :  { %9147 = shalt.err (%p9599_p11)  }
0x2e90   :  { %9149 = vsyncmov [#allocation6 + $0x2] }
0x2e93   :  { %s9150_s22 = vpop.sfrf %9149 }
0x2e94   :  { %p9600_p12 = scmp.ne.s32.totalorder %s9150_s22, 0 }
0x2e96   :  { %9154 = shalt.err (%p9600_p12)  }
0x2e97   :  { %9156 = vsyncmov [#allocation6 + $0x3] }
0x2e9a   :  { %s9157_s25 = vpop.sfrf %9156 }
0x2e9b   :  { %p9601_p13 = scmp.ne.s32.totalorder %s9157_s25, 0 }
0x2e9d   :  { %9161 = shalt.err (%p9601_p13)  }

</bundles_post_ra>
